<compile_context>
chip_gen: v7x
topology: tpu7x:2x2x1
jax: 0.10.0
libtpu: 0.0.40
codegen_flags: <defaults>
</compile_context>

<pallas_src>
import jax
import jax.numpy as jnp
from jax.experimental import pallas as pl
from jax.experimental.pallas import tpu as pltpu

# ---- synthetic small DistilBERT-style config (from_pretrained replaced) -----
VOCAB = 50
MAX_POS = 16
HIDDEN = 32
N_LAYERS = 2
N_HEADS = 4
HEAD_DIM = HIDDEN // N_HEADS
FFN = 64
FINAL_SIZE = 16
BATCH = 2
SEQ = 8
LN_EPS = 1e-12
POOLING = "CLS"            # BertPooler(pooling='CLS')
POOL_ACTIVATION = "tanh"   # BertPooler(pool_activation='tanh')

T = 3                      # anchor / positive / negative
TB = T * BATCH             # 6 stacked sequences
ROWS = TB * SEQ            # 48 token rows processed in one shot

# lane-dense padded sizes (128-wide tiles)
HP = 128                   # padded hidden lanes
FP = 128                   # padded FFN lanes
QP = N_HEADS * HP          # 512: head-major lanes, one 128-lane tile per head
OUTP = 128                 # padded pooler-output lanes


# ----------------------------- kernel helpers --------------------------------
def _gelu(x):
    # TODO(synk): PyTorch nn.GELU / HF DistilBERT default is exact erf-GELU;
    # using the tanh approximation here.
    c = 0.7978845608028654  # sqrt(2/pi)
    return 0.5 * x * (1.0 + jnp.tanh(c * (x + 0.044715 * x * x * x)))


# ------------------------------- fused kernel --------------------------------
def fused_bert_kernel(ids_ref, mask_ref, we_ref, pe_ref, eg_ref, eb_ref,
                      wq_ref, bq_ref, wk_ref, bk_ref, wv_ref, bv_ref,
                      wo_ref, bo_ref, ln1g_ref, ln1b_ref,
                      w1_ref, b1_ref, w2_ref, b2_ref, ln2g_ref, ln2b_ref,
                      pw_ref, pb_ref, o_ref):
    f32, bf16 = jnp.float32, jnp.bfloat16

    # ---- fused embedding gather: one_hot(ids) @ word_emb rides the idle MXU --
    ids = ids_ref[...]                                               # (ROWS, 1) int32
    onehot = (jax.lax.broadcasted_iota(jnp.int32, (ROWS, HP), 1) == ids).astype(f32)
    h = jnp.dot(onehot, we_ref[...], preferred_element_type=f32)     # (ROWS, HP)
    h = (h.reshape(TB, SEQ, HP) + pe_ref[...][None]).reshape(ROWS, HP)

    # ---- LayerNorm with MXU row statistics (mean already lane-broadcast) ----
    red = jnp.full((HP, HP), 1.0 / HIDDEN, dtype=f32)

    def layer_norm(x, g, b):
        mean = jnp.dot(x, red, preferred_element_type=f32)           # (ROWS, HP)
        ex2 = jnp.dot(x * x, red, preferred_element_type=f32)
        var = jnp.maximum(ex2 - mean * mean, 0.0)
        # padded lanes come out exactly 0 again because g/b pads are 0
        return (x - mean) * jax.lax.rsqrt(var + LN_EPS) * g + b

    h = layer_norm(h, eg_ref[...], eb_ref[...])                      # embedding LN

    # additive attention-mask bias: computed ONCE, reused by every layer
    bias = (1.0 - mask_ref[...]) * (-1e9)                            # (TB, S)
    bias_z = jnp.concatenate([bias] * N_HEADS, axis=0)[:, None, :]   # (NH*TB, 1, S)

    def dense(v_bf, w, b):
        # bf16 MXU operands, f32 accumulate; elementwise math stays f32
        return jnp.dot(v_bf, w, preferred_element_type=f32) + b

    def split_heads(t):
        # (ROWS, NH*128) -> (NH*TB, S, 128); slices land on 128-lane tile
        # boundaries and the concat is along the untiled outer axis (both free)
        t3 = t.reshape(TB, SEQ, QP)
        return jnp.concatenate(
            [t3[:, :, i * HP:(i + 1) * HP] for i in range(N_HEADS)], axis=0)

    for l in range(N_LAYERS):                    # static unroll; weights VMEM-resident
        h_bf = h.astype(bf16)                    # hoisted cast, reused by Q/K/V
        q = split_heads(dense(h_bf, wq_ref[l], bq_ref[l]))   # 1/sqrt(d) folded into wq/bq
        k = split_heads(dense(h_bf, wk_ref[l], bk_ref[l]))
        v = split_heads(dense(h_bf, wv_ref[l], bv_ref[l]))

        # batched multi-head attention: one einsum pair over all heads
        s = jnp.einsum("zqd,zkd->zqk", q.astype(bf16), k.astype(bf16),
                       preferred_element_type=f32)                   # (NH*TB, S, S)
        s = s + bias_z
        s = s - jnp.max(s, axis=-1, keepdims=True)
        p = jnp.exp(s)
        p = p * pl.reciprocal(jnp.sum(p, axis=-1, keepdims=True), approx=True)

        ctx = jnp.einsum("zqk,zkd->zqd", p.astype(bf16), v.astype(bf16),
                         preferred_element_type=f32)                 # (NH*TB, S, 128)
        # heads back to head-major lane tiles (128-lane boundaries: free placement)
        ctx = jnp.concatenate([ctx[i * TB:(i + 1) * TB] for i in range(N_HEADS)],
                              axis=-1).reshape(ROWS, QP)

        attn = dense(ctx.astype(bf16), wo_ref[l], bo_ref[l])         # (ROWS, HP)
        h = layer_norm(h + attn, ln1g_ref[l], ln1b_ref[l])           # sa_layer_norm

        ff = dense(h.astype(bf16), w1_ref[l], b1_ref[l])
        ff = _gelu(ff)
        ff = dense(ff.astype(bf16), w2_ref[l], b2_ref[l])
        h = layer_norm(h + ff, ln2g_ref[l], ln2b_ref[l])             # output_layer_norm

    # ---- BertPooler (fused): CLS -> dense -> tanh, 128-lane-dense store ------
    h3 = h.reshape(TB, SEQ, HP)
    if POOLING == "CLS":
        pooled = h3[:, 0, :]
    else:  # 'MEAN' (unmasked mean over all S tokens, matching the reference)
        pooled = jnp.mean(h3, axis=1)
    out = jnp.dot(pooled.astype(bf16), pw_ref[...],
                  preferred_element_type=f32) + pb_ref[...]
    if POOL_ACTIVATION == "tanh":
        out = jnp.tanh(out)
    elif POOL_ACTIVATION == "gelu":
        out = _gelu(out)
    o_ref[...] = out.astype(o_ref.dtype)


# ----------------------------- pallas_call glue -------------------------------
def _full_spec(shape):
    nd = len(shape)
    return pl.BlockSpec(shape, lambda i, _nd=nd: (0,) * _nd)


@jax.jit
def frozen_single_bert_forward(packed, a, p, n, a_mask, p_mask, n_mask):
    # stack the three texts on the row axis: one fused 48-row kernel step
    ids = jnp.stack([a, p, n], axis=0).astype(jnp.int32).reshape(ROWS, 1)
    masks = jnp.stack([a_mask, p_mask, n_mask], axis=0).astype(jnp.float32).reshape(TB, SEQ)

    in_specs = [
        _full_spec((ROWS, 1)),                                        # token ids
        _full_spec((TB, SEQ)),                                        # attention masks
        _full_spec((HP, HP)),                                         # word embeddings
        _full_spec((SEQ, HP)),                                        # position embeddings
        _full_spec((1, HP)), _full_spec((1, HP)),                     # emb LayerNorm g/b
        _full_spec((N_LAYERS, HP, QP)), _full_spec((N_LAYERS, 1, QP)),    # wq, bq (head-major, pre-scaled)
        _full_spec((N_LAYERS, HP, QP)), _full_spec((N_LAYERS, 1, QP)),    # wk, bk
        _full_spec((N_LAYERS, HP, QP)), _full_spec((N_LAYERS, 1, QP)),    # wv, bv
        _full_spec((N_LAYERS, QP, HP)), _full_spec((N_LAYERS, 1, HP)),    # wo (head-major rows), bo
        _full_spec((N_LAYERS, 1, HP)), _full_spec((N_LAYERS, 1, HP)),     # ln1 g/b
        _full_spec((N_LAYERS, HP, FP)), _full_spec((N_LAYERS, 1, FP)),    # w1, b1
        _full_spec((N_LAYERS, FP, HP)), _full_spec((N_LAYERS, 1, HP)),    # w2, b2
        _full_spec((N_LAYERS, 1, HP)), _full_spec((N_LAYERS, 1, HP)),     # ln2 g/b
        _full_spec((HP, OUTP)), _full_spec((1, OUTP)),                # pooler w/b
    ]

    pooled = pl.pallas_call(
        fused_bert_kernel,
        grid=(1,),   # single fused step (2-TC split not worth the 2:1 imbalance at this size)
        in_specs=in_specs,
        out_specs=pl.BlockSpec((TB, OUTP), lambda i: (0, 0)),
        out_shape=jax.ShapeDtypeStruct((TB, OUTP), jnp.float32),
        compiler_params=pltpu.CompilerParams(dimension_semantics=("arbitrary",)),
    )(ids, masks, packed["word_emb"], packed["pos_emb"],
      packed["emb_ln_g"], packed["emb_ln_b"],
      packed["wq"], packed["bq"], packed["wk"], packed["bk"],
      packed["wv"], packed["bv"], packed["wo"], packed["bo"],
      packed["ln1g"], packed["ln1b"], packed["w1"], packed["b1"],
      packed["w2"], packed["b2"], packed["ln2g"], packed["ln2b"],
      packed["pool_w"], packed["pool_b"])

    # strip lane padding and un-stack the three texts
    pooled = pooled[:, :FINAL_SIZE].reshape(T, BATCH, FINAL_SIZE)
    return pooled[0], pooled[1], pooled[2]


# --------------------------- deterministic params -----------------------------
def init_params(key):
    def normal(k, shape, std=0.02):
        return std * jax.random.normal(k, shape, dtype=jnp.float32)

    keys = jax.random.split(key, 3 + N_LAYERS)
    params = {
        "word_emb": normal(keys[0], (VOCAB, HIDDEN)),
        "pos_emb": normal(keys[1], (MAX_POS, HIDDEN)),
        "emb_ln_g": jnp.ones((1, HIDDEN), jnp.float32),
        "emb_ln_b": jnp.zeros((1, HIDDEN), jnp.float32),
        "pool_w": normal(keys[2], (HIDDEN, FINAL_SIZE)),
        "pool_b": jnp.zeros((1, FINAL_SIZE), jnp.float32),
        "layers": [],
    }
    for l in range(N_LAYERS):
        lk = jax.random.split(keys[3 + l], 6)
        params["layers"].append({
            "wq": normal(lk[0], (HIDDEN, HIDDEN)), "bq": jnp.zeros((1, HIDDEN), jnp.float32),
            "wk": normal(lk[1], (HIDDEN, HIDDEN)), "bk": jnp.zeros((1, HIDDEN), jnp.float32),
            "wv": normal(lk[2], (HIDDEN, HIDDEN)), "bv": jnp.zeros((1, HIDDEN), jnp.float32),
            "wo": normal(lk[3], (HIDDEN, HIDDEN)), "bo": jnp.zeros((1, HIDDEN), jnp.float32),
            "ln1g": jnp.ones((1, HIDDEN), jnp.float32), "ln1b": jnp.zeros((1, HIDDEN), jnp.float32),
            "w1": normal(lk[4], (HIDDEN, FFN)), "b1": jnp.zeros((1, FFN), jnp.float32),
            "w2": normal(lk[5], (FFN, HIDDEN)), "b2": jnp.zeros((1, HIDDEN), jnp.float32),
            "ln2g": jnp.ones((1, HIDDEN), jnp.float32), "ln2b": jnp.zeros((1, HIDDEN), jnp.float32),
        })
    return params


def pack_params(p):
    """Zero-pad to 128-lane tiles, re-lay out heads on the host, stack layers.

    Q/K/V weights become head-major on the output axis (each head owns a full
    128-lane tile), wo becomes head-major on the row axis, and the attention
    scale 1/sqrt(head_dim) is folded into wq/bq.  Matmul weights are bf16;
    biases / LayerNorm params / embeddings stay f32.  All pads are exact zeros.
    """
    bf16, f32 = jnp.bfloat16, jnp.float32
    scale = float(HEAD_DIM) ** -0.5

    def pad2(x, rows, cols):
        return jnp.pad(x, ((0, rows - x.shape[0]), (0, cols - x.shape[1])))

    def head_cols(w, b):
        wp = jnp.zeros((HP, QP), f32)
        bp = jnp.zeros((1, QP), f32)
        for i in range(N_HEADS):
            wp = wp.at[:HIDDEN, i * HP:i * HP + HEAD_DIM].set(
                w[:, i * HEAD_DIM:(i + 1) * HEAD_DIM])
            bp = bp.at[:, i * HP:i * HP + HEAD_DIM].set(
                b[:, i * HEAD_DIM:(i + 1) * HEAD_DIM])
        return wp, bp

    def head_rows(w):
        wp = jnp.zeros((QP, HP), f32)
        for i in range(N_HEADS):
            wp = wp.at[i * HP:i * HP + HEAD_DIM, :HIDDEN].set(
                w[i * HEAD_DIM:(i + 1) * HEAD_DIM, :])
        return wp

    wq_l, bq_l, wk_l, bk_l, wv_l, bv_l, wo_l = [], [], [], [], [], [], []
    for layer in p["layers"]:
        wq, bq = head_cols(layer["wq"] * scale, layer["bq"] * scale)
        wk, bk = head_cols(layer["wk"], layer["bk"])
        wv, bv = head_cols(layer["wv"], layer["bv"])
        wq_l.append(wq); bq_l.append(bq)
        wk_l.append(wk); bk_l.append(bk)
        wv_l.append(wv); bv_l.append(bv)
        wo_l.append(head_rows(layer["wo"]))

    def stack(name, rows, cols, dtype):
        return jnp.stack([pad2(layer[name], rows, cols)
                          for layer in p["layers"]]).astype(dtype)

    return {
        "word_emb": pad2(p["word_emb"], HP, HP),
        "pos_emb": pad2(p["pos_emb"][:SEQ], SEQ, HP),
        "emb_ln_g": pad2(p["emb_ln_g"], 1, HP),
        "emb_ln_b": pad2(p["emb_ln_b"], 1, HP),
        "wq": jnp.stack(wq_l).astype(bf16), "bq": jnp.stack(bq_l),
        "wk": jnp.stack(wk_l).astype(bf16), "bk": jnp.stack(bk_l),
        "wv": jnp.stack(wv_l).astype(bf16), "bv": jnp.stack(bv_l),
        "wo": jnp.stack(wo_l).astype(bf16), "bo": stack("bo", 1, HP, f32),
        "ln1g": stack("ln1g", 1, HP, f32), "ln1b": stack("ln1b", 1, HP, f32),
        "w1": stack("w1", HP, FP, bf16), "b1": stack("b1", 1, FP, f32),
        "w2": stack("w2", FP, HP, bf16), "b2": stack("b2", 1, HP, f32),
        "ln2g": stack("ln2g", 1, HP, f32), "ln2b": stack("ln2b", 1, HP, f32),
        "pool_w": pad2(p["pool_w"], HP, OUTP).astype(bf16),
        "pool_b": pad2(p["pool_b"], 1, OUTP),
    }


if __name__ == "__main__":
    key = jax.random.PRNGKey(0)
    pkey, ka, kp, kn = jax.random.split(key, 4)
    params = init_params(pkey)
    packed = pack_params(params)

    a = jax.random.randint(ka, (BATCH, SEQ), 0, VOCAB, dtype=jnp.int32)
    p = jax.random.randint(kp, (BATCH, SEQ), 0, VOCAB, dtype=jnp.int32)
    n = jax.random.randint(kn, (BATCH, SEQ), 0, VOCAB, dtype=jnp.int32)
    a_mask = jnp.ones((BATCH, SEQ), jnp.int32).at[1, 6:].set(0)
    p_mask = jnp.ones((BATCH, SEQ), jnp.int32).at[0, 5:].set(0)
    n_mask = jnp.ones((BATCH, SEQ), jnp.int32)

    out_a, out_p, out_n = frozen_single_bert_forward(
        packed, a, p, n, a_mask, p_mask, n_mask)
    jax.block_until_ready((out_a, out_p, out_n))

    assert out_a.shape == (BATCH, FINAL_SIZE)
    assert out_p.shape == (BATCH, FINAL_SIZE)
    assert out_n.shape == (BATCH, FINAL_SIZE)
    assert jnp.all(jnp.isfinite(out_a)) and jnp.all(jnp.isfinite(out_p)) and jnp.all(jnp.isfinite(out_n))
    print("KERNEL_OK")
</pallas_src>

<mosaic_0001>
module attributes {stable_mosaic.version = 11 : i64} {
  func.func @fused_bert_kernel(%arg0: i32, %arg1: memref<48x1xi32, #tpu.memory_space<vmem>>, %arg2: memref<6x8xf32, #tpu.memory_space<vmem>>, %arg3: memref<128x128xf32, #tpu.memory_space<vmem>>, %arg4: memref<8x128xf32, #tpu.memory_space<vmem>>, %arg5: memref<1x128xf32, #tpu.memory_space<vmem>>, %arg6: memref<1x128xf32, #tpu.memory_space<vmem>>, %arg7: memref<2x128x512xbf16, #tpu.memory_space<vmem>>, %arg8: memref<2x1x512xf32, #tpu.memory_space<vmem>>, %arg9: memref<2x128x512xbf16, #tpu.memory_space<vmem>>, %arg10: memref<2x1x512xf32, #tpu.memory_space<vmem>>, %arg11: memref<2x128x512xbf16, #tpu.memory_space<vmem>>, %arg12: memref<2x1x512xf32, #tpu.memory_space<vmem>>, %arg13: memref<2x512x128xbf16, #tpu.memory_space<vmem>>, %arg14: memref<2x1x128xf32, #tpu.memory_space<vmem>>, %arg15: memref<2x1x128xf32, #tpu.memory_space<vmem>>, %arg16: memref<2x1x128xf32, #tpu.memory_space<vmem>>, %arg17: memref<2x128x128xbf16, #tpu.memory_space<vmem>>, %arg18: memref<2x1x128xf32, #tpu.memory_space<vmem>>, %arg19: memref<2x128x128xbf16, #tpu.memory_space<vmem>>, %arg20: memref<2x1x128xf32, #tpu.memory_space<vmem>>, %arg21: memref<2x1x128xf32, #tpu.memory_space<vmem>>, %arg22: memref<2x1x128xf32, #tpu.memory_space<vmem>>, %arg23: memref<128x128xbf16, #tpu.memory_space<vmem>>, %arg24: memref<1x128xf32, #tpu.memory_space<vmem>>, %arg25: memref<6x128xf32, #tpu.memory_space<vmem>>) attributes {dimension_semantics = [#tpu.dimension_semantics<arbitrary>], iteration_bounds = array<i64: 1>, scalar_prefetch = 0 : i64, scratch_operands = 0 : i64, tpu.core_type = #tpu.core_type<tc>, window_params = [{pipeline_mode = #tpu.pipeline_mode<synchronous>, transform_indices = @transform_0, window_bounds = array<i64: 48, 1>}, {pipeline_mode = #tpu.pipeline_mode<synchronous>, transform_indices = @transform_1, window_bounds = array<i64: 6, 8>}, {pipeline_mode = #tpu.pipeline_mode<synchronous>, transform_indices = @transform_2, window_bounds = array<i64: 128, 128>}, {pipeline_mode = #tpu.pipeline_mode<synchronous>, transform_indices = @transform_3, window_bounds = array<i64: 8, 128>}, {pipeline_mode = #tpu.pipeline_mode<synchronous>, transform_indices = @transform_4, window_bounds = array<i64: 1, 128>}, {pipeline_mode = #tpu.pipeline_mode<synchronous>, transform_indices = @transform_5, window_bounds = array<i64: 1, 128>}, {pipeline_mode = #tpu.pipeline_mode<synchronous>, transform_indices = @transform_6, window_bounds = array<i64: 2, 128, 512>}, {pipeline_mode = #tpu.pipeline_mode<synchronous>, transform_indices = @transform_7, window_bounds = array<i64: 2, 1, 512>}, {pipeline_mode = #tpu.pipeline_mode<synchronous>, transform_indices = @transform_8, window_bounds = array<i64: 2, 128, 512>}, {pipeline_mode = #tpu.pipeline_mode<synchronous>, transform_indices = @transform_9, window_bounds = array<i64: 2, 1, 512>}, {pipeline_mode = #tpu.pipeline_mode<synchronous>, transform_indices = @transform_10, window_bounds = array<i64: 2, 128, 512>}, {pipeline_mode = #tpu.pipeline_mode<synchronous>, transform_indices = @transform_11, window_bounds = array<i64: 2, 1, 512>}, {pipeline_mode = #tpu.pipeline_mode<synchronous>, transform_indices = @transform_12, window_bounds = array<i64: 2, 512, 128>}, {pipeline_mode = #tpu.pipeline_mode<synchronous>, transform_indices = @transform_13, window_bounds = array<i64: 2, 1, 128>}, {pipeline_mode = #tpu.pipeline_mode<synchronous>, transform_indices = @transform_14, window_bounds = array<i64: 2, 1, 128>}, {pipeline_mode = #tpu.pipeline_mode<synchronous>, transform_indices = @transform_15, window_bounds = array<i64: 2, 1, 128>}, {pipeline_mode = #tpu.pipeline_mode<synchronous>, transform_indices = @transform_16, window_bounds = array<i64: 2, 128, 128>}, {pipeline_mode = #tpu.pipeline_mode<synchronous>, transform_indices = @transform_17, window_bounds = array<i64: 2, 1, 128>}, {pipeline_mode = #tpu.pipeline_mode<synchronous>, transform_indices = @transform_18, window_bounds = array<i64: 2, 128, 128>}, {pipeline_mode = #tpu.pipeline_mode<synchronous>, transform_indices = @transform_19, window_bounds = array<i64: 2, 1, 128>}, {pipeline_mode = #tpu.pipeline_mode<synchronous>, transform_indices = @transform_20, window_bounds = array<i64: 2, 1, 128>}, {pipeline_mode = #tpu.pipeline_mode<synchronous>, transform_indices = @transform_21, window_bounds = array<i64: 2, 1, 128>}, {pipeline_mode = #tpu.pipeline_mode<synchronous>, transform_indices = @transform_22, window_bounds = array<i64: 128, 128>}, {pipeline_mode = #tpu.pipeline_mode<synchronous>, transform_indices = @transform_23, window_bounds = array<i64: 1, 128>}, {pipeline_mode = #tpu.pipeline_mode<synchronous>, transform_indices = @transform_24, window_bounds = array<i64: 6, 128>}]} {
    %c0 = arith.constant 0 : index
    %c0_0 = arith.constant 0 : index
    %0 = vector.load %arg1[%c0, %c0_0] : memref<48x1xi32, #tpu.memory_space<vmem>>, vector<48x1xi32>
    %1 = tpu.iota {dimensions = array<i32: 1>} : vector<48x128xi32>
    %2 = vector.broadcast %0 : vector<48x1xi32> to vector<48x128xi32>
    %3 = arith.cmpi eq, %1, %2 : vector<48x128xi32>
    %4 = arith.extui %3 : vector<48x128xi1> to vector<48x128xi32>
    %5 = arith.sitofp %4 : vector<48x128xi32> to vector<48x128xf32>
    %c0_1 = arith.constant 0 : index
    %c0_2 = arith.constant 0 : index
    %6 = vector.load %arg3[%c0_1, %c0_2] : memref<128x128xf32, #tpu.memory_space<vmem>>, vector<128x128xf32>
    %cst = arith.constant dense<0.000000e+00> : vector<48x128xf32>
    %7 = tpu.matmul %5, %6, %cst {dimension_numbers = #tpu.dot_dimension_numbers<[1], [0], [0], [1], [0, 0, 1, 1], [], []>} : vector<48x128xf32>, vector<128x128xf32>, vector<48x128xf32> -> vector<48x128xf32>
    %8 = vector.shape_cast %7 : vector<48x128xf32> to vector<6x8x128xf32>
    %c0_3 = arith.constant 0 : index
    %c0_4 = arith.constant 0 : index
    %9 = vector.load %arg4[%c0_3, %c0_4] : memref<8x128xf32, #tpu.memory_space<vmem>>, vector<8x128xf32>
    %10 = vector.shape_cast %9 : vector<8x128xf32> to vector<1x8x128xf32>
    %11 = vector.broadcast %10 : vector<1x8x128xf32> to vector<6x8x128xf32>
    %12 = arith.addf %8, %11 : vector<6x8x128xf32>
    %13 = vector.shape_cast %12 : vector<6x8x128xf32> to vector<48x128xf32>
    %cst_5 = arith.constant 3.125000e-02 : f32
    %14 = vector.broadcast %cst_5 : f32 to vector<128x128xf32>
    %c0_6 = arith.constant 0 : index
    %c0_7 = arith.constant 0 : index
    %15 = vector.load %arg5[%c0_6, %c0_7] : memref<1x128xf32, #tpu.memory_space<vmem>>, vector<1x128xf32>
    %c0_8 = arith.constant 0 : index
    %c0_9 = arith.constant 0 : index
    %16 = vector.load %arg6[%c0_8, %c0_9] : memref<1x128xf32, #tpu.memory_space<vmem>>, vector<1x128xf32>
    %cst_10 = arith.constant dense<0.000000e+00> : vector<48x128xf32>
    %17 = tpu.matmul %13, %14, %cst_10 {dimension_numbers = #tpu.dot_dimension_numbers<[1], [0], [0], [1], [0, 0, 1, 1], [], []>} : vector<48x128xf32>, vector<128x128xf32>, vector<48x128xf32> -> vector<48x128xf32>
    %18 = arith.mulf %13, %13 : vector<48x128xf32>
    %cst_11 = arith.constant dense<0.000000e+00> : vector<48x128xf32>
    %19 = tpu.matmul %18, %14, %cst_11 {dimension_numbers = #tpu.dot_dimension_numbers<[1], [0], [0], [1], [0, 0, 1, 1], [], []>} : vector<48x128xf32>, vector<128x128xf32>, vector<48x128xf32> -> vector<48x128xf32>
    %20 = arith.mulf %17, %17 : vector<48x128xf32>
    %21 = arith.subf %19, %20 : vector<48x128xf32>
    %cst_12 = arith.constant 0.000000e+00 : f32
    %22 = vector.broadcast %cst_12 : f32 to vector<48x128xf32>
    %23 = arith.maximumf %21, %22 : vector<48x128xf32>
    %24 = arith.subf %13, %17 : vector<48x128xf32>
    %cst_13 = arith.constant 9.99999996E-13 : f32
    %25 = vector.broadcast %cst_13 : f32 to vector<48x128xf32>
    %26 = arith.addf %23, %25 : vector<48x128xf32>
    %27 = math.rsqrt %26 : vector<48x128xf32>
    %28 = arith.mulf %24, %27 : vector<48x128xf32>
    %29 = vector.broadcast %15 : vector<1x128xf32> to vector<48x128xf32>
    %30 = arith.mulf %28, %29 : vector<48x128xf32>
    %31 = vector.broadcast %16 : vector<1x128xf32> to vector<48x128xf32>
    %32 = arith.addf %30, %31 : vector<48x128xf32>
    %c0_14 = arith.constant 0 : index
    %c0_15 = arith.constant 0 : index
    %33 = vector.load %arg2[%c0_14, %c0_15] : memref<6x8xf32, #tpu.memory_space<vmem>>, vector<6x8xf32>
    %cst_16 = arith.constant 1.000000e+00 : f32
    %34 = vector.broadcast %cst_16 : f32 to vector<6x8xf32>
    %35 = arith.subf %34, %33 : vector<6x8xf32>
    %cst_17 = arith.constant -1.000000e+09 : f32
    %36 = vector.broadcast %cst_17 : f32 to vector<6x8xf32>
    %37 = arith.mulf %35, %36 : vector<6x8xf32>
    %38 = tpu.concatenate %37, %37, %37, %37 in 0 : vector<6x8xf32>, vector<6x8xf32>, vector<6x8xf32>, vector<6x8xf32> -> vector<24x8xf32>
    %39 = vector.shape_cast %38 : vector<24x8xf32> to vector<24x1x8xf32>
    %40 = arith.truncf %32 : vector<48x128xf32> to vector<48x128xbf16>
    %c0_18 = arith.constant 0 : index
    %c0_19 = arith.constant 0 : index
    %c0_20 = arith.constant 0 : index
    %41 = vector.load %arg7[%c0_18, %c0_19, %c0_20] : memref<2x128x512xbf16, #tpu.memory_space<vmem>>, vector<1x128x512xbf16>
    %42 = vector.shape_cast %41 : vector<1x128x512xbf16> to vector<128x512xbf16>
    %c0_21 = arith.constant 0 : index
    %c0_22 = arith.constant 0 : index
    %c0_23 = arith.constant 0 : index
    %43 = vector.load %arg8[%c0_21, %c0_22, %c0_23] : memref<2x1x512xf32, #tpu.memory_space<vmem>>, vector<1x1x512xf32>
    %44 = vector.shape_cast %43 : vector<1x1x512xf32> to vector<1x512xf32>
    %cst_24 = arith.constant dense<0.000000e+00> : vector<48x512xf32>
    %45 = tpu.matmul %40, %42, %cst_24 {dimension_numbers = #tpu.dot_dimension_numbers<[1], [0], [0], [1], [0, 0, 1, 1], [], []>} : vector<48x128xbf16>, vector<128x512xbf16>, vector<48x512xf32> -> vector<48x512xf32>
    %46 = vector.broadcast %44 : vector<1x512xf32> to vector<48x512xf32>
    %47 = arith.addf %45, %46 : vector<48x512xf32>
    %48 = vector.shape_cast %47 : vector<48x512xf32> to vector<6x8x512xf32>
    %49 = vector.extract_strided_slice %48 {offsets = [0, 0, 0], sizes = [6, 8, 128], strides = [1, 1, 1]} : vector<6x8x512xf32> to vector<6x8x128xf32>
    %50 = vector.extract_strided_slice %48 {offsets = [0, 0, 128], sizes = [6, 8, 128], strides = [1, 1, 1]} : vector<6x8x512xf32> to vector<6x8x128xf32>
    %51 = vector.extract_strided_slice %48 {offsets = [0, 0, 256], sizes = [6, 8, 128], strides = [1, 1, 1]} : vector<6x8x512xf32> to vector<6x8x128xf32>
    %52 = vector.extract_strided_slice %48 {offsets = [0, 0, 384], sizes = [6, 8, 128], strides = [1, 1, 1]} : vector<6x8x512xf32> to vector<6x8x128xf32>
    %53 = tpu.concatenate %49, %50, %51, %52 in 0 : vector<6x8x128xf32>, vector<6x8x128xf32>, vector<6x8x128xf32>, vector<6x8x128xf32> -> vector<24x8x128xf32>
    %c0_25 = arith.constant 0 : index
    %c0_26 = arith.constant 0 : index
    %c0_27 = arith.constant 0 : index
    %54 = vector.load %arg9[%c0_25, %c0_26, %c0_27] : memref<2x128x512xbf16, #tpu.memory_space<vmem>>, vector<1x128x512xbf16>
    %55 = vector.shape_cast %54 : vector<1x128x512xbf16> to vector<128x512xbf16>
    %c0_28 = arith.constant 0 : index
    %c0_29 = arith.constant 0 : index
    %c0_30 = arith.constant 0 : index
    %56 = vector.load %arg10[%c0_28, %c0_29, %c0_30] : memref<2x1x512xf32, #tpu.memory_space<vmem>>, vector<1x1x512xf32>
    %57 = vector.shape_cast %56 : vector<1x1x512xf32> to vector<1x512xf32>
    %cst_31 = arith.constant dense<0.000000e+00> : vector<48x512xf32>
    %58 = tpu.matmul %40, %55, %cst_31 {dimension_numbers = #tpu.dot_dimension_numbers<[1], [0], [0], [1], [0, 0, 1, 1], [], []>} : vector<48x128xbf16>, vector<128x512xbf16>, vector<48x512xf32> -> vector<48x512xf32>
    %59 = vector.broadcast %57 : vector<1x512xf32> to vector<48x512xf32>
    %60 = arith.addf %58, %59 : vector<48x512xf32>
    %61 = vector.shape_cast %60 : vector<48x512xf32> to vector<6x8x512xf32>
    %62 = vector.extract_strided_slice %61 {offsets = [0, 0, 0], sizes = [6, 8, 128], strides = [1, 1, 1]} : vector<6x8x512xf32> to vector<6x8x128xf32>
    %63 = vector.extract_strided_slice %61 {offsets = [0, 0, 128], sizes = [6, 8, 128], strides = [1, 1, 1]} : vector<6x8x512xf32> to vector<6x8x128xf32>
    %64 = vector.extract_strided_slice %61 {offsets = [0, 0, 256], sizes = [6, 8, 128], strides = [1, 1, 1]} : vector<6x8x512xf32> to vector<6x8x128xf32>
    %65 = vector.extract_strided_slice %61 {offsets = [0, 0, 384], sizes = [6, 8, 128], strides = [1, 1, 1]} : vector<6x8x512xf32> to vector<6x8x128xf32>
    %66 = tpu.concatenate %62, %63, %64, %65 in 0 : vector<6x8x128xf32>, vector<6x8x128xf32>, vector<6x8x128xf32>, vector<6x8x128xf32> -> vector<24x8x128xf32>
    %c0_32 = arith.constant 0 : index
    %c0_33 = arith.constant 0 : index
    %c0_34 = arith.constant 0 : index
    %67 = vector.load %arg11[%c0_32, %c0_33, %c0_34] : memref<2x128x512xbf16, #tpu.memory_space<vmem>>, vector<1x128x512xbf16>
    %68 = vector.shape_cast %67 : vector<1x128x512xbf16> to vector<128x512xbf16>
    %c0_35 = arith.constant 0 : index
    %c0_36 = arith.constant 0 : index
    %c0_37 = arith.constant 0 : index
    %69 = vector.load %arg12[%c0_35, %c0_36, %c0_37] : memref<2x1x512xf32, #tpu.memory_space<vmem>>, vector<1x1x512xf32>
    %70 = vector.shape_cast %69 : vector<1x1x512xf32> to vector<1x512xf32>
    %cst_38 = arith.constant dense<0.000000e+00> : vector<48x512xf32>
    %71 = tpu.matmul %40, %68, %cst_38 {dimension_numbers = #tpu.dot_dimension_numbers<[1], [0], [0], [1], [0, 0, 1, 1], [], []>} : vector<48x128xbf16>, vector<128x512xbf16>, vector<48x512xf32> -> vector<48x512xf32>
    %72 = vector.broadcast %70 : vector<1x512xf32> to vector<48x512xf32>
    %73 = arith.addf %71, %72 : vector<48x512xf32>
    %74 = vector.shape_cast %73 : vector<48x512xf32> to vector<6x8x512xf32>
    %75 = vector.extract_strided_slice %74 {offsets = [0, 0, 0], sizes = [6, 8, 128], strides = [1, 1, 1]} : vector<6x8x512xf32> to vector<6x8x128xf32>
    %76 = vector.extract_strided_slice %74 {offsets = [0, 0, 128], sizes = [6, 8, 128], strides = [1, 1, 1]} : vector<6x8x512xf32> to vector<6x8x128xf32>
    %77 = vector.extract_strided_slice %74 {offsets = [0, 0, 256], sizes = [6, 8, 128], strides = [1, 1, 1]} : vector<6x8x512xf32> to vector<6x8x128xf32>
    %78 = vector.extract_strided_slice %74 {offsets = [0, 0, 384], sizes = [6, 8, 128], strides = [1, 1, 1]} : vector<6x8x512xf32> to vector<6x8x128xf32>
    %79 = tpu.concatenate %75, %76, %77, %78 in 0 : vector<6x8x128xf32>, vector<6x8x128xf32>, vector<6x8x128xf32>, vector<6x8x128xf32> -> vector<24x8x128xf32>
    %80 = arith.truncf %53 : vector<24x8x128xf32> to vector<24x8x128xbf16>
    %81 = arith.truncf %66 : vector<24x8x128xf32> to vector<24x8x128xbf16>
    "tpu.trace_start"() <{level = 10 : i32, message = "zqd,zkd->zqk"}> : () -> ()
    %cst_39 = arith.constant dense<0.000000e+00> : vector<24x8x8xf32>
    %82 = tpu.matmul %80, %81, %cst_39 {dimension_numbers = #tpu.dot_dimension_numbers<[2], [2], [1], [1], [0, 0, 0, 1, 1, 1], [0], [0]>} : vector<24x8x128xbf16>, vector<24x8x128xbf16>, vector<24x8x8xf32> -> vector<24x8x8xf32>
    "tpu.trace_stop"() : () -> ()
    %83 = vector.broadcast %39 : vector<24x1x8xf32> to vector<24x8x8xf32>
    %84 = arith.addf %82, %83 : vector<24x8x8xf32>
    %cst_40 = arith.constant dense<0xFF800000> : vector<24x8xf32>
    %85 = vector.multi_reduction <maximumf>, %84, %cst_40 [2] : vector<24x8x8xf32> to vector<24x8xf32>
    %86 = vector.shape_cast %85 : vector<24x8xf32> to vector<24x8x1xf32>
    %87 = vector.broadcast %86 : vector<24x8x1xf32> to vector<24x8x8xf32>
    %88 = arith.subf %84, %87 : vector<24x8x8xf32>
    %89 = math.exp %88 : vector<24x8x8xf32>
    %cst_41 = arith.constant dense<0.000000e+00> : vector<24x8xf32>
    %90 = vector.multi_reduction <add>, %89, %cst_41 [2] : vector<24x8x8xf32> to vector<24x8xf32>
    %91 = vector.shape_cast %90 : vector<24x8xf32> to vector<24x8x1xf32>
    %92 = tpu.reciprocal %91 {approx = true} : vector<24x8x1xf32> -> vector<24x8x1xf32>
    %93 = vector.broadcast %92 : vector<24x8x1xf32> to vector<24x8x8xf32>
    %94 = arith.mulf %89, %93 : vector<24x8x8xf32>
    %95 = arith.truncf %94 : vector<24x8x8xf32> to vector<24x8x8xbf16>
    %96 = arith.truncf %79 : vector<24x8x128xf32> to vector<24x8x128xbf16>
    "tpu.trace_start"() <{level = 10 : i32, message = "zqk,zkd->zqd"}> : () -> ()
    %cst_42 = arith.constant dense<0.000000e+00> : vector<24x8x128xf32>
    %97 = tpu.matmul %95, %96, %cst_42 {dimension_numbers = #tpu.dot_dimension_numbers<[2], [1], [1], [2], [0, 0, 0, 1, 1, 2], [0], [0]>} : vector<24x8x8xbf16>, vector<24x8x128xbf16>, vector<24x8x128xf32> -> vector<24x8x128xf32>
    "tpu.trace_stop"() : () -> ()
    %98 = vector.extract_strided_slice %97 {offsets = [0, 0, 0], sizes = [6, 8, 128], strides = [1, 1, 1]} : vector<24x8x128xf32> to vector<6x8x128xf32>
    %99 = vector.extract_strided_slice %97 {offsets = [6, 0, 0], sizes = [6, 8, 128], strides = [1, 1, 1]} : vector<24x8x128xf32> to vector<6x8x128xf32>
    %100 = vector.extract_strided_slice %97 {offsets = [12, 0, 0], sizes = [6, 8, 128], strides = [1, 1, 1]} : vector<24x8x128xf32> to vector<6x8x128xf32>
    %101 = vector.extract_strided_slice %97 {offsets = [18, 0, 0], sizes = [6, 8, 128], strides = [1, 1, 1]} : vector<24x8x128xf32> to vector<6x8x128xf32>
    %102 = tpu.concatenate %98, %99, %100, %101 in 2 : vector<6x8x128xf32>, vector<6x8x128xf32>, vector<6x8x128xf32>, vector<6x8x128xf32> -> vector<6x8x512xf32>
    %103 = vector.shape_cast %102 : vector<6x8x512xf32> to vector<48x512xf32>
    %104 = arith.truncf %103 : vector<48x512xf32> to vector<48x512xbf16>
    %c0_43 = arith.constant 0 : index
    %c0_44 = arith.constant 0 : index
    %c0_45 = arith.constant 0 : index
    %105 = vector.load %arg13[%c0_43, %c0_44, %c0_45] : memref<2x512x128xbf16, #tpu.memory_space<vmem>>, vector<1x512x128xbf16>
    %106 = vector.shape_cast %105 : vector<1x512x128xbf16> to vector<512x128xbf16>
    %c0_46 = arith.constant 0 : index
    %c0_47 = arith.constant 0 : index
    %c0_48 = arith.constant 0 : index
    %107 = vector.load %arg14[%c0_46, %c0_47, %c0_48] : memref<2x1x128xf32, #tpu.memory_space<vmem>>, vector<1x1x128xf32>
    %108 = vector.shape_cast %107 : vector<1x1x128xf32> to vector<1x128xf32>
    %cst_49 = arith.constant dense<0.000000e+00> : vector<48x128xf32>
    %109 = tpu.matmul %104, %106, %cst_49 {dimension_numbers = #tpu.dot_dimension_numbers<[1], [0], [0], [1], [0, 0, 1, 1], [], []>} : vector<48x512xbf16>, vector<512x128xbf16>, vector<48x128xf32> -> vector<48x128xf32>
    %110 = vector.broadcast %108 : vector<1x128xf32> to vector<48x128xf32>
    %111 = arith.addf %109, %110 : vector<48x128xf32>
    %112 = arith.addf %32, %111 : vector<48x128xf32>
    %c0_50 = arith.constant 0 : index
    %c0_51 = arith.constant 0 : index
    %c0_52 = arith.constant 0 : index
    %113 = vector.load %arg15[%c0_50, %c0_51, %c0_52] : memref<2x1x128xf32, #tpu.memory_space<vmem>>, vector<1x1x128xf32>
    %114 = vector.shape_cast %113 : vector<1x1x128xf32> to vector<1x128xf32>
    %c0_53 = arith.constant 0 : index
    %c0_54 = arith.constant 0 : index
    %c0_55 = arith.constant 0 : index
    %115 = vector.load %arg16[%c0_53, %c0_54, %c0_55] : memref<2x1x128xf32, #tpu.memory_space<vmem>>, vector<1x1x128xf32>
    %116 = vector.shape_cast %115 : vector<1x1x128xf32> to vector<1x128xf32>
    %cst_56 = arith.constant dense<0.000000e+00> : vector<48x128xf32>
    %117 = tpu.matmul %112, %14, %cst_56 {dimension_numbers = #tpu.dot_dimension_numbers<[1], [0], [0], [1], [0, 0, 1, 1], [], []>} : vector<48x128xf32>, vector<128x128xf32>, vector<48x128xf32> -> vector<48x128xf32>
    %118 = arith.mulf %112, %112 : vector<48x128xf32>
    %cst_57 = arith.constant dense<0.000000e+00> : vector<48x128xf32>
    %119 = tpu.matmul %118, %14, %cst_57 {dimension_numbers = #tpu.dot_dimension_numbers<[1], [0], [0], [1], [0, 0, 1, 1], [], []>} : vector<48x128xf32>, vector<128x128xf32>, vector<48x128xf32> -> vector<48x128xf32>
    %120 = arith.mulf %117, %117 : vector<48x128xf32>
    %121 = arith.subf %119, %120 : vector<48x128xf32>
    %cst_58 = arith.constant 0.000000e+00 : f32
    %122 = vector.broadcast %cst_58 : f32 to vector<48x128xf32>
    %123 = arith.maximumf %121, %122 : vector<48x128xf32>
    %124 = arith.subf %112, %117 : vector<48x128xf32>
    %cst_59 = arith.constant 9.99999996E-13 : f32
    %125 = vector.broadcast %cst_59 : f32 to vector<48x128xf32>
    %126 = arith.addf %123, %125 : vector<48x128xf32>
    %127 = math.rsqrt %126 : vector<48x128xf32>
    %128 = arith.mulf %124, %127 : vector<48x128xf32>
    %129 = vector.broadcast %114 : vector<1x128xf32> to vector<48x128xf32>
    %130 = arith.mulf %128, %129 : vector<48x128xf32>
    %131 = vector.broadcast %116 : vector<1x128xf32> to vector<48x128xf32>
    %132 = arith.addf %130, %131 : vector<48x128xf32>
    %133 = arith.truncf %132 : vector<48x128xf32> to vector<48x128xbf16>
    %c0_60 = arith.constant 0 : index
    %c0_61 = arith.constant 0 : index
    %c0_62 = arith.constant 0 : index
    %134 = vector.load %arg17[%c0_60, %c0_61, %c0_62] : memref<2x128x128xbf16, #tpu.memory_space<vmem>>, vector<1x128x128xbf16>
    %135 = vector.shape_cast %134 : vector<1x128x128xbf16> to vector<128x128xbf16>
    %c0_63 = arith.constant 0 : index
    %c0_64 = arith.constant 0 : index
    %c0_65 = arith.constant 0 : index
    %136 = vector.load %arg18[%c0_63, %c0_64, %c0_65] : memref<2x1x128xf32, #tpu.memory_space<vmem>>, vector<1x1x128xf32>
    %137 = vector.shape_cast %136 : vector<1x1x128xf32> to vector<1x128xf32>
    %cst_66 = arith.constant dense<0.000000e+00> : vector<48x128xf32>
    %138 = tpu.matmul %133, %135, %cst_66 {dimension_numbers = #tpu.dot_dimension_numbers<[1], [0], [0], [1], [0, 0, 1, 1], [], []>} : vector<48x128xbf16>, vector<128x128xbf16>, vector<48x128xf32> -> vector<48x128xf32>
    %139 = vector.broadcast %137 : vector<1x128xf32> to vector<48x128xf32>
    %140 = arith.addf %138, %139 : vector<48x128xf32>
    %cst_67 = arith.constant 5.000000e-01 : f32
    %141 = vector.broadcast %cst_67 : f32 to vector<48x128xf32>
    %142 = arith.mulf %141, %140 : vector<48x128xf32>
    %cst_68 = arith.constant 4.471500e-02 : f32
    %143 = vector.broadcast %cst_68 : f32 to vector<48x128xf32>
    %144 = arith.mulf %143, %140 : vector<48x128xf32>
    %145 = arith.mulf %144, %140 : vector<48x128xf32>
    %146 = arith.mulf %145, %140 : vector<48x128xf32>
    %147 = arith.addf %140, %146 : vector<48x128xf32>
    %cst_69 = arith.constant 0.797884583 : f32
    %148 = vector.broadcast %cst_69 : f32 to vector<48x128xf32>
    %149 = arith.mulf %148, %147 : vector<48x128xf32>
    %150 = math.tanh %149 : vector<48x128xf32>
    %cst_70 = arith.constant 1.000000e+00 : f32
    %151 = vector.broadcast %cst_70 : f32 to vector<48x128xf32>
    %152 = arith.addf %151, %150 : vector<48x128xf32>
    %153 = arith.mulf %142, %152 : vector<48x128xf32>
    %154 = arith.truncf %153 : vector<48x128xf32> to vector<48x128xbf16>
    %c0_71 = arith.constant 0 : index
    %c0_72 = arith.constant 0 : index
    %c0_73 = arith.constant 0 : index
    %155 = vector.load %arg19[%c0_71, %c0_72, %c0_73] : memref<2x128x128xbf16, #tpu.memory_space<vmem>>, vector<1x128x128xbf16>
    %156 = vector.shape_cast %155 : vector<1x128x128xbf16> to vector<128x128xbf16>
    %c0_74 = arith.constant 0 : index
    %c0_75 = arith.constant 0 : index
    %c0_76 = arith.constant 0 : index
    %157 = vector.load %arg20[%c0_74, %c0_75, %c0_76] : memref<2x1x128xf32, #tpu.memory_space<vmem>>, vector<1x1x128xf32>
    %158 = vector.shape_cast %157 : vector<1x1x128xf32> to vector<1x128xf32>
    %cst_77 = arith.constant dense<0.000000e+00> : vector<48x128xf32>
    %159 = tpu.matmul %154, %156, %cst_77 {dimension_numbers = #tpu.dot_dimension_numbers<[1], [0], [0], [1], [0, 0, 1, 1], [], []>} : vector<48x128xbf16>, vector<128x128xbf16>, vector<48x128xf32> -> vector<48x128xf32>
    %160 = vector.broadcast %158 : vector<1x128xf32> to vector<48x128xf32>
    %161 = arith.addf %159, %160 : vector<48x128xf32>
    %162 = arith.addf %132, %161 : vector<48x128xf32>
    %c0_78 = arith.constant 0 : index
    %c0_79 = arith.constant 0 : index
    %c0_80 = arith.constant 0 : index
    %163 = vector.load %arg21[%c0_78, %c0_79, %c0_80] : memref<2x1x128xf32, #tpu.memory_space<vmem>>, vector<1x1x128xf32>
    %164 = vector.shape_cast %163 : vector<1x1x128xf32> to vector<1x128xf32>
    %c0_81 = arith.constant 0 : index
    %c0_82 = arith.constant 0 : index
    %c0_83 = arith.constant 0 : index
    %165 = vector.load %arg22[%c0_81, %c0_82, %c0_83] : memref<2x1x128xf32, #tpu.memory_space<vmem>>, vector<1x1x128xf32>
    %166 = vector.shape_cast %165 : vector<1x1x128xf32> to vector<1x128xf32>
    %cst_84 = arith.constant dense<0.000000e+00> : vector<48x128xf32>
    %167 = tpu.matmul %162, %14, %cst_84 {dimension_numbers = #tpu.dot_dimension_numbers<[1], [0], [0], [1], [0, 0, 1, 1], [], []>} : vector<48x128xf32>, vector<128x128xf32>, vector<48x128xf32> -> vector<48x128xf32>
    %168 = arith.mulf %162, %162 : vector<48x128xf32>
    %cst_85 = arith.constant dense<0.000000e+00> : vector<48x128xf32>
    %169 = tpu.matmul %168, %14, %cst_85 {dimension_numbers = #tpu.dot_dimension_numbers<[1], [0], [0], [1], [0, 0, 1, 1], [], []>} : vector<48x128xf32>, vector<128x128xf32>, vector<48x128xf32> -> vector<48x128xf32>
    %170 = arith.mulf %167, %167 : vector<48x128xf32>
    %171 = arith.subf %169, %170 : vector<48x128xf32>
    %cst_86 = arith.constant 0.000000e+00 : f32
    %172 = vector.broadcast %cst_86 : f32 to vector<48x128xf32>
    %173 = arith.maximumf %171, %172 : vector<48x128xf32>
    %174 = arith.subf %162, %167 : vector<48x128xf32>
    %cst_87 = arith.constant 9.99999996E-13 : f32
    %175 = vector.broadcast %cst_87 : f32 to vector<48x128xf32>
    %176 = arith.addf %173, %175 : vector<48x128xf32>
    %177 = math.rsqrt %176 : vector<48x128xf32>
    %178 = arith.mulf %174, %177 : vector<48x128xf32>
    %179 = vector.broadcast %164 : vector<1x128xf32> to vector<48x128xf32>
    %180 = arith.mulf %178, %179 : vector<48x128xf32>
    %181 = vector.broadcast %166 : vector<1x128xf32> to vector<48x128xf32>
    %182 = arith.addf %180, %181 : vector<48x128xf32>
    %183 = arith.truncf %182 : vector<48x128xf32> to vector<48x128xbf16>
    %c1 = arith.constant 1 : index
    %c0_88 = arith.constant 0 : index
    %c0_89 = arith.constant 0 : index
    %184 = vector.load %arg7[%c1, %c0_88, %c0_89] : memref<2x128x512xbf16, #tpu.memory_space<vmem>>, vector<1x128x512xbf16>
    %185 = vector.shape_cast %184 : vector<1x128x512xbf16> to vector<128x512xbf16>
    %c1_90 = arith.constant 1 : index
    %c0_91 = arith.constant 0 : index
    %c0_92 = arith.constant 0 : index
    %186 = vector.load %arg8[%c1_90, %c0_91, %c0_92] : memref<2x1x512xf32, #tpu.memory_space<vmem>>, vector<1x1x512xf32>
    %187 = vector.shape_cast %186 : vector<1x1x512xf32> to vector<1x512xf32>
    %cst_93 = arith.constant dense<0.000000e+00> : vector<48x512xf32>
    %188 = tpu.matmul %183, %185, %cst_93 {dimension_numbers = #tpu.dot_dimension_numbers<[1], [0], [0], [1], [0, 0, 1, 1], [], []>} : vector<48x128xbf16>, vector<128x512xbf16>, vector<48x512xf32> -> vector<48x512xf32>
    %189 = vector.broadcast %187 : vector<1x512xf32> to vector<48x512xf32>
    %190 = arith.addf %188, %189 : vector<48x512xf32>
    %191 = vector.shape_cast %190 : vector<48x512xf32> to vector<6x8x512xf32>
    %192 = vector.extract_strided_slice %191 {offsets = [0, 0, 0], sizes = [6, 8, 128], strides = [1, 1, 1]} : vector<6x8x512xf32> to vector<6x8x128xf32>
    %193 = vector.extract_strided_slice %191 {offsets = [0, 0, 128], sizes = [6, 8, 128], strides = [1, 1, 1]} : vector<6x8x512xf32> to vector<6x8x128xf32>
    %194 = vector.extract_strided_slice %191 {offsets = [0, 0, 256], sizes = [6, 8, 128], strides = [1, 1, 1]} : vector<6x8x512xf32> to vector<6x8x128xf32>
    %195 = vector.extract_strided_slice %191 {offsets = [0, 0, 384], sizes = [6, 8, 128], strides = [1, 1, 1]} : vector<6x8x512xf32> to vector<6x8x128xf32>
    %196 = tpu.concatenate %192, %193, %194, %195 in 0 : vector<6x8x128xf32>, vector<6x8x128xf32>, vector<6x8x128xf32>, vector<6x8x128xf32> -> vector<24x8x128xf32>
    %c1_94 = arith.constant 1 : index
    %c0_95 = arith.constant 0 : index
    %c0_96 = arith.constant 0 : index
    %197 = vector.load %arg9[%c1_94, %c0_95, %c0_96] : memref<2x128x512xbf16, #tpu.memory_space<vmem>>, vector<1x128x512xbf16>
    %198 = vector.shape_cast %197 : vector<1x128x512xbf16> to vector<128x512xbf16>
    %c1_97 = arith.constant 1 : index
    %c0_98 = arith.constant 0 : index
    %c0_99 = arith.constant 0 : index
    %199 = vector.load %arg10[%c1_97, %c0_98, %c0_99] : memref<2x1x512xf32, #tpu.memory_space<vmem>>, vector<1x1x512xf32>
    %200 = vector.shape_cast %199 : vector<1x1x512xf32> to vector<1x512xf32>
    %cst_100 = arith.constant dense<0.000000e+00> : vector<48x512xf32>
    %201 = tpu.matmul %183, %198, %cst_100 {dimension_numbers = #tpu.dot_dimension_numbers<[1], [0], [0], [1], [0, 0, 1, 1], [], []>} : vector<48x128xbf16>, vector<128x512xbf16>, vector<48x512xf32> -> vector<48x512xf32>
    %202 = vector.broadcast %200 : vector<1x512xf32> to vector<48x512xf32>
    %203 = arith.addf %201, %202 : vector<48x512xf32>
    %204 = vector.shape_cast %203 : vector<48x512xf32> to vector<6x8x512xf32>
    %205 = vector.extract_strided_slice %204 {offsets = [0, 0, 0], sizes = [6, 8, 128], strides = [1, 1, 1]} : vector<6x8x512xf32> to vector<6x8x128xf32>
    %206 = vector.extract_strided_slice %204 {offsets = [0, 0, 128], sizes = [6, 8, 128], strides = [1, 1, 1]} : vector<6x8x512xf32> to vector<6x8x128xf32>
    %207 = vector.extract_strided_slice %204 {offsets = [0, 0, 256], sizes = [6, 8, 128], strides = [1, 1, 1]} : vector<6x8x512xf32> to vector<6x8x128xf32>
    %208 = vector.extract_strided_slice %204 {offsets = [0, 0, 384], sizes = [6, 8, 128], strides = [1, 1, 1]} : vector<6x8x512xf32> to vector<6x8x128xf32>
    %209 = tpu.concatenate %205, %206, %207, %208 in 0 : vector<6x8x128xf32>, vector<6x8x128xf32>, vector<6x8x128xf32>, vector<6x8x128xf32> -> vector<24x8x128xf32>
    %c1_101 = arith.constant 1 : index
    %c0_102 = arith.constant 0 : index
    %c0_103 = arith.constant 0 : index
    %210 = vector.load %arg11[%c1_101, %c0_102, %c0_103] : memref<2x128x512xbf16, #tpu.memory_space<vmem>>, vector<1x128x512xbf16>
    %211 = vector.shape_cast %210 : vector<1x128x512xbf16> to vector<128x512xbf16>
    %c1_104 = arith.constant 1 : index
    %c0_105 = arith.constant 0 : index
    %c0_106 = arith.constant 0 : index
    %212 = vector.load %arg12[%c1_104, %c0_105, %c0_106] : memref<2x1x512xf32, #tpu.memory_space<vmem>>, vector<1x1x512xf32>
    %213 = vector.shape_cast %212 : vector<1x1x512xf32> to vector<1x512xf32>
    %cst_107 = arith.constant dense<0.000000e+00> : vector<48x512xf32>
    %214 = tpu.matmul %183, %211, %cst_107 {dimension_numbers = #tpu.dot_dimension_numbers<[1], [0], [0], [1], [0, 0, 1, 1], [], []>} : vector<48x128xbf16>, vector<128x512xbf16>, vector<48x512xf32> -> vector<48x512xf32>
    %215 = vector.broadcast %213 : vector<1x512xf32> to vector<48x512xf32>
    %216 = arith.addf %214, %215 : vector<48x512xf32>
    %217 = vector.shape_cast %216 : vector<48x512xf32> to vector<6x8x512xf32>
    %218 = vector.extract_strided_slice %217 {offsets = [0, 0, 0], sizes = [6, 8, 128], strides = [1, 1, 1]} : vector<6x8x512xf32> to vector<6x8x128xf32>
    %219 = vector.extract_strided_slice %217 {offsets = [0, 0, 128], sizes = [6, 8, 128], strides = [1, 1, 1]} : vector<6x8x512xf32> to vector<6x8x128xf32>
    %220 = vector.extract_strided_slice %217 {offsets = [0, 0, 256], sizes = [6, 8, 128], strides = [1, 1, 1]} : vector<6x8x512xf32> to vector<6x8x128xf32>
    %221 = vector.extract_strided_slice %217 {offsets = [0, 0, 384], sizes = [6, 8, 128], strides = [1, 1, 1]} : vector<6x8x512xf32> to vector<6x8x128xf32>
    %222 = tpu.concatenate %218, %219, %220, %221 in 0 : vector<6x8x128xf32>, vector<6x8x128xf32>, vector<6x8x128xf32>, vector<6x8x128xf32> -> vector<24x8x128xf32>
    %223 = arith.truncf %196 : vector<24x8x128xf32> to vector<24x8x128xbf16>
    %224 = arith.truncf %209 : vector<24x8x128xf32> to vector<24x8x128xbf16>
    "tpu.trace_start"() <{level = 10 : i32, message = "zqd,zkd->zqk"}> : () -> ()
    %cst_108 = arith.constant dense<0.000000e+00> : vector<24x8x8xf32>
    %225 = tpu.matmul %223, %224, %cst_108 {dimension_numbers = #tpu.dot_dimension_numbers<[2], [2], [1], [1], [0, 0, 0, 1, 1, 1], [0], [0]>} : vector<24x8x128xbf16>, vector<24x8x128xbf16>, vector<24x8x8xf32> -> vector<24x8x8xf32>
    "tpu.trace_stop"() : () -> ()
    %226 = vector.broadcast %39 : vector<24x1x8xf32> to vector<24x8x8xf32>
    %227 = arith.addf %225, %226 : vector<24x8x8xf32>
    %cst_109 = arith.constant dense<0xFF800000> : vector<24x8xf32>
    %228 = vector.multi_reduction <maximumf>, %227, %cst_109 [2] : vector<24x8x8xf32> to vector<24x8xf32>
    %229 = vector.shape_cast %228 : vector<24x8xf32> to vector<24x8x1xf32>
    %230 = vector.broadcast %229 : vector<24x8x1xf32> to vector<24x8x8xf32>
    %231 = arith.subf %227, %230 : vector<24x8x8xf32>
    %232 = math.exp %231 : vector<24x8x8xf32>
    %cst_110 = arith.constant dense<0.000000e+00> : vector<24x8xf32>
    %233 = vector.multi_reduction <add>, %232, %cst_110 [2] : vector<24x8x8xf32> to vector<24x8xf32>
    %234 = vector.shape_cast %233 : vector<24x8xf32> to vector<24x8x1xf32>
    %235 = tpu.reciprocal %234 {approx = true} : vector<24x8x1xf32> -> vector<24x8x1xf32>
    %236 = vector.broadcast %235 : vector<24x8x1xf32> to vector<24x8x8xf32>
    %237 = arith.mulf %232, %236 : vector<24x8x8xf32>
    %238 = arith.truncf %237 : vector<24x8x8xf32> to vector<24x8x8xbf16>
    %239 = arith.truncf %222 : vector<24x8x128xf32> to vector<24x8x128xbf16>
    "tpu.trace_start"() <{level = 10 : i32, message = "zqk,zkd->zqd"}> : () -> ()
    %cst_111 = arith.constant dense<0.000000e+00> : vector<24x8x128xf32>
    %240 = tpu.matmul %238, %239, %cst_111 {dimension_numbers = #tpu.dot_dimension_numbers<[2], [1], [1], [2], [0, 0, 0, 1, 1, 2], [0], [0]>} : vector<24x8x8xbf16>, vector<24x8x128xbf16>, vector<24x8x128xf32> -> vector<24x8x128xf32>
    "tpu.trace_stop"() : () -> ()
    %241 = vector.extract_strided_slice %240 {offsets = [0, 0, 0], sizes = [6, 8, 128], strides = [1, 1, 1]} : vector<24x8x128xf32> to vector<6x8x128xf32>
    %242 = vector.extract_strided_slice %240 {offsets = [6, 0, 0], sizes = [6, 8, 128], strides = [1, 1, 1]} : vector<24x8x128xf32> to vector<6x8x128xf32>
    %243 = vector.extract_strided_slice %240 {offsets = [12, 0, 0], sizes = [6, 8, 128], strides = [1, 1, 1]} : vector<24x8x128xf32> to vector<6x8x128xf32>
    %244 = vector.extract_strided_slice %240 {offsets = [18, 0, 0], sizes = [6, 8, 128], strides = [1, 1, 1]} : vector<24x8x128xf32> to vector<6x8x128xf32>
    %245 = tpu.concatenate %241, %242, %243, %244 in 2 : vector<6x8x128xf32>, vector<6x8x128xf32>, vector<6x8x128xf32>, vector<6x8x128xf32> -> vector<6x8x512xf32>
    %246 = vector.shape_cast %245 : vector<6x8x512xf32> to vector<48x512xf32>
    %247 = arith.truncf %246 : vector<48x512xf32> to vector<48x512xbf16>
    %c1_112 = arith.constant 1 : index
    %c0_113 = arith.constant 0 : index
    %c0_114 = arith.constant 0 : index
    %248 = vector.load %arg13[%c1_112, %c0_113, %c0_114] : memref<2x512x128xbf16, #tpu.memory_space<vmem>>, vector<1x512x128xbf16>
    %249 = vector.shape_cast %248 : vector<1x512x128xbf16> to vector<512x128xbf16>
    %c1_115 = arith.constant 1 : index
    %c0_116 = arith.constant 0 : index
    %c0_117 = arith.constant 0 : index
    %250 = vector.load %arg14[%c1_115, %c0_116, %c0_117] : memref<2x1x128xf32, #tpu.memory_space<vmem>>, vector<1x1x128xf32>
    %251 = vector.shape_cast %250 : vector<1x1x128xf32> to vector<1x128xf32>
    %cst_118 = arith.constant dense<0.000000e+00> : vector<48x128xf32>
    %252 = tpu.matmul %247, %249, %cst_118 {dimension_numbers = #tpu.dot_dimension_numbers<[1], [0], [0], [1], [0, 0, 1, 1], [], []>} : vector<48x512xbf16>, vector<512x128xbf16>, vector<48x128xf32> -> vector<48x128xf32>
    %253 = vector.broadcast %251 : vector<1x128xf32> to vector<48x128xf32>
    %254 = arith.addf %252, %253 : vector<48x128xf32>
    %255 = arith.addf %182, %254 : vector<48x128xf32>
    %c1_119 = arith.constant 1 : index
    %c0_120 = arith.constant 0 : index
    %c0_121 = arith.constant 0 : index
    %256 = vector.load %arg15[%c1_119, %c0_120, %c0_121] : memref<2x1x128xf32, #tpu.memory_space<vmem>>, vector<1x1x128xf32>
    %257 = vector.shape_cast %256 : vector<1x1x128xf32> to vector<1x128xf32>
    %c1_122 = arith.constant 1 : index
    %c0_123 = arith.constant 0 : index
    %c0_124 = arith.constant 0 : index
    %258 = vector.load %arg16[%c1_122, %c0_123, %c0_124] : memref<2x1x128xf32, #tpu.memory_space<vmem>>, vector<1x1x128xf32>
    %259 = vector.shape_cast %258 : vector<1x1x128xf32> to vector<1x128xf32>
    %cst_125 = arith.constant dense<0.000000e+00> : vector<48x128xf32>
    %260 = tpu.matmul %255, %14, %cst_125 {dimension_numbers = #tpu.dot_dimension_numbers<[1], [0], [0], [1], [0, 0, 1, 1], [], []>} : vector<48x128xf32>, vector<128x128xf32>, vector<48x128xf32> -> vector<48x128xf32>
    %261 = arith.mulf %255, %255 : vector<48x128xf32>
    %cst_126 = arith.constant dense<0.000000e+00> : vector<48x128xf32>
    %262 = tpu.matmul %261, %14, %cst_126 {dimension_numbers = #tpu.dot_dimension_numbers<[1], [0], [0], [1], [0, 0, 1, 1], [], []>} : vector<48x128xf32>, vector<128x128xf32>, vector<48x128xf32> -> vector<48x128xf32>
    %263 = arith.mulf %260, %260 : vector<48x128xf32>
    %264 = arith.subf %262, %263 : vector<48x128xf32>
    %cst_127 = arith.constant 0.000000e+00 : f32
    %265 = vector.broadcast %cst_127 : f32 to vector<48x128xf32>
    %266 = arith.maximumf %264, %265 : vector<48x128xf32>
    %267 = arith.subf %255, %260 : vector<48x128xf32>
    %cst_128 = arith.constant 9.99999996E-13 : f32
    %268 = vector.broadcast %cst_128 : f32 to vector<48x128xf32>
    %269 = arith.addf %266, %268 : vector<48x128xf32>
    %270 = math.rsqrt %269 : vector<48x128xf32>
    %271 = arith.mulf %267, %270 : vector<48x128xf32>
    %272 = vector.broadcast %257 : vector<1x128xf32> to vector<48x128xf32>
    %273 = arith.mulf %271, %272 : vector<48x128xf32>
    %274 = vector.broadcast %259 : vector<1x128xf32> to vector<48x128xf32>
    %275 = arith.addf %273, %274 : vector<48x128xf32>
    %276 = arith.truncf %275 : vector<48x128xf32> to vector<48x128xbf16>
    %c1_129 = arith.constant 1 : index
    %c0_130 = arith.constant 0 : index
    %c0_131 = arith.constant 0 : index
    %277 = vector.load %arg17[%c1_129, %c0_130, %c0_131] : memref<2x128x128xbf16, #tpu.memory_space<vmem>>, vector<1x128x128xbf16>
    %278 = vector.shape_cast %277 : vector<1x128x128xbf16> to vector<128x128xbf16>
    %c1_132 = arith.constant 1 : index
    %c0_133 = arith.constant 0 : index
    %c0_134 = arith.constant 0 : index
    %279 = vector.load %arg18[%c1_132, %c0_133, %c0_134] : memref<2x1x128xf32, #tpu.memory_space<vmem>>, vector<1x1x128xf32>
    %280 = vector.shape_cast %279 : vector<1x1x128xf32> to vector<1x128xf32>
    %cst_135 = arith.constant dense<0.000000e+00> : vector<48x128xf32>
    %281 = tpu.matmul %276, %278, %cst_135 {dimension_numbers = #tpu.dot_dimension_numbers<[1], [0], [0], [1], [0, 0, 1, 1], [], []>} : vector<48x128xbf16>, vector<128x128xbf16>, vector<48x128xf32> -> vector<48x128xf32>
    %282 = vector.broadcast %280 : vector<1x128xf32> to vector<48x128xf32>
    %283 = arith.addf %281, %282 : vector<48x128xf32>
    %cst_136 = arith.constant 5.000000e-01 : f32
    %284 = vector.broadcast %cst_136 : f32 to vector<48x128xf32>
    %285 = arith.mulf %284, %283 : vector<48x128xf32>
    %cst_137 = arith.constant 4.471500e-02 : f32
    %286 = vector.broadcast %cst_137 : f32 to vector<48x128xf32>
    %287 = arith.mulf %286, %283 : vector<48x128xf32>
    %288 = arith.mulf %287, %283 : vector<48x128xf32>
    %289 = arith.mulf %288, %283 : vector<48x128xf32>
    %290 = arith.addf %283, %289 : vector<48x128xf32>
    %cst_138 = arith.constant 0.797884583 : f32
    %291 = vector.broadcast %cst_138 : f32 to vector<48x128xf32>
    %292 = arith.mulf %291, %290 : vector<48x128xf32>
    %293 = math.tanh %292 : vector<48x128xf32>
    %cst_139 = arith.constant 1.000000e+00 : f32
    %294 = vector.broadcast %cst_139 : f32 to vector<48x128xf32>
    %295 = arith.addf %294, %293 : vector<48x128xf32>
    %296 = arith.mulf %285, %295 : vector<48x128xf32>
    %297 = arith.truncf %296 : vector<48x128xf32> to vector<48x128xbf16>
    %c1_140 = arith.constant 1 : index
    %c0_141 = arith.constant 0 : index
    %c0_142 = arith.constant 0 : index
    %298 = vector.load %arg19[%c1_140, %c0_141, %c0_142] : memref<2x128x128xbf16, #tpu.memory_space<vmem>>, vector<1x128x128xbf16>
    %299 = vector.shape_cast %298 : vector<1x128x128xbf16> to vector<128x128xbf16>
    %c1_143 = arith.constant 1 : index
    %c0_144 = arith.constant 0 : index
    %c0_145 = arith.constant 0 : index
    %300 = vector.load %arg20[%c1_143, %c0_144, %c0_145] : memref<2x1x128xf32, #tpu.memory_space<vmem>>, vector<1x1x128xf32>
    %301 = vector.shape_cast %300 : vector<1x1x128xf32> to vector<1x128xf32>
    %cst_146 = arith.constant dense<0.000000e+00> : vector<48x128xf32>
    %302 = tpu.matmul %297, %299, %cst_146 {dimension_numbers = #tpu.dot_dimension_numbers<[1], [0], [0], [1], [0, 0, 1, 1], [], []>} : vector<48x128xbf16>, vector<128x128xbf16>, vector<48x128xf32> -> vector<48x128xf32>
    %303 = vector.broadcast %301 : vector<1x128xf32> to vector<48x128xf32>
    %304 = arith.addf %302, %303 : vector<48x128xf32>
    %305 = arith.addf %275, %304 : vector<48x128xf32>
    %c1_147 = arith.constant 1 : index
    %c0_148 = arith.constant 0 : index
    %c0_149 = arith.constant 0 : index
    %306 = vector.load %arg21[%c1_147, %c0_148, %c0_149] : memref<2x1x128xf32, #tpu.memory_space<vmem>>, vector<1x1x128xf32>
    %307 = vector.shape_cast %306 : vector<1x1x128xf32> to vector<1x128xf32>
    %c1_150 = arith.constant 1 : index
    %c0_151 = arith.constant 0 : index
    %c0_152 = arith.constant 0 : index
    %308 = vector.load %arg22[%c1_150, %c0_151, %c0_152] : memref<2x1x128xf32, #tpu.memory_space<vmem>>, vector<1x1x128xf32>
    %309 = vector.shape_cast %308 : vector<1x1x128xf32> to vector<1x128xf32>
    %cst_153 = arith.constant dense<0.000000e+00> : vector<48x128xf32>
    %310 = tpu.matmul %305, %14, %cst_153 {dimension_numbers = #tpu.dot_dimension_numbers<[1], [0], [0], [1], [0, 0, 1, 1], [], []>} : vector<48x128xf32>, vector<128x128xf32>, vector<48x128xf32> -> vector<48x128xf32>
    %311 = arith.mulf %305, %305 : vector<48x128xf32>
    %cst_154 = arith.constant dense<0.000000e+00> : vector<48x128xf32>
    %312 = tpu.matmul %311, %14, %cst_154 {dimension_numbers = #tpu.dot_dimension_numbers<[1], [0], [0], [1], [0, 0, 1, 1], [], []>} : vector<48x128xf32>, vector<128x128xf32>, vector<48x128xf32> -> vector<48x128xf32>
    %313 = arith.mulf %310, %310 : vector<48x128xf32>
    %314 = arith.subf %312, %313 : vector<48x128xf32>
    %cst_155 = arith.constant 0.000000e+00 : f32
    %315 = vector.broadcast %cst_155 : f32 to vector<48x128xf32>
    %316 = arith.maximumf %314, %315 : vector<48x128xf32>
    %317 = arith.subf %305, %310 : vector<48x128xf32>
    %cst_156 = arith.constant 9.99999996E-13 : f32
    %318 = vector.broadcast %cst_156 : f32 to vector<48x128xf32>
    %319 = arith.addf %316, %318 : vector<48x128xf32>
    %320 = math.rsqrt %319 : vector<48x128xf32>
    %321 = arith.mulf %317, %320 : vector<48x128xf32>
    %322 = vector.broadcast %307 : vector<1x128xf32> to vector<48x128xf32>
    %323 = arith.mulf %321, %322 : vector<48x128xf32>
    %324 = vector.broadcast %309 : vector<1x128xf32> to vector<48x128xf32>
    %325 = arith.addf %323, %324 : vector<48x128xf32>
    %326 = vector.shape_cast %325 : vector<48x128xf32> to vector<6x8x128xf32>
    %327 = vector.extract_strided_slice %326 {offsets = [0, 0, 0], sizes = [6, 1, 128], strides = [1, 1, 1]} : vector<6x8x128xf32> to vector<6x1x128xf32>
    %328 = vector.shape_cast %327 : vector<6x1x128xf32> to vector<6x128xf32>
    %329 = arith.truncf %328 : vector<6x128xf32> to vector<6x128xbf16>
    %c0_157 = arith.constant 0 : index
    %c0_158 = arith.constant 0 : index
    %330 = vector.load %arg23[%c0_157, %c0_158] : memref<128x128xbf16, #tpu.memory_space<vmem>>, vector<128x128xbf16>
    %cst_159 = arith.constant dense<0.000000e+00> : vector<6x128xf32>
    %331 = tpu.matmul %329, %330, %cst_159 {dimension_numbers = #tpu.dot_dimension_numbers<[1], [0], [0], [1], [0, 0, 1, 1], [], []>} : vector<6x128xbf16>, vector<128x128xbf16>, vector<6x128xf32> -> vector<6x128xf32>
    %c0_160 = arith.constant 0 : index
    %c0_161 = arith.constant 0 : index
    %332 = vector.load %arg24[%c0_160, %c0_161] : memref<1x128xf32, #tpu.memory_space<vmem>>, vector<1x128xf32>
    %333 = vector.broadcast %332 : vector<1x128xf32> to vector<6x128xf32>
    %334 = arith.addf %331, %333 : vector<6x128xf32>
    %335 = math.tanh %334 : vector<6x128xf32>
    %c0_162 = arith.constant 0 : index
    %c0_163 = arith.constant 0 : index
    %336 = vector.load %arg25[%c0_162, %c0_163] : memref<6x128xf32, #tpu.memory_space<vmem>>, vector<6x128xf32>
    tpu.vector_store %arg25[%c0_162, %c0_163], %335 {strides = array<i32>} : memref<6x128xf32, #tpu.memory_space<vmem>>, vector<6x128xf32>,
    return
  }
  func.func @transform_0(%arg0: i32) -> (i32, i32) {
    %c0_i32 = arith.constant 0 : i32
    %c0_i32_0 = arith.constant 0 : i32
    %c0_i32_1 = arith.constant 0 : i32
    return %c0_i32, %c0_i32_0 : i32, i32
  }
  func.func @transform_1(%arg0: i32) -> (i32, i32) {
    %c0_i32 = arith.constant 0 : i32
    %c0_i32_0 = arith.constant 0 : i32
    %c0_i32_1 = arith.constant 0 : i32
    return %c0_i32, %c0_i32_0 : i32, i32
  }
  func.func @transform_2(%arg0: i32) -> (i32, i32) {
    %c0_i32 = arith.constant 0 : i32
    %c0_i32_0 = arith.constant 0 : i32
    %c0_i32_1 = arith.constant 0 : i32
    return %c0_i32, %c0_i32_0 : i32, i32
  }
  func.func @transform_3(%arg0: i32) -> (i32, i32) {
    %c0_i32 = arith.constant 0 : i32
    %c0_i32_0 = arith.constant 0 : i32
    %c0_i32_1 = arith.constant 0 : i32
    return %c0_i32, %c0_i32_0 : i32, i32
  }
  func.func @transform_4(%arg0: i32) -> (i32, i32) {
    %c0_i32 = arith.constant 0 : i32
    %c0_i32_0 = arith.constant 0 : i32
    %c0_i32_1 = arith.constant 0 : i32
    return %c0_i32, %c0_i32_0 : i32, i32
  }
  func.func @transform_5(%arg0: i32) -> (i32, i32) {
    %c0_i32 = arith.constant 0 : i32
    %c0_i32_0 = arith.constant 0 : i32
    %c0_i32_1 = arith.constant 0 : i32
    return %c0_i32, %c0_i32_0 : i32, i32
  }
  func.func @transform_6(%arg0: i32) -> (i32, i32, i32) {
    %c0_i32 = arith.constant 0 : i32
    %c0_i32_0 = arith.constant 0 : i32
    %c0_i32_1 = arith.constant 0 : i32
    %c0_i32_2 = arith.constant 0 : i32
    return %c0_i32, %c0_i32_0, %c0_i32_1 : i32, i32, i32
  }
  func.func @transform_7(%arg0: i32) -> (i32, i32, i32) {
    %c0_i32 = arith.constant 0 : i32
    %c0_i32_0 = arith.constant 0 : i32
    %c0_i32_1 = arith.constant 0 : i32
    %c0_i32_2 = arith.constant 0 : i32
    return %c0_i32, %c0_i32_0, %c0_i32_1 : i32, i32, i32
  }
  func.func @transform_8(%arg0: i32) -> (i32, i32, i32) {
    %c0_i32 = arith.constant 0 : i32
    %c0_i32_0 = arith.constant 0 : i32
    %c0_i32_1 = arith.constant 0 : i32
    %c0_i32_2 = arith.constant 0 : i32
    return %c0_i32, %c0_i32_0, %c0_i32_1 : i32, i32, i32
  }
  func.func @transform_9(%arg0: i32) -> (i32, i32, i32) {
    %c0_i32 = arith.constant 0 : i32
    %c0_i32_0 = arith.constant 0 : i32
    %c0_i32_1 = arith.constant 0 : i32
    %c0_i32_2 = arith.constant 0 : i32
    return %c0_i32, %c0_i32_0, %c0_i32_1 : i32, i32, i32
  }
  func.func @transform_10(%arg0: i32) -> (i32, i32, i32) {
    %c0_i32 = arith.constant 0 : i32
    %c0_i32_0 = arith.constant 0 : i32
    %c0_i32_1 = arith.constant 0 : i32
    %c0_i32_2 = arith.constant 0 : i32
    return %c0_i32, %c0_i32_0, %c0_i32_1 : i32, i32, i32
  }
  func.func @transform_11(%arg0: i32) -> (i32, i32, i32) {
    %c0_i32 = arith.constant 0 : i32
    %c0_i32_0 = arith.constant 0 : i32
    %c0_i32_1 = arith.constant 0 : i32
    %c0_i32_2 = arith.constant 0 : i32
    return %c0_i32, %c0_i32_0, %c0_i32_1 : i32, i32, i32
  }
  func.func @transform_12(%arg0: i32) -> (i32, i32, i32) {
    %c0_i32 = arith.constant 0 : i32
    %c0_i32_0 = arith.constant 0 : i32
    %c0_i32_1 = arith.constant 0 : i32
    %c0_i32_2 = arith.constant 0 : i32
    return %c0_i32, %c0_i32_0, %c0_i32_1 : i32, i32, i32
  }
  func.func @transform_13(%arg0: i32) -> (i32, i32, i32) {
    %c0_i32 = arith.constant 0 : i32
    %c0_i32_0 = arith.constant 0 : i32
    %c0_i32_1 = arith.constant 0 : i32
    %c0_i32_2 = arith.constant 0 : i32
    return %c0_i32, %c0_i32_0, %c0_i32_1 : i32, i32, i32
  }
  func.func @transform_14(%arg0: i32) -> (i32, i32, i32) {
    %c0_i32 = arith.constant 0 : i32
    %c0_i32_0 = arith.constant 0 : i32
    %c0_i32_1 = arith.constant 0 : i32
    %c0_i32_2 = arith.constant 0 : i32
    return %c0_i32, %c0_i32_0, %c0_i32_1 : i32, i32, i32
  }
  func.func @transform_15(%arg0: i32) -> (i32, i32, i32) {
    %c0_i32 = arith.constant 0 : i32
    %c0_i32_0 = arith.constant 0 : i32
    %c0_i32_1 = arith.constant 0 : i32
    %c0_i32_2 = arith.constant 0 : i32
    return %c0_i32, %c0_i32_0, %c0_i32_1 : i32, i32, i32
  }
  func.func @transform_16(%arg0: i32) -> (i32, i32, i32) {
    %c0_i32 = arith.constant 0 : i32
    %c0_i32_0 = arith.constant 0 : i32
    %c0_i32_1 = arith.constant 0 : i32
    %c0_i32_2 = arith.constant 0 : i32
    return %c0_i32, %c0_i32_0, %c0_i32_1 : i32, i32, i32
  }
  func.func @transform_17(%arg0: i32) -> (i32, i32, i32) {
    %c0_i32 = arith.constant 0 : i32
    %c0_i32_0 = arith.constant 0 : i32
    %c0_i32_1 = arith.constant 0 : i32
    %c0_i32_2 = arith.constant 0 : i32
    return %c0_i32, %c0_i32_0, %c0_i32_1 : i32, i32, i32
  }
  func.func @transform_18(%arg0: i32) -> (i32, i32, i32) {
    %c0_i32 = arith.constant 0 : i32
    %c0_i32_0 = arith.constant 0 : i32
    %c0_i32_1 = arith.constant 0 : i32
    %c0_i32_2 = arith.constant 0 : i32
    return %c0_i32, %c0_i32_0, %c0_i32_1 : i32, i32, i32
  }
  func.func @transform_19(%arg0: i32) -> (i32, i32, i32) {
    %c0_i32 = arith.constant 0 : i32
    %c0_i32_0 = arith.constant 0 : i32
    %c0_i32_1 = arith.constant 0 : i32
    %c0_i32_2 = arith.constant 0 : i32
    return %c0_i32, %c0_i32_0, %c0_i32_1 : i32, i32, i32
  }
  func.func @transform_20(%arg0: i32) -> (i32, i32, i32) {
    %c0_i32 = arith.constant 0 : i32
    %c0_i32_0 = arith.constant 0 : i32
    %c0_i32_1 = arith.constant 0 : i32
    %c0_i32_2 = arith.constant 0 : i32
    return %c0_i32, %c0_i32_0, %c0_i32_1 : i32, i32, i32
  }
  func.func @transform_21(%arg0: i32) -> (i32, i32, i32) {
    %c0_i32 = arith.constant 0 : i32
    %c0_i32_0 = arith.constant 0 : i32
    %c0_i32_1 = arith.constant 0 : i32
    %c0_i32_2 = arith.constant 0 : i32
    return %c0_i32, %c0_i32_0, %c0_i32_1 : i32, i32, i32
  }
  func.func @transform_22(%arg0: i32) -> (i32, i32) {
    %c0_i32 = arith.constant 0 : i32
    %c0_i32_0 = arith.constant 0 : i32
    %c0_i32_1 = arith.constant 0 : i32
    return %c0_i32, %c0_i32_0 : i32, i32
  }
  func.func @transform_23(%arg0: i32) -> (i32, i32) {
    %c0_i32 = arith.constant 0 : i32
    %c0_i32_0 = arith.constant 0 : i32
    %c0_i32_1 = arith.constant 0 : i32
    return %c0_i32, %c0_i32_0 : i32, i32
  }
  func.func @transform_24(%arg0: i32) -> (i32, i32) {
    %c0_i32 = arith.constant 0 : i32
    %c0_i32_0 = arith.constant 0 : i32
    %c0_i32_1 = arith.constant 0 : i32
    return %c0_i32, %c0_i32_0 : i32, i32
  }
}

</mosaic_0001>

<bundles_post_ra>
// kernel: frozen_single_bert_forward.1
= control target key start
LH: loop header
LB: loop body
LE: loop exit
PB: predicated region body
PF: predicated region fallthrough
CT: control target
= control target key end

     0   :  { %s16385_s0 = inlined_call_operand.vmem [shape: s32[48,1], index: 0, kind: input, shape index: {}]   ;;  %s16386_s1 = inlined_call_operand.vmem [shape: f32[6,8], index: 1, kind: input, shape index: {}]   ;;  %s16387_s2 = inlined_call_operand.vmem [shape: f32[128,128], index: 2, kind: input, shape index: {}]   ;;  %s16388_s3 = inlined_call_operand.vmem [shape: f32[8,128], index: 3, kind: input, shape index: {}]   ;;  %s16389_s4 = inlined_call_operand.vmem [shape: f32[1,128], index: 4, kind: input, shape index: {}]   ;;  %s16390_s5 = inlined_call_operand.vmem [shape: f32[1,128], index: 5, kind: input, shape index: {}]   ;;  %s16391_s6 = inlined_call_operand.hbm [shape: bf16[2,128,512], index: 6, kind: input, shape index: {}]   ;;  %s16392_s7 = inlined_call_operand.vmem [shape: f32[2,1,512], index: 7, kind: input, shape index: {}]   ;;  %s16393_s8 = inlined_call_operand.hbm [shape: bf16[2,128,512], index: 8, kind: input, shape index: {}]   ;;  %s16394_s9 = inlined_call_operand.vmem [shape: f32[2,1,512], index: 9, kind: input, shape index: {}]   ;;  %s16395_s10 = inlined_call_operand.hbm [shape: bf16[2,128,512], index: 10, kind: input, shape index: {}]   ;;  %s16396_s11 = inlined_call_operand.vmem [shape: f32[2,1,512], index: 11, kind: input, shape index: {}]   ;;  %s16397_s12 = inlined_call_operand.hbm [shape: bf16[2,512,128], index: 12, kind: input, shape index: {}]   ;;  %s16398_s13 = inlined_call_operand.vmem [shape: f32[2,1,128], index: 13, kind: input, shape index: {}]   ;;  %s16399_s14 = inlined_call_operand.vmem [shape: f32[2,1,128], index: 14, kind: input, shape index: {}]   ;;  %s16400_s15 = inlined_call_operand.vmem [shape: f32[2,1,128], index: 15, kind: input, shape index: {}]   ;;  %s16401_s16 = inlined_call_operand.hbm [shape: bf16[2,128,128], index: 16, kind: input, shape index: {}]   ;;  %s16402_s17 = inlined_call_operand.vmem [shape: f32[2,1,128], index: 17, kind: input, shape index: {}]   ;;  %s16403_s18 = inlined_call_operand.hbm [shape: bf16[2,128,128], index: 18, kind: input, shape index: {}]   ;;  %s16404_s19 = inlined_call_operand.vmem [shape: f32[2,1,128], index: 19, kind: input, shape index: {}]   ;;  %s16405_s20 = inlined_call_operand.vmem [shape: f32[2,1,128], index: 20, kind: input, shape index: {}]   ;;  %s16406_s21 = inlined_call_operand.vmem [shape: f32[2,1,128], index: 21, kind: input, shape index: {}]   ;;  %s16407_s22 = inlined_call_operand.hbm [shape: bf16[128,128], index: 22, kind: input, shape index: {}]   ;;  %s16408_s23 = inlined_call_operand.vmem [shape: f32[1,128], index: 23, kind: input, shape index: {}]   ;;  %s16409_s24 = inlined_call_operand.vmem [shape: f32[6,128], index: 24, kind: output, shape index: {}]  }
   0x1   :  { %16463 = sst [smem:[#allocation50_spill]] %s16385_s0 }
   0x2   :  { %16464 = sst [smem:[#allocation51_spill]] %s16386_s1 }
   0x3   :  { %16465 = sst [smem:[#allocation52_spill]] %s16387_s2 }
   0x4   :  { %16466 = sst [smem:[#allocation53_spill]] %s16388_s3 }
   0x5   :  { %16467 = sst [smem:[#allocation54_spill]] %s16389_s4 }
   0x6   :  { %16468 = sst [smem:[#allocation55_spill]] %s16390_s5 }
   0x7   :  { %16469 = sst [smem:[#allocation56_spill]] %s16391_s6 }
   0x8   :  { %16470 = sst [smem:[#allocation57_spill]] %s16392_s7 }
   0x9   :  { %16471 = sst [smem:[#allocation58_spill]] %s16393_s8 }
   0xa   :  { %16472 = sst [smem:[#allocation59_spill]] %s16409_s24 }
   0xb   :  { %29 = vsyncpa [#allocation3], 0 }
   0xc   :  { %30 = vsyncpa [#allocation5], 0 }
   0xd   :  { %31 = vsyncpa [#allocation8], 0 }
   0xe   :  { %32 = vsyncpa [#allocation11], 0  ;;  %s13666_s5 = smov [#allocation4]   ;;  %s13667_s27 = smov [#allocation7]  }
   0xf   :  { %s64_s26 = sshll.u32 %s13666_s5, 4  ;;  %s92_s28 = sshll.u32 %s13667_s27, 4  ;;  %s65_s26 = int_to_ptr.vmem [resolvable:$true] %s64_s26  ;;  %s13808_s28 = int_to_ptr.vmem [resolvable:$true] %s92_s28 }
  0x10   :  { %s16473_s29 = sld [smem:[#allocation58_spill]] }
  0x16   :  { %s13504_s0 = scalar_lea.hbm %s16473_s29, 8192 }
  0x17   :  { %p13505_p0 = scmp.ne.s32.totalorder %s16473_s29, %s13504_s0  ;;  %p13508_p1 = scmp.lt.u32.totalorder %s13504_s0, %s16473_s29 }
  0x19   :  { %p13510_p2 = pnand %p13508_p1, %p13505_p0 }
  0x1b   :  { %13513 = shalt.err (!%p13510_p2)
}
  0x1c   :  { %s13514_s8 = scalar_lea.vmem %s65_s26, 8192  ;;  %p13519_p4 = scmp.lt.s32.totalorder %s65_s26, %s65_s26 }
  0x1d   :  { %p13515_p3 = scmp.ne.s32.totalorder %s65_s26, %s13514_s8  ;;  %p13520_p5 = scmp.lt.s32.totalorder %s13514_s8, %s13514_s8 }
  0x1f   :  { %p13521_p6 = por %p13520_p5, %p13519_p4 }
  0x21   :  { %p13522_p7 = pnand %p13521_p6, %p13515_p3 }
  0x23   :  { %13525 = shalt.err (!%p13522_p7)
}
  0x24   :  { %s16415_s4 = smov 256   ;;  %s16417_s1 = smov 16  }
  0x25   :  { %70 = dma.hbm_to_vmem [thread:$0]  %s16473_s29, 8192, %s65_s26, [#allocation5], %s16415_s4, %s16415_s4, %s16417_s1  }
  0x26   :  { %s13526_s0 = scalar_lea.hbm %s16397_s12, 8192 }
  0x27   :  { %p13527_p8 = scmp.ne.s32.totalorder %s16397_s12, %s13526_s0  ;;  %p13530_p9 = scmp.lt.u32.totalorder %s13526_s0, %s16397_s12 }
  0x29   :  { %p13532_p10 = pnand %p13530_p9, %p13527_p8 }
  0x2b   :  { %13535 = shalt.err (!%p13532_p10)
}
  0x2c   :  { %s13536_s8 = scalar_lea.vmem %s13808_s28, 8192  ;;  %p13541_p12 = scmp.lt.s32.totalorder %s13808_s28, %s13808_s28 }
  0x2d   :  { %p13537_p11 = scmp.ne.s32.totalorder %s13808_s28, %s13536_s8  ;;  %p13542_p13 = scmp.lt.s32.totalorder %s13536_s8, %s13536_s8 }
  0x2f   :  { %p13543_p0 = por %p13542_p13, %p13541_p12 }
  0x31   :  { %p13544_p1 = pnand %p13543_p0, %p13537_p11 }
  0x33   :  { %13547 = shalt.err (!%p13544_p1)
}
  0x34   :  { %s16419_s26 = smov 64   ;;  %s13671_s29 = smov 4  }
  0x35   :  { %98 = dma.hbm_to_vmem [thread:$0]  %s16397_s12, 8192, %s13808_s28, [#allocation8], %s16419_s26, %s16419_s26, %s13671_s29  }
  0x36   :  { %s13672_s6 = smov [#allocation10]   ;;  %s13673_s0 = smov [#allocation2]  }
  0x37   :  { %s124_s2 = sshll.u32 %s13672_s6, 4  ;;  %s50_s7 = sshll.u32 %s13673_s0, 4  ;;  %s125_s2 = int_to_ptr.vmem [resolvable:$true] %s124_s2  ;;  %s13845_s7 = int_to_ptr.vmem [resolvable:$true] %s50_s7 }
  0x38   :  { %s13548_s25 = scalar_lea.hbm %s16403_s18, 2048 }
  0x39   :  { %p13549_p2 = scmp.ne.s32.totalorder %s16403_s18, %s13548_s25  ;;  %p13552_p3 = scmp.lt.u32.totalorder %s13548_s25, %s16403_s18 }
  0x3b   :  { %p13554_p4 = pnand %p13552_p3, %p13549_p2 }
  0x3d   :  { %13557 = shalt.err (!%p13554_p4)
}
  0x3e   :  { %s13558_s12 = scalar_lea.vmem %s125_s2, 2048  ;;  %p13563_p6 = scmp.lt.s32.totalorder %s125_s2, %s125_s2 }
  0x3f   :  { %p13559_p5 = scmp.ne.s32.totalorder %s125_s2, %s13558_s12  ;;  %p13564_p7 = scmp.lt.s32.totalorder %s13558_s12, %s13558_s12 }
  0x41   :  { %p13565_p8 = por %p13564_p7, %p13563_p6 }
  0x43   :  { %p13566_p9 = pnand %p13565_p8, %p13559_p5 }
  0x45   :  { %13569 = shalt.err (!%p13566_p9)
}
  0x46   :  { %130 = dma.hbm_to_vmem [thread:$0]  %s16403_s18, 2048, %s125_s2, [#allocation11], %s16419_s26, %s16419_s26, %s13671_s29  }
  0x47   :  { %s16474_s24 = sld [smem:[#allocation56_spill]] }
  0x4d   :  { %s13570_s1 = scalar_lea.hbm %s16474_s24, 8192 }
  0x4e   :  { %p13571_p10 = scmp.ne.s32.totalorder %s16474_s24, %s13570_s1  ;;  %p13574_p11 = scmp.lt.u32.totalorder %s13570_s1, %s16474_s24 }
  0x50   :  { %p13576_p12 = pnand %p13574_p11, %p13571_p10 }
  0x52   :  { %13579 = shalt.err (!%p13576_p12)
}
  0x53   :  { %s13580_s25 = scalar_lea.vmem %s13845_s7, 8192  ;;  %p13585_p0 = scmp.lt.s32.totalorder %s13845_s7, %s13845_s7 }
  0x54   :  { %p13581_p13 = scmp.ne.s32.totalorder %s13845_s7, %s13580_s25  ;;  %p13586_p1 = scmp.lt.s32.totalorder %s13580_s25, %s13580_s25 }
  0x56   :  { %p13587_p2 = por %p13586_p1, %p13585_p0 }
  0x58   :  { %p13588_p3 = pnand %p13587_p2, %p13581_p13 }
  0x5a   :  { %13591 = shalt.err (!%p13588_p3)
}
  0x5b   :  { %s16475_s18 = smov 16   ;;  %s16476_s2 = smov 256  }
  0x5c   :  { %56 = dma.hbm_to_vmem [thread:$0]  %s16474_s24, 8192, %s13845_s7, [#allocation3], %s16476_s2, %s16476_s2, %s16475_s18  }
  0x5d   :  { %s13674_s28 = smov [#allocation6]   ;;  %s13675_s4 = smov [#allocation9]  }
  0x5e   :  { %s78_s5 = sshll.u32 %s13674_s28, 4  ;;  %s110_s27 = sshll.u32 %s13675_s4, 4  ;;  %s79_s5 = int_to_ptr.vmem [resolvable:$true] %s78_s5  ;;  %s13882_s27 = int_to_ptr.vmem [resolvable:$true] %s110_s27 }
  0x5f   :  { %s13592_s0 = scalar_lea.hbm %s16395_s10, 8192 }
  0x60   :  { %p13593_p4 = scmp.ne.s32.totalorder %s16395_s10, %s13592_s0  ;;  %p13596_p5 = scmp.lt.u32.totalorder %s13592_s0, %s16395_s10 }
  0x62   :  { %p13598_p6 = pnand %p13596_p5, %p13593_p4 }
  0x64   :  { %13601 = shalt.err (!%p13598_p6)
}
  0x65   :  { %s13602_s7 = scalar_lea.vmem %s79_s5, 8192  ;;  %p13607_p8 = scmp.lt.s32.totalorder %s79_s5, %s79_s5 }
  0x66   :  { %p13603_p7 = scmp.ne.s32.totalorder %s79_s5, %s13602_s7  ;;  %p13608_p9 = scmp.lt.s32.totalorder %s13602_s7, %s13602_s7 }
  0x68   :  { %p13609_p10 = por %p13608_p9, %p13607_p8 }
  0x6a   :  { %p13610_p11 = pnand %p13609_p10, %p13603_p7 }
  0x6c   :  { %13613 = shalt.err (!%p13610_p11)
}
  0x6d   :  { %84 = dma.hbm_to_vmem [thread:$0]  %s16395_s10, 8192, %s79_s5, [#allocation5], %s16476_s2, %s16476_s2, %s16475_s18  }
  0x6e   :  { %s13614_s26 = scalar_lea.hbm %s16401_s16, 2048 }
  0x6f   :  { %p13615_p12 = scmp.ne.s32.totalorder %s16401_s16, %s13614_s26  ;;  %p13618_p13 = scmp.lt.u32.totalorder %s13614_s26, %s16401_s16 }
  0x71   :  { %p13620_p0 = pnand %p13618_p13, %p13615_p12 }
  0x73   :  { %13623 = shalt.err (!%p13620_p0)
}
  0x74   :  { %s13624_s30 = scalar_lea.vmem %s13882_s27, 2048  ;;  %p13629_p2 = scmp.lt.s32.totalorder %s13882_s27, %s13882_s27 }
  0x75   :  { %p13625_p1 = scmp.ne.s32.totalorder %s13882_s27, %s13624_s30  ;;  %p13630_p3 = scmp.lt.s32.totalorder %s13624_s30, %s13624_s30 }
  0x77   :  { %p13631_p4 = por %p13630_p3, %p13629_p2 }
  0x79   :  { %p13632_p5 = pnand %p13631_p4, %p13625_p1 }
  0x7b   :  { %13635 = shalt.err (!%p13632_p5)
}
  0x7c   :  { %s16477_s10 = smov 64   ;;  %s13676_s5 = smov [#allocation12]  }
  0x7d   :  { %116 = dma.hbm_to_vmem [thread:$0]  %s16401_s16, 2048, %s13882_s27, [#allocation8], %s16477_s10, %s16477_s10, %s13671_s29  }
  0x7e   :  { %s142_s3 = sshll.u32 %s13676_s5, 4  ;;  %s13636_s24 = scalar_lea.hbm %s16407_s22, 1024  ;;  %s143_s3 = int_to_ptr.vmem [resolvable:$true] %s142_s3 }
  0x7f   :  { %p13637_p6 = scmp.ne.s32.totalorder %s16407_s22, %s13636_s24  ;;  %p13640_p7 = scmp.lt.u32.totalorder %s13636_s24, %s16407_s22 }
  0x81   :  { %p13642_p8 = pnand %p13640_p7, %p13637_p6 }
  0x83   :  { %13645 = shalt.err (!%p13642_p8)
}
  0x84   :  { %s13646_s4 = scalar_lea.vmem %s143_s3, 1024  ;;  %p13651_p10 = scmp.lt.s32.totalorder %s143_s3, %s143_s3 }
  0x85   :  { %p13647_p9 = scmp.ne.s32.totalorder %s143_s3, %s13646_s4  ;;  %p13652_p11 = scmp.lt.s32.totalorder %s13646_s4, %s13646_s4 }
  0x87   :  { %p13653_p12 = por %p13652_p11, %p13651_p10 }
  0x89   :  { %p13654_p13 = pnand %p13653_p12, %p13647_p9 }
  0x8b   :  { %13657 = shalt.err (!%p13654_p13)
}
  0x8c   :  { %148 = dma.hbm_to_vmem [thread:$0]  %s16407_s22, 1024, %s143_s3, [#allocation11], %s16477_s10, %s16477_s10, %s13671_s29  }
  0x8d   :  { %13658 = dma.done.wait [#allocation3], 8192  }
  0x8e   :  { %13659 = vsyncadd [#allocation3], 4294959104 }
  0x8f   :  { %13660 = dma.done.wait [#allocation5], 16384  }
  0x90   :  { %13661 = vsyncadd [#allocation5], 4294950912 }
  0x91   :  { %13662 = dma.done.wait [#allocation8], 10240  }
  0x92   :  { %13663 = vsyncadd [#allocation8], 4294957056 }
  0x93   :  { %13664 = dma.done.wait [#allocation11], 3072  }
  0x94   :  { %13665 = vsyncadd [#allocation11], 4294964224  ;;  %v16421_v0 = vmov 0   ;;  %s16478_s0 = sld [smem:[#allocation50_spill]]  ;;  %s16479_s25 = sld [smem:[#allocation52_spill]]  ;;  %v179_v32 = vlaneseq  ;;  %v13679_v36 = vmov 1.0  }
  0x95   :  { %12832 = vset.pattern.permute.xlu0 %v16421_v0  ;;  %12833 = vset.pattern.permute.xlu1 %v16421_v0  ;;  %v16423_v23 = vmov 0.03125|0.03125   ;;  %v12836_v41 = vld [vmem:[#allocation2 + $0x4] ss:$16 sps:$4 sm:$0xff]   ;;  %v12839_v42 = vld [vmem:[#allocation2 + $0xc] ss:$16 sps:$4 sm:$0xff]  }
  0x96   :  { %12639 = vmatprep.subr.bf16.mxu1 %v16423_v23  ;;  %v180_v33 = vand.u32 127, %v179_v32  ;;  %s16480_s10 = sld [smem:[#allocation53_spill]]  ;;  %v12834_v48 = vld [vmem:[#allocation2] ss:$16 sps:$4 sm:$0xff]   ;;  %v12837_v51 = vld [vmem:[#allocation2 + $0x8] ss:$16 sps:$4 sm:$0xff]  }
  0x97   :  { %12640 = vmatpush3.bf16.msra.mxu1 %v16423_v23  ;;  %s16481_s3 = sld [smem:[#allocation54_spill]]  ;;  %s16482_s24 = sld [smem:[#allocation55_spill]]  ;;  %vm13681_vm6 = vmmov 0   ;;  %vm611_vm7 = vcmask 1043456   ;;  %vm609_vm8 = vcmask 1045504   ;;  %vm2916_vm9 = vcmask 64512  }
  0x98   :  { %12641 = vmatprep.subr.bf16.mxu1 %v16423_v23  ;;  %s16491_s4 = sld [smem:[#allocation57_spill]]  ;;  %s16501_s30 = sld [smem:[#allocation51_spill]]  ;;  %vm613_vm10 = vcmask 1041408   ;;  %vm10328_vm11 = vcmask 1041409   ;;  %vm10331_vm12 = vcmask 1042434   ;;  %vm10334_vm13 = vcmask 1043459  }
  0x99   :  { %vm10337_vm14 = vcmask 1044484   ;;  %vm10340_vm15 = vcmask 1045509   ;;  %s16583_s7 = sld [smem:[#allocation59_spill]] }
  0x9a   :  { %v173_v1 = vld [vmem:[%s16478_s0] sm:$0xff]  ;;  %v175_v2 = vld [vmem:[%s16478_s0 + $0x10] sm:$0xff]  ;;  %v174_v3 = vld [vmem:[%s16478_s0 + $0x8] sm:$0xff] }
  0x9b   :  { %182 = vperm.xlu0 %12832, %v173_v1   ;;  %188 = vperm.xlu1 %12833, %v175_v2   ;;  %v176_v4 = vld [vmem:[%s16478_s0 + $0x18] sm:$0xff]  ;;  %v217_v5 = vld [vmem:[%s16479_s25] sm:$0xff]  ;;  %v218_v6 = vld [vmem:[%s16479_s25 + $0x8] sm:$0xff] }
  0x9c   :  { %v219_v7 = vld [vmem:[%s16479_s25 + $0x10] sm:$0xff]  ;;  %v12607_v8 = vpack.c.bf16 %v218_v6, %v217_v5  ;;  %v220_v9 = vld [vmem:[%s16479_s25 + $0x18] sm:$0xff]  ;;  %v221_v11 = vld [vmem:[%s16479_s25 + $0x20] sm:$0xff]  ;;  %12642 = vmatpush3.bf16.msra.mxu1 %v16423_v23 }
  0x9d   :  { %v12611_v10 = vpack.c.bf16 %v220_v9, %v219_v7  ;;  %v222_v12 = vld [vmem:[%s16479_s25 + $0x28] sm:$0xff]  ;;  %v177_v13 = vld [vmem:[%s16478_s0 + $0x20] sm:$0xff]  ;;  %v223_v15 = vld [vmem:[%s16479_s25 + $0x30] sm:$0xff]  ;;  %12643 = vmatprep.subr.bf16.mxu1 %v16423_v23 }
  0x9e   :  { %v178_v14 = vld [vmem:[%s16478_s0 + $0x28] sm:$0xff]  ;;  %12608 = vmatprep.subr.bf16.mxu0 %v12607_v8  ;;  %v224_v16 = vld [vmem:[%s16479_s25 + $0x38] sm:$0xff]  ;;  %v12615_v17 = vpack.c.bf16 %v222_v12, %v221_v11  ;;  %v225_v18 = vld [vmem:[%s16479_s25 + $0x40] sm:$0xff] }
  0x9f   :  { %185 = vperm.xlu0 %12832, %v174_v3   ;;  %191 = vperm.xlu1 %12833, %v176_v4   ;;  %v226_v19 = vld [vmem:[%s16479_s25 + $0x48] sm:$0xff]  ;;  %v12619_v20 = vpack.c.bf16 %v224_v16, %v223_v15  ;;  %v227_v21 = vld [vmem:[%s16479_s25 + $0x50] sm:$0xff]  ;;  %v228_v22 = vld [vmem:[%s16479_s25 + $0x58] sm:$0xff] }
  0xa0   :  { %12610 = vmatpush3.bf16.msra.mxu0 %v12607_v8  ;;  %v12623_v24 = vpack.c.bf16 %v226_v19, %v225_v18  ;;  %v229_v25 = vld [vmem:[%s16479_s25 + $0x60] sm:$0xff]  ;;  %v230_v26 = vld [vmem:[%s16479_s25 + $0x68] sm:$0xff]  ;;  %v12627_v27 = vpack.c.bf16 %v228_v22, %v227_v21  ;;  %v231_v28 = vld [vmem:[%s16479_s25 + $0x70] sm:$0xff]  ;;  %12644 = vmatpush3.bf16.msra.mxu1 %v16423_v23 }
  0xa1   :  { %12612 = vmatprep.subr.bf16.mxu0 %v12611_v10  ;;  %v232_v29 = vld [vmem:[%s16479_s25 + $0x78] sm:$0xff]  ;;  %v12631_v30 = vpack.c.bf16 %v230_v26, %v229_v25  ;;  %12645 = vmatprep.subr.bf16.mxu1 %v16423_v23  ;;  %v328_v43 = vld [vmem:[%s16480_s10] sm:$0xff] }
  0xa2   :  { %v12635_v31 = vpack.c.bf16 %v232_v29, %v231_v28  ;;  %v12842_v1 = vld [vmem:[#allocation2 + $0x24] ss:$16 sps:$4 sm:$0xff]   ;;  %v12845_v2 = vld [vmem:[#allocation2 + $0x2c] ss:$16 sps:$4 sm:$0xff]   ;;  %v12840_v3 = vld [vmem:[#allocation2 + $0x20] ss:$16 sps:$4 sm:$0xff]  }
  0xa3   :  { %194 = vperm.xlu0 %12832, %v177_v13   ;;  %197 = vperm.xlu1 %12833, %v178_v14   ;;  %v12843_v4 = vld [vmem:[#allocation2 + $0x28] ss:$16 sps:$4 sm:$0xff]   ;;  %v12848_v5 = vld [vmem:[#allocation2 + $0x44] ss:$16 sps:$4 sm:$0xff]   ;;  %v12851_v6 = vld [vmem:[#allocation2 + $0x4c] ss:$16 sps:$4 sm:$0xff]  }
  0xa4   :  { %12614 = vmatpush3.bf16.msra.mxu0 %v12611_v10  ;;  %12646 = vmatpush3.bf16.msra.mxu1 %v16423_v23  ;;  %v12846_v7 = vld [vmem:[#allocation2 + $0x40] ss:$16 sps:$4 sm:$0xff]   ;;  %v12849_v8 = vld [vmem:[#allocation2 + $0x48] ss:$16 sps:$4 sm:$0xff]   ;;  %v12854_v9 = vld [vmem:[#allocation2 + $0x64] ss:$16 sps:$4 sm:$0xff]  }
  0xa5   :  { %12616 = vmatprep.subr.bf16.mxu0 %v12615_v17  ;;  %12647 = vmatprep.subr.bf16.mxu1 %v16423_v23  ;;  %v12857_v10 = vld [vmem:[#allocation2 + $0x6c] ss:$16 sps:$4 sm:$0xff]   ;;  %v12852_v11 = vld [vmem:[#allocation2 + $0x60] ss:$16 sps:$4 sm:$0xff]   ;;  %v12855_v12 = vld [vmem:[#allocation2 + $0x68] ss:$16 sps:$4 sm:$0xff]  }
  0xa6   :  { %v12860_v13 = vld [vmem:[#allocation2 + $0x84] ss:$16 sps:$4 sm:$0xff]   ;;  %v12863_v14 = vld [vmem:[#allocation2 + $0x8c] ss:$16 sps:$4 sm:$0xff]   ;;  %v12858_v15 = vld [vmem:[#allocation2 + $0x80] ss:$16 sps:$4 sm:$0xff]  }
  0xa7   :  { %v12861_v16 = vld [vmem:[#allocation2 + $0x88] ss:$16 sps:$4 sm:$0xff]   ;;  %v12869_v18 = vld [vmem:[#allocation2 + $0xac] ss:$16 sps:$4 sm:$0xff]   ;;  %v12864_v19 = vld [vmem:[#allocation2 + $0xa0] ss:$16 sps:$4 sm:$0xff]  }
  0xa8   :  { %12618 = vmatpush3.bf16.msra.mxu0 %v12615_v17  ;;  %12648 = vmatpush3.bf16.msra.mxu1 %v16423_v23  ;;  %v12866_v17 = vld [vmem:[#allocation2 + $0xa4] ss:$16 sps:$4 sm:$0xff]   ;;  %v12875_v22 = vld [vmem:[#allocation2 + $0xcc] ss:$16 sps:$4 sm:$0xff]   ;;  %v12873_v25 = vld [vmem:[#allocation2 + $0xc8] ss:$16 sps:$4 sm:$0xff]  }
  0xa9   :  { %12620 = vmatprep.subr.bf16.mxu0 %v12619_v20  ;;  %12649 = vmatprep.subr.bf16.mxu1 %v16423_v23  ;;  %v12872_v21 = vld [vmem:[#allocation2 + $0xc4] ss:$16 sps:$4 sm:$0xff]   ;;  %v12876_v28 = vld [vmem:[#allocation2 + $0xe0] ss:$16 sps:$4 sm:$0xff]   ;;  %v12879_v29 = vld [vmem:[#allocation2 + $0xe8] ss:$16 sps:$4 sm:$0xff]  }
  0xaa   :  { %v12878_v26 = vld [vmem:[#allocation2 + $0xe4] ss:$16 sps:$4 sm:$0xff]  }
  0xac   :  { %12622 = vmatpush3.bf16.msra.mxu0 %v12619_v20  ;;  %12650 = vmatpush3.bf16.msra.mxu1 %v16423_v23  ;;  %v12867_v20 = vld [vmem:[#allocation2 + $0xa8] ss:$16 sps:$4 sm:$0xff]  }
  0xad   :  { %12624 = vmatprep.subr.bf16.mxu0 %v12623_v24  ;;  %12651 = vmatprep.subr.bf16.mxu1 %v16423_v23 }
  0xb0   :  { %12626 = vmatpush3.bf16.msra.mxu0 %v12623_v24  ;;  %12652 = vmatpush3.bf16.msra.mxu1 %v16423_v23  ;;  %v12870_v24 = vld [vmem:[#allocation2 + $0xc0] ss:$16 sps:$4 sm:$0xff]  }
  0xb1   :  { %12628 = vmatprep.subr.bf16.mxu0 %v12627_v27  ;;  %12653 = vmatprep.subr.bf16.mxu1 %v16423_v23 }
  0xb4   :  { %12630 = vmatpush3.bf16.msra.mxu0 %v12627_v27  ;;  %12654 = vmatpush3.bf16.msra.mxu1 %v16423_v23  ;;  %v12881_v27 = vld [vmem:[#allocation2 + $0xec] ss:$16 sps:$4 sm:$0xff]  }
  0xb5   :  { %12632 = vmatprep.subr.bf16.mxu0 %v12631_v30  ;;  %982 = vmatprep.subr.bf16.mxu1 %v12836_v41 }
  0xb8   :  { %12634 = vmatpush3.bf16.msra.mxu0 %v12631_v30  ;;  %v12884_v30 = vld [vmem:[#allocation4 + $0x4] ss:$16 sps:$4 sm:$0xff]  }
  0xb9   :  { %12636 = vmatprep.subr.bf16.mxu0 %v12635_v31 }
  0xbc   :  { %12638 = vmatpush3.bf16.msra.mxu0 %v12635_v31  ;;  %v12887_v31 = vld [vmem:[#allocation4 + $0xc] ss:$16 sps:$4 sm:$0xff]  }
  0xbd   :  { %12655 = vmatprep.subr.bf16.mxu0 %v16423_v23 }
 0x11a   :  { %v183_v34 = vpop.permute.xlu0 %182  ;;  %v189_v35 = vpop.permute.xlu1 %188 }
 0x11b   :  { %vm199_vm0 = vcmp.eq.s32.totalorder %v180_v33, %v183_v34  ;;  %vm201_vm1 = vcmp.eq.s32.totalorder %v180_v33, %v189_v35 }
 0x11c   :  { %11480 = vmatprep.mubr.msk.f32.mxu0 %vm199_vm0, %v13679_v36 }
 0x11e   :  { %v186_v37 = vpop.permute.xlu0 %185  ;;  %v192_v38 = vpop.permute.xlu1 %191 }
 0x11f   :  { %vm200_vm2 = vcmp.eq.s32.totalorder %v180_v33, %v186_v37  ;;  %vm202_vm3 = vcmp.eq.s32.totalorder %v180_v33, %v192_v38 }
 0x120   :  { %11481 = vmatmul.mubr.msk.f32.vlgmr.msra.gmra.mrb[0].mxu0 %vm200_vm2, %v13679_v36 }
 0x121   :  { %11483 = vmatprep.mubr.msk.f32.mxu0 %vm201_vm1, %v13679_v36  ;;  %12656 = vmatpush3.bf16.msra.mxu0 %v16423_v23 }
 0x122   :  { %v195_v39 = vpop.permute.xlu0 %194  ;;  %v198_v40 = vpop.permute.xlu1 %197  ;;  %12657 = vmatprep.subr.bf16.mxu0 %v16423_v23 }
 0x123   :  { %vm203_vm4 = vcmp.eq.s32.totalorder %v180_v33, %v195_v39  ;;  %vm204_vm5 = vcmp.eq.s32.totalorder %v180_v33, %v198_v40 }
 0x124   :  { %11484 = vmatmul.mubr.msk.f32.gmra.mrb[2].mxu0 %vm202_vm3, %v13679_v36 }
 0x125   :  { %11486 = vmatprep.mubr.msk.f32.mxu0 %vm203_vm4, %v13679_v36  ;;  %12658 = vmatpush3.bf16.msra.mxu0 %v16423_v23 }
 0x126   :  { %12659 = vmatprep.subr.bf16.mxu0 %v16423_v23 }
 0x128   :  { %11487 = vmatmul.mubr.msk.f32.gmra.mrb[4].mxu0 %vm204_vm5, %v13679_v36 }
 0x129   :  { %12660 = vmatpush3.bf16.msra.mxu0 %v16423_v23 }
 0x12a   :  { %12661 = vmatprep.subr.bf16.mxu0 %v16423_v23 }
 0x12d   :  { %12662 = vmatpush3.bf16.msra.mxu0 %v16423_v23 }
 0x12e   :  { %12663 = vmatprep.subr.bf16.mxu0 %v16423_v23 }
 0x131   :  { %12664 = vmatpush3.bf16.msra.mxu0 %v16423_v23 }
 0x132   :  { %12665 = vmatprep.subr.bf16.mxu0 %v16423_v23 }
 0x135   :  { %12666 = vmatpush3.bf16.msra.mxu0 %v16423_v23 }
 0x136   :  { %12667 = vmatprep.subr.bf16.mxu0 %v16423_v23 }
 0x139   :  { %12668 = vmatpush3.bf16.msra.mxu0 %v16423_v23 }
 0x13a   :  { %12669 = vmatprep.subr.bf16.mxu0 %v16423_v23 }
 0x13d   :  { %12670 = vmatpush3.bf16.msra.mxu0 %v16423_v23 }
 0x13e   :  { %1045 = vmatprep.subr.bf16.mxu0 %v12839_v42 }
 0x1f3   :  { %v11482_v44 = vpop.f32.mrb[0].mxu0 }
 0x1f4   :  { %v14038_v45 = vadd.f32 %v11482_v44, %v328_v43  ;;  %v299_v46 = vpop.f32.mrb[1].mxu0 }
 0x1f5   :  { %v14040_v47 = vadd.f32 %v328_v43, %v299_v46 }
 0x1f6   :  { %v433_v52 = vmul.f32 %v14038_v45, %v14038_v45 }
 0x1f7   :  { %v11485_v49 = vpop.f32.mrb[2].mxu0  ;;  %11521 = vmatprep.mubr.f32.mxu1 %v14040_v47  ;;  %v432_v50 = vmul.f32 %v14040_v47, %v14040_v47 }
 0x1f8   :  { %v14047_v53 = vadd.f32 %v11485_v49, %v328_v43  ;;  %v309_v54 = vpop.f32.mrb[3].mxu0  ;;  %11522 = vmatmul.mubr.f32.vlgmr.msra.gmra.mrb[0].mxu1 %v14038_v45 }
 0x1f9   :  { %v14050_v55 = vadd.f32 %v328_v43, %v309_v54  ;;  %11562 = vmatprep.mubr.f32.mxu0 %v432_v50  ;;  %983 = vmatpush1.bf16.msra.mxu1 %v12834_v48 }
 0x1fa   :  { %11563 = vmatmul.mubr.f32.vlgmr.msra.gmra.mrb[6].mxu0 %v433_v52  ;;  %v435_v56 = vmul.f32 %v14047_v53, %v14047_v53  ;;  %984 = vmatprep.subr.bf16.mxu1 %v12842_v1 }
 0x1fb   :  { %v11488_v57 = vpop.f32.mrb[4].mxu0  ;;  %11524 = vmatprep.mubr.f32.mxu1 %v14050_v55  ;;  %v434_v58 = vmul.f32 %v14050_v55, %v14050_v55  ;;  %1046 = vmatpush1.bf16.msra.mxu0 %v12837_v51 }
 0x1fc   :  { %v14057_v59 = vadd.f32 %v11488_v57, %v328_v43  ;;  %v319_v60 = vpop.f32.mrb[5].mxu0  ;;  %11525 = vmatmul.mubr.f32.gmra.mrb[2].mxu1 %v14047_v53  ;;  %1047 = vmatprep.subr.bf16.mxu0 %v12845_v2 }
 0x1fd   :  { %v14060_v61 = vadd.f32 %v328_v43, %v319_v60  ;;  %11565 = vmatprep.mubr.f32.mxu0 %v434_v58  ;;  %985 = vmatpush1.bf16.msra.mxu1 %v12840_v3 }
 0x1fe   :  { %11566 = vmatmul.mubr.f32.gmra.mrb[8].mxu0 %v435_v56  ;;  %v437_v62 = vmul.f32 %v14057_v59, %v14057_v59  ;;  %986 = vmatprep.subr.bf16.mxu1 %v12848_v5 }
 0x1ff   :  { %11527 = vmatprep.mubr.f32.mxu1 %v14060_v61  ;;  %v436_v63 = vmul.f32 %v14060_v61, %v14060_v61  ;;  %1048 = vmatpush1.bf16.msra.mxu0 %v12843_v4 }
 0x200   :  { %11528 = vmatmul.mubr.f32.gmra.mrb[4].mxu1 %v14057_v59  ;;  %1049 = vmatprep.subr.bf16.mxu0 %v12851_v6 }
 0x201   :  { %11568 = vmatprep.mubr.f32.mxu0 %v436_v63  ;;  %1014 = vmatprep.mubr.bf16.mxu1 %v16421_v0 }
 0x202   :  { %11569 = vmatmul.mubr.f32.gmra.mrb[10].mxu0 %v437_v62  ;;  %987 = vmatpush1.bf16.msra.mxu1 %v12846_v7 }
 0x203   :  { %1077 = vmatprep.mubr.bf16.mxu0 %v16421_v0  ;;  %1050 = vmatpush1.bf16.msra.mxu0 %v12849_v8 }
 0x204   :  { %988 = vmatprep.subr.bf16.mxu1 %v12854_v9  ;;  %1051 = vmatprep.subr.bf16.mxu0 %v12857_v10 }
 0x206   :  { %989 = vmatpush1.bf16.msra.mxu1 %v12852_v11 }
 0x207   :  { %1052 = vmatpush1.bf16.msra.mxu0 %v12855_v12  ;;  %990 = vmatprep.subr.bf16.mxu1 %v12860_v13 }
 0x208   :  { %1053 = vmatprep.subr.bf16.mxu0 %v12863_v14 }
 0x20a   :  { %991 = vmatpush1.bf16.msra.mxu1 %v12858_v15  ;;  %v10454_v15 = vld [vmem:[%s16481_s3] ss:$0 sm:$0xff] }
 0x20b   :  { %1054 = vmatpush1.bf16.msra.mxu0 %v12861_v16  ;;  %992 = vmatprep.subr.bf16.mxu1 %v12866_v17 }
 0x20c   :  { %1055 = vmatprep.subr.bf16.mxu0 %v12869_v18 }
 0x20e   :  { %993 = vmatpush1.bf16.msra.mxu1 %v12864_v19  ;;  %v10455_v19 = vld [vmem:[%s16482_s24] ss:$0 sm:$0xff] }
 0x20f   :  { %1056 = vmatpush1.bf16.msra.mxu0 %v12867_v20  ;;  %994 = vmatprep.subr.bf16.mxu1 %v12872_v21 }
 0x210   :  { %1057 = vmatprep.subr.bf16.mxu0 %v12875_v22 }
 0x212   :  { %995 = vmatpush1.bf16.msra.mxu1 %v12870_v24 }
 0x213   :  { %1058 = vmatpush1.bf16.msra.mxu0 %v12873_v25  ;;  %996 = vmatprep.subr.bf16.mxu1 %v12878_v26 }
 0x214   :  { %1059 = vmatprep.subr.bf16.mxu0 %v12881_v27 }
 0x216   :  { %997 = vmatpush1.bf16.msra.mxu1 %v12876_v28 }
 0x217   :  { %1060 = vmatpush1.bf16.msra.mxu0 %v12879_v29  ;;  %1322 = vmatprep.subr.bf16.mxu1 %v12884_v30  ;;  %v12882_v30 = vld [vmem:[#allocation4] ss:$16 sps:$4 sm:$0xff]  }
 0x218   :  { %1385 = vmatprep.subr.bf16.mxu0 %v12887_v31  ;;  %v12885_v31 = vld [vmem:[#allocation4 + $0x8] ss:$16 sps:$4 sm:$0xff]  }
 0x2cb   :  { %v11523_v33 = vpop.f32.mrb[0].mxu1 }
 0x2cc   :  { %v403_v34 = vpop.f32.mrb[1].mxu1  ;;  %v534_v35 = vmul.f32 %v11523_v33, %v11523_v33  ;;  %v552_v12 = vsub.f32 %v14038_v45, %v11523_v33 }
 0x2cd   :  { %v11564_v36 = vpop.f32.mrb[6].mxu0  ;;  %v533_v37 = vmul.f32 %v403_v34, %v403_v34  ;;  %v551_v14 = vsub.f32 %v14040_v47, %v403_v34 }
 0x2ce   :  { %v540_v38 = vsub.f32 %v11564_v36, %v534_v35  ;;  %v504_v39 = vpop.f32.mrb[7].mxu0 }
 0x2cf   :  { %v539_v40 = vsub.f32 %v504_v39, %v533_v37  ;;  %v11526_v41 = vpop.f32.mrb[2].mxu1  ;;  %v12893_v37 = vld [vmem:[#allocation4 + $0x2c] ss:$16 sps:$4 sm:$0xff]  }
 0x2d0   :  { %v546_v42 = vmax.f32 %v540_v38, 0.0  ;;  %v413_v43 = vpop.f32.mrb[3].mxu1  ;;  %v536_v44 = vmul.f32 %v11526_v41, %v11526_v41  ;;  %v554_v21 = vsub.f32 %v14047_v53, %v11526_v41  ;;  %v12891_v41 = vld [vmem:[#allocation4 + $0x28] ss:$16 sps:$4 sm:$0xff]  }
 0x2d1   :  { %v545_v46 = vmax.f32 %v539_v40, 0.0  ;;  %v11567_v48 = vpop.f32.mrb[8].mxu0  ;;  %v535_v49 = vmul.f32 %v413_v43, %v413_v43  ;;  %v553_v24 = vsub.f32 %v14050_v55, %v413_v43  ;;  %v12890_v55 = vld [vmem:[#allocation4 + $0x24] ss:$16 sps:$4 sm:$0xff]  }
 0x2d2   :  { %v558_v50 = vadd.f32 1e-12, %v546_v42  ;;  %v542_v51 = vsub.f32 %v11567_v48, %v536_v44  ;;  %v514_v52 = vpop.f32.mrb[9].mxu0  ;;  %v12899_v42 = vld [vmem:[#allocation4 + $0x4c] ss:$16 sps:$4 sm:$0xff]  }
 0x2d3   :  { %v557_v54 = vadd.f32 1e-12, %v545_v46  ;;  %v541_v56 = vsub.f32 %v514_v52, %v535_v49  ;;  %v11529_v57 = vpop.f32.mrb[4].mxu1  ;;  %v12894_v46 = vld [vmem:[#allocation4 + $0x40] ss:$16 sps:$4 sm:$0xff]  }
 0x2d4   :  { %13226 = vrsqrt.f32 %v558_v50  ;;  %v548_v58 = vmax.f32 %v542_v51, 0.0  ;;  %v423_v60 = vpop.f32.mrb[5].mxu1  ;;  %v538_v62 = vmul.f32 %v11529_v57, %v11529_v57  ;;  %v556_v29 = vsub.f32 %v14057_v59, %v11529_v57  ;;  %v12888_v59 = vld [vmem:[#allocation4 + $0x20] ss:$16 sps:$4 sm:$0xff]   ;;  %v12897_v48 = vld [vmem:[#allocation4 + $0x48] ss:$16 sps:$4 sm:$0xff]  }
 0x2d5   :  { %13228 = vrsqrt.f32 %v557_v54  ;;  %v547_v63 = vmax.f32 %v541_v56, 0.0  ;;  %v11570_v1 = vpop.f32.mrb[10].mxu0  ;;  %v537_v2 = vmul.f32 %v423_v60, %v423_v60  ;;  %v555_v53 = vsub.f32 %v14060_v61, %v423_v60  ;;  %v12896_v61 = vld [vmem:[#allocation4 + $0x44] ss:$16 sps:$4 sm:$0xff]   ;;  %v12905_v54 = vld [vmem:[#allocation4 + $0x6c] ss:$16 sps:$4 sm:$0xff]  }
 0x2d6   :  { %v560_v3 = vadd.f32 1e-12, %v548_v58  ;;  %v544_v4 = vsub.f32 %v11570_v1, %v538_v62  ;;  %v524_v5 = vpop.f32.mrb[11].mxu0  ;;  %v12902_v52 = vld [vmem:[#allocation4 + $0x64] ss:$16 sps:$4 sm:$0xff]  }
 0x2d7   :  { %v559_v6 = vadd.f32 1e-12, %v547_v63  ;;  %v543_v7 = vsub.f32 %v524_v5, %v537_v2  ;;  %v12900_v56 = vld [vmem:[#allocation4 + $0x60] ss:$16 sps:$4 sm:$0xff]   ;;  %v12903_v57 = vld [vmem:[#allocation4 + $0x68] ss:$16 sps:$4 sm:$0xff]  }
 0x2d8   :  { %13230 = vrsqrt.f32 %v560_v3  ;;  %v550_v8 = vmax.f32 %v544_v4, 0.0  ;;  %v12908_v58 = vld [vmem:[#allocation4 + $0x84] ss:$16 sps:$4 sm:$0xff]   ;;  %v12911_v60 = vld [vmem:[#allocation4 + $0x8c] ss:$16 sps:$4 sm:$0xff]  }
 0x2d9   :  { %13232 = vrsqrt.f32 %v559_v6  ;;  %v549_v9 = vmax.f32 %v543_v7, 0.0  ;;  %v12906_v1 = vld [vmem:[#allocation4 + $0x80] ss:$16 sps:$4 sm:$0xff]   ;;  %v12909_v2 = vld [vmem:[#allocation4 + $0x88] ss:$16 sps:$4 sm:$0xff]  }
 0x2da   :  { %v562_v10 = vadd.f32 1e-12, %v550_v8  ;;  %v12914_v4 = vld [vmem:[#allocation4 + $0xa4] ss:$16 sps:$4 sm:$0xff]   ;;  %v12917_v5 = vld [vmem:[#allocation4 + $0xac] ss:$16 sps:$4 sm:$0xff]  }
 0x2db   :  { %v561_v11 = vadd.f32 1e-12, %v549_v9  ;;  %v12912_v6 = vld [vmem:[#allocation4 + $0xa0] ss:$16 sps:$4 sm:$0xff]   ;;  %v12915_v7 = vld [vmem:[#allocation4 + $0xa8] ss:$16 sps:$4 sm:$0xff]  }
 0x2dc   :  { %13234 = vrsqrt.f32 %v562_v10  ;;  %v12920_v8 = vld [vmem:[#allocation4 + $0xc4] ss:$16 sps:$4 sm:$0xff]   ;;  %v12923_v9 = vld [vmem:[#allocation4 + $0xcc] ss:$16 sps:$4 sm:$0xff]   ;;  %v12918_v10 = vld [vmem:[#allocation4 + $0xc0] ss:$16 sps:$4 sm:$0xff]  }
 0x2dd   :  { %13236 = vrsqrt.f32 %v561_v11  ;;  %v12921_v11 = vld [vmem:[#allocation4 + $0xc8] ss:$16 sps:$4 sm:$0xff]  }
 0x2de   :  { %v13227_v13 = vpop.eup %13226 }
 0x2df   :  { %v13229_v16 = vpop.eup %13228  ;;  %v570_v17 = vmul.f32 %v13227_v13, %v552_v12  ;;  %v12926_v12 = vld [vmem:[#allocation4 + $0xe4] ss:$16 sps:$4 sm:$0xff]   ;;  %v12929_v13 = vld [vmem:[#allocation4 + $0xec] ss:$16 sps:$4 sm:$0xff]  }
 0x2e0   :  { %v569_v18 = vmul.f32 %v13229_v16, %v551_v14  ;;  %v12924_v14 = vld [vmem:[#allocation4 + $0xe0] ss:$16 sps:$4 sm:$0xff]   ;;  %v12932_v16 = vld [vmem:[#allocation6 + $0x4] ss:$16 sps:$4 sm:$0xff]  }
 0x2e1   :  { %v582_v20 = vmul.f32 %v10454_v15, %v570_v17  ;;  %v14118_v17 = vld [vmem:[#allocation6 + $0xc] ss:$16 sps:$4 sm:$0xff]  }
 0x2e2   :  { %v13231_v22 = vpop.eup %13230  ;;  %v581_v45 = vmul.f32 %v10454_v15, %v569_v18  ;;  %v12930_v18 = vld [vmem:[#allocation6] ss:$16 sps:$4 sm:$0xff]  }
 0x2e3   :  { %v13233_v25 = vpop.eup %13232  ;;  %v572_v47 = vmul.f32 %v13231_v22, %v554_v21  ;;  %v14080_v26 = vadd.f32 %v10455_v19, %v582_v20  ;;  %v12938_v20 = vld [vmem:[#allocation6 + $0x24] ss:$16 sps:$4 sm:$0xff]   ;;  %v14123_v21 = vld [vmem:[#allocation6 + $0x2c] ss:$16 sps:$4 sm:$0xff]   ;;  %v12936_v22 = vld [vmem:[#allocation6 + $0x20] ss:$16 sps:$4 sm:$0xff]  }
 0x2e4   :  { %v571_v27 = vmul.f32 %v13233_v25, %v553_v24  ;;  %v14082_v28 = vadd.f32 %v10455_v19, %v581_v45  ;;  %v14128_v45 = vld [vmem:[#allocation6 + $0x28] ss:$16 sps:$4 sm:$0xff]   ;;  %v12944_v24 = vld [vmem:[#allocation6 + $0x44] ss:$16 sps:$4 sm:$0xff]   ;;  %v14131_v25 = vld [vmem:[#allocation6 + $0x4c] ss:$16 sps:$4 sm:$0xff]  }
 0x2e5   :  { %16483 = vst [vmem:[#allocation17_spill] sm:$0xff] %v14080_v26  ;;  %v584_v34 = vmul.f32 %v10454_v15, %v572_v47  ;;  %v12942_v47 = vld [vmem:[#allocation6 + $0x40] ss:$16 sps:$4 sm:$0xff]  }
 0x2e6   :  { %16484 = vst [vmem:[#allocation18_spill] sm:$0xff] %v14082_v28  ;;  %v13235_v33 = vpop.eup %13234  ;;  %v583_v35 = vmul.f32 %v10454_v15, %v571_v27  ;;  %v14088_v36 = vpack.c.bf16 %v14080_v26, %v14082_v28  ;;  %v14136_v27 = vld [vmem:[#allocation6 + $0x48] ss:$16 sps:$4 sm:$0xff]  }
 0x2e7   :  { %v13237_v38 = vpop.eup %13236  ;;  %v574_v39 = vmul.f32 %v13235_v33, %v556_v29  ;;  %v14094_v44 = vadd.f32 %v10455_v19, %v584_v34  ;;  %v12950_v29 = vld [vmem:[#allocation6 + $0x64] ss:$16 sps:$4 sm:$0xff]   ;;  %v12951_v33 = vld [vmem:[#allocation6 + $0x68] ss:$16 sps:$4 sm:$0xff]  }
 0x2e8   :  { %v573_v40 = vmul.f32 %v13237_v38, %v555_v53  ;;  %1015 = vmatmul.mubr.bf16.vlgmr.msra.gmra.mrb[8].mxu1 %v14088_v36  ;;  %1078 = vmatmul.mubr.bf16.vlgmr.msra.gmra.mrb[12].mxu0 %v14088_v36  ;;  %v14092_v43 = vadd.f32 %v10455_v19, %v583_v35  ;;  %v12956_v34 = vld [vmem:[#allocation6 + $0x84] ss:$16 sps:$4 sm:$0xff]   ;;  %v12959_v35 = vld [vmem:[#allocation6 + $0x8c] ss:$16 sps:$4 sm:$0xff]   ;;  %v12954_v53 = vld [vmem:[#allocation6 + $0x80] ss:$16 sps:$4 sm:$0xff]  }
 0x2e9   :  { %1323 = vmatpush1.bf16.msra.mxu1 %v12882_v30  ;;  %1386 = vmatpush1.bf16.msra.mxu0 %v12885_v31  ;;  %16486 = vst [vmem:[#allocation20_spill] sm:$0xff] %v14094_v44  ;;  %v586_v49 = vmul.f32 %v10454_v15, %v574_v39  ;;  %v12953_v30 = vld [vmem:[#allocation6 + $0x6c] ss:$16 sps:$4 sm:$0xff]   ;;  %v12948_v31 = vld [vmem:[#allocation6 + $0x60] ss:$16 sps:$4 sm:$0xff]  }
 0x2ea   :  { %1324 = vmatprep.subr.bf16.mxu1 %v12890_v55  ;;  %1387 = vmatprep.subr.bf16.mxu0 %v12893_v37  ;;  %16485 = vst [vmem:[#allocation19_spill] sm:$0xff] %v14092_v43  ;;  %v585_v50 = vmul.f32 %v10454_v15, %v573_v40  ;;  %v14100_v51 = vpack.c.bf16 %v14094_v44, %v14092_v43  ;;  %v12927_v15 = vld [vmem:[#allocation4 + $0xe8] ss:$16 sps:$4 sm:$0xff]   ;;  %v12962_v37 = vld [vmem:[#allocation6 + $0xa4] ss:$16 sps:$4 sm:$0xff]  }
 0x2eb   :  { %1024 = vmatprep.mubr.bf16.mxu1 %v16421_v0  ;;  %1087 = vmatprep.mubr.bf16.mxu0 %v16421_v0  ;;  %v14106_v63 = vadd.f32 %v10455_v19, %v586_v49  ;;  %v12957_v55 = vld [vmem:[#allocation6 + $0x88] ss:$16 sps:$4 sm:$0xff]   ;;  %v12965_v38 = vld [vmem:[#allocation6 + $0xac] ss:$16 sps:$4 sm:$0xff]   ;;  %v12960_v39 = vld [vmem:[#allocation6 + $0xa0] ss:$16 sps:$4 sm:$0xff]  }
 0x2ec   :  { %v14104_v62 = vadd.f32 %v10455_v19, %v585_v50  ;;  %v14120_v19 = vld [vmem:[#allocation6 + $0x8] ss:$16 sps:$4 sm:$0xff]   ;;  %v12972_v49 = vld [vmem:[#allocation6 + $0xe0] ss:$16 sps:$4 sm:$0xff]  }
 0x2ed   :  { %1325 = vmatpush1.bf16.msra.mxu1 %v12888_v59  ;;  %1388 = vmatpush1.bf16.msra.mxu0 %v12891_v41  ;;  %16488 = vst [vmem:[#allocation22_spill] sm:$0xff] %v14106_v63  ;;  %v12963_v40 = vld [vmem:[#allocation6 + $0xa8] ss:$16 sps:$4 sm:$0xff]   ;;  %v12968_v59 = vld [vmem:[#allocation6 + $0xc4] ss:$16 sps:$4 sm:$0xff]  }
 0x2ee   :  { %1326 = vmatprep.subr.bf16.mxu1 %v12896_v61  ;;  %1389 = vmatprep.subr.bf16.mxu0 %v12899_v42  ;;  %16487 = vst [vmem:[#allocation21_spill] sm:$0xff] %v14104_v62  ;;  %v14112_v3 = vpack.c.bf16 %v14106_v63, %v14104_v62  ;;  %v12971_v41 = vld [vmem:[#allocation6 + $0xcc] ss:$16 sps:$4 sm:$0xff]   ;;  %v12966_v61 = vld [vmem:[#allocation6 + $0xc0] ss:$16 sps:$4 sm:$0xff]  }
 0x2ef   :  { %v12969_v42 = vld [vmem:[#allocation6 + $0xc8] ss:$16 sps:$4 sm:$0xff]  }
 0x2f0   :  { %1025 = vmatmul.mubr.bf16.gmra.mrb[12].mxu1 %v14100_v51  ;;  %1088 = vmatmul.mubr.bf16.gmra.mrb[16].mxu0 %v14100_v51  ;;  %v12975_v50 = vld [vmem:[#allocation6 + $0xe8] ss:$16 sps:$4 sm:$0xff]  }
 0x2f1   :  { %1327 = vmatpush1.bf16.msra.mxu1 %v12894_v46  ;;  %1390 = vmatpush1.bf16.msra.mxu0 %v12897_v48  ;;  %v12974_v46 = vld [vmem:[#allocation6 + $0xe4] ss:$16 sps:$4 sm:$0xff]   ;;  %v12977_v48 = vld [vmem:[#allocation6 + $0xec] ss:$16 sps:$4 sm:$0xff]  }
 0x2f2   :  { %1328 = vmatprep.subr.bf16.mxu1 %v12902_v52  ;;  %1391 = vmatprep.subr.bf16.mxu0 %v12905_v54 }
 0x2f3   :  { %1034 = vmatprep.mubr.bf16.mxu1 %v16421_v0  ;;  %1097 = vmatprep.mubr.bf16.mxu0 %v16421_v0 }
 0x2f5   :  { %1329 = vmatpush1.bf16.msra.mxu1 %v12900_v56  ;;  %1392 = vmatpush1.bf16.msra.mxu0 %v12903_v57 }
 0x2f6   :  { %1330 = vmatprep.subr.bf16.mxu1 %v12908_v58  ;;  %1393 = vmatprep.subr.bf16.mxu0 %v12911_v60 }
 0x2f8   :  { %1035 = vmatmul.mubr.bf16.gmra.mrb[16].mxu1 %v14112_v3  ;;  %1098 = vmatmul.mubr.bf16.gmra.mrb[20].mxu0 %v14112_v3 }
 0x2f9   :  { %1331 = vmatpush1.bf16.msra.mxu1 %v12906_v1  ;;  %1394 = vmatpush1.bf16.msra.mxu0 %v12909_v2 }
 0x2fa   :  { %1332 = vmatprep.subr.bf16.mxu1 %v12914_v4  ;;  %1395 = vmatprep.subr.bf16.mxu0 %v12917_v5 }
 0x2fb   :  { %1354 = vmatprep.mubr.bf16.mxu1 %v16421_v0  ;;  %1417 = vmatprep.mubr.bf16.mxu0 %v16421_v0 }
 0x2fd   :  { %1333 = vmatpush1.bf16.msra.mxu1 %v12912_v6  ;;  %1396 = vmatpush1.bf16.msra.mxu0 %v12915_v7 }
 0x2fe   :  { %1334 = vmatprep.subr.bf16.mxu1 %v12920_v8  ;;  %1397 = vmatprep.subr.bf16.mxu0 %v12923_v9 }
 0x301   :  { %1335 = vmatpush1.bf16.msra.mxu1 %v12918_v10  ;;  %1398 = vmatpush1.bf16.msra.mxu0 %v12921_v11 }
 0x302   :  { %1336 = vmatprep.subr.bf16.mxu1 %v12926_v12  ;;  %1399 = vmatprep.subr.bf16.mxu0 %v12929_v13 }
 0x305   :  { %1337 = vmatpush1.bf16.msra.mxu1 %v12924_v14  ;;  %1400 = vmatpush1.bf16.msra.mxu0 %v12927_v15 }
 0x306   :  { %1662 = vmatprep.subr.bf16.mxu1 %v12932_v16  ;;  %1725 = vmatprep.subr.bf16.mxu0 %v14118_v17 }
 0x308   :  { %1355 = vmatmul.mubr.bf16.vlgmr.msra.gmra.mrb[20].mxu1 %v14088_v36  ;;  %1418 = vmatmul.mubr.bf16.vlgmr.msra.gmra.mrb[24].mxu0 %v14088_v36 }
 0x309   :  { %1663 = vmatpush1.bf16.msra.mxu1 %v12930_v18  ;;  %1726 = vmatpush1.bf16.msra.mxu0 %v14120_v19  ;;  %v14215_v18 = vshrl.u32 %v179_v32, 7  ;;  %v14237_v32 = vld [vmem:[%s16491_s4] sm:$0xf] }
 0x30a   :  { %1664 = vmatprep.subr.bf16.mxu1 %v12938_v20  ;;  %1727 = vmatprep.subr.bf16.mxu0 %v14123_v21 }
 0x30b   :  { %1364 = vmatprep.mubr.bf16.mxu1 %v16421_v0  ;;  %1427 = vmatprep.mubr.bf16.mxu0 %v16421_v0  ;;  %16490 = vst [vmem:[#allocation24_spill] sm:$0xff] %v14215_v18  ;;  %v14223_v20 = vsub.s32 0, %v14215_v18 }
 0x30d   :  { %1665 = vmatpush1.bf16.msra.mxu1 %v12936_v22  ;;  %1728 = vmatpush1.bf16.msra.mxu0 %v14128_v45 }
 0x30e   :  { %1666 = vmatprep.subr.bf16.mxu1 %v12944_v24  ;;  %1729 = vmatprep.subr.bf16.mxu0 %v14131_v25 }
 0x310   :  { %1365 = vmatmul.mubr.bf16.gmra.mrb[24].mxu1 %v14100_v51  ;;  %1428 = vmatmul.mubr.bf16.gmra.mrb[28].mxu0 %v14100_v51 }
 0x311   :  { %1667 = vmatpush1.bf16.msra.mxu1 %v12942_v47  ;;  %1730 = vmatpush1.bf16.msra.mxu0 %v14136_v27 }
 0x312   :  { %1668 = vmatprep.subr.bf16.mxu1 %v12950_v29  ;;  %1731 = vmatprep.subr.bf16.mxu0 %v12953_v30 }
 0x313   :  { %1374 = vmatprep.mubr.bf16.mxu1 %v16421_v0  ;;  %1437 = vmatprep.mubr.bf16.mxu0 %v16421_v0 }
 0x315   :  { %1669 = vmatpush1.bf16.msra.mxu1 %v12948_v31  ;;  %1732 = vmatpush1.bf16.msra.mxu0 %v12951_v33 }
 0x316   :  { %1670 = vmatprep.subr.bf16.mxu1 %v12956_v34  ;;  %1733 = vmatprep.subr.bf16.mxu0 %v12959_v35 }
 0x318   :  { %1375 = vmatmul.mubr.bf16.gmra.mrb[28].mxu1 %v14112_v3  ;;  %1438 = vmatmul.mubr.bf16.gmra.mrb[32].mxu0 %v14112_v3 }
 0x319   :  { %1671 = vmatpush1.bf16.msra.mxu1 %v12954_v53  ;;  %1734 = vmatpush1.bf16.msra.mxu0 %v12957_v55 }
 0x31a   :  { %1672 = vmatprep.subr.bf16.mxu1 %v12962_v37  ;;  %1735 = vmatprep.subr.bf16.mxu0 %v12965_v38 }
 0x31b   :  { %1694 = vmatprep.mubr.bf16.mxu1 %v16421_v0  ;;  %1757 = vmatprep.mubr.bf16.mxu0 %v16421_v0 }
 0x31d   :  { %1673 = vmatpush1.bf16.msra.mxu1 %v12960_v39  ;;  %1736 = vmatpush1.bf16.msra.mxu0 %v12963_v40 }
 0x31e   :  { %1674 = vmatprep.subr.bf16.mxu1 %v12968_v59  ;;  %1737 = vmatprep.subr.bf16.mxu0 %v12971_v41 }
 0x321   :  { %1675 = vmatpush1.bf16.msra.mxu1 %v12966_v61  ;;  %1738 = vmatpush1.bf16.msra.mxu0 %v12969_v42 }
 0x322   :  { %1676 = vmatprep.subr.bf16.mxu1 %v12974_v46  ;;  %1739 = vmatprep.subr.bf16.mxu0 %v12977_v48 }
 0x325   :  { %1677 = vmatpush1.bf16.msra.mxu1 %v12972_v49  ;;  %1740 = vmatpush1.bf16.msra.mxu0 %v12975_v50 }
 0x326   :  { %12799 = vmatprep.subr.bf16.mxu1 %v14118_v17 }
 0x328   :  { %1695 = vmatmul.mubr.bf16.vlgmr.msra.gmra.mrb[32].mxu1 %v14088_v36  ;;  %1758 = vmatmul.mubr.bf16.vlgmr.msra.gmra.mrb[36].mxu0 %v14088_v36  ;;  %v16425_v36 = vmov 0.0  }
 0x329   :  { %12807 = vmatpush1.bf16.msra.mxu1 %v14120_v19  ;;  %1704 = vmatprep.mubr.bf16.mxu1 %v16421_v0  ;;  %v14220_v19 = vld [vmem:[%s16394_s9] sm:$0xf] }
 0x32a   :  { %12800 = vmatprep.subr.bf16.mxu1 %v14123_v21  ;;  %1767 = vmatprep.mubr.bf16.mxu0 %v16421_v0  ;;  %v14226_v21 = vsub.s32 3, %v14215_v18  ;;  %v14230_v22 = vrot.slane %v14220_v19, %v14223_v20 }
 0x32b   :  { %11595 = vmatprep.subr.bf16.mxu0 %v16425_v36 }
 0x32d   :  { %12808 = vmatpush1.bf16.msra.mxu1 %v14128_v45  ;;  %v1157_v45 = vrot.slane %v14220_v19, %v14226_v21 }
 0x32e   :  { %12801 = vmatprep.subr.bf16.mxu1 %v14131_v25 }
 0x330   :  { %1705 = vmatmul.mubr.bf16.gmra.mrb[36].mxu1 %v14100_v51  ;;  %1768 = vmatmul.mubr.bf16.gmra.mrb[40].mxu0 %v14100_v51 }
 0x331   :  { %12809 = vmatpush1.bf16.msra.mxu1 %v14136_v27  ;;  %1714 = vmatprep.mubr.bf16.mxu1 %v16421_v0 }
 0x332   :  { %12802 = vmatprep.subr.bf16.mxu1 %v12953_v30  ;;  %11597 = vmatprep.mubr.msk.bf16.mxu0 %vm13681_vm6, %v16425_v36  ;;  %v14244_v30 = vrot.slane %v14237_v32, %v14223_v20 }
 0x335   :  { %12810 = vmatpush1.bf16.msra.mxu1 %v12951_v33 }
 0x336   :  { %12803 = vmatprep.subr.bf16.mxu1 %v12959_v35 }
 0x338   :  { %1715 = vmatmul.mubr.bf16.gmra.mrb[40].mxu1 %v14112_v3 }
 0x339   :  { %12811 = vmatpush1.bf16.msra.mxu1 %v12957_v55  ;;  %1777 = vmatprep.mubr.bf16.mxu1 %v16421_v0 }
 0x33a   :  { %12804 = vmatprep.subr.bf16.mxu1 %v12965_v38 }
 0x33d   :  { %12812 = vmatpush1.bf16.msra.mxu1 %v12963_v40 }
 0x33e   :  { %12805 = vmatprep.subr.bf16.mxu1 %v12971_v41 }
 0x341   :  { %12813 = vmatpush1.bf16.msra.mxu1 %v12969_v42 }
 0x342   :  { %12806 = vmatprep.subr.bf16.mxu1 %v12977_v48 }
 0x345   :  { %12814 = vmatpush1.bf16.msra.mxu1 %v12975_v50 }
 0x346   :  { %11571 = vmatprep.subr.bf16.mxu1 %v16425_v36 }
 0x348   :  { %1778 = vmatmul.mubr.bf16.vlgmr.msra.gmra.mrb[44].mxu1 %v14112_v3 }
 0x349   :  { %11573 = vmatprep.mubr.msk.bf16.mxu1 %vm13681_vm6, %v16425_v36 }
 0x3bb   :  { %v1016_v51 = vpop.f32.mrb[8].mxu1  ;;  %v14170_v52 = vpop.f32.mrb[12].mxu0 }
 0x3bc   :  { %v14172_v54 = vpop.f32.mrb[9].mxu1  ;;  %v14174_v56 = vpop.f32.mrb[13].mxu0  ;;  %v1017_v38 = vadd.f32 %v1016_v51, %v14244_v30 }
 0x3bd   :  { %v1020_v57 = vpop.f32.mrb[10].mxu1  ;;  %v14176_v58 = vpop.f32.mrb[14].mxu0 }
 0x3be   :  { %v14178_v60 = vpop.f32.mrb[11].mxu1  ;;  %v14180_v1 = vpop.f32.mrb[15].mxu0  ;;  %v1788_v42 = vpack.c.bf16 %v1017_v38, %v1017_v38  ;;  %v14277_v38 = vsub.s32 1, %v14215_v18 }
 0x3c0   :  { %16492 = vst [vmem:[#allocation25_spill] sm:$0xff] %v14277_v38 }
 0x3c3   :  { %v14182_v2 = vpop.f32.mrb[12].mxu1  ;;  %v14184_v3 = vpop.f32.mrb[16].mxu0 }
 0x3c4   :  { %v14186_v4 = vpop.f32.mrb[13].mxu1  ;;  %v14188_v5 = vpop.f32.mrb[17].mxu0 }
 0x3c5   :  { %v14190_v6 = vpop.f32.mrb[14].mxu1  ;;  %v14192_v7 = vpop.f32.mrb[18].mxu0 }
 0x3c6   :  { %v14194_v8 = vpop.f32.mrb[15].mxu1  ;;  %v14196_v9 = vpop.f32.mrb[19].mxu0 }
 0x3cb   :  { %v14198_v10 = vpop.f32.mrb[16].mxu1  ;;  %v14200_v11 = vpop.f32.mrb[20].mxu0 }
 0x3cc   :  { %v14202_v12 = vpop.f32.mrb[17].mxu1  ;;  %v14204_v13 = vpop.f32.mrb[21].mxu0 }
 0x3cd   :  { %v14206_v14 = vpop.f32.mrb[18].mxu1  ;;  %v14208_v15 = vpop.f32.mrb[22].mxu0 }
 0x3ce   :  { %v14210_v16 = vpop.f32.mrb[19].mxu1  ;;  %v14212_v17 = vpop.f32.mrb[23].mxu0 }
 0x3cf   :  { %16489 = vst [vmem:[#allocation23_spill] sm:$0xff] %v14212_v17 }
 0x3db   :  { %v1356_v24 = vpop.f32.mrb[20].mxu1  ;;  %v14239_v25 = vpop.f32.mrb[24].mxu0 }
 0x3dc   :  { %v1357_v47 = vadd.f32 %v1356_v24, %v14230_v22  ;;  %v1358_v27 = vpop.f32.mrb[21].mxu1  ;;  %v1421_v29 = vpop.f32.mrb[25].mxu0 }
 0x3dd   :  { %v14246_v31 = vadd.f32 %v1421_v29, %v1157_v45  ;;  %v1360_v33 = vpop.f32.mrb[22].mxu1  ;;  %v14248_v34 = vpop.f32.mrb[26].mxu0  ;;  %v1021_v29 = vadd.f32 %v1020_v57, %v14244_v30 }
 0x3de   :  { %v1812_v35 = vpack.c.bf16 %v1357_v47, %v1357_v47  ;;  %v14250_v53 = vpop.f32.mrb[23].mxu1  ;;  %v1425_v55 = vpop.f32.mrb[27].mxu0  ;;  %v1361_v39 = vadd.f32 %v1360_v33, %v14230_v22 }
 0x3df   :  { %v14252_v37 = vadd.f32 %v1425_v55, %v1157_v45 }
 0x3e0   :  { %11572 = vmatpush3.bf16.xpose.msra.mxu1 %v1812_v35  ;;  %v1813_v50 = vpack.c.bf16 %v1361_v39, %v1361_v39 }
 0x3e1   :  { %11577 = vmatprep.subr.bf16.mxu1 %v16425_v36 }
 0x3e3   :  { %v1366_v40 = vpop.f32.mrb[24].mxu1  ;;  %v14257_v59 = vpop.f32.mrb[28].mxu0 }
 0x3e4   :  { %v14259_v41 = vpop.f32.mrb[25].mxu1  ;;  %v1431_v61 = vpop.f32.mrb[29].mxu0  ;;  %v1367_v33 = vadd.f32 %v1366_v40, %v14230_v22  ;;  %v14288_v40 = vrot.slane %v14220_v19, %v14277_v38 }
 0x3e5   :  { %v14261_v46 = vadd.f32 %v1431_v61, %v1157_v45  ;;  %v1370_v48 = vpop.f32.mrb[26].mxu1  ;;  %v14263_v49 = vpop.f32.mrb[30].mxu0 }
 0x3e6   :  { %v14265_v24 = vpop.f32.mrb[27].mxu1  ;;  %v1435_v51 = vpop.f32.mrb[31].mxu0  ;;  %v1814_v23 = vpack.c.bf16 %v1367_v33, %v1367_v33  ;;  %v1359_v33 = vadd.f32 %v1358_v27, %v14288_v40 }
 0x3e7   :  { %v14267_v47 = vadd.f32 %v1435_v51, %v1157_v45  ;;  %11574 = vmatmul.mubr.bf16.vlgmr.msra.gmra.mrb[48].mxu1 %v1788_v42 }
 0x3e8   :  { %11578 = vmatpush3.bf16.xpose.msra.mxu1 %v1813_v50  ;;  %11579 = vmatprep.mubr.msk.bf16.mxu1 %vm13681_vm6, %v16425_v36  ;;  %v1789_v50 = vpack.c.bf16 %v1021_v29, %v1021_v29  ;;  %v1027_v29 = vadd.f32 %v14182_v2, %v14244_v30  ;;  %v14308_v2 = vsub.s32 2, %v14215_v18 }
 0x3e9   :  { %11583 = vmatprep.subr.bf16.mxu1 %v16425_v36 }
 0x3eb   :  { %v1376_v35 = vpop.f32.mrb[28].mxu1  ;;  %v14274_v55 = vpop.f32.mrb[32].mxu0 }
 0x3ec   :  { %v1377_v39 = vadd.f32 %v1376_v35, %v14230_v22  ;;  %v14280_v61 = vpop.f32.mrb[29].mxu1  ;;  %v1441_v42 = vpop.f32.mrb[33].mxu0  ;;  %v1037_v35 = vadd.f32 %v14198_v10, %v14244_v30  ;;  %v14312_v10 = vrot.slane %v14237_v32, %v14277_v38 }
 0x3ed   :  { %v14282_v51 = vadd.f32 %v1441_v42, %v1157_v45  ;;  %v1380_v0 = vpop.f32.mrb[30].mxu1  ;;  %v14284_v57 = vpop.f32.mrb[34].mxu0  ;;  %v16494_v42 = vmov 0.0  }
 0x3ee   :  { %v1816_v36 = vpack.c.bf16 %v1377_v39, %v1377_v39  ;;  %v14290_v63 = vpop.f32.mrb[31].mxu1  ;;  %v1445_v62 = vpop.f32.mrb[35].mxu0  ;;  %v1371_v39 = vadd.f32 %v1370_v48, %v14230_v22  ;;  %v1031_v48 = vadd.f32 %v14190_v6, %v14244_v30  ;;  %v1369_v6 = vadd.f32 %v14259_v41, %v14288_v40 }
 0x3ef   :  { %v14292_v44 = vadd.f32 %v1445_v62, %v1157_v45  ;;  %11580 = vmatmul.mubr.bf16.vlgmr.msra.gmra.mrb[52].mxu1 %v1789_v50  ;;  %v1790_v62 = vpack.c.bf16 %v1027_v29, %v1027_v29  ;;  %v1818_v45 = vpack.c.bf16 %v1359_v33, %v1359_v33  ;;  %v1019_v33 = vadd.f32 %v14172_v54, %v14312_v10 }
 0x3f0   :  { %11584 = vmatpush3.bf16.xpose.msra.mxu1 %v1814_v23  ;;  %11596 = vmatpush3.bf16.xpose.msra.mxu0 %v1816_v36  ;;  %v1792_v23 = vpack.c.bf16 %v1037_v35, %v1037_v35  ;;  %v1480_v36 = vld [vmem:[%s16396_s11] sm:$0xf]  ;;  %v1815_v50 = vpack.c.bf16 %v1371_v39, %v1371_v39  ;;  %v1381_v39 = vadd.f32 %v1380_v0, %v14230_v22 }
 0x3f1   :  { %16493 = vst [vmem:[#allocation26_spill] sm:$0xff] %v14292_v44  ;;  %11585 = vmatprep.mubr.msk.bf16.mxu1 %vm13681_vm6, %v16494_v42  ;;  %11589 = vmatprep.subr.bf16.mxu1 %v16494_v42  ;;  %v14315_v27 = vrot.slane %v1480_v36, %v14308_v2  ;;  %v14320_v29 = vrot.slane %v1480_v36, %v14277_v38 }
 0x3f2   :  { %11607 = vmatprep.subr.bf16.mxu0 %v16494_v42  ;;  %v14323_v35 = vrot.slane %v1480_v36, %v14226_v21  ;;  %v1791_v43 = vpack.c.bf16 %v1031_v48, %v1031_v48  ;;  %v1794_v28 = vpack.c.bf16 %v1019_v33, %v1019_v33  ;;  %v1817_v41 = vpack.c.bf16 %v1381_v39, %v1381_v39 }
 0x3f3   :  { %v14367_v33 = vrot.slane %v1480_v36, %v14223_v20 }
 0x3f7   :  { %11586 = vmatmul.mubr.bf16.vlgmr.msra.gmra.mrb[56].mxu1 %v1790_v62  ;;  %11598 = vmatmul.mubr.bf16.vlgmr.msra.gmra.mrb[44].mxu0 %v1792_v23 }
 0x3f8   :  { %11590 = vmatpush3.bf16.xpose.msra.mxu1 %v1815_v50  ;;  %11608 = vmatpush3.bf16.xpose.msra.mxu0 %v1818_v45 }
 0x3f9   :  { %11591 = vmatprep.mubr.msk.bf16.mxu1 %vm13681_vm6, %v16494_v42  ;;  %11609 = vmatprep.mubr.msk.bf16.mxu0 %vm13681_vm6, %v16494_v42 }
 0x3fa   :  { %11601 = vmatprep.subr.bf16.mxu1 %v16494_v42  ;;  %11619 = vmatprep.subr.bf16.mxu0 %v16494_v42 }
 0x3fb   :  { %v14336_v62 = vpop.f32.mrb[32].mxu1  ;;  %v1759_v23 = vpop.f32.mrb[36].mxu0 }
 0x3fc   :  { %v14339_v45 = vadd.f32 %v1759_v23, %v14315_v27  ;;  %v1698_v50 = vpop.f32.mrb[33].mxu1  ;;  %v1761_v38 = vpop.f32.mrb[37].mxu0 }
 0x3fd   :  { %v14342_v54 = vadd.f32 %v1698_v50, %v14320_v29  ;;  %v14345_v0 = vadd.f32 %v1761_v38, %v14323_v35  ;;  %v14347_v22 = vpop.f32.mrb[34].mxu1  ;;  %v1763_v26 = vpop.f32.mrb[38].mxu0  ;;  %v1041_v38 = vadd.f32 %v14206_v14, %v14244_v30 }
 0x3fe   :  { %16495 = vst [vmem:[#allocation27_spill] sm:$0xff] %v14339_v45  ;;  %v14350_v18 = vadd.f32 %v1763_v26, %v14315_v27  ;;  %v1702_v17 = vpop.f32.mrb[35].mxu1  ;;  %v1765_v23 = vpop.f32.mrb[39].mxu0  ;;  %v1820_v45 = vpack.c.bf16 %v1369_v6, %v1369_v6  ;;  %v1029_v26 = vadd.f32 %v14186_v4, %v14312_v10 }
 0x3ff   :  { %16496 = vst [vmem:[#allocation28_spill] sm:$0xff] %v14345_v0  ;;  %v14353_v44 = vadd.f32 %v1702_v17, %v14320_v29  ;;  %v14356_v48 = vadd.f32 %v1765_v23, %v14323_v35  ;;  %11592 = vmatmul.mubr.bf16.vlgmr.msra.gmra.mrb[60].mxu1 %v1791_v43  ;;  %11610 = vmatmul.mubr.bf16.vlgmr.msra.gmra.mrb[48].mxu0 %v1794_v28 }
 0x400   :  { %11602 = vmatpush3.bf16.xpose.msra.mxu1 %v1817_v41  ;;  %11620 = vmatpush3.bf16.xpose.msra.mxu0 %v1820_v45  ;;  %v1363_v17 = vadd.f32 %v14250_v53, %v14288_v40  ;;  %v1379_v28 = vadd.f32 %v14280_v61, %v14288_v40  ;;  %v1793_v39 = vpack.c.bf16 %v1041_v38, %v1041_v38 }
 0x401   :  { %16497 = vst [vmem:[#allocation29_spill] sm:$0xff] %v14356_v48  ;;  %11603 = vmatprep.mubr.msk.bf16.mxu1 %vm13681_vm6, %v16494_v42  ;;  %11621 = vmatprep.mubr.msk.bf16.mxu0 %vm13681_vm6, %v16494_v42  ;;  %v1796_v41 = vpack.c.bf16 %v1029_v26, %v1029_v26  ;;  %v14395_v38 = vrot.slane %v14220_v19, %v14308_v2 }
 0x402   :  { %11613 = vmatprep.subr.bf16.mxu1 %v16494_v42  ;;  %11631 = vmatprep.subr.bf16.mxu0 %v16494_v42  ;;  %v1819_v23 = vpack.c.bf16 %v1363_v17, %v1363_v17  ;;  %v1023_v26 = vadd.f32 %v14178_v60, %v14312_v10  ;;  %v1039_v19 = vadd.f32 %v14202_v12, %v14312_v10 }
 0x403   :  { %v1706_v43 = vpop.f32.mrb[36].mxu1  ;;  %v1769_v14 = vpop.f32.mrb[40].mxu0  ;;  %v1373_v17 = vadd.f32 %v14265_v24, %v14288_v40 }
 0x404   :  { %v14376_v4 = vadd.f32 %v1706_v43, %v14367_v33  ;;  %v14379_v30 = vadd.f32 %v1769_v14, %v14315_v27  ;;  %v1708_v53 = vpop.f32.mrb[37].mxu1  ;;  %v1771_v36 = vpop.f32.mrb[41].mxu0 }
 0x405   :  { %v14382_v6 = vadd.f32 %v1708_v53, %v14320_v29  ;;  %v14385_v45 = vadd.f32 %v1771_v36, %v14323_v35  ;;  %v1710_v61 = vpop.f32.mrb[38].mxu1  ;;  %v1773_v50 = vpop.f32.mrb[42].mxu0  ;;  %v1822_v53 = vpack.c.bf16 %v1379_v28, %v1379_v28 }
 0x406   :  { %v14388_v48 = vadd.f32 %v1710_v61, %v14367_v33  ;;  %v14391_v43 = vadd.f32 %v1773_v50, %v14315_v27  ;;  %v1712_v14 = vpop.f32.mrb[39].mxu1  ;;  %v1775_v0 = vpop.f32.mrb[43].mxu0  ;;  %v1795_v61 = vpack.c.bf16 %v1023_v26, %v1023_v26  ;;  %v14425_v50 = vrot.slane %v14237_v32, %v14308_v2 }
 0x407   :  { %16498 = vst [vmem:[#allocation30_spill] sm:$0xff] %v14385_v45  ;;  %v14398_v36 = vadd.f32 %v1712_v14, %v14320_v29  ;;  %v14401_v45 = vadd.f32 %v1775_v0, %v14323_v35  ;;  %11604 = vmatmul.mubr.bf16.vlgmr.msra.gmra.mrb[64].mxu1 %v1793_v39  ;;  %11622 = vmatmul.mubr.bf16.vlgmr.msra.gmra.mrb[52].mxu0 %v1796_v41 }
 0x408   :  { %11614 = vmatpush3.bf16.xpose.msra.mxu1 %v1819_v23  ;;  %11632 = vmatpush3.bf16.xpose.msra.mxu0 %v1822_v53  ;;  %v1420_v0 = vadd.f32 %v14239_v25, %v14395_v38  ;;  %v1798_v41 = vpack.c.bf16 %v1039_v19, %v1039_v19  ;;  %v1821_v23 = vpack.c.bf16 %v1373_v17, %v1373_v17 }
 0x409   :  { %11615 = vmatprep.mubr.msk.bf16.mxu1 %vm13681_vm6, %v16494_v42  ;;  %11633 = vmatprep.mubr.msk.bf16.mxu0 %vm13681_vm6, %v16494_v42  ;;  %v1033_v26 = vadd.f32 %v14194_v8, %v14312_v10  ;;  %v1080_v19 = vadd.f32 %v14170_v52, %v14425_v50  ;;  %v1383_v17 = vadd.f32 %v14290_v63, %v14288_v40 }
 0x40a   :  { %11625 = vmatprep.subr.bf16.mxu1 %v16494_v42  ;;  %11643 = vmatprep.subr.bf16.mxu0 %v16494_v42  ;;  %v1824_v53 = vpack.c.bf16 %v1420_v0, %v1420_v0  ;;  %v1043_v63 = vadd.f32 %v14210_v16, %v14312_v10  ;;  %v1090_v52 = vadd.f32 %v14184_v3, %v14425_v50 }
 0x40b   :  { %v1716_v28 = vpop.f32.mrb[40].mxu1  ;;  %v1797_v8 = vpack.c.bf16 %v1033_v26, %v1033_v26  ;;  %v1800_v0 = vpack.c.bf16 %v1080_v19, %v1080_v19  ;;  %v1440_v40 = vadd.f32 %v14274_v55, %v14395_v38 }
 0x40c   :  { %v14418_v60 = vadd.f32 %v1716_v28, %v14367_v33  ;;  %v1718_v39 = vpop.f32.mrb[41].mxu1 }
 0x40d   :  { %v14421_v12 = vadd.f32 %v1718_v39, %v14320_v29  ;;  %v1720_v24 = vpop.f32.mrb[42].mxu1  ;;  %v1823_v39 = vpack.c.bf16 %v1383_v17, %v1383_v17  ;;  %v1828_v19 = vpack.c.bf16 %v1440_v40, %v1440_v40  ;;  %v1084_v17 = vadd.f32 %v14176_v58, %v14425_v50 }
 0x40e   :  { %v14428_v25 = vadd.f32 %v1720_v24, %v14367_v33  ;;  %v1722_v14 = vpop.f32.mrb[43].mxu1  ;;  %v14487_v58 = vrot.slane %v14237_v32, %v14226_v21  ;;  %v1444_v32 = vadd.f32 %v14284_v57, %v14395_v38 }
 0x40f   :  { %v14431_v28 = vadd.f32 %v1722_v14, %v14320_v29  ;;  %11616 = vmatmul.mubr.bf16.vlgmr.msra.gmra.mrb[68].mxu1 %v1795_v61  ;;  %11634 = vmatmul.mubr.bf16.vlgmr.msra.gmra.mrb[56].mxu0 %v1798_v41  ;;  %v1430_v29 = vadd.f32 %v14257_v59, %v14395_v38  ;;  %v1424_v59 = vadd.f32 %v14248_v34, %v14395_v38 }
 0x410   :  { %11626 = vmatpush3.bf16.xpose.msra.mxu1 %v1821_v23  ;;  %11644 = vmatpush3.bf16.xpose.msra.mxu0 %v1824_v53  ;;  %v1799_v41 = vpack.c.bf16 %v1043_v63, %v1043_v63  ;;  %v1802_v23 = vpack.c.bf16 %v1090_v52, %v1090_v52  ;;  %v1832_v63 = vpack.c.bf16 %v14261_v46, %v14261_v46 }
 0x411   :  { %11627 = vmatprep.mubr.msk.bf16.mxu1 %vm13681_vm6, %v16494_v42  ;;  %11645 = vmatprep.mubr.msk.bf16.mxu0 %vm13681_vm6, %v16494_v42  ;;  %v1826_v61 = vpack.c.bf16 %v1430_v29, %v1430_v29  ;;  %v1825_v14 = vpack.c.bf16 %v1424_v59, %v1424_v59  ;;  %v1100_v29 = vadd.f32 %v14200_v11, %v14425_v50 }
 0x412   :  { %11637 = vmatprep.subr.bf16.mxu1 %v16494_v42  ;;  %11655 = vmatprep.subr.bf16.mxu0 %v16494_v42  ;;  %v1830_v11 = vpack.c.bf16 %v14246_v31, %v14246_v31  ;;  %v1092_v57 = vadd.f32 %v14188_v5, %v14487_v58  ;;  %v1831_v52 = vpack.c.bf16 %v14252_v37, %v14252_v37 }
 0x413   :  { %v1086_v5 = vadd.f32 %v14180_v1, %v14487_v58  ;;  %v1102_v59 = vadd.f32 %v14204_v13, %v14487_v58  ;;  %v1833_v1 = vpack.c.bf16 %v14267_v47, %v14267_v47  ;;  %v1096_v13 = vadd.f32 %v14196_v9, %v14487_v58  ;;  %v16500_v9 = vld [vmem:[#allocation23_spill] sm:$0xff] }
 0x415   :  { %v1809_v47 = vpack.c.bf16 %v1096_v13, %v1096_v13 }
 0x417   :  { %11628 = vmatmul.mubr.bf16.vlgmr.msra.gmra.mrb[72].mxu1 %v1797_v8  ;;  %11646 = vmatmul.mubr.bf16.vlgmr.msra.gmra.mrb[60].mxu0 %v1800_v0  ;;  %v1804_v8 = vpack.c.bf16 %v1100_v29, %v1100_v29 }
 0x418   :  { %11638 = vmatpush3.bf16.xpose.msra.mxu1 %v1823_v39  ;;  %11656 = vmatpush3.bf16.xpose.msra.mxu0 %v1826_v61  ;;  %v1082_v39 = vadd.f32 %v14174_v56, %v14487_v58  ;;  %v1104_v56 = vadd.f32 %v14208_v15, %v14425_v50  ;;  %v1834_v15 = vpack.c.bf16 %v14282_v51, %v14282_v51 }
 0x419   :  { %11639 = vmatprep.mubr.msk.bf16.mxu1 %vm13681_vm6, %v16494_v42  ;;  %11657 = vmatprep.mubr.msk.bf16.mxu0 %vm13681_vm6, %v16494_v42  ;;  %v1807_v51 = vpack.c.bf16 %v1086_v5, %v1086_v5 }
 0x41a   :  { %11649 = vmatprep.subr.bf16.mxu1 %v16494_v42  ;;  %11667 = vmatprep.subr.bf16.mxu0 %v16494_v42  ;;  %v1806_v61 = vpack.c.bf16 %v1082_v39, %v1082_v39  ;;  %v1805_v46 = vpack.c.bf16 %v1104_v56, %v1104_v56 }
 0x41b   :  { %v1779_v24 = vpop.f32.mrb[44].mxu1 }
 0x41c   :  { %v14462_v16 = vadd.f32 %v1779_v24, %v14315_v27  ;;  %v1781_v10 = vpop.f32.mrb[45].mxu1  ;;  %v16499_v24 = vld [vmem:[#allocation26_spill] sm:$0xff] }
 0x41d   :  { %v14465_v3 = vadd.f32 %v1781_v10, %v14323_v35  ;;  %v1783_v34 = vpop.f32.mrb[46].mxu1  ;;  %v1835_v10 = vpack.c.bf16 %v16499_v24, %v16499_v24 }
 0x41e   :  { %v14468_v53 = vadd.f32 %v1783_v34, %v14315_v27  ;;  %v1785_v26 = vpop.f32.mrb[47].mxu1  ;;  %v1434_v27 = vadd.f32 %v14263_v49, %v14395_v38  ;;  %v1094_v49 = vadd.f32 %v14192_v7, %v14425_v50  ;;  %v1829_v7 = vpack.c.bf16 %v1444_v32, %v1444_v32 }
 0x41f   :  { %v14471_v55 = vadd.f32 %v1785_v26, %v14323_v35  ;;  %11640 = vmatmul.mubr.bf16.vlgmr.msra.gmra.mrb[76].mxu1 %v1799_v41  ;;  %11658 = vmatmul.mubr.bf16.vlgmr.msra.gmra.mrb[64].mxu0 %v1802_v23  ;;  %v1801_v35 = vpack.c.bf16 %v1084_v17, %v1084_v17  ;;  %v1808_v38 = vpack.c.bf16 %v1092_v57, %v1092_v57 }
 0x420   :  { %11650 = vmatpush3.bf16.xpose.msra.mxu1 %v1825_v14  ;;  %11668 = vmatpush3.bf16.xpose.msra.mxu0 %v1828_v19  ;;  %v1827_v0 = vpack.c.bf16 %v1434_v27, %v1434_v27  ;;  %v1803_v31 = vpack.c.bf16 %v1094_v49, %v1094_v49  ;;  %v1697_v50 = vadd.f32 %v14336_v62, %v14367_v33  ;;  %v13682_v19 = vmov 1966171168  }
 0x421   :  { %11651 = vmatprep.mubr.msk.bf16.mxu1 %vm13681_vm6, %v16494_v42  ;;  %11669 = vmatprep.mubr.msk.bf16.mxu0 %vm13681_vm6, %v16494_v42  ;;  %v1810_v62 = vpack.c.bf16 %v1102_v59, %v1102_v59  ;;  %v1701_v41 = vadd.f32 %v14347_v22, %v14367_v33  ;;  %v1106_v34 = vadd.f32 %v16500_v9, %v14487_v58  ;;  %v599_v22 = vld [vmem:[%s16501_s30] sm:$0x3f]  ;;  %v620_v17 = vunpack.c.l.s4 %v13682_v19  ;;  %v16502_v58 = vld [vmem:[#allocation24_spill] sm:$0xff] }
 0x422   :  { %11661 = vmatprep.subr.bf16.mxu1 %v16494_v42  ;;  %11679 = vmatprep.subr.bf16.mxu0 %v16494_v42  ;;  %v3205_v37 = vpack.c.bf16 %v1697_v50, %v1697_v50  ;;  %v600_v33 = vsub.f32 1.0, %v599_v22 }
 0x423   :  { %v3206_v23 = vpack.c.bf16 %v1701_v41, %v1701_v41  ;;  %v1811_v14 = vpack.c.bf16 %v1106_v34, %v1106_v34  ;;  %v621_v27 = vunpack.c.0.s8 %v620_v17 }
 0x424   :  { %v3233_v40 = vsel %vm611_vm7, %v3205_v37, 0  ;;  %v14558_v29 = vmul.f32 -1e+09, %v600_v33 }
 0x425   :  { %v3279_v26 = vsel %vm611_vm7, %v3206_v23, 0 }
 0x426   :  { %v605_v24 = vrot.slane %v14558_v29, 4 }
 0x427   :  { %11652 = vmatmul.mubr.bf16.vlgmr.msra.gmra.mrb[80].mxu1 %v1801_v35  ;;  %11670 = vmatmul.mubr.bf16.vlgmr.msra.gmra.mrb[68].mxu0 %v1804_v8  ;;  %v603_v35 = vrot.slane %v14558_v29, 2  ;;  %v14562_v8 = vsub.s32 %v621_v27, %v16502_v58 }
 0x428   :  { %11662 = vmatpush3.bf16.xpose.msra.mxu1 %v1827_v0  ;;  %11680 = vmatpush3.bf16.xpose.msra.mxu0 %v1830_v11 }
 0x429   :  { %11663 = vmatprep.mubr.msk.bf16.mxu1 %vm13681_vm6, %v16494_v42  ;;  %11681 = vmatprep.mubr.msk.bf16.mxu0 %vm13681_vm6, %v16494_v42  ;;  %v610_v0 = vsel %vm609_vm8, %v14558_v29, %v603_v35 }
 0x42a   :  { %11673 = vmatprep.subr.bf16.mxu1 %v16494_v42  ;;  %11691 = vmatprep.subr.bf16.mxu0 %v16494_v42  ;;  %v625_v11 = vrot.slane %v610_v0, %v14562_v8  ;;  %v618_v56 = vcombine.high %v610_v0, %v610_v0 }
 0x42c   :  { %v641_v49 = vrot.slane %v625_v11, %v14562_v8  ;;  %v633_v32 = vcombine.high %v625_v11, %v625_v11  ;;  %v612_v11 = vsel %vm611_vm7, %v603_v35, %v605_v24 }
 0x42e   :  { %v14568_v39 = vrot.slane %v641_v49, %v14223_v20  ;;  %v663_v37 = vcombine.high %v641_v49, %v641_v49 }
 0x42f   :  { %11664 = vmatmul.mubr.bf16.vlgmr.msra.gmra.mrb[84].mxu1 %v1803_v31  ;;  %11682 = vmatmul.mubr.bf16.vlgmr.msra.gmra.mrb[72].mxu0 %v1806_v61 }
 0x430   :  { %11674 = vmatpush3.bf16.xpose.msra.mxu1 %v1829_v7  ;;  %11692 = vmatpush3.bf16.xpose.msra.mxu0 %v1832_v63  ;;  %v655_v63 = vrot.slane %v633_v32, %v14562_v8  ;;  %v14587_v13 = vrot.slane %v663_v37, %v14223_v20 }
 0x431   :  { %11675 = vmatprep.mubr.msk.bf16.mxu1 %vm13681_vm6, %v16494_v42  ;;  %11693 = vmatprep.mubr.msk.bf16.mxu0 %vm13681_vm6, %v16494_v42 }
 0x432   :  { %11685 = vmatprep.subr.bf16.mxu1 %v16494_v42  ;;  %11703 = vmatprep.subr.bf16.mxu0 %v16494_v42 }
 0x437   :  { %11676 = vmatmul.mubr.bf16.vlgmr.msra.gmra.mrb[88].mxu1 %v1805_v46  ;;  %11694 = vmatmul.mubr.bf16.vlgmr.msra.gmra.mrb[76].mxu0 %v1808_v38 }
 0x438   :  { %11686 = vmatpush3.bf16.xpose.msra.mxu1 %v1831_v52  ;;  %11704 = vmatpush3.bf16.xpose.msra.mxu0 %v1834_v15  ;;  %v14577_v52 = vrot.slane %v655_v63, %v14223_v20  ;;  %v632_v15 = vrot.slane %v618_v56, %v14562_v8 }
 0x439   :  { %11687 = vmatprep.mubr.msk.bf16.mxu1 %vm13681_vm6, %v16494_v42  ;;  %11705 = vmatprep.mubr.msk.bf16.mxu0 %vm13681_vm6, %v16494_v42 }
 0x43a   :  { %11697 = vmatprep.subr.bf16.mxu1 %v16494_v42  ;;  %11715 = vmatprep.subr.bf16.mxu0 %v16494_v42  ;;  %v634_v32 = vcombine.high %v632_v15, %v632_v15 }
 0x43f   :  { %11688 = vmatmul.mubr.bf16.vlgmr.msra.gmra.mrb[92].mxu1 %v1807_v51  ;;  %11706 = vmatmul.mubr.bf16.vlgmr.msra.gmra.mrb[80].mxu0 %v1810_v62  ;;  %v648_v51 = vrot.slane %v632_v15, %v14562_v8 }
 0x440   :  { %11698 = vmatpush3.bf16.xpose.msra.mxu1 %v1833_v1  ;;  %11716 = vmatpush3.bf16.msra.mxu0 %v3233_v40 }
 0x441   :  { %11699 = vmatprep.mubr.msk.bf16.mxu1 %vm13681_vm6, %v16494_v42  ;;  %11709 = vmatprep.subr.bf16.mxu1 %v16494_v42  ;;  %v664_v19 = vcombine.high %v648_v51, %v648_v51 }
 0x442   :  { %11717 = vmatprep.mubr.msk.bf16.mxu0 %vm13681_vm6, %v16494_v42  ;;  %11727 = vmatprep.subr.bf16.mxu0 %v16494_v42 }
 0x447   :  { %11700 = vmatmul.mubr.bf16.vlgmr.msra.gmra.mrb[96].mxu1 %v1809_v47  ;;  %v14590_v47 = vrot.slane %v648_v51, %v14223_v20 }
 0x448   :  { %11710 = vmatpush3.bf16.xpose.msra.mxu1 %v1835_v10  ;;  %11711 = vmatprep.mubr.msk.bf16.mxu1 %vm13681_vm6, %v16494_v42 }
 0x449   :  { %11721 = vmatprep.subr.bf16.mxu1 %v16494_v42  ;;  %16503 = vst [vmem:[#allocation26_spill] sm:$0xff] %v14590_v47 }
 0x44f   :  { %11712 = vmatmul.mubr.bf16.vlgmr.msra.gmra.mrb[100].mxu1 %v1811_v14 }
 0x450   :  { %11722 = vmatpush3.bf16.msra.mxu1 %v3279_v26  ;;  %11723 = vmatprep.mubr.msk.bf16.mxu1 %vm13681_vm6, %v16494_v42  ;;  %v665_v26 = vcombine.high %v655_v63, %v655_v63 }
 0x451   :  { %11733 = vmatprep.subr.bf16.mxu1 %v16494_v42 }
 0x452   :  { %v14607_v49 = vrot.slane %v665_v26, %v14223_v20 }
 0x454   :  { %16504 = vst [vmem:[#allocation23_spill] sm:$0xff] %v14607_v49 }
 0x4ba   :  { %v1990_v31 = vpop.f32.mrb[48].mxu1 }
 0x4bb   :  { %v11575_v61 = vpop.f32.mrb[49].mxu1  ;;  %v14571_v7 = vadd.f32 %v1990_v31, %v14568_v39  ;;  %v14610_v31 = vrot.slane %v664_v19, %v14223_v20 }
 0x4bc   :  { %v1993_v57 = vpop.f32.mrb[50].mxu1  ;;  %v674_v61 = vrot.slane %v612_v11, %v14562_v8 }
 0x4bd   :  { %v11576_v46 = vpop.f32.mrb[51].mxu1  ;;  %v2917_v38 = vsel %vm2916_vm9, %v14571_v7, -inf  ;;  %16505 = vst [vmem:[#allocation24_spill] sm:$0xff] %v14610_v31 }
 0x4be   :  { %2918 = vmax.xlane.f32.xlu0 %v2917_v38  ;;  %v662_v38 = vrot.slane %v634_v32, %v14562_v8  ;;  %v690_v15 = vrot.slane %v674_v61, %v14562_v8 }
 0x4c2   :  { %v2030_v50 = vpop.f32.mrb[52].mxu1 }
 0x4c3   :  { %v11581_v5 = vpop.f32.mrb[53].mxu1  ;;  %v14581_v59 = vadd.f32 %v2030_v50, %v14577_v52 }
 0x4c4   :  { %v2033_v62 = vpop.f32.mrb[54].mxu1 }
 0x4c5   :  { %v11582_v1 = vpop.f32.mrb[55].mxu1  ;;  %v2920_v40 = vsel %vm2916_vm9, %v14581_v59, -inf }
 0x4c6   :  { %2921 = vmax.xlane.f32.xlu1 %v2920_v40 }
 0x4ca   :  { %v2070_v10 = vpop.f32.mrb[56].mxu1  ;;  %v2150_v41 = vpop.f32.mrb[44].mxu0 }
 0x4cb   :  { %v11587_v9 = vpop.f32.mrb[57].mxu1  ;;  %v11599_v34 = vpop.f32.mrb[45].mxu0  ;;  %v14594_v23 = vadd.f32 %v2070_v10, %v14587_v13  ;;  %v14597_v14 = vadd.f32 %v2150_v41, %v14590_v47  ;;  %v14626_v10 = vrot.slane %v662_v38, %v14223_v20  ;;  %v14629_v41 = vrot.slane %v690_v15, %v14223_v20 }
 0x4cc   :  { %v2073_v22 = vpop.f32.mrb[58].mxu1  ;;  %v2153_v33 = vpop.f32.mrb[46].mxu0 }
 0x4cd   :  { %v11588_v17 = vpop.f32.mrb[59].mxu1  ;;  %v11600_v27 = vpop.f32.mrb[47].mxu0  ;;  %v2923_v58 = vsel %vm2916_vm9, %v14594_v23, -inf  ;;  %v2929_v0 = vsel %vm2916_vm9, %v14597_v14, -inf  ;;  %16506 = vst [vmem:[#allocation31_spill] sm:$0xff] %v14626_v10  ;;  %16507 = vst [vmem:[#allocation32_spill] sm:$0xff] %v14629_v41  ;;  %v666_v33 = vcombine.high %v662_v38, %v662_v38 }
 0x4ce   :  { %2924 = vmax.xlane.f32.xlu0 %v2923_v58  ;;  %2930 = vmax.xlane.f32.xlu1 %v2929_v0  ;;  %v712_v58 = vcombine.high %v690_v15, %v690_v15  ;;  %v667_v0 = vcombine.high %v612_v11, %v612_v11 }
 0x4cf   :  { %v14642_v38 = vrot.slane %v666_v33, %v14223_v20 }
 0x4d0   :  { %v681_v11 = vrot.slane %v667_v0, %v14562_v8 }
 0x4d1   :  { %16508 = vst [vmem:[#allocation33_spill] sm:$0xff] %v14642_v38 }
 0x4d2   :  { %v2110_v63 = vpop.f32.mrb[60].mxu1  ;;  %v2230_v56 = vpop.f32.mrb[48].mxu0 }
 0x4d3   :  { %v11593_v57 = vpop.f32.mrb[61].mxu1  ;;  %v14614_v46 = vadd.f32 %v2110_v63, %v14607_v49  ;;  %v11611_v35 = vpop.f32.mrb[49].mxu0  ;;  %v14618_v5 = vadd.f32 %v2230_v56, %v14610_v31 }
 0x4d4   :  { %v2113_v50 = vpop.f32.mrb[62].mxu1  ;;  %v2233_v37 = vpop.f32.mrb[50].mxu0 }
 0x4d5   :  { %v11594_v51 = vpop.f32.mrb[63].mxu1  ;;  %v2926_v62 = vsel %vm2916_vm9, %v14614_v46, -inf  ;;  %v11612_v1 = vpop.f32.mrb[51].mxu0  ;;  %v2935_v40 = vsel %vm2916_vm9, %v14618_v5, -inf  ;;  %v682_v50 = vcombine.high %v674_v61, %v674_v61  ;;  %v14645_v37 = vrot.slane %v712_v58, %v14223_v20 }
 0x4d6   :  { %2927 = vmax.xlane.f32.xlu0 %v2926_v62  ;;  %2936 = vmax.xlane.f32.xlu1 %v2935_v40  ;;  %v697_v61 = vrot.slane %v681_v11, %v14562_v8 }
 0x4d7   :  { %16509 = vst [vmem:[#allocation34_spill] sm:$0xff] %v14645_v37  ;;  %v704_v40 = vrot.slane %v682_v50, %v14562_v8 }
 0x4da   :  { %v2190_v9 = vpop.f32.mrb[64].mxu1  ;;  %v2310_v34 = vpop.f32.mrb[52].mxu0 }
 0x4db   :  { %v11605_v26 = vpop.f32.mrb[65].mxu1  ;;  %v14632_v22 = vadd.f32 %v2190_v9, %v14626_v10  ;;  %v11623_v19 = vpop.f32.mrb[53].mxu0  ;;  %v14635_v27 = vadd.f32 %v2310_v34, %v14629_v41 }
 0x4dc   :  { %v2193_v17 = vpop.f32.mrb[66].mxu1  ;;  %v2313_v32 = vpop.f32.mrb[54].mxu0 }
 0x4dd   :  { %v11606_v63 = vpop.f32.mrb[67].mxu1  ;;  %v2932_v56 = vsel %vm2916_vm9, %v14632_v22, -inf  ;;  %v11624_v57 = vpop.f32.mrb[55].mxu0  ;;  %v2941_v35 = vsel %vm2916_vm9, %v14635_v27, -inf  ;;  %v14661_v32 = vrot.slane %v704_v40, %v14223_v20 }
 0x4de   :  { %2933 = vmax.xlane.f32.xlu0 %v2932_v56  ;;  %2942 = vmax.xlane.f32.xlu1 %v2941_v35  ;;  %v14664_v63 = vrot.slane %v697_v61, %v14223_v20  ;;  %v607_v56 = vrot.slane %v14558_v29, 6 }
 0x4df   :  { %16510 = vst [vmem:[#allocation35_spill] sm:$0xff] %v14661_v32 }
 0x4e0   :  { %16511 = vst [vmem:[#allocation36_spill] sm:$0xff] %v14664_v63 }
 0x4e2   :  { %v2270_v15 = vpop.f32.mrb[68].mxu1  ;;  %v2390_v51 = vpop.f32.mrb[56].mxu0 }
 0x4e3   :  { %v11617_v62 = vpop.f32.mrb[69].mxu1  ;;  %v14649_v1 = vadd.f32 %v2270_v15, %v14642_v38  ;;  %v11635_v9 = vpop.f32.mrb[57].mxu0  ;;  %v14653_v26 = vadd.f32 %v2390_v51, %v14645_v37  ;;  %v714_v51 = vcombine.high %v704_v40, %v704_v40 }
 0x4e4   :  { %v2273_v34 = vpop.f32.mrb[70].mxu1  ;;  %v2393_v33 = vpop.f32.mrb[58].mxu0 }
 0x4e5   :  { %v11618_v19 = vpop.f32.mrb[71].mxu1  ;;  %v2938_v17 = vsel %vm2916_vm9, %v14649_v1, -inf  ;;  %v11636_v58 = vpop.f32.mrb[59].mxu0  ;;  %v2947_v0 = vsel %vm2916_vm9, %v14653_v26, -inf  ;;  %v713_v33 = vcombine.high %v697_v61, %v697_v61  ;;  %v14680_v40 = vrot.slane %v714_v51, %v14223_v20 }
 0x4e6   :  { %2939 = vmax.xlane.f32.xlu0 %v2938_v17  ;;  %2948 = vmax.xlane.f32.xlu1 %v2947_v0  ;;  %v614_v0 = vsel %vm613_vm10, %v605_v24, %v607_v56 }
 0x4e7   :  { %16512 = vst [vmem:[#allocation37_spill] sm:$0xff] %v14680_v40  ;;  %v14683_v61 = vrot.slane %v713_v33, %v14223_v20 }
 0x4e9   :  { %16513 = vst [vmem:[#allocation38_spill] sm:$0xff] %v14683_v61 }
 0x4ea   :  { %v2350_v57 = vpop.f32.mrb[72].mxu1  ;;  %v2470_v35 = vpop.f32.mrb[60].mxu0 }
 0x4eb   :  { %v11629_v50 = vpop.f32.mrb[73].mxu1  ;;  %v14668_v15 = vadd.f32 %v2350_v57, %v14661_v32  ;;  %v11647_v62 = vpop.f32.mrb[61].mxu0  ;;  %v14671_v34 = vadd.f32 %v2470_v35, %v14664_v63  ;;  %v683_v35 = vcombine.high %v681_v11, %v681_v11 }
 0x4ec   :  { %v2353_v9 = vpop.f32.mrb[74].mxu1  ;;  %v2473_v19 = vpop.f32.mrb[62].mxu0  ;;  %v723_v50 = vrot.slane %v614_v0, %v14562_v8 }
 0x4ed   :  { %v11630_v17 = vpop.f32.mrb[75].mxu1  ;;  %v2944_v58 = vsel %vm2916_vm9, %v14668_v15, -inf  ;;  %v11648_v37 = vpop.f32.mrb[63].mxu0  ;;  %v2953_v57 = vsel %vm2916_vm9, %v14671_v34, -inf  ;;  %v711_v24 = vrot.slane %v683_v35, %v14562_v8 }
 0x4ee   :  { %2945 = vmax.xlane.f32.xlu0 %v2944_v58  ;;  %2954 = vmax.xlane.f32.xlu1 %v2953_v57  ;;  %v739_v11 = vrot.slane %v723_v50, %v14562_v8 }
 0x4ef   :  { %v14699_v35 = vrot.slane %v711_v24, %v14223_v20 }
 0x4f0   :  { %v761_v63 = vcombine.high %v739_v11, %v739_v11 }
 0x4f1   :  { %16514 = vst [vmem:[#allocation39_spill] sm:$0xff] %v14699_v35 }
 0x4f2   :  { %v2430_v62 = vpop.f32.mrb[76].mxu1  ;;  %v2550_v9 = vpop.f32.mrb[64].mxu0 }
 0x4f3   :  { %v11641_v19 = vpop.f32.mrb[77].mxu1  ;;  %v14687_v29 = vadd.f32 %v2430_v62, %v14680_v40  ;;  %v11659_v37 = vpop.f32.mrb[65].mxu0  ;;  %v14691_v17 = vadd.f32 %v2550_v9, %v14683_v61 }
 0x4f4   :  { %v2433_v56 = vpop.f32.mrb[78].mxu1  ;;  %v2553_v51 = vpop.f32.mrb[66].mxu0  ;;  %v14702_v19 = vrot.slane %v739_v11, %v14223_v20 }
 0x4f5   :  { %v11642_v33 = vpop.f32.mrb[79].mxu1  ;;  %v2950_v58 = vsel %vm2916_vm9, %v14687_v29, -inf  ;;  %v11660_v57 = vpop.f32.mrb[67].mxu0  ;;  %v2959_v62 = vsel %vm2916_vm9, %v14691_v17, -inf }
 0x4f6   :  { %2951 = vmax.xlane.f32.xlu0 %v2950_v58  ;;  %2960 = vmax.xlane.f32.xlu1 %v2959_v62  ;;  %16515 = vst [vmem:[#allocation40_spill] sm:$0xff] %v14702_v19  ;;  %v715_v33 = vcombine.high %v711_v24, %v711_v24  ;;  %v716_v62 = vcombine.high %v614_v0, %v614_v0 }
 0x4f8   :  { %v14715_v24 = vrot.slane %v715_v33, %v14223_v20  ;;  %v730_v0 = vrot.slane %v716_v62, %v14562_v8 }
 0x4fa   :  { %v2510_v9 = vpop.f32.mrb[80].mxu1  ;;  %v2630_v37 = vpop.f32.mrb[68].mxu0  ;;  %16516 = vst [vmem:[#allocation41_spill] sm:$0xff] %v14715_v24 }
 0x4fb   :  { %v11653_v56 = vpop.f32.mrb[81].mxu1  ;;  %v14705_v51 = vadd.f32 %v2510_v9, %v14699_v35  ;;  %v11671_v61 = vpop.f32.mrb[69].mxu0  ;;  %v14708_v58 = vadd.f32 %v2630_v37, %v14702_v19  ;;  %v14718_v9 = vrot.slane %v761_v63, %v14223_v20 }
 0x4fc   :  { %v2513_v57 = vpop.f32.mrb[82].mxu1  ;;  %v2633_v40 = vpop.f32.mrb[70].mxu0  ;;  %v731_v61 = vcombine.high %v723_v50, %v723_v50  ;;  %v746_v50 = vrot.slane %v730_v0, %v14562_v8 }
 0x4fd   :  { %v11654_v32 = vpop.f32.mrb[83].mxu1  ;;  %v2956_v41 = vsel %vm2916_vm9, %v14705_v51, -inf  ;;  %v11672_v38 = vpop.f32.mrb[71].mxu0  ;;  %v2965_v56 = vsel %vm2916_vm9, %v14708_v58, -inf  ;;  %16517 = vst [vmem:[#allocation42_spill] sm:$0xff] %v14718_v9 }
 0x4fe   :  { %2957 = vmax.xlane.f32.xlu0 %v2956_v41  ;;  %2966 = vmax.xlane.f32.xlu1 %v2965_v56  ;;  %v753_v41 = vrot.slane %v731_v61, %v14562_v8 }
 0x500   :  { %v14734_v61 = vrot.slane %v753_v41, %v14223_v20 }
 0x502   :  { %v2590_v40 = vpop.f32.mrb[84].mxu1  ;;  %v2710_v32 = vpop.f32.mrb[72].mxu0  ;;  %16518 = vst [vmem:[#allocation43_spill] sm:$0xff] %v14734_v61 }
 0x503   :  { %v11665_v11 = vpop.f32.mrb[85].mxu1  ;;  %v14722_v37 = vadd.f32 %v2590_v40, %v14715_v24  ;;  %v11683_v38 = vpop.f32.mrb[73].mxu0  ;;  %v14726_v56 = vadd.f32 %v2710_v32, %v14718_v9 }
 0x504   :  { %v2593_v57 = vpop.f32.mrb[86].mxu1  ;;  %v2713_v33 = vpop.f32.mrb[74].mxu0  ;;  %v14737_v11 = vrot.slane %v746_v50, %v14223_v20 }
 0x505   :  { %v11666_v63 = vpop.f32.mrb[87].mxu1  ;;  %v2962_v62 = vsel %vm2916_vm9, %v14722_v37, -inf  ;;  %v11684_v19 = vpop.f32.mrb[75].mxu0  ;;  %v2971_v40 = vsel %vm2916_vm9, %v14726_v56, -inf }
 0x506   :  { %2963 = vmax.xlane.f32.xlu0 %v2962_v62  ;;  %2972 = vmax.xlane.f32.xlu1 %v2971_v40  ;;  %16519 = vst [vmem:[#allocation44_spill] sm:$0xff] %v14737_v11  ;;  %v763_v63 = vcombine.high %v753_v41, %v753_v41  ;;  %v732_v41 = vcombine.high %v730_v0, %v730_v0 }
 0x50a   :  { %v2670_v32 = vpop.f32.mrb[88].mxu1  ;;  %v2790_v38 = vpop.f32.mrb[76].mxu0 }
 0x50b   :  { %v11677_v57 = vpop.f32.mrb[89].mxu1  ;;  %v14740_v33 = vadd.f32 %v2670_v32, %v14734_v61  ;;  %v11695_v9 = vpop.f32.mrb[77].mxu0  ;;  %v14743_v62 = vadd.f32 %v2790_v38, %v14737_v11  ;;  %v14750_v32 = vrot.slane %v763_v63, %v14223_v20 }
 0x50c   :  { %v2673_v19 = vpop.f32.mrb[90].mxu1  ;;  %v2793_v24 = vpop.f32.mrb[78].mxu0 }
 0x50d   :  { %v11678_v40 = vpop.f32.mrb[91].mxu1  ;;  %v2968_v35 = vsel %vm2916_vm9, %v14740_v33, -inf  ;;  %v11696_v31 = vpop.f32.mrb[79].mxu0  ;;  %v2977_v10 = vsel %vm2916_vm9, %v14743_v62, -inf  ;;  %16520 = vst [vmem:[#allocation45_spill] sm:$0xff] %v14750_v32  ;;  %v760_v24 = vrot.slane %v732_v41, %v14562_v8 }
 0x50e   :  { %2969 = vmax.xlane.f32.xlu0 %v2968_v35  ;;  %2978 = vmax.xlane.f32.xlu1 %v2977_v10 }
 0x50f   :  { %v14759_v63 = vrot.slane %v760_v24, %v14223_v20 }
 0x511   :  { %16521 = vst [vmem:[#allocation46_spill] sm:$0xff] %v14759_v63 }
 0x512   :  { %v2750_v9 = vpop.f32.mrb[92].mxu1  ;;  %v2870_v57 = vpop.f32.mrb[80].mxu0 }
 0x513   :  { %v11689_v19 = vpop.f32.mrb[93].mxu1  ;;  %v14753_v38 = vadd.f32 %v2750_v9, %v14750_v32  ;;  %v11707_v40 = vpop.f32.mrb[81].mxu0 }
 0x514   :  { %v2753_v11 = vpop.f32.mrb[94].mxu1  ;;  %v2873_v31 = vpop.f32.mrb[82].mxu0 }
 0x515   :  { %v11690_v35 = vpop.f32.mrb[95].mxu1  ;;  %v2974_v61 = vsel %vm2916_vm9, %v14753_v38, -inf  ;;  %v11708_v10 = vpop.f32.mrb[83].mxu0 }
 0x516   :  { %2975 = vmax.xlane.f32.xlu0 %v2974_v61 }
 0x51a   :  { %v2830_v0 = vpop.f32.mrb[96].mxu1 }
 0x51b   :  { %v11701_v47 = vpop.f32.mrb[97].mxu1  ;;  %v14762_v19 = vadd.f32 %v2830_v0, %v14759_v63 }
 0x51c   :  { %v2833_v9 = vpop.f32.mrb[98].mxu1  ;;  %v762_v47 = vcombine.high %v746_v50, %v746_v50 }
 0x51d   :  { %v11702_v32 = vpop.f32.mrb[99].mxu1  ;;  %v2980_v8 = vsel %vm2916_vm9, %v14762_v19, -inf }
 0x51e   :  { %2981 = vmax.xlane.f32.xlu0 %v2980_v8  ;;  %v14769_v32 = vrot.slane %v762_v47, %v14223_v20  ;;  %v764_v8 = vcombine.high %v760_v24, %v760_v24 }
 0x522   :  { %v2910_v11 = vpop.f32.mrb[100].mxu1 }
 0x523   :  { %v11713_v41 = vpop.f32.mrb[101].mxu1 }
 0x524   :  { %v2913_v40 = vpop.f32.mrb[102].mxu1 }
 0x525   :  { %v11714_v31 = vpop.f32.mrb[103].mxu1 }
 0x54b   :  { %v2919_v35 = vpop.xlane.xlu0 %2918 }
 0x54c   :  { %v2989_v61 = vsub.f32 %v14571_v7, %v2919_v35  ;;  %v14776_v7 = vadd.f32 %v2870_v57, %v14769_v32 }
 0x54e   :  { %v3013_v10 = vmul.f32 1.442695, %v2989_v61  ;;  %v2983_v24 = vsel %vm2916_vm9, %v14776_v7, -inf }
 0x550   :  { %13238 = vpow2.f32 %v3013_v10 }
 0x553   :  { %v2922_v49 = vpop.xlane.xlu1 %2921 }
 0x554   :  { %v2990_v0 = vsub.f32 %v14581_v59, %v2922_v49 }
 0x556   :  { %v3015_v63 = vmul.f32 1.442695, %v2990_v0 }
 0x558   :  { %13240 = vpow2.f32 %v3015_v63  ;;  %v14781_v63 = vrot.slane %v764_v8, %v14223_v20 }
 0x55a   :  { %v14771_v9 = vpop.eup %13238  ;;  %16522 = vst [vmem:[#allocation47_spill] sm:$0xff] %v14781_v63  ;;  %v14788_v57 = vadd.f32 %v2910_v11, %v14781_v63 }
 0x55b   :  { %v2925_v41 = vpop.xlane.xlu0 %2924  ;;  %v2931_v40 = vpop.xlane.xlu1 %2930  ;;  %v3061_v31 = vsel %vm2916_vm9, %v14771_v9, 0.0 }
 0x55c   :  { %v2991_v50 = vsub.f32 %v14594_v23, %v2925_v41  ;;  %v2993_v59 = vsub.f32 %v14597_v14, %v2931_v40  ;;  %3062 = vadd.xlane.f32.xlu1 %v3061_v31  ;;  %v2986_v40 = vsel %vm2916_vm9, %v14788_v57, -inf }
 0x55e   :  { %v3017_v49 = vmul.f32 1.442695, %v2991_v50  ;;  %v3021_v35 = vmul.f32 1.442695, %v2993_v59 }
 0x560   :  { %13242 = vpow2.f32 %v3017_v49  ;;  %2984 = vmax.xlane.f32.xlu1 %v2983_v24 }
 0x561   :  { %13244 = vpow2.f32 %v3021_v35 }
 0x562   :  { %v14785_v61 = vpop.eup %13240 }
 0x563   :  { %v2928_v23 = vpop.xlane.xlu0 %2927  ;;  %v3064_v14 = vsel %vm2916_vm9, %v14785_v61, 0.0  ;;  %v2937_v47 = vpop.xlane.xlu1 %2936 }
 0x564   :  { %v2992_v10 = vsub.f32 %v14614_v46, %v2928_v23  ;;  %3065 = vadd.xlane.f32.xlu0 %v3064_v14  ;;  %v2995_v0 = vsub.f32 %v14618_v5, %v2937_v47 }
 0x566   :  { %v3019_v8 = vmul.f32 1.442695, %v2992_v10  ;;  %v3025_v41 = vmul.f32 1.442695, %v2995_v0 }
 0x568   :  { %13246 = vpow2.f32 %v3019_v8  ;;  %2987 = vmax.xlane.f32.xlu0 %v2986_v40 }
 0x569   :  { %13248 = vpow2.f32 %v3025_v41 }
 0x56a   :  { %v14796_v11 = vpop.eup %13242 }
 0x56b   :  { %v2934_v31 = vpop.xlane.xlu0 %2933  ;;  %v3067_v50 = vsel %vm2916_vm9, %v14796_v11, 0.0  ;;  %v14800_v59 = vpop.eup %13244 }
 0x56c   :  { %v2994_v46 = vsub.f32 %v14632_v22, %v2934_v31  ;;  %v2943_v49 = vpop.xlane.xlu1 %2942  ;;  %3068 = vadd.xlane.f32.xlu1 %v3067_v50  ;;  %v3073_v23 = vsel %vm2916_vm9, %v14800_v59, 0.0 }
 0x56d   :  { %v2997_v5 = vsub.f32 %v14635_v27, %v2943_v49 }
 0x56e   :  { %v3023_v35 = vmul.f32 1.442695, %v2994_v46 }
 0x56f   :  { %v3029_v24 = vmul.f32 1.442695, %v2997_v5 }
 0x570   :  { %13250 = vpow2.f32 %v3023_v35  ;;  %3074 = vadd.xlane.f32.xlu1 %v3073_v23 }
 0x571   :  { %13252 = vpow2.f32 %v3029_v24 }
 0x572   :  { %v14806_v14 = vpop.eup %13246 }
 0x573   :  { %v14808_v10 = vpop.eup %13248  ;;  %v2940_v47 = vpop.xlane.xlu0 %2939  ;;  %v3070_v22 = vsel %vm2916_vm9, %v14806_v14, 0.0 }
 0x574   :  { %v2996_v0 = vsub.f32 %v14649_v1, %v2940_v47  ;;  %v2949_v8 = vpop.xlane.xlu1 %2948  ;;  %3071 = vadd.xlane.f32.xlu0 %v3070_v22  ;;  %v3079_v27 = vsel %vm2916_vm9, %v14808_v10, 0.0 }
 0x575   :  { %v2999_v41 = vsub.f32 %v14653_v26, %v2949_v8  ;;  %3080 = vadd.xlane.f32.xlu1 %v3079_v27 }
 0x576   :  { %v3027_v40 = vmul.f32 1.442695, %v2996_v0 }
 0x577   :  { %v3033_v31 = vmul.f32 1.442695, %v2999_v41 }
 0x578   :  { %13254 = vpow2.f32 %v3027_v40 }
 0x579   :  { %13256 = vpow2.f32 %v3033_v31 }
 0x57a   :  { %v14816_v50 = vpop.eup %13250 }
 0x57b   :  { %v14818_v46 = vpop.eup %13252  ;;  %v2946_v49 = vpop.xlane.xlu0 %2945  ;;  %v3076_v1 = vsel %vm2916_vm9, %v14816_v50, 0.0 }
 0x57c   :  { %v2998_v5 = vsub.f32 %v14668_v15, %v2946_v49  ;;  %v2955_v35 = vpop.xlane.xlu1 %2954  ;;  %3077 = vadd.xlane.f32.xlu0 %v3076_v1  ;;  %v3085_v26 = vsel %vm2916_vm9, %v14818_v46, 0.0 }
 0x57d   :  { %v3001_v24 = vsub.f32 %v14671_v34, %v2955_v35  ;;  %3086 = vadd.xlane.f32.xlu1 %v3085_v26 }
 0x57e   :  { %v3031_v23 = vmul.f32 1.442695, %v2998_v5 }
 0x57f   :  { %v3037_v47 = vmul.f32 1.442695, %v3001_v24 }
 0x580   :  { %13258 = vpow2.f32 %v3031_v23 }
 0x581   :  { %13260 = vpow2.f32 %v3037_v47 }
 0x582   :  { %v14826_v22 = vpop.eup %13254 }
 0x583   :  { %v14828_v0 = vpop.eup %13256  ;;  %v2952_v8 = vpop.xlane.xlu0 %2951  ;;  %v3082_v15 = vsel %vm2916_vm9, %v14826_v22, 0.0 }
 0x584   :  { %v3000_v27 = vsub.f32 %v14687_v29, %v2952_v8  ;;  %v2961_v41 = vpop.xlane.xlu1 %2960  ;;  %3083 = vadd.xlane.f32.xlu0 %v3082_v15  ;;  %v3091_v34 = vsel %vm2916_vm9, %v14828_v0, 0.0 }
 0x585   :  { %v3003_v40 = vsub.f32 %v14691_v17, %v2961_v41  ;;  %3092 = vadd.xlane.f32.xlu1 %v3091_v34 }
 0x586   :  { %v3035_v31 = vmul.f32 1.442695, %v3000_v27 }
 0x587   :  { %v3041_v49 = vmul.f32 1.442695, %v3003_v40 }
 0x588   :  { %13262 = vpow2.f32 %v3035_v31 }
 0x589   :  { %13264 = vpow2.f32 %v3041_v49 }
 0x58a   :  { %v14836_v1 = vpop.eup %13258 }
 0x58b   :  { %v14838_v5 = vpop.eup %13260  ;;  %v2958_v35 = vpop.xlane.xlu0 %2957  ;;  %v3088_v29 = vsel %vm2916_vm9, %v14836_v1, 0.0 }
 0x58c   :  { %v3002_v26 = vsub.f32 %v14705_v51, %v2958_v35  ;;  %v2967_v24 = vpop.xlane.xlu1 %2966  ;;  %3089 = vadd.xlane.f32.xlu0 %v3088_v29  ;;  %v3097_v17 = vsel %vm2916_vm9, %v14838_v5, 0.0 }
 0x58d   :  { %v3005_v23 = vsub.f32 %v14708_v58, %v2967_v24  ;;  %3098 = vadd.xlane.f32.xlu1 %v3097_v17 }
 0x58e   :  { %v3039_v47 = vmul.f32 1.442695, %v3002_v26 }
 0x58f   :  { %v3045_v8 = vmul.f32 1.442695, %v3005_v23 }
 0x590   :  { %13266 = vpow2.f32 %v3039_v47 }
 0x591   :  { %13268 = vpow2.f32 %v3045_v8 }
 0x592   :  { %v14846_v15 = vpop.eup %13262 }
 0x593   :  { %v14848_v27 = vpop.eup %13264  ;;  %v2964_v41 = vpop.xlane.xlu0 %2963  ;;  %v3094_v51 = vsel %vm2916_vm9, %v14846_v15, 0.0 }
 0x594   :  { %v3004_v34 = vsub.f32 %v14722_v37, %v2964_v41  ;;  %v2973_v40 = vpop.xlane.xlu1 %2972  ;;  %3095 = vadd.xlane.f32.xlu0 %v3094_v51  ;;  %v3103_v58 = vsel %vm2916_vm9, %v14848_v27, 0.0 }
 0x595   :  { %v3007_v31 = vsub.f32 %v14726_v56, %v2973_v40  ;;  %3104 = vadd.xlane.f32.xlu1 %v3103_v58 }
 0x596   :  { %v3043_v49 = vmul.f32 1.442695, %v3004_v34 }
 0x597   :  { %v3049_v35 = vmul.f32 1.442695, %v3007_v31 }
 0x598   :  { %13270 = vpow2.f32 %v3043_v49 }
 0x599   :  { %13272 = vpow2.f32 %v3049_v35 }
 0x59a   :  { %v14856_v29 = vpop.eup %13266 }
 0x59b   :  { %v14858_v26 = vpop.eup %13268  ;;  %v2970_v24 = vpop.xlane.xlu0 %2969  ;;  %v3100_v37 = vsel %vm2916_vm9, %v14856_v29, 0.0 }
 0x59c   :  { %v3006_v17 = vsub.f32 %v14740_v33, %v2970_v24  ;;  %v2979_v23 = vpop.xlane.xlu1 %2978  ;;  %3101 = vadd.xlane.f32.xlu0 %v3100_v37  ;;  %v3109_v56 = vsel %vm2916_vm9, %v14858_v26, 0.0 }
 0x59d   :  { %v3009_v47 = vsub.f32 %v14743_v62, %v2979_v23  ;;  %3110 = vadd.xlane.f32.xlu1 %v3109_v56 }
 0x59e   :  { %v3047_v8 = vmul.f32 1.442695, %v3006_v17 }
 0x59f   :  { %v3053_v41 = vmul.f32 1.442695, %v3009_v47 }
 0x5a0   :  { %13274 = vpow2.f32 %v3047_v8 }
 0x5a1   :  { %13276 = vpow2.f32 %v3053_v41 }
 0x5a2   :  { %v14866_v51 = vpop.eup %13270 }
 0x5a3   :  { %v14868_v34 = vpop.eup %13272  ;;  %v2976_v40 = vpop.xlane.xlu0 %2975  ;;  %v3106_v33 = vsel %vm2916_vm9, %v14866_v51, 0.0 }
 0x5a4   :  { %v3008_v58 = vsub.f32 %v14753_v38, %v2976_v40  ;;  %3107 = vadd.xlane.f32.xlu0 %v3106_v33  ;;  %v3115_v31 = vsel %vm2916_vm9, %v14868_v34, 0.0 }
 0x5a5   :  { %3116 = vadd.xlane.f32.xlu1 %v3115_v31 }
 0x5a6   :  { %v3051_v62 = vmul.f32 1.442695, %v3008_v58 }
 0x5a8   :  { %13278 = vpow2.f32 %v3051_v62 }
 0x5aa   :  { %v14875_v49 = vpop.eup %13274 }
 0x5ab   :  { %v14877_v35 = vpop.eup %13276  ;;  %v2982_v24 = vpop.xlane.xlu0 %2981  ;;  %v3112_v37 = vsel %vm2916_vm9, %v14875_v49, 0.0 }
 0x5ac   :  { %v3010_v17 = vsub.f32 %v14762_v19, %v2982_v24  ;;  %3113 = vadd.xlane.f32.xlu0 %v3112_v37  ;;  %v3121_v38 = vsel %vm2916_vm9, %v14877_v35, 0.0  ;;  %v3207_v24 = vpack.c.bf16 %v14376_v4, %v14376_v4 }
 0x5ad   :  { %3122 = vadd.xlane.f32.xlu1 %v3121_v38 }
 0x5ae   :  { %v3055_v23 = vmul.f32 1.442695, %v3010_v17 }
 0x5b0   :  { %13280 = vpow2.f32 %v3055_v23 }
 0x5b2   :  { %v14884_v56 = vpop.eup %13278 }
 0x5b3   :  { %v3118_v47 = vsel %vm2916_vm9, %v14884_v56, 0.0 }
 0x5b4   :  { %3119 = vadd.xlane.f32.xlu0 %v3118_v47 }
 0x5ba   :  { %v14888_v8 = vpop.eup %13280 }
 0x5bb   :  { %v3124_v41 = vsel %vm2916_vm9, %v14888_v8, 0.0 }
 0x5bc   :  { %3125 = vadd.xlane.f32.xlu0 %v3124_v41  ;;  %v3325_v41 = vsel %vm611_vm7, %v3207_v24, 0 }
 0x5e9   :  { %v3063_v19 = vpop.xlane.xlu1 %3062 }
 0x5ea   :  { %13282 = vrcp.f32 %v3063_v19 }
 0x5ed   :  { %v2985_v40 = vpop.xlane.xlu1 %2984 }
 0x5ee   :  { %v3011_v33 = vsub.f32 %v14776_v7, %v2985_v40  ;;  %v3208_v40 = vpack.c.bf16 %v14388_v48, %v14388_v48 }
 0x5f0   :  { %v3057_v58 = vmul.f32 1.442695, %v3011_v33 }
 0x5f1   :  { %v3066_v31 = vpop.xlane.xlu0 %3065 }
 0x5f2   :  { %13284 = vpow2.f32 %v3057_v58 }
 0x5f3   :  { %13286 = vrcp.f32 %v3066_v31 }
 0x5f4   :  { %v13283_v62 = vpop.eup %13282 }
 0x5f5   :  { %v3157_v37 = vmul.f32 %v13283_v62, %v14771_v9  ;;  %v2988_v17 = vpop.xlane.xlu0 %2987  ;;  %v3371_v62 = vsel %vm611_vm7, %v3208_v40, 0  ;;  %v3211_v40 = vpack.c.bf16 %v14342_v54, %v14342_v54 }
 0x5f6   :  { %v3012_v38 = vsub.f32 %v14788_v57, %v2988_v17  ;;  %v3209_v17 = vpack.c.bf16 %v14418_v60, %v14418_v60 }
 0x5f7   :  { %v3181_v23 = vpack.c.bf16 %v3157_v37, %v3157_v37 }
 0x5f8   :  { %v3059_v47 = vmul.f32 1.442695, %v3012_v38 }
 0x5f9   :  { %11718 = vmatmul.mubr.msk.bf16.vlgmr.msra.gmra.mrb[84].mxu0 %vm2916_vm9, %v3181_v23  ;;  %v3069_v7 = vpop.xlane.xlu1 %3068 }
 0x5fa   :  { %13288 = vpow2.f32 %v3059_v47  ;;  %11728 = vmatpush3.bf16.msra.mxu0 %v3325_v41  ;;  %11729 = vmatprep.mubr.msk.bf16.mxu0 %vm13681_vm6, %v16494_v42 }
 0x5fb   :  { %13290 = vrcp.f32 %v3069_v7  ;;  %11739 = vmatprep.subr.bf16.mxu0 %v16494_v42  ;;  %v3417_v7 = vsel %vm611_vm7, %v3209_v17, 0  ;;  %v3213_v17 = vpack.c.bf16 %v14382_v6, %v14382_v6 }
 0x5fc   :  { %v14902_v4 = vpop.eup %13284 }
 0x5fd   :  { %v13287_v9 = vpop.eup %13286  ;;  %v3075_v19 = vpop.xlane.xlu1 %3074  ;;  %v3127_v57 = vsel %vm2916_vm9, %v14902_v4, 0.0 }
 0x5fe   :  { %v3158_v33 = vmul.f32 %v13287_v9, %v14785_v61  ;;  %3128 = vadd.xlane.f32.xlu1 %v3127_v57  ;;  %13292 = vrcp.f32 %v3075_v19 }
 0x600   :  { %v3182_v58 = vpack.c.bf16 %v3158_v33, %v3158_v33 }
 0x601   :  { %v3072_v31 = vpop.xlane.xlu0 %3071 }
 0x602   :  { %11724 = vmatmul.mubr.msk.bf16.vlgmr.msra.gmra.mrb[104].mxu1 %vm2916_vm9, %v3182_v58  ;;  %13294 = vrcp.f32 %v3072_v31  ;;  %v3081_v37 = vpop.xlane.xlu1 %3080 }
 0x603   :  { %11734 = vmatpush3.bf16.msra.mxu1 %v3371_v62  ;;  %11735 = vmatprep.mubr.msk.bf16.mxu1 %vm13681_vm6, %v16494_v42  ;;  %13296 = vrcp.f32 %v3081_v37 }
 0x604   :  { %v14913_v24 = vpop.eup %13288  ;;  %11745 = vmatprep.subr.bf16.mxu1 %v16494_v42 }
 0x605   :  { %v13291_v48 = vpop.eup %13290  ;;  %v3130_v61 = vsel %vm2916_vm9, %v14913_v24, 0.0 }
 0x606   :  { %v3159_v38 = vmul.f32 %v13291_v48, %v14796_v11  ;;  %3131 = vadd.xlane.f32.xlu0 %v3130_v61  ;;  %v3210_v11 = vpack.c.bf16 %v14428_v25, %v14428_v25  ;;  %v3509_v25 = vsel %vm611_vm7, %v3211_v40, 0  ;;  %v3212_v48 = vpack.c.bf16 %v14353_v44, %v14353_v44 }
 0x607   :  { %v3601_v44 = vsel %vm611_vm7, %v3213_v17, 0 }
 0x608   :  { %v3183_v23 = vpack.c.bf16 %v3159_v38, %v3159_v38  ;;  %v13293_v47 = vpop.eup %13292  ;;  %v3463_v62 = vsel %vm611_vm7, %v3210_v11, 0 }
 0x609   :  { %v3078_v41 = vpop.xlane.xlu0 %3077  ;;  %v3161_v19 = vmul.f32 %v13293_v47, %v14800_v59  ;;  %v3555_v47 = vsel %vm611_vm7, %v3212_v48, 0 }
 0x60a   :  { %13298 = vrcp.f32 %v3078_v41  ;;  %11730 = vmatmul.mubr.msk.bf16.vlgmr.msra.gmra.mrb[88].mxu0 %vm2916_vm9, %v3183_v23  ;;  %v3087_v60 = vpop.xlane.xlu1 %3086 }
 0x60b   :  { %11740 = vmatpush3.bf16.msra.mxu0 %v3417_v7  ;;  %11741 = vmatprep.mubr.msk.bf16.mxu0 %vm13681_vm6, %v16494_v42  ;;  %13300 = vrcp.f32 %v3087_v60  ;;  %v3185_v58 = vpack.c.bf16 %v3161_v19, %v3161_v19  ;;  %v3215_v60 = vpack.c.bf16 %v14421_v12, %v14421_v12 }
 0x60c   :  { %v13295_v9 = vpop.eup %13294  ;;  %11751 = vmatprep.subr.bf16.mxu0 %v16494_v42 }
 0x60d   :  { %v3160_v57 = vmul.f32 %v13295_v9, %v14806_v14  ;;  %v13297_v31 = vpop.eup %13296  ;;  %v3214_v9 = vpack.c.bf16 %v14398_v36, %v14398_v36  ;;  %v3693_v36 = vsel %vm611_vm7, %v3215_v60, 0 }
 0x60e   :  { %v3163_v14 = vmul.f32 %v13297_v31, %v14808_v10  ;;  %v3216_v31 = vpack.c.bf16 %v14431_v28, %v14431_v28 }
 0x60f   :  { %v3184_v33 = vpack.c.bf16 %v3160_v57, %v3160_v57  ;;  %v3647_v40 = vsel %vm611_vm7, %v3214_v9, 0 }
 0x610   :  { %v3187_v23 = vpack.c.bf16 %v3163_v14, %v3163_v14 }
 0x611   :  { %11736 = vmatmul.mubr.msk.bf16.vlgmr.msra.gmra.mrb[108].mxu1 %vm2916_vm9, %v3184_v33  ;;  %v3084_v59 = vpop.xlane.xlu0 %3083 }
 0x612   :  { %11746 = vmatpush3.bf16.msra.mxu1 %v3463_v62  ;;  %13302 = vrcp.f32 %v3084_v59  ;;  %11742 = vmatmul.mubr.msk.bf16.vlgmr.msra.gmra.mrb[92].mxu0 %vm2916_vm9, %v3185_v58  ;;  %v3093_v37 = vpop.xlane.xlu1 %3092  ;;  %v16523_v59 = vld [vmem:[#allocation27_spill] sm:$0xff] }
 0x613   :  { %11752 = vmatpush3.bf16.msra.mxu0 %v3509_v25  ;;  %11747 = vmatprep.mubr.msk.bf16.mxu1 %vm13681_vm6, %v16494_v42  ;;  %13304 = vrcp.f32 %v3093_v37  ;;  %v3217_v25 = vpack.c.bf16 %v16523_v59, %v16523_v59  ;;  %v3739_v37 = vsel %vm611_vm7, %v3216_v31, 0 }
 0x614   :  { %v13299_v54 = vpop.eup %13298  ;;  %11753 = vmatprep.mubr.msk.bf16.mxu0 %vm13681_vm6, %v16494_v42  ;;  %11757 = vmatprep.subr.bf16.mxu1 %v16494_v42 }
 0x615   :  { %v3162_v61 = vmul.f32 %v13299_v54, %v14816_v50  ;;  %11763 = vmatprep.subr.bf16.mxu0 %v16494_v42  ;;  %v13301_v10 = vpop.eup %13300  ;;  %v3785_v28 = vsel %vm611_vm7, %v3217_v25, 0 }
 0x616   :  { %v3165_v50 = vmul.f32 %v13301_v10, %v14818_v46  ;;  %v3219_v10 = vpack.c.bf16 %v14379_v30, %v14379_v30 }
 0x617   :  { %v3186_v38 = vpack.c.bf16 %v3162_v61, %v3162_v61 }
 0x618   :  { %v3189_v57 = vpack.c.bf16 %v3165_v50, %v3165_v50 }
 0x619   :  { %11748 = vmatmul.mubr.msk.bf16.vlgmr.msra.gmra.mrb[112].mxu1 %vm2916_vm9, %v3186_v38  ;;  %v3090_v41 = vpop.xlane.xlu0 %3089  ;;  %v3218_v38 = vpack.c.bf16 %v14350_v18, %v14350_v18  ;;  %v3877_v18 = vsel %vm611_vm7, %v3219_v10, 0  ;;  %v3226_v10 = vpack.c.bf16 %v14401_v45, %v14401_v45 }
 0x61a   :  { %11758 = vmatpush3.bf16.msra.mxu1 %v3555_v47  ;;  %13306 = vrcp.f32 %v3090_v41  ;;  %11754 = vmatmul.mubr.msk.bf16.vlgmr.msra.gmra.mrb[96].mxu0 %vm2916_vm9, %v3187_v23  ;;  %v3099_v7 = vpop.xlane.xlu1 %3098 }
 0x61b   :  { %11764 = vmatpush3.bf16.msra.mxu0 %v3601_v44  ;;  %11759 = vmatprep.mubr.msk.bf16.mxu1 %vm13681_vm6, %v16494_v42  ;;  %13308 = vrcp.f32 %v3099_v7  ;;  %v3831_v44 = vsel %vm611_vm7, %v3218_v38, 0  ;;  %v3220_v7 = vpack.c.bf16 %v14391_v43, %v14391_v43 }
 0x61c   :  { %v13303_v6 = vpop.eup %13302  ;;  %11765 = vmatprep.mubr.msk.bf16.mxu0 %vm13681_vm6, %v16494_v42  ;;  %11769 = vmatprep.subr.bf16.mxu1 %v16494_v42 }
 0x61d   :  { %v3164_v19 = vmul.f32 %v13303_v6, %v14826_v22  ;;  %11775 = vmatprep.subr.bf16.mxu0 %v16494_v42  ;;  %v13305_v46 = vpop.eup %13304 }
 0x61e   :  { %v3167_v22 = vmul.f32 %v13305_v46, %v14828_v0 }
 0x61f   :  { %v3188_v11 = vpack.c.bf16 %v3164_v19, %v3164_v19  ;;  %v3221_v19 = vpack.c.bf16 %v14462_v16, %v14462_v16 }
 0x620   :  { %v3191_v14 = vpack.c.bf16 %v3167_v22, %v3167_v22 }
 0x621   :  { %11760 = vmatmul.mubr.msk.bf16.vlgmr.msra.gmra.mrb[116].mxu1 %vm2916_vm9, %v3188_v11  ;;  %v3096_v33 = vpop.xlane.xlu0 %3095  ;;  %v3969_v43 = vsel %vm611_vm7, %v3221_v19, 0  ;;  %v12979_v19 = vld [vmem:[#allocation7] sm:$0xff]  }
 0x622   :  { %11770 = vmatpush3.bf16.msra.mxu1 %v3647_v40  ;;  %13310 = vrcp.f32 %v3096_v33  ;;  %11766 = vmatmul.mubr.msk.bf16.vlgmr.msra.gmra.mrb[100].mxu0 %vm2916_vm9, %v3189_v57  ;;  %v3105_v58 = vpop.xlane.xlu1 %3104  ;;  %v3923_v57 = vsel %vm611_vm7, %v3220_v7, 0  ;;  %v3222_v33 = vpack.c.bf16 %v14468_v53, %v14468_v53 }
 0x623   :  { %11776 = vmatpush3.bf16.msra.mxu0 %v3693_v36  ;;  %11771 = vmatprep.mubr.msk.bf16.mxu1 %vm13681_vm6, %v16494_v42  ;;  %13312 = vrcp.f32 %v3105_v58 }
 0x624   :  { %v13307_v12 = vpop.eup %13306  ;;  %11777 = vmatprep.mubr.msk.bf16.mxu0 %vm13681_vm6, %v16494_v42  ;;  %11781 = vmatprep.subr.bf16.mxu1 %v16494_v42 }
 0x625   :  { %v3166_v62 = vmul.f32 %v13307_v12, %v14836_v1  ;;  %11787 = vmatprep.subr.bf16.mxu0 %v16494_v42  ;;  %v13309_v0 = vpop.eup %13308  ;;  %v16524_v12 = vld [vmem:[#allocation28_spill] sm:$0xff] }
 0x626   :  { %v3169_v61 = vmul.f32 %v13309_v0, %v14838_v5  ;;  %v3223_v22 = vpack.c.bf16 %v16524_v12, %v16524_v12  ;;  %v12997_v12 = vld [vmem:[#allocation7 + $0x88] sm:$0xff]  }
 0x627   :  { %v3190_v54 = vpack.c.bf16 %v3166_v62, %v3166_v62  ;;  %v4015_v62 = vsel %vm611_vm7, %v3222_v33, 0  ;;  %v12984_v33 = vld [vmem:[#allocation7 + $0x58] sm:$0xff]  }
 0x628   :  { %v3193_v41 = vpack.c.bf16 %v3169_v61, %v3169_v61  ;;  %v4061_v53 = vsel %vm611_vm7, %v3223_v22, 0  ;;  %v12986_v22 = vld [vmem:[#allocation7 + $0x60] sm:$0xff]  }
 0x629   :  { %11772 = vmatmul.mubr.msk.bf16.vlgmr.msra.gmra.mrb[120].mxu1 %vm2916_vm9, %v3190_v54  ;;  %v3102_v48 = vpop.xlane.xlu0 %3101  ;;  %v16525_v54 = vld [vmem:[#allocation29_spill] sm:$0xff] }
 0x62a   :  { %11782 = vmatpush3.bf16.msra.mxu1 %v3739_v37  ;;  %13314 = vrcp.f32 %v3102_v48  ;;  %11778 = vmatmul.mubr.msk.bf16.vlgmr.msra.gmra.mrb[104].mxu0 %vm2916_vm9, %v3191_v14  ;;  %v3111_v17 = vpop.xlane.xlu1 %3110  ;;  %v3224_v14 = vpack.c.bf16 %v16525_v54, %v16525_v54  ;;  %v16526_v37 = vld [vmem:[#allocation30_spill] sm:$0xff]  ;;  %v12991_v54 = vld [vmem:[#allocation7 + $0x30] sm:$0xff]  }
 0x62b   :  { %11788 = vmatpush3.bf16.msra.mxu0 %v3785_v28  ;;  %11783 = vmatprep.mubr.msk.bf16.mxu1 %vm13681_vm6, %v16494_v42  ;;  %13316 = vrcp.f32 %v3111_v17  ;;  %v3225_v48 = vpack.c.bf16 %v16526_v37, %v16526_v37  ;;  %v13004_v37 = vld [vmem:[#allocation7 + $0xe8] sm:$0xff]  }
 0x62c   :  { %v13311_v1 = vpop.eup %13310  ;;  %11789 = vmatprep.mubr.msk.bf16.mxu0 %vm13681_vm6, %v16494_v42  ;;  %11793 = vmatprep.subr.bf16.mxu1 %v16494_v42 }
 0x62d   :  { %v3168_v23 = vmul.f32 %v13311_v1, %v14846_v15  ;;  %11799 = vmatprep.subr.bf16.mxu0 %v16494_v42  ;;  %v13313_v5 = vpop.eup %13312  ;;  %v4153_v38 = vsel %vm611_vm7, %v3225_v48, 0  ;;  %v12993_v48 = vld [vmem:[#allocation7 + $0x38] sm:$0xff]  }
 0x62e   :  { %v3171_v15 = vmul.f32 %v13313_v5, %v14848_v27 }
 0x62f   :  { %v3192_v47 = vpack.c.bf16 %v3168_v23, %v3168_v23 }
 0x630   :  { %v3195_v11 = vpack.c.bf16 %v3171_v15, %v3171_v15 }
 0x631   :  { %11784 = vmatmul.mubr.msk.bf16.vlgmr.msra.gmra.mrb[124].mxu1 %vm2916_vm9, %v3192_v47  ;;  %v3108_v6 = vpop.xlane.xlu0 %3107 }
 0x632   :  { %11794 = vmatpush3.bf16.msra.mxu1 %v3831_v44  ;;  %13318 = vrcp.f32 %v3108_v6  ;;  %11790 = vmatmul.mubr.msk.bf16.vlgmr.msra.gmra.mrb[108].mxu0 %vm2916_vm9, %v3193_v41  ;;  %v3117_v50 = vpop.xlane.xlu1 %3116  ;;  %v3227_v41 = vpack.c.bf16 %v14465_v3, %v14465_v3  ;;  %v3228_v3 = vpack.c.bf16 %v14471_v55, %v14471_v55 }
 0x633   :  { %11800 = vmatpush3.bf16.msra.mxu0 %v3877_v18  ;;  %11795 = vmatprep.mubr.msk.bf16.mxu1 %vm13681_vm6, %v16494_v42  ;;  %13320 = vrcp.f32 %v3117_v50  ;;  %v12994_v50 = vld [vmem:[#allocation7 + $0xc0] sm:$0xff]  }
 0x634   :  { %v13315_v30 = vpop.eup %13314  ;;  %11801 = vmatprep.mubr.msk.bf16.mxu0 %vm13681_vm6, %v16494_v42  ;;  %11805 = vmatprep.subr.bf16.mxu1 %v16494_v42  ;;  %v4245_v6 = vsel %vm611_vm7, %v3227_v41, 0  ;;  %v4291_v15 = vsel %vm611_vm7, %v3228_v3, 0 }
 0x635   :  { %v3170_v9 = vmul.f32 %v13315_v30, %v14856_v29  ;;  %11811 = vmatprep.subr.bf16.mxu0 %v16494_v42  ;;  %v13317_v27 = vpop.eup %13316  ;;  %v12978_v30 = vld [vmem:[#allocation7 + $0x40] sm:$0xff]  }
 0x636   :  { %v3173_v29 = vmul.f32 %v13317_v27, %v14858_v26  ;;  %v12981_v27 = vld [vmem:[#allocation7 + $0x8] sm:$0xff]  }
 0x637   :  { %v3194_v60 = vpack.c.bf16 %v3170_v9, %v3170_v9 }
 0x638   :  { %v3197_v31 = vpack.c.bf16 %v3173_v29, %v3173_v29  ;;  %v12995_v29 = vld [vmem:[#allocation7 + $0x80] sm:$0xff]  }
 0x639   :  { %11796 = vmatmul.mubr.msk.bf16.vlgmr.msra.gmra.mrb[128].mxu1 %vm2916_vm9, %v3194_v60  ;;  %v3114_v46 = vpop.xlane.xlu0 %3113 }
 0x63a   :  { %11806 = vmatpush3.bf16.msra.mxu1 %v3923_v57  ;;  %13322 = vrcp.f32 %v3114_v46  ;;  %11802 = vmatmul.mubr.msk.bf16.vlgmr.msra.gmra.mrb[112].mxu0 %vm2916_vm9, %v3195_v11  ;;  %v3123_v40 = vpop.xlane.xlu1 %3122  ;;  %v12980_v11 = vld [vmem:[#allocation7 + $0x48] sm:$0xff]   ;;  %v12982_v57 = vld [vmem:[#allocation7 + $0x50] sm:$0xff]  }
 0x63b   :  { %11812 = vmatpush3.bf16.msra.mxu0 %v3969_v43  ;;  %11807 = vmatprep.mubr.msk.bf16.mxu1 %vm13681_vm6, %v16494_v42  ;;  %13324 = vrcp.f32 %v3123_v40 }
 0x63c   :  { %v13319_v16 = vpop.eup %13318  ;;  %11813 = vmatprep.mubr.msk.bf16.mxu0 %vm13681_vm6, %v16494_v42  ;;  %11817 = vmatprep.subr.bf16.mxu1 %v16494_v42 }
 0x63d   :  { %v3172_v36 = vmul.f32 %v13319_v16, %v14866_v51  ;;  %11823 = vmatprep.subr.bf16.mxu0 %v16494_v42  ;;  %v13321_v26 = vpop.eup %13320  ;;  %v12983_v16 = vld [vmem:[#allocation7 + $0x10] sm:$0xff]  }
 0x63e   :  { %v3175_v25 = vmul.f32 %v13321_v26, %v14868_v34  ;;  %v4107_v34 = vsel %vm611_vm7, %v3224_v14, 0  ;;  %v12988_v26 = vld [vmem:[#allocation7 + $0x68] sm:$0xff]   ;;  %v13003_v14 = vld [vmem:[#allocation7 + $0xa0] sm:$0xff]  }
 0x63f   :  { %v3196_v58 = vpack.c.bf16 %v3172_v36, %v3172_v36  ;;  %v12996_v36 = vld [vmem:[#allocation7 + $0xc8] sm:$0xff]  }
 0x640   :  { %v3199_v1 = vpack.c.bf16 %v3175_v25, %v3175_v25  ;;  %v13002_v25 = vld [vmem:[#allocation7 + $0xe0] sm:$0xff]  }
 0x641   :  { %11808 = vmatmul.mubr.msk.bf16.vlgmr.msra.gmra.mrb[132].mxu1 %vm2916_vm9, %v3196_v58  ;;  %v3120_v59 = vpop.xlane.xlu0 %3119  ;;  %v12998_v58 = vld [vmem:[#allocation7 + $0xd0] sm:$0xff]  }
 0x642   :  { %11818 = vmatpush3.bf16.msra.mxu1 %v4015_v62  ;;  %13326 = vrcp.f32 %v3120_v59  ;;  %11814 = vmatmul.mubr.msk.bf16.vlgmr.msra.gmra.mrb[116].mxu0 %vm2916_vm9, %v3197_v31  ;;  %v12987_v31 = vld [vmem:[#allocation7 + $0x20] sm:$0xff]   ;;  %v13000_v62 = vld [vmem:[#allocation7 + $0xd8] sm:$0xff]   ;;  %v12989_v59 = vld [vmem:[#allocation7 + $0x28] sm:$0xff]  }
 0x643   :  { %11824 = vmatpush3.bf16.msra.mxu0 %v4061_v53  ;;  %11819 = vmatprep.mubr.msk.bf16.mxu1 %vm13681_vm6, %v16494_v42  ;;  %v13001_v53 = vld [vmem:[#allocation7 + $0x98] sm:$0xff]  }
 0x644   :  { %v13323_v51 = vpop.eup %13322  ;;  %11825 = vmatprep.mubr.msk.bf16.mxu0 %vm13681_vm6, %v16494_v42  ;;  %11829 = vmatprep.subr.bf16.mxu1 %v16494_v42 }
 0x645   :  { %v3174_v0 = vmul.f32 %v13323_v51, %v14875_v49  ;;  %11835 = vmatprep.subr.bf16.mxu0 %v16494_v42  ;;  %v13325_v61 = vpop.eup %13324  ;;  %v12990_v51 = vld [vmem:[#allocation7 + $0x70] sm:$0xff]  }
 0x646   :  { %v3177_v23 = vmul.f32 %v13325_v61, %v14877_v35  ;;  %v4199_v35 = vsel %vm611_vm7, %v3226_v10, 0  ;;  %v13007_v61 = vld [vmem:[#allocation7 + $0xb0] sm:$0xff]  }
 0x647   :  { %v3198_v28 = vpack.c.bf16 %v3174_v0, %v3174_v0  ;;  %v12992_v0 = vld [vmem:[#allocation7 + $0x78] sm:$0xff]  }
 0x648   :  { %v3201_v44 = vpack.c.bf16 %v3177_v23, %v3177_v23 }
 0x649   :  { %11820 = vmatmul.mubr.msk.bf16.vlgmr.msra.gmra.mrb[136].mxu1 %vm2916_vm9, %v3198_v28  ;;  %v3126_v17 = vpop.xlane.xlu0 %3125  ;;  %v13005_v28 = vld [vmem:[#allocation7 + $0xa8] sm:$0xff]  }
 0x64a   :  { %11830 = vmatpush3.bf16.msra.mxu1 %v4107_v34  ;;  %13328 = vrcp.f32 %v3126_v17  ;;  %11826 = vmatmul.mubr.msk.bf16.vlgmr.msra.gmra.mrb[120].mxu0 %vm2916_vm9, %v3199_v1  ;;  %v13006_v1 = vld [vmem:[#allocation7 + $0xf0] sm:$0xff]   ;;  %v13008_v34 = vld [vmem:[#allocation7 + $0xf8] sm:$0xff]   ;;  %v16527_v17 = vmov 0.03125|0.03125  }
 0x64b   :  { %11836 = vmatpush3.bf16.msra.mxu0 %v4153_v38  ;;  %11831 = vmatprep.mubr.msk.bf16.mxu1 %vm13681_vm6, %v16494_v42  ;;  %v13009_v38 = vld [vmem:[#allocation7 + $0xb8] sm:$0xff]  }
 0x64c   :  { %v13327_v49 = vpop.eup %13326  ;;  %11837 = vmatprep.mubr.msk.bf16.mxu0 %vm13681_vm6, %v16494_v42  ;;  %11841 = vmatprep.subr.bf16.mxu1 %v16494_v42 }
 0x64d   :  { %v3176_v47 = vmul.f32 %v13327_v49, %v14884_v56  ;;  %11847 = vmatprep.subr.bf16.mxu0 %v16494_v42 }
 0x64f   :  { %v3200_v5 = vpack.c.bf16 %v3176_v47, %v3176_v47 }
 0x651   :  { %11832 = vmatmul.mubr.msk.bf16.vlgmr.msra.gmra.mrb[140].mxu1 %vm2916_vm9, %v3200_v5 }
 0x652   :  { %11838 = vmatmul.mubr.msk.bf16.vlgmr.msra.gmra.mrb[124].mxu0 %vm2916_vm9, %v3201_v44  ;;  %11842 = vmatpush3.bf16.msra.mxu1 %v4199_v35 }
 0x653   :  { %11848 = vmatpush3.bf16.msra.mxu0 %v4245_v6  ;;  %11843 = vmatprep.mubr.msk.bf16.mxu1 %vm13681_vm6, %v16494_v42 }
 0x654   :  { %v13329_v45 = vpop.eup %13328  ;;  %11853 = vmatprep.subr.bf16.mxu1 %v16494_v42  ;;  %11849 = vmatprep.mubr.msk.bf16.mxu0 %vm13681_vm6, %v16494_v42 }
 0x655   :  { %v3178_v56 = vmul.f32 %v13329_v45, %v14888_v8  ;;  %10987 = vmatprep.subr.bf16.mxu0 %v12978_v30 }
 0x657   :  { %v3202_v18 = vpack.c.bf16 %v3178_v56, %v3178_v56 }
 0x659   :  { %11844 = vmatmul.mubr.msk.bf16.vlgmr.msra.gmra.mrb[144].mxu1 %vm2916_vm9, %v3202_v18 }
 0x65a   :  { %11854 = vmatpush3.bf16.msra.mxu1 %v4291_v15  ;;  %11855 = vmatprep.mubr.msk.bf16.mxu1 %vm13681_vm6, %v16494_v42 }
 0x65b   :  { %11021 = vmatprep.subr.bf16.mxu1 %v12994_v50 }
 0x68b   :  { %v3129_v7 = vpop.xlane.xlu1 %3128 }
 0x68c   :  { %13330 = vrcp.f32 %v3129_v7 }
 0x693   :  { %v3132_v9 = vpop.xlane.xlu0 %3131 }
 0x694   :  { %13332 = vrcp.f32 %v3132_v9 }
 0x696   :  { %v13331_v55 = vpop.eup %13330 }
 0x697   :  { %v3179_v8 = vmul.f32 %v13331_v55, %v14902_v4  ;;  %v12985_v4 = vld [vmem:[#allocation7 + $0x18] sm:$0xff]  }
 0x699   :  { %v3203_v60 = vpack.c.bf16 %v3179_v8, %v3179_v8 }
 0x69b   :  { %11850 = vmatmul.mubr.msk.bf16.vlgmr.msra.gmra.mrb[128].mxu0 %vm2916_vm9, %v3203_v60 }
 0x69c   :  { %10988 = vmatpush3.bf16.msra.mxu0 %v12979_v19 }
 0x69d   :  { %10989 = vmatprep.subr.bf16.mxu0 %v12980_v11 }
 0x69e   :  { %v13333_v46 = vpop.eup %13332 }
 0x69f   :  { %v3180_v43 = vmul.f32 %v13333_v46, %v14913_v24  ;;  %v12999_v24 = vld [vmem:[#allocation7 + $0x90] sm:$0xff]  }
 0x6a0   :  { %10990 = vmatpush3.bf16.msra.mxu0 %v12981_v27 }
 0x6a1   :  { %v3204_v40 = vpack.c.bf16 %v3180_v43, %v3180_v43  ;;  %10991 = vmatprep.subr.bf16.mxu0 %v12982_v57 }
 0x6a3   :  { %11856 = vmatmul.mubr.msk.bf16.vlgmr.msra.gmra.mrb[148].mxu1 %vm2916_vm9, %v3204_v40 }
 0x6a4   :  { %10992 = vmatpush3.bf16.msra.mxu0 %v12983_v16  ;;  %11022 = vmatpush3.bf16.msra.mxu1 %v12995_v29 }
 0x6a5   :  { %10993 = vmatprep.subr.bf16.mxu0 %v12984_v33  ;;  %11023 = vmatprep.subr.bf16.mxu1 %v12996_v36 }
 0x6a8   :  { %10994 = vmatpush3.bf16.msra.mxu0 %v12985_v4  ;;  %11024 = vmatpush3.bf16.msra.mxu1 %v12997_v12 }
 0x6a9   :  { %10995 = vmatprep.subr.bf16.mxu0 %v12986_v22  ;;  %11025 = vmatprep.subr.bf16.mxu1 %v12998_v58 }
 0x6ac   :  { %10996 = vmatpush3.bf16.msra.mxu0 %v12987_v31  ;;  %11026 = vmatpush3.bf16.msra.mxu1 %v12999_v24 }
 0x6ad   :  { %10997 = vmatprep.subr.bf16.mxu0 %v12988_v26  ;;  %11027 = vmatprep.subr.bf16.mxu1 %v13000_v62 }
 0x6b0   :  { %10998 = vmatpush3.bf16.msra.mxu0 %v12989_v59  ;;  %11028 = vmatpush3.bf16.msra.mxu1 %v13001_v53 }
 0x6b1   :  { %10999 = vmatprep.subr.bf16.mxu0 %v12990_v51  ;;  %11029 = vmatprep.subr.bf16.mxu1 %v13002_v25 }
 0x6b4   :  { %11000 = vmatpush3.bf16.msra.mxu0 %v12991_v54  ;;  %11030 = vmatpush3.bf16.msra.mxu1 %v13003_v14 }
 0x6b5   :  { %11001 = vmatprep.subr.bf16.mxu0 %v12992_v0  ;;  %11031 = vmatprep.subr.bf16.mxu1 %v13004_v37 }
 0x6b8   :  { %11002 = vmatpush3.bf16.msra.mxu0 %v12993_v48  ;;  %11032 = vmatpush3.bf16.msra.mxu1 %v13005_v28 }
 0x6b9   :  { %11033 = vmatprep.subr.bf16.mxu1 %v13006_v1  ;;  %12671 = vmatprep.subr.bf16.mxu0 %v16527_v17 }
 0x6bc   :  { %11034 = vmatpush3.bf16.msra.mxu1 %v13007_v61 }
 0x6bd   :  { %11035 = vmatprep.subr.bf16.mxu1 %v13008_v34 }
 0x6c0   :  { %11036 = vmatpush3.bf16.msra.mxu1 %v13009_v38 }
 0x6c1   :  { %12687 = vmatprep.subr.bf16.mxu1 %v16527_v17 }
 0x6cc   :  { %v3269_v49 = vpop.f32.mrb[84].mxu0 }
 0x6cd   :  { %v11719_v23 = vpop.f32.mrb[85].mxu0 }
 0x6ce   :  { %v3272_v10 = vpop.f32.mrb[86].mxu0 }
 0x6cf   :  { %v11720_v47 = vpop.f32.mrb[87].mxu0 }
 0x6d5   :  { %v3315_v41 = vpop.f32.mrb[104].mxu1 }
 0x6d6   :  { %v4333_v5 = vpack.c.bf16 %v3315_v41, %v3269_v49  ;;  %v11725_v44 = vpop.f32.mrb[105].mxu1 }
 0x6d7   :  { %v3318_v35 = vpop.f32.mrb[106].mxu1 }
 0x6d8   :  { %v11726_v6 = vpop.f32.mrb[107].mxu1 }
 0x6dd   :  { %v3361_v45 = vpop.f32.mrb[88].mxu0 }
 0x6de   :  { %v11731_v3 = vpop.f32.mrb[89].mxu0 }
 0x6df   :  { %v3364_v56 = vpop.f32.mrb[90].mxu0 }
 0x6e0   :  { %v11732_v18 = vpop.f32.mrb[91].mxu0 }
 0x6e4   :  { %v3407_v30 = vpop.f32.mrb[108].mxu1 }
 0x6e5   :  { %v4337_v15 = vpack.c.bf16 %v3407_v30, %v3361_v45  ;;  %v3453_v50 = vpop.f32.mrb[92].mxu0  ;;  %v11737_v7 = vpop.f32.mrb[109].mxu1 }
 0x6e6   :  { %v11743_v9 = vpop.f32.mrb[93].mxu0  ;;  %v3410_v55 = vpop.f32.mrb[110].mxu1 }
 0x6e7   :  { %v3456_v8 = vpop.f32.mrb[94].mxu0  ;;  %v11738_v19 = vpop.f32.mrb[111].mxu1 }
 0x6e8   :  { %v11744_v60 = vpop.f32.mrb[95].mxu0 }
 0x6ec   :  { %v3499_v11 = vpop.f32.mrb[112].mxu1 }
 0x6ed   :  { %v4341_v27 = vpack.c.bf16 %v3499_v11, %v3453_v50  ;;  %v3545_v57 = vpop.f32.mrb[96].mxu0  ;;  %v11749_v46 = vpop.f32.mrb[113].mxu1 }
 0x6ee   :  { %v11755_v43 = vpop.f32.mrb[97].mxu0  ;;  %v3502_v16 = vpop.f32.mrb[114].mxu1 }
 0x6ef   :  { %v3548_v29 = vpop.f32.mrb[98].mxu0  ;;  %v11750_v40 = vpop.f32.mrb[115].mxu1 }
 0x6f0   :  { %v11756_v33 = vpop.f32.mrb[99].mxu0 }
 0x6f4   :  { %v3591_v36 = vpop.f32.mrb[116].mxu1 }
 0x6f5   :  { %v4334_v4 = vpack.c.bf16 %v3591_v36, %v3545_v57  ;;  %v3637_v12 = vpop.f32.mrb[100].mxu0  ;;  %v11761_v22 = vpop.f32.mrb[117].mxu1 }
 0x6f6   :  { %v11767_v58 = vpop.f32.mrb[101].mxu0  ;;  %v3594_v31 = vpop.f32.mrb[118].mxu1 }
 0x6f7   :  { %v3640_v24 = vpop.f32.mrb[102].mxu0  ;;  %v11762_v26 = vpop.f32.mrb[119].mxu1  ;;  %4640 = vmatprep.mubr.bf16.mxu0 %v4334_v4 }
 0x6f8   :  { %v11768_v62 = vpop.f32.mrb[103].mxu0  ;;  %4641 = vmatmul.mubr.bf16.vlgmr.msra.gmra.mrb[132].mxu0 %v4333_v5 }
 0x6f9   :  { %12672 = vmatpush3.bf16.msra.mxu0 %v16527_v17 }
 0x6fa   :  { %12673 = vmatprep.subr.bf16.mxu0 %v16527_v17 }
 0x6fc   :  { %v3683_v59 = vpop.f32.mrb[120].mxu1 }
 0x6fd   :  { %v4338_v53 = vpack.c.bf16 %v3683_v59, %v3637_v12  ;;  %v3729_v51 = vpop.f32.mrb[104].mxu0  ;;  %v11773_v25 = vpop.f32.mrb[121].mxu1  ;;  %12674 = vmatpush3.bf16.msra.mxu0 %v16527_v17 }
 0x6fe   :  { %v11779_v54 = vpop.f32.mrb[105].mxu0  ;;  %v3686_v14 = vpop.f32.mrb[122].mxu1  ;;  %12675 = vmatprep.subr.bf16.mxu0 %v16527_v17 }
 0x6ff   :  { %v3732_v0 = vpop.f32.mrb[106].mxu0  ;;  %v11774_v37 = vpop.f32.mrb[123].mxu1  ;;  %4648 = vmatprep.mubr.bf16.mxu0 %v4338_v53 }
 0x700   :  { %v11780_v48 = vpop.f32.mrb[107].mxu0  ;;  %4649 = vmatmul.mubr.bf16.gmra.mrb[136].mxu0 %v4337_v15 }
 0x701   :  { %12676 = vmatpush3.bf16.msra.mxu0 %v16527_v17 }
 0x702   :  { %12677 = vmatprep.subr.bf16.mxu0 %v16527_v17 }
 0x704   :  { %v3775_v28 = vpop.f32.mrb[124].mxu1 }
 0x705   :  { %v4342_v1 = vpack.c.bf16 %v3775_v28, %v3729_v51  ;;  %v3821_v61 = vpop.f32.mrb[108].mxu0  ;;  %v11785_v34 = vpop.f32.mrb[125].mxu1  ;;  %12678 = vmatpush3.bf16.msra.mxu0 %v16527_v17 }
 0x706   :  { %v11791_v38 = vpop.f32.mrb[109].mxu0  ;;  %v3778_v49 = vpop.f32.mrb[126].mxu1  ;;  %12679 = vmatprep.subr.bf16.mxu0 %v16527_v17 }
 0x707   :  { %v3824_v23 = vpop.f32.mrb[110].mxu0  ;;  %v11786_v10 = vpop.f32.mrb[127].mxu1  ;;  %4656 = vmatprep.mubr.bf16.mxu0 %v4342_v1 }
 0x708   :  { %v11792_v47 = vpop.f32.mrb[111].mxu0  ;;  %4657 = vmatmul.mubr.bf16.gmra.mrb[140].mxu0 %v4341_v27 }
 0x709   :  { %12680 = vmatpush3.bf16.msra.mxu0 %v16527_v17 }
 0x70a   :  { %12681 = vmatprep.subr.bf16.mxu0 %v16527_v17 }
 0x70c   :  { %v3867_v41 = vpop.f32.mrb[128].mxu1 }
 0x70d   :  { %v4335_v5 = vpack.c.bf16 %v3867_v41, %v3821_v61  ;;  %v3913_v44 = vpop.f32.mrb[112].mxu0  ;;  %v11797_v35 = vpop.f32.mrb[129].mxu1  ;;  %12682 = vmatpush3.bf16.msra.mxu0 %v16527_v17 }
 0x70e   :  { %v11803_v6 = vpop.f32.mrb[113].mxu0  ;;  %v3870_v45 = vpop.f32.mrb[130].mxu1  ;;  %12683 = vmatprep.subr.bf16.mxu0 %v16527_v17 }
 0x70f   :  { %v3916_v3 = vpop.f32.mrb[114].mxu0  ;;  %v11798_v56 = vpop.f32.mrb[131].mxu1 }
 0x710   :  { %v11804_v18 = vpop.f32.mrb[115].mxu0 }
 0x711   :  { %12684 = vmatpush3.bf16.msra.mxu0 %v16527_v17 }
 0x712   :  { %12685 = vmatprep.subr.bf16.mxu0 %v16527_v17 }
 0x714   :  { %v3959_v30 = vpop.f32.mrb[132].mxu1 }
 0x715   :  { %v4339_v15 = vpack.c.bf16 %v3959_v30, %v3913_v44  ;;  %v4005_v50 = vpop.f32.mrb[116].mxu0  ;;  %v11809_v7 = vpop.f32.mrb[133].mxu1  ;;  %12686 = vmatpush3.bf16.msra.mxu0 %v16527_v17 }
 0x716   :  { %v11815_v9 = vpop.f32.mrb[117].mxu0  ;;  %v3962_v55 = vpop.f32.mrb[134].mxu1  ;;  %11941 = vmatprep.subr.bf16.mxu0 %v16494_v42  ;;  %v10576_v7 = vld [vmem:[%s16398_s13] ss:$0 sm:$0xff] }
 0x717   :  { %v4008_v8 = vpop.f32.mrb[118].mxu0  ;;  %v11810_v19 = vpop.f32.mrb[135].mxu1 }
 0x718   :  { %v11816_v60 = vpop.f32.mrb[119].mxu0 }
 0x71c   :  { %v4051_v11 = vpop.f32.mrb[136].mxu1 }
 0x71d   :  { %v4343_v27 = vpack.c.bf16 %v4051_v11, %v4005_v50  ;;  %v4097_v57 = vpop.f32.mrb[120].mxu0  ;;  %v11821_v46 = vpop.f32.mrb[137].mxu1 }
 0x71e   :  { %v11827_v43 = vpop.f32.mrb[121].mxu0  ;;  %v4054_v16 = vpop.f32.mrb[138].mxu1 }
 0x71f   :  { %v4100_v29 = vpop.f32.mrb[122].mxu0  ;;  %v11822_v40 = vpop.f32.mrb[139].mxu1 }
 0x720   :  { %v11828_v33 = vpop.f32.mrb[123].mxu0 }
 0x724   :  { %v4143_v36 = vpop.f32.mrb[140].mxu1 }
 0x725   :  { %v4336_v4 = vpack.c.bf16 %v4143_v36, %v4097_v57  ;;  %v4189_v12 = vpop.f32.mrb[124].mxu0  ;;  %v11833_v22 = vpop.f32.mrb[141].mxu1  ;;  %v16528_v36 = vld [vmem:[#allocation18_spill] sm:$0xff] }
 0x726   :  { %v11839_v58 = vpop.f32.mrb[125].mxu0  ;;  %v4146_v31 = vpop.f32.mrb[142].mxu1  ;;  %v16529_v22 = vld [vmem:[#allocation17_spill] sm:$0xff] }
 0x727   :  { %v4192_v24 = vpop.f32.mrb[126].mxu0  ;;  %v11834_v26 = vpop.f32.mrb[143].mxu1  ;;  %4697 = vmatprep.mubr.bf16.mxu1 %v4336_v4 }
 0x728   :  { %v11840_v62 = vpop.f32.mrb[127].mxu0  ;;  %4698 = vmatmul.mubr.bf16.vlgmr.msra.gmra.mrb[152].mxu1 %v4335_v5 }
 0x729   :  { %12688 = vmatpush3.bf16.msra.mxu1 %v16527_v17 }
 0x72a   :  { %12689 = vmatprep.subr.bf16.mxu1 %v16527_v17 }
 0x72c   :  { %v4235_v59 = vpop.f32.mrb[144].mxu1 }
 0x72d   :  { %v4340_v53 = vpack.c.bf16 %v4235_v59, %v4189_v12  ;;  %v11845_v51 = vpop.f32.mrb[145].mxu1  ;;  %12690 = vmatpush3.bf16.msra.mxu1 %v16527_v17  ;;  %v13010_v12 = vld [vmem:[#allocation9] sm:$0xff]  }
 0x72e   :  { %v4238_v25 = vpop.f32.mrb[146].mxu1  ;;  %12691 = vmatprep.subr.bf16.mxu1 %v16527_v17 }
 0x72f   :  { %v11846_v54 = vpop.f32.mrb[147].mxu1  ;;  %4705 = vmatprep.mubr.bf16.mxu1 %v4340_v53 }
 0x730   :  { %4706 = vmatmul.mubr.bf16.gmra.mrb[156].mxu1 %v4339_v15 }
 0x731   :  { %12692 = vmatpush3.bf16.msra.mxu1 %v16527_v17 }
 0x732   :  { %12693 = vmatprep.subr.bf16.mxu1 %v16527_v17 }
 0x735   :  { %12694 = vmatpush3.bf16.msra.mxu1 %v16527_v17 }
 0x736   :  { %12695 = vmatprep.subr.bf16.mxu1 %v16527_v17 }
 0x739   :  { %12696 = vmatpush3.bf16.msra.mxu1 %v16527_v17 }
 0x73a   :  { %12697 = vmatprep.subr.bf16.mxu1 %v16527_v17 }
 0x73d   :  { %12698 = vmatpush3.bf16.msra.mxu1 %v16527_v17 }
 0x73e   :  { %12699 = vmatprep.subr.bf16.mxu1 %v16527_v17 }
 0x741   :  { %12700 = vmatpush3.bf16.msra.mxu1 %v16527_v17 }
 0x742   :  { %12701 = vmatprep.subr.bf16.mxu1 %v16527_v17 }
 0x745   :  { %12702 = vmatpush3.bf16.msra.mxu1 %v16527_v17 }
 0x746   :  { %11969 = vmatprep.subr.bf16.mxu1 %v16494_v42 }
 0x76e   :  { %v4281_v14 = vpop.f32.mrb[128].mxu0 }
 0x76f   :  { %v11851_v0 = vpop.f32.mrb[129].mxu0 }
 0x770   :  { %v4284_v37 = vpop.f32.mrb[130].mxu0 }
 0x771   :  { %v11852_v48 = vpop.f32.mrb[131].mxu0 }
 0x772   :  { %v16530_v48 = vld [vmem:[#allocation19_spill] sm:$0xff] }
 0x776   :  { %v4327_v28 = vpop.f32.mrb[148].mxu1 }
 0x777   :  { %v4344_v1 = vpack.c.bf16 %v4327_v28, %v4281_v14  ;;  %v11857_v61 = vpop.f32.mrb[149].mxu1 }
 0x778   :  { %v4330_v34 = vpop.f32.mrb[150].mxu1 }
 0x779   :  { %v11858_v38 = vpop.f32.mrb[151].mxu1  ;;  %4713 = vmatprep.mubr.bf16.mxu1 %v4344_v1  ;;  %v16531_v1 = vld [vmem:[#allocation20_spill] sm:$0xff] }
 0x77a   :  { %4714 = vmatmul.mubr.bf16.gmra.mrb[160].mxu1 %v4343_v27 }
 0x7cb   :  { %v11003_v49 = vpop.f32.mrb[132].mxu0 }
 0x7cc   :  { %v11004_v23 = vpop.f32.mrb[133].mxu0 }
 0x7cd   :  { %v11005_v10 = vadd.f32 %v11004_v23, %v11003_v49  ;;  %v11006_v47 = vpop.f32.mrb[134].mxu0 }
 0x7ce   :  { %v11007_v41 = vpop.f32.mrb[135].mxu0 }
 0x7cf   :  { %v11008_v5 = vadd.f32 %v11007_v41, %v11006_v47  ;;  %v4643_v27 = vadd.f32 %v11005_v10, %v10576_v7 }
 0x7d1   :  { %v4646_v16 = vadd.f32 %v11008_v5, %v10576_v7 }
 0x7d3   :  { %v11009_v44 = vpop.f32.mrb[136].mxu0 }
 0x7d4   :  { %v11010_v35 = vpop.f32.mrb[137].mxu0 }
 0x7d5   :  { %v11011_v6 = vadd.f32 %v11010_v35, %v11009_v44  ;;  %v11012_v45 = vpop.f32.mrb[138].mxu0 }
 0x7d6   :  { %v11013_v3 = vpop.f32.mrb[139].mxu0 }
 0x7d7   :  { %v11014_v56 = vadd.f32 %v11013_v3, %v11012_v45  ;;  %v4651_v62 = vadd.f32 %v11011_v6, %v10576_v7  ;;  %v16532_v6 = vld [vmem:[#allocation21_spill] sm:$0xff]  ;;  %v16533_v3 = vld [vmem:[#allocation22_spill] sm:$0xff] }
 0x7d9   :  { %v4654_v54 = vadd.f32 %v11014_v56, %v10576_v7 }
 0x7db   :  { %v11015_v18 = vpop.f32.mrb[140].mxu0 }
 0x7dc   :  { %v11016_v30 = vpop.f32.mrb[141].mxu0 }
 0x7dd   :  { %v11017_v15 = vadd.f32 %v11016_v30, %v11015_v18  ;;  %v11018_v50 = vpop.f32.mrb[142].mxu0 }
 0x7de   :  { %v11019_v9 = vpop.f32.mrb[143].mxu0 }
 0x7df   :  { %v4659_v55 = vadd.f32 %v11017_v15, %v10576_v7  ;;  %v11020_v8 = vadd.f32 %v11019_v9, %v11018_v50  ;;  %v13011_v15 = vld [vmem:[#allocation9 + $0x8] sm:$0xff]   ;;  %v13012_v50 = vld [vmem:[#allocation9 + $0x10] sm:$0xff]   ;;  %v13014_v9 = vld [vmem:[#allocation9 + $0x20] sm:$0xff]  }
 0x7e1   :  { %v4662_v19 = vadd.f32 %v11020_v8, %v10576_v7  ;;  %v13013_v7 = vld [vmem:[#allocation9 + $0x18] sm:$0xff]   ;;  %v13016_v8 = vld [vmem:[#allocation9 + $0x30] sm:$0xff]  }
 0x7fb   :  { %v11037_v60 = vpop.f32.mrb[152].mxu1 }
 0x7fc   :  { %v11038_v11 = vpop.f32.mrb[153].mxu1 }
 0x7fd   :  { %v11039_v57 = vadd.f32 %v11038_v11, %v11037_v60  ;;  %v11040_v46 = vpop.f32.mrb[154].mxu1 }
 0x7fe   :  { %v11041_v43 = vpop.f32.mrb[155].mxu1 }
 0x7ff   :  { %v4700_v29 = vadd.f32 %v11039_v57, %v4643_v27  ;;  %v11042_v40 = vadd.f32 %v11041_v43, %v11040_v46 }
 0x801   :  { %v4703_v33 = vadd.f32 %v11042_v40, %v4646_v16  ;;  %v15118_v4 = vadd.f32 %v4700_v29, %v16528_v36 }
 0x803   :  { %v15121_v58 = vadd.f32 %v4703_v33, %v16529_v22  ;;  %v11043_v31 = vpop.f32.mrb[156].mxu1  ;;  %11891 = vmatprep.mubr.f32.mxu0 %v15118_v4  ;;  %v4825_v24 = vmul.f32 %v15118_v4, %v15118_v4 }
 0x804   :  { %v11044_v26 = vpop.f32.mrb[157].mxu1 }
 0x805   :  { %v4826_v59 = vmul.f32 %v15121_v58, %v15121_v58  ;;  %v11045_v53 = vadd.f32 %v11044_v26, %v11043_v31  ;;  %v11046_v51 = vpop.f32.mrb[158].mxu1  ;;  %11892 = vmatmul.mubr.f32.vlgmr.msra.gmra.mrb[144].mxu0 %v15121_v58  ;;  %11932 = vmatprep.mubr.f32.mxu1 %v4825_v24 }
 0x806   :  { %v11047_v25 = vpop.f32.mrb[159].mxu1  ;;  %11942 = vmatpush3.bf16.msra.mxu0 %v13010_v12 }
 0x807   :  { %v4708_v14 = vadd.f32 %v11045_v53, %v4651_v62  ;;  %v11048_v0 = vadd.f32 %v11047_v25, %v11046_v51  ;;  %11933 = vmatmul.mubr.f32.vlgmr.msra.gmra.mrb[6].mxu1 %v4826_v59  ;;  %11943 = vmatprep.subr.bf16.mxu0 %v16494_v42 }
 0x809   :  { %v4711_v37 = vadd.f32 %v11048_v0, %v4654_v54  ;;  %v15131_v28 = vadd.f32 %v4708_v14, %v16530_v48 }
 0x80a   :  { %11944 = vmatpush3.bf16.msra.mxu0 %v13011_v15 }
 0x80b   :  { %11894 = vmatprep.mubr.f32.mxu0 %v15131_v28  ;;  %v15135_v61 = vadd.f32 %v4711_v37, %v16531_v1  ;;  %v4827_v34 = vmul.f32 %v15131_v28, %v15131_v28  ;;  %11945 = vmatprep.subr.bf16.mxu0 %v16494_v42 }
 0x80d   :  { %11895 = vmatmul.mubr.f32.gmra.mrb[146].mxu0 %v15135_v61  ;;  %11935 = vmatprep.mubr.f32.mxu1 %v4827_v34  ;;  %v4828_v38 = vmul.f32 %v15135_v61, %v15135_v61  ;;  %v10609_v34 = vld [vmem:[%s16399_s14] ss:$0 sm:$0xff] }
 0x80e   :  { %11946 = vmatpush3.bf16.msra.mxu0 %v13012_v50 }
 0x80f   :  { %11936 = vmatmul.mubr.f32.gmra.mrb[164].mxu1 %v4828_v38  ;;  %11947 = vmatprep.subr.bf16.mxu0 %v16494_v42 }
 0x812   :  { %11948 = vmatpush3.bf16.msra.mxu0 %v13013_v7 }
 0x813   :  { %11949 = vmatprep.subr.bf16.mxu0 %v16494_v42 }
 0x816   :  { %11950 = vmatpush3.bf16.msra.mxu0 %v13014_v9 }
 0x817   :  { %11951 = vmatprep.subr.bf16.mxu0 %v16494_v42 }
 0x84d   :  { %v11049_v49 = vpop.f32.mrb[160].mxu1 }
 0x84e   :  { %v11050_v23 = vpop.f32.mrb[161].mxu1 }
 0x84f   :  { %v11051_v10 = vadd.f32 %v11050_v23, %v11049_v49  ;;  %v11052_v47 = vpop.f32.mrb[162].mxu1 }
 0x850   :  { %v11053_v41 = vpop.f32.mrb[163].mxu1 }
 0x851   :  { %v4716_v5 = vadd.f32 %v11051_v10, %v4659_v55  ;;  %v11054_v44 = vadd.f32 %v11053_v41, %v11052_v47  ;;  %v13015_v55 = vld [vmem:[#allocation9 + $0x28] sm:$0xff]   ;;  %v10610_v10 = vld [vmem:[%s16400_s15] ss:$0 sm:$0xff] }
 0x852   :  { %11952 = vmatpush3.bf16.msra.mxu0 %v13015_v55 }
 0x853   :  { %v4719_v35 = vadd.f32 %v11054_v44, %v4662_v19  ;;  %v15143_v45 = vadd.f32 %v4716_v5, %v16532_v6  ;;  %11953 = vmatprep.subr.bf16.mxu0 %v16494_v42  ;;  %v13017_v19 = vld [vmem:[#allocation9 + $0x38] sm:$0xff]  }
 0x855   :  { %11897 = vmatprep.mubr.f32.mxu0 %v15143_v45  ;;  %v15147_v56 = vadd.f32 %v4719_v35, %v16533_v3  ;;  %v4829_v18 = vmul.f32 %v15143_v45, %v15143_v45 }
 0x856   :  { %11954 = vmatpush3.bf16.msra.mxu0 %v13016_v8 }
 0x857   :  { %11898 = vmatmul.mubr.f32.gmra.mrb[148].mxu0 %v15147_v56  ;;  %11938 = vmatprep.mubr.f32.mxu1 %v4829_v18  ;;  %v4830_v30 = vmul.f32 %v15147_v56, %v15147_v56 }
 0x858   :  { %11957 = vmatprep.mubr.msk.bf16.mxu0 %vm13681_vm6, %v16494_v42  ;;  %11955 = vmatprep.subr.bf16.mxu0 %v16494_v42 }
 0x859   :  { %11939 = vmatmul.mubr.f32.gmra.mrb[166].mxu1 %v4830_v30 }
 0x85a   :  { %11985 = vmatprep.mubr.msk.bf16.mxu1 %vm13681_vm6, %v16494_v42  ;;  %11956 = vmatpush3.bf16.msra.mxu0 %v13017_v19 }
 0x85b   :  { %12703 = vmatprep.subr.bf16.mxu0 %v16527_v17 }
 0x8d8   :  { %v11893_v60 = vpop.f32.mrb[144].mxu0 }
 0x8d9   :  { %v4927_v11 = vmul.f32 %v11893_v60, %v11893_v60  ;;  %v4796_v27 = vpop.f32.mrb[145].mxu0  ;;  %v4945_v37 = vsub.f32 %v15121_v58, %v11893_v60 }
 0x8da   :  { %v4926_v57 = vmul.f32 %v4796_v27, %v4796_v27  ;;  %v11934_v46 = vpop.f32.mrb[6].mxu1  ;;  %v4944_v1 = vsub.f32 %v15118_v4, %v4796_v27 }
 0x8db   :  { %v4933_v43 = vsub.f32 %v11934_v46, %v4927_v11  ;;  %v4897_v16 = vpop.f32.mrb[7].mxu1 }
 0x8dc   :  { %v4932_v29 = vsub.f32 %v4897_v16, %v4926_v57 }
 0x8dd   :  { %v4939_v40 = vmax.f32 %v4933_v43, 0.0 }
 0x8de   :  { %v4938_v33 = vmax.f32 %v4932_v29, 0.0 }
 0x8df   :  { %v4951_v36 = vadd.f32 1e-12, %v4939_v40 }
 0x8e0   :  { %v4950_v12 = vadd.f32 1e-12, %v4938_v33  ;;  %v11896_v22 = vpop.f32.mrb[146].mxu0 }
 0x8e1   :  { %13334 = vrsqrt.f32 %v4951_v36  ;;  %v4929_v31 = vmul.f32 %v11896_v22, %v11896_v22  ;;  %v4806_v24 = vpop.f32.mrb[147].mxu0  ;;  %v4947_v44 = vsub.f32 %v15135_v61, %v11896_v22 }
 0x8e2   :  { %13336 = vrsqrt.f32 %v4950_v12  ;;  %v4928_v26 = vmul.f32 %v4806_v24, %v4806_v24  ;;  %v11937_v62 = vpop.f32.mrb[164].mxu1  ;;  %v4946_v35 = vsub.f32 %v15131_v28, %v4806_v24 }
 0x8e3   :  { %v4935_v59 = vsub.f32 %v11937_v62, %v4929_v31  ;;  %v4907_v53 = vpop.f32.mrb[165].mxu1 }
 0x8e4   :  { %v4934_v51 = vsub.f32 %v4907_v53, %v4928_v26 }
 0x8e5   :  { %v4941_v25 = vmax.f32 %v4935_v59, 0.0 }
 0x8e6   :  { %v4940_v54 = vmax.f32 %v4934_v51, 0.0  ;;  %v13018_v51 = vld [vmem:[#allocation10] sm:$0xff]  }
 0x8e7   :  { %v4953_v14 = vadd.f32 1e-12, %v4941_v25  ;;  %11970 = vmatpush3.bf16.msra.mxu1 %v13018_v51  ;;  %v13021_v25 = vld [vmem:[#allocation10 + $0x18] sm:$0xff]  }
 0x8e8   :  { %v4952_v0 = vadd.f32 1e-12, %v4940_v54  ;;  %11971 = vmatprep.subr.bf16.mxu1 %v16494_v42  ;;  %v13022_v54 = vld [vmem:[#allocation10 + $0x20] sm:$0xff]  }
 0x8e9   :  { %13338 = vrsqrt.f32 %v4953_v14  ;;  %v13023_v14 = vld [vmem:[#allocation10 + $0x28] sm:$0xff]  }
 0x8ea   :  { %13340 = vrsqrt.f32 %v4952_v0  ;;  %v13024_v0 = vld [vmem:[#allocation10 + $0x30] sm:$0xff]  }
 0x8eb   :  { %v13335_v48 = vpop.eup %13334 }
 0x8ec   :  { %v13337_v38 = vpop.eup %13336  ;;  %v4963_v49 = vmul.f32 %v13335_v48, %v4945_v37  ;;  %v13025_v37 = vld [vmem:[#allocation10 + $0x38] sm:$0xff]   ;;  %v15225_v48 = vld [vmem:[%s16402_s17] ss:$0 sm:$0xff] }
 0x8ed   :  { %v4962_v23 = vmul.f32 %v13337_v38, %v4944_v1 }
 0x8ee   :  { %v4975_v47 = vmul.f32 %v10609_v34, %v4963_v49 }
 0x8ef   :  { %v4974_v41 = vmul.f32 %v10609_v34, %v4962_v23 }
 0x8f0   :  { %v15173_v5 = vadd.f32 %v10610_v10, %v4975_v47 }
 0x8f1   :  { %v15175_v58 = vadd.f32 %v10610_v10, %v4974_v41 }
 0x8f3   :  { %v13339_v4 = vpop.eup %13338  ;;  %v4992_v6 = vpack.c.bf16 %v15173_v5, %v15175_v58 }
 0x8f4   :  { %v13341_v3 = vpop.eup %13340  ;;  %v4965_v18 = vmul.f32 %v13339_v4, %v4947_v44 }
 0x8f5   :  { %11958 = vmatmul.mubr.bf16.vlgmr.msra.gmra.mrb[152].mxu0 %v4992_v6  ;;  %v4964_v30 = vmul.f32 %v13341_v3, %v4946_v35 }
 0x8f6   :  { %11961 = vmatprep.mubr.msk.bf16.mxu0 %vm13681_vm6, %v16494_v42  ;;  %v4977_v15 = vmul.f32 %v10609_v34, %v4965_v18  ;;  %12704 = vmatpush3.bf16.msra.mxu0 %v16527_v17 }
 0x8f7   :  { %v4976_v50 = vmul.f32 %v10609_v34, %v4964_v30  ;;  %12705 = vmatprep.subr.bf16.mxu0 %v16527_v17 }
 0x8f8   :  { %v15185_v61 = vadd.f32 %v10610_v10, %v4977_v15 }
 0x8f9   :  { %v15187_v7 = vadd.f32 %v10610_v10, %v4976_v50 }
 0x8fa   :  { %12706 = vmatpush3.bf16.msra.mxu0 %v16527_v17 }
 0x8fb   :  { %v4993_v28 = vpack.c.bf16 %v15185_v61, %v15187_v7  ;;  %12707 = vmatprep.subr.bf16.mxu0 %v16527_v17 }
 0x8fd   :  { %11962 = vmatmul.mubr.bf16.gmra.mrb[156].mxu0 %v4993_v28 }
 0x8fe   :  { %11965 = vmatprep.mubr.msk.bf16.mxu0 %vm13681_vm6, %v16494_v42  ;;  %12708 = vmatpush3.bf16.msra.mxu0 %v16527_v17 }
 0x8ff   :  { %12709 = vmatprep.subr.bf16.mxu0 %v16527_v17 }
 0x902   :  { %12710 = vmatpush3.bf16.msra.mxu0 %v16527_v17 }
 0x903   :  { %12711 = vmatprep.subr.bf16.mxu0 %v16527_v17 }
 0x906   :  { %12712 = vmatpush3.bf16.msra.mxu0 %v16527_v17 }
 0x907   :  { %12713 = vmatprep.subr.bf16.mxu0 %v16527_v17 }
 0x90a   :  { %12714 = vmatpush3.bf16.msra.mxu0 %v16527_v17 }
 0x90b   :  { %12715 = vmatprep.subr.bf16.mxu0 %v16527_v17 }
 0x90e   :  { %12716 = vmatpush3.bf16.msra.mxu0 %v16527_v17 }
 0x90f   :  { %12717 = vmatprep.subr.bf16.mxu0 %v16527_v17 }
 0x912   :  { %12718 = vmatpush3.bf16.msra.mxu0 %v16527_v17 }
 0x92a   :  { %v11899_v9 = vpop.f32.mrb[148].mxu0 }
 0x92b   :  { %v4931_v55 = vmul.f32 %v11899_v9, %v11899_v9  ;;  %v4816_v8 = vpop.f32.mrb[149].mxu0  ;;  %v4949_v40 = vsub.f32 %v15147_v56, %v11899_v9  ;;  %v13019_v56 = vld [vmem:[#allocation10 + $0x8] sm:$0xff]  }
 0x92c   :  { %v4930_v19 = vmul.f32 %v4816_v8, %v4816_v8  ;;  %v11940_v60 = vpop.f32.mrb[166].mxu1  ;;  %v4948_v36 = vsub.f32 %v15143_v45, %v4816_v8  ;;  %11972 = vmatpush3.bf16.msra.mxu1 %v13019_v56  ;;  %v13020_v45 = vld [vmem:[#allocation10 + $0x10] sm:$0xff]  }
 0x92d   :  { %v4937_v11 = vsub.f32 %v11940_v60, %v4931_v55  ;;  %v4917_v27 = vpop.f32.mrb[167].mxu1  ;;  %11973 = vmatprep.subr.bf16.mxu1 %v16494_v42 }
 0x92e   :  { %v4936_v57 = vsub.f32 %v4917_v27, %v4930_v19 }
 0x92f   :  { %v4943_v46 = vmax.f32 %v4937_v11, 0.0 }
 0x930   :  { %v4942_v43 = vmax.f32 %v4936_v57, 0.0  ;;  %11974 = vmatpush3.bf16.msra.mxu1 %v13020_v45 }
 0x931   :  { %v4955_v16 = vadd.f32 1e-12, %v4943_v46  ;;  %11975 = vmatprep.subr.bf16.mxu1 %v16494_v42 }
 0x932   :  { %v4954_v29 = vadd.f32 1e-12, %v4942_v43 }
 0x933   :  { %13342 = vrsqrt.f32 %v4955_v16 }
 0x934   :  { %13344 = vrsqrt.f32 %v4954_v29  ;;  %11976 = vmatpush3.bf16.msra.mxu1 %v13021_v25 }
 0x935   :  { %11977 = vmatprep.subr.bf16.mxu1 %v16494_v42 }
 0x938   :  { %11978 = vmatpush3.bf16.msra.mxu1 %v13022_v54 }
 0x939   :  { %11979 = vmatprep.subr.bf16.mxu1 %v16494_v42 }
 0x93c   :  { %11980 = vmatpush3.bf16.msra.mxu1 %v13023_v14 }
 0x93d   :  { %v13343_v33 = vpop.eup %13342  ;;  %11981 = vmatprep.subr.bf16.mxu1 %v16494_v42 }
 0x93e   :  { %v13345_v12 = vpop.eup %13344  ;;  %v4967_v22 = vmul.f32 %v13343_v33, %v4949_v40 }
 0x93f   :  { %v4966_v31 = vmul.f32 %v13345_v12, %v4948_v36 }
 0x940   :  { %v4979_v24 = vmul.f32 %v10609_v34, %v4967_v22  ;;  %11982 = vmatpush3.bf16.msra.mxu1 %v13024_v0 }
 0x941   :  { %v4978_v26 = vmul.f32 %v10609_v34, %v4966_v31  ;;  %11983 = vmatprep.subr.bf16.mxu1 %v16494_v42 }
 0x942   :  { %v15208_v62 = vadd.f32 %v10610_v10, %v4979_v24 }
 0x943   :  { %v15210_v59 = vadd.f32 %v10610_v10, %v4978_v26 }
 0x944   :  { %11984 = vmatpush3.bf16.msra.mxu1 %v13025_v37 }
 0x945   :  { %v4994_v53 = vpack.c.bf16 %v15208_v62, %v15210_v59  ;;  %12719 = vmatprep.subr.bf16.mxu1 %v16527_v17 }
 0x947   :  { %11966 = vmatmul.mubr.bf16.gmra.mrb[160].mxu0 %v4994_v53 }
 0x9c8   :  { %v5100_v1 = vpop.f32.mrb[152].mxu0 }
 0x9c9   :  { %v5101_v34 = vadd.f32 %v15225_v48, %v5100_v1  ;;  %v11959_v38 = vpop.f32.mrb[153].mxu0 }
 0x9ca   :  { %v5103_v49 = vpop.f32.mrb[154].mxu0 }
 0x9cb   :  { %v5129_v23 = vmul.f32 0.044715, %v5101_v34  ;;  %v5104_v10 = vadd.f32 %v15225_v48, %v5103_v49  ;;  %v11960_v47 = vpop.f32.mrb[155].mxu0  ;;  %v5123_v31 = vmul.f32 0.5, %v5101_v34 }
 0x9cd   :  { %v5135_v41 = vmul.f32 %v5129_v23, %v5101_v34  ;;  %v5130_v44 = vmul.f32 0.044715, %v5104_v10  ;;  %v5124_v24 = vmul.f32 0.5, %v5104_v10 }
 0x9cf   :  { %v5141_v4 = vmul.f32 %v5135_v41, %v5101_v34  ;;  %v5136_v35 = vmul.f32 %v5130_v44, %v5104_v10 }
 0x9d0   :  { %v5108_v6 = vpop.f32.mrb[156].mxu0 }
 0x9d1   :  { %v5147_v3 = vadd.f32 %v5141_v4, %v5101_v34  ;;  %v5142_v18 = vmul.f32 %v5136_v35, %v5104_v10  ;;  %v5109_v30 = vadd.f32 %v15225_v48, %v5108_v6  ;;  %v11963_v15 = vpop.f32.mrb[157].mxu0 }
 0x9d2   :  { %v5111_v50 = vpop.f32.mrb[158].mxu0 }
 0x9d3   :  { %v5153_v28 = vmul.f32 0.7978846, %v5147_v3  ;;  %v5148_v9 = vadd.f32 %v5142_v18, %v5104_v10  ;;  %v5131_v55 = vmul.f32 0.044715, %v5109_v30  ;;  %v5112_v8 = vadd.f32 %v15225_v48, %v5111_v50  ;;  %v11964_v19 = vpop.f32.mrb[159].mxu0 }
 0x9d4   :  { %v5125_v14 = vmul.f32 0.5, %v5109_v30 }
 0x9d5   :  { %13346 = vtanh.f32 %v5153_v28  ;;  %v5154_v60 = vmul.f32 0.7978846, %v5148_v9  ;;  %v5137_v11 = vmul.f32 %v5131_v55, %v5109_v30  ;;  %v5132_v27 = vmul.f32 0.044715, %v5112_v8 }
 0x9d6   :  { %v5126_v0 = vmul.f32 0.5, %v5112_v8 }
 0x9d7   :  { %13348 = vtanh.f32 %v5154_v60  ;;  %v5143_v57 = vmul.f32 %v5137_v11, %v5109_v30  ;;  %v5138_v46 = vmul.f32 %v5132_v27, %v5112_v8 }
 0x9d9   :  { %v5144_v43 = vmul.f32 %v5138_v46, %v5112_v8  ;;  %v5149_v16 = vadd.f32 %v5143_v57, %v5109_v30 }
 0x9db   :  { %v5150_v29 = vadd.f32 %v5144_v43, %v5112_v8  ;;  %v5155_v40 = vmul.f32 0.7978846, %v5149_v16  ;;  %v13028_v43 = vld [vmem:[#allocation2 + $0x104] ss:$16 sps:$4 sm:$0xff]   ;;  %v13031_v16 = vld [vmem:[#allocation2 + $0x10c] ss:$16 sps:$4 sm:$0xff]  }
 0x9dc   :  { %5797 = vmatprep.subr.bf16.mxu0 %v13028_v43  ;;  %v13056_v43 = vld [vmem:[#allocation2 + $0x1a0] ss:$16 sps:$4 sm:$0xff]  }
 0x9dd   :  { %v5156_v33 = vmul.f32 0.7978846, %v5150_v29  ;;  %13350 = vtanh.f32 %v5155_v40  ;;  %v10620_v29 = vld [vmem:[%s16404_s19] ss:$0 sm:$0xff] }
 0x9df   :  { %v13347_v36 = vpop.eup %13346  ;;  %13352 = vtanh.f32 %v5156_v33 }
 0x9e0   :  { %v5165_v12 = vadd.f32 1.0, %v13347_v36 }
 0x9e1   :  { %v13349_v22 = vpop.eup %13348 }
 0x9e2   :  { %v5166_v26 = vadd.f32 1.0, %v13349_v22  ;;  %v5171_v53 = vmul.f32 %v5165_v12, %v5123_v31 }
 0x9e4   :  { %v5172_v51 = vmul.f32 %v5166_v26, %v5124_v24  ;;  %v13026_v26 = vld [vmem:[#allocation2 + $0x100] ss:$16 sps:$4 sm:$0xff]  }
 0x9e6   :  { %v5177_v56 = vpack.c.bf16 %v5172_v51, %v5171_v53 }
 0x9e7   :  { %v13351_v45 = vpop.eup %13350 }
 0x9e8   :  { %11986 = vmatmul.mubr.bf16.vlgmr.msra.gmra.mrb[168].mxu1 %v5177_v56  ;;  %v5167_v25 = vadd.f32 1.0, %v13351_v45  ;;  %v13029_v56 = vld [vmem:[#allocation2 + $0x108] ss:$16 sps:$4 sm:$0xff]  }
 0x9e9   :  { %v13353_v54 = vpop.eup %13352  ;;  %11989 = vmatprep.mubr.msk.bf16.mxu1 %vm13681_vm6, %v16494_v42  ;;  %12720 = vmatpush3.bf16.msra.mxu1 %v16527_v17 }
 0x9ea   :  { %v5168_v37 = vadd.f32 1.0, %v13353_v54  ;;  %12721 = vmatprep.subr.bf16.mxu1 %v16527_v17  ;;  %v5173_v1 = vmul.f32 %v5167_v25, %v5125_v14 }
 0x9ec   :  { %v5174_v34 = vmul.f32 %v5168_v37, %v5126_v0 }
 0x9ed   :  { %12722 = vmatpush3.bf16.msra.mxu1 %v16527_v17 }
 0x9ee   :  { %v5178_v38 = vpack.c.bf16 %v5174_v34, %v5173_v1  ;;  %12723 = vmatprep.subr.bf16.mxu1 %v16527_v17 }
 0x9f0   :  { %11990 = vmatmul.mubr.bf16.gmra.mrb[172].mxu1 %v5178_v38 }
 0x9f1   :  { %11993 = vmatprep.mubr.msk.bf16.mxu1 %vm13681_vm6, %v16494_v42  ;;  %12724 = vmatpush3.bf16.msra.mxu1 %v16527_v17 }
 0x9f2   :  { %12725 = vmatprep.subr.bf16.mxu1 %v16527_v17 }
 0x9f5   :  { %12726 = vmatpush3.bf16.msra.mxu1 %v16527_v17 }
 0x9f6   :  { %12727 = vmatprep.subr.bf16.mxu1 %v16527_v17 }
 0x9f9   :  { %12728 = vmatpush3.bf16.msra.mxu1 %v16527_v17 }
 0x9fa   :  { %12729 = vmatprep.subr.bf16.mxu1 %v16527_v17 }
 0x9fd   :  { %12730 = vmatpush3.bf16.msra.mxu1 %v16527_v17 }
 0x9fe   :  { %12731 = vmatprep.subr.bf16.mxu1 %v16527_v17 }
 0xa01   :  { %12732 = vmatpush3.bf16.msra.mxu1 %v16527_v17 }
 0xa02   :  { %12733 = vmatprep.subr.bf16.mxu1 %v16527_v17 }
 0xa05   :  { %12734 = vmatpush3.bf16.msra.mxu1 %v16527_v17 }
 0xa06   :  { %5860 = vmatprep.subr.bf16.mxu1 %v13031_v16  ;;  %v13059_v16 = vld [vmem:[#allocation2 + $0x1a8] ss:$16 sps:$4 sm:$0xff]  }
 0xa1a   :  { %v5116_v49 = vpop.f32.mrb[160].mxu0 }
 0xa1b   :  { %v5117_v23 = vadd.f32 %v15225_v48, %v5116_v49  ;;  %v11967_v10 = vpop.f32.mrb[161].mxu0 }
 0xa1c   :  { %v5119_v47 = vpop.f32.mrb[162].mxu0 }
 0xa1d   :  { %v5133_v41 = vmul.f32 0.044715, %v5117_v23  ;;  %v5120_v44 = vadd.f32 %v15225_v48, %v5119_v47  ;;  %v11968_v4 = vpop.f32.mrb[163].mxu0  ;;  %v5127_v60 = vmul.f32 0.5, %v5117_v23 }
 0xa1f   :  { %v5139_v35 = vmul.f32 %v5133_v41, %v5117_v23  ;;  %v5134_v6 = vmul.f32 0.044715, %v5120_v44  ;;  %v5128_v11 = vmul.f32 0.5, %v5120_v44 }
 0xa21   :  { %v5145_v3 = vmul.f32 %v5139_v35, %v5117_v23  ;;  %v5140_v18 = vmul.f32 %v5134_v6, %v5120_v44  ;;  %v16534_v6 = vmov 0  }
 0xa23   :  { %v5146_v30 = vmul.f32 %v5140_v18, %v5120_v44  ;;  %v5151_v15 = vadd.f32 %v5145_v3, %v5117_v23  ;;  %v13037_v3 = vld [vmem:[#allocation2 + $0x12c] ss:$16 sps:$4 sm:$0xff]   ;;  %v13032_v18 = vld [vmem:[#allocation2 + $0x120] ss:$16 sps:$4 sm:$0xff]  }
 0xa25   :  { %v5152_v50 = vadd.f32 %v5146_v30, %v5120_v44  ;;  %v5157_v28 = vmul.f32 0.7978846, %v5151_v15  ;;  %v13035_v30 = vld [vmem:[#allocation2 + $0x128] ss:$16 sps:$4 sm:$0xff]   ;;  %v13043_v15 = vld [vmem:[#allocation2 + $0x14c] ss:$16 sps:$4 sm:$0xff]  }
 0xa27   :  { %v5158_v9 = vmul.f32 0.7978846, %v5152_v50  ;;  %13354 = vtanh.f32 %v5157_v28  ;;  %v13038_v50 = vld [vmem:[#allocation2 + $0x140] ss:$16 sps:$4 sm:$0xff]   ;;  %v13041_v28 = vld [vmem:[#allocation2 + $0x148] ss:$16 sps:$4 sm:$0xff]  }
 0xa29   :  { %13356 = vtanh.f32 %v5158_v9  ;;  %v13046_v9 = vld [vmem:[#allocation2 + $0x164] ss:$16 sps:$4 sm:$0xff]  }
 0xa31   :  { %v13355_v55 = vpop.eup %13354 }
 0xa32   :  { %v5169_v8 = vadd.f32 1.0, %v13355_v55  ;;  %v13049_v55 = vld [vmem:[#allocation2 + $0x16c] ss:$16 sps:$4 sm:$0xff]  }
 0xa33   :  { %v13357_v19 = vpop.eup %13356 }
 0xa34   :  { %v5170_v27 = vadd.f32 1.0, %v13357_v19  ;;  %v5175_v57 = vmul.f32 %v5169_v8, %v5127_v60  ;;  %v13044_v8 = vld [vmem:[#allocation2 + $0x160] ss:$16 sps:$4 sm:$0xff]   ;;  %v13047_v19 = vld [vmem:[#allocation2 + $0x168] ss:$16 sps:$4 sm:$0xff]  }
 0xa35   :  { %v13052_v60 = vld [vmem:[#allocation2 + $0x184] ss:$16 sps:$4 sm:$0xff]  }
 0xa36   :  { %v5176_v48 = vmul.f32 %v5170_v27, %v5128_v11  ;;  %v13055_v11 = vld [vmem:[#allocation2 + $0x18c] ss:$16 sps:$4 sm:$0xff]   ;;  %v13050_v27 = vld [vmem:[#allocation2 + $0x180] ss:$16 sps:$4 sm:$0xff]  }
 0xa38   :  { %v5179_v46 = vpack.c.bf16 %v5176_v48, %v5175_v57  ;;  %v13053_v57 = vld [vmem:[#allocation2 + $0x188] ss:$16 sps:$4 sm:$0xff]   ;;  %v13058_v48 = vld [vmem:[#allocation2 + $0x1a4] ss:$16 sps:$4 sm:$0xff]  }
 0xa3a   :  { %11994 = vmatmul.mubr.bf16.gmra.mrb[176].mxu1 %v5179_v46  ;;  %v13061_v46 = vld [vmem:[#allocation2 + $0x1ac] ss:$16 sps:$4 sm:$0xff]  }
 0xabb   :  { %v5285_v40 = vpop.f32.mrb[168].mxu1 }
 0xabc   :  { %v5286_v33 = vadd.f32 %v10620_v29, %v5285_v40  ;;  %v11987_v36 = vpop.f32.mrb[169].mxu1  ;;  %v13067_v40 = vld [vmem:[#allocation2 + $0x1cc] ss:$16 sps:$4 sm:$0xff]  }
 0xabd   :  { %v5288_v12 = vpop.f32.mrb[170].mxu1  ;;  %v13065_v36 = vld [vmem:[#allocation2 + $0x1c8] ss:$16 sps:$4 sm:$0xff]  }
 0xabe   :  { %v15256_v22 = vadd.f32 %v5286_v33, %v15175_v58  ;;  %v5289_v31 = vadd.f32 %v10620_v29, %v5288_v12  ;;  %v11988_v24 = vpop.f32.mrb[171].mxu1  ;;  %v13062_v33 = vld [vmem:[#allocation2 + $0x1c0] ss:$16 sps:$4 sm:$0xff]   ;;  %v13070_v12 = vld [vmem:[#allocation2 + $0x1e4] ss:$16 sps:$4 sm:$0xff]  }
 0xabf   :  { %v13068_v24 = vld [vmem:[#allocation2 + $0x1e0] ss:$16 sps:$4 sm:$0xff]  }
 0xac0   :  { %v15259_v53 = vadd.f32 %v5289_v31, %v15173_v5  ;;  %12029 = vmatprep.mubr.f32.mxu0 %v15256_v22  ;;  %v5411_v51 = vmul.f32 %v15256_v22, %v15256_v22  ;;  %v13073_v31 = vld [vmem:[#allocation2 + $0x1ec] ss:$16 sps:$4 sm:$0xff]  }
 0xac2   :  { %v5412_v45 = vmul.f32 %v15259_v53, %v15259_v53  ;;  %12030 = vmatmul.mubr.f32.vlgmr.msra.gmra.mrb[150].mxu0 %v15259_v53  ;;  %12070 = vmatprep.mubr.f32.mxu1 %v5411_v51  ;;  %v13076_v51 = vld [vmem:[#allocation4 + $0x104] ss:$16 sps:$4 sm:$0xff]  }
 0xac3   :  { %v5293_v58 = vpop.f32.mrb[172].mxu1  ;;  %5798 = vmatpush1.bf16.msra.mxu0 %v13026_v26  ;;  %v13071_v26 = vld [vmem:[#allocation2 + $0x1e8] ss:$16 sps:$4 sm:$0xff]  }
 0xac4   :  { %v5294_v25 = vadd.f32 %v10620_v29, %v5293_v58  ;;  %v11991_v54 = vpop.f32.mrb[173].mxu1  ;;  %12071 = vmatmul.mubr.f32.vlgmr.msra.gmra.mrb[180].mxu1 %v5412_v45 }
 0xac5   :  { %v5296_v14 = vpop.f32.mrb[174].mxu1  ;;  %5861 = vmatpush1.bf16.msra.mxu1 %v13029_v56  ;;  %v13079_v56 = vld [vmem:[#allocation4 + $0x10c] ss:$16 sps:$4 sm:$0xff]  }
 0xac6   :  { %v15268_v5 = vadd.f32 %v5294_v25, %v15187_v7  ;;  %v5297_v0 = vadd.f32 %v10620_v29, %v5296_v14  ;;  %v11992_v37 = vpop.f32.mrb[175].mxu1  ;;  %5862 = vmatprep.subr.bf16.mxu1 %v13037_v3 }
 0xac8   :  { %v15271_v1 = vadd.f32 %v5297_v0, %v15185_v61  ;;  %12032 = vmatprep.mubr.f32.mxu0 %v15268_v5  ;;  %v5413_v34 = vmul.f32 %v15268_v5, %v15268_v5 }
 0xac9   :  { %5863 = vmatpush1.bf16.msra.mxu1 %v13035_v30 }
 0xaca   :  { %12033 = vmatmul.mubr.f32.gmra.mrb[164].mxu0 %v15271_v1  ;;  %12073 = vmatprep.mubr.f32.mxu1 %v5413_v34  ;;  %v5414_v38 = vmul.f32 %v15271_v1, %v15271_v1 }
 0xacb   :  { %5864 = vmatprep.subr.bf16.mxu1 %v13043_v15 }
 0xacc   :  { %12074 = vmatmul.mubr.f32.gmra.mrb[182].mxu1 %v5414_v38 }
 0xacd   :  { %5865 = vmatpush1.bf16.msra.mxu1 %v13041_v28 }
 0xace   :  { %5866 = vmatprep.subr.bf16.mxu1 %v13049_v55 }
 0xad1   :  { %5867 = vmatpush1.bf16.msra.mxu1 %v13047_v19 }
 0xad2   :  { %5868 = vmatprep.subr.bf16.mxu1 %v13055_v11  ;;  %v15303_v11 = vld [vmem:[%s16406_s21] ss:$0 sm:$0xff] }
 0xad5   :  { %5869 = vmatpush1.bf16.msra.mxu1 %v13053_v57 }
 0xad6   :  { %5870 = vmatprep.subr.bf16.mxu1 %v13061_v46 }
 0xad9   :  { %5871 = vmatpush1.bf16.msra.mxu1 %v13059_v16 }
 0xada   :  { %5872 = vmatprep.subr.bf16.mxu1 %v13067_v40  ;;  %v13074_v40 = vld [vmem:[#allocation4 + $0x100] ss:$16 sps:$4 sm:$0xff]  }
 0xadd   :  { %5873 = vmatpush1.bf16.msra.mxu1 %v13065_v36 }
 0xade   :  { %5874 = vmatprep.subr.bf16.mxu1 %v13073_v31  ;;  %v13082_v31 = vld [vmem:[#allocation4 + $0x124] ss:$16 sps:$4 sm:$0xff]  }
 0xae1   :  { %5875 = vmatpush1.bf16.msra.mxu1 %v13071_v26 }
 0xae2   :  { %6202 = vmatprep.subr.bf16.mxu1 %v13079_v56  ;;  %v13083_v56 = vld [vmem:[#allocation4 + $0x128] ss:$16 sps:$4 sm:$0xff]  }
 0xb0d   :  { %v5301_v49 = vpop.f32.mrb[176].mxu1 }
 0xb0e   :  { %v5302_v7 = vadd.f32 %v10620_v29, %v5301_v49  ;;  %v11995_v23 = vpop.f32.mrb[177].mxu1 }
 0xb0f   :  { %v5304_v10 = vpop.f32.mrb[178].mxu1 }
 0xb10   :  { %v15280_v47 = vadd.f32 %v5302_v7, %v15210_v59  ;;  %v5305_v61 = vadd.f32 %v10620_v29, %v5304_v10  ;;  %v11996_v41 = vpop.f32.mrb[179].mxu1  ;;  %v13034_v59 = vld [vmem:[#allocation2 + $0x124] ss:$16 sps:$4 sm:$0xff]  }
 0xb11   :  { %5799 = vmatprep.subr.bf16.mxu0 %v13034_v59  ;;  %v13064_v29 = vld [vmem:[#allocation2 + $0x1c4] ss:$16 sps:$4 sm:$0xff]  }
 0xb12   :  { %v15283_v44 = vadd.f32 %v5305_v61, %v15208_v62  ;;  %12035 = vmatprep.mubr.f32.mxu0 %v15280_v47  ;;  %v5415_v4 = vmul.f32 %v15280_v47, %v15280_v47  ;;  %5800 = vmatpush1.bf16.msra.mxu0 %v13032_v18  ;;  %v13040_v62 = vld [vmem:[#allocation2 + $0x144] ss:$16 sps:$4 sm:$0xff]  }
 0xb13   :  { %5801 = vmatprep.subr.bf16.mxu0 %v13040_v62 }
 0xb14   :  { %12036 = vmatmul.mubr.f32.gmra.mrb[166].mxu0 %v15283_v44  ;;  %12076 = vmatprep.mubr.f32.mxu1 %v5415_v4  ;;  %v5416_v35 = vmul.f32 %v15283_v44, %v15283_v44 }
 0xb15   :  { %5829 = vmatprep.mubr.bf16.mxu0 %v16534_v6 }
 0xb16   :  { %12077 = vmatmul.mubr.f32.gmra.mrb[184].mxu1 %v5416_v35  ;;  %5802 = vmatpush1.bf16.msra.mxu0 %v13038_v50 }
 0xb17   :  { %5892 = vmatprep.mubr.bf16.mxu1 %v16534_v6  ;;  %5803 = vmatprep.subr.bf16.mxu0 %v13046_v9 }
 0xb1a   :  { %5804 = vmatpush1.bf16.msra.mxu0 %v13044_v8  ;;  %v15298_v8 = vld [vmem:[%s16405_s20] ss:$0 sm:$0xff] }
 0xb1b   :  { %5805 = vmatprep.subr.bf16.mxu0 %v13052_v60 }
 0xb1e   :  { %5806 = vmatpush1.bf16.msra.mxu0 %v13050_v27 }
 0xb1f   :  { %5807 = vmatprep.subr.bf16.mxu0 %v13058_v48 }
 0xb22   :  { %5808 = vmatpush1.bf16.msra.mxu0 %v13056_v43 }
 0xb23   :  { %5809 = vmatprep.subr.bf16.mxu0 %v13064_v29 }
 0xb26   :  { %5810 = vmatpush1.bf16.msra.mxu0 %v13062_v33  ;;  %v13077_v33 = vld [vmem:[#allocation4 + $0x108] ss:$16 sps:$4 sm:$0xff]  }
 0xb27   :  { %5811 = vmatprep.subr.bf16.mxu0 %v13070_v12 }
 0xb2a   :  { %5812 = vmatpush1.bf16.msra.mxu0 %v13068_v24  ;;  %v13085_v24 = vld [vmem:[#allocation4 + $0x12c] ss:$16 sps:$4 sm:$0xff]  }
 0xb2b   :  { %6139 = vmatprep.subr.bf16.mxu0 %v13076_v51  ;;  %v13080_v51 = vld [vmem:[#allocation4 + $0x120] ss:$16 sps:$4 sm:$0xff]  }
 0xb95   :  { %v12031_v45 = vpop.f32.mrb[150].mxu0 }
 0xb96   :  { %v5513_v58 = vmul.f32 %v12031_v45, %v12031_v45  ;;  %v5382_v25 = vpop.f32.mrb[151].mxu0  ;;  %v5531_v28 = vsub.f32 %v15259_v53, %v12031_v45 }
 0xb97   :  { %v5512_v54 = vmul.f32 %v5382_v25, %v5382_v25  ;;  %v12072_v14 = vpop.f32.mrb[180].mxu1  ;;  %v5530_v55 = vsub.f32 %v15256_v22, %v5382_v25  ;;  %v13091_v25 = vld [vmem:[#allocation4 + $0x14c] ss:$16 sps:$4 sm:$0xff]  }
 0xb98   :  { %v5519_v0 = vsub.f32 %v12072_v14, %v5513_v58  ;;  %v5483_v37 = vpop.f32.mrb[181].mxu1  ;;  %v13088_v58 = vld [vmem:[#allocation4 + $0x144] ss:$16 sps:$4 sm:$0xff]  }
 0xb99   :  { %v5518_v34 = vsub.f32 %v5483_v37, %v5512_v54  ;;  %v13089_v37 = vld [vmem:[#allocation4 + $0x148] ss:$16 sps:$4 sm:$0xff]  }
 0xb9a   :  { %v5525_v38 = vmax.f32 %v5519_v0, 0.0  ;;  %v13086_v0 = vld [vmem:[#allocation4 + $0x140] ss:$16 sps:$4 sm:$0xff]  }
 0xb9b   :  { %v5524_v49 = vmax.f32 %v5518_v34, 0.0  ;;  %v13094_v34 = vld [vmem:[#allocation4 + $0x164] ss:$16 sps:$4 sm:$0xff]  }
 0xb9c   :  { %v5537_v7 = vadd.f32 1e-12, %v5525_v38  ;;  %v13097_v38 = vld [vmem:[#allocation4 + $0x16c] ss:$16 sps:$4 sm:$0xff]  }
 0xb9d   :  { %v5536_v23 = vadd.f32 1e-12, %v5524_v49  ;;  %v12034_v10 = vpop.f32.mrb[164].mxu0  ;;  %v13092_v49 = vld [vmem:[#allocation4 + $0x160] ss:$16 sps:$4 sm:$0xff]  }
 0xb9e   :  { %13358 = vrsqrt.f32 %v5537_v7  ;;  %v5515_v61 = vmul.f32 %v12034_v10, %v12034_v10  ;;  %v5392_v41 = vpop.f32.mrb[165].mxu0  ;;  %v5533_v46 = vsub.f32 %v15271_v1, %v12034_v10  ;;  %v13095_v7 = vld [vmem:[#allocation4 + $0x168] ss:$16 sps:$4 sm:$0xff]   ;;  %v13103_v10 = vld [vmem:[#allocation4 + $0x18c] ss:$16 sps:$4 sm:$0xff]  }
 0xb9f   :  { %13360 = vrsqrt.f32 %v5536_v23  ;;  %v5514_v4 = vmul.f32 %v5392_v41, %v5392_v41  ;;  %v12075_v35 = vpop.f32.mrb[182].mxu1  ;;  %v5532_v16 = vsub.f32 %v15268_v5, %v5392_v41  ;;  %v13100_v23 = vld [vmem:[#allocation4 + $0x184] ss:$16 sps:$4 sm:$0xff]   ;;  %v13101_v41 = vld [vmem:[#allocation4 + $0x188] ss:$16 sps:$4 sm:$0xff]  }
 0xba0   :  { %v5521_v59 = vsub.f32 %v12075_v35, %v5515_v61  ;;  %v5493_v3 = vpop.f32.mrb[183].mxu1  ;;  %v13098_v61 = vld [vmem:[#allocation4 + $0x180] ss:$16 sps:$4 sm:$0xff]   ;;  %v13109_v35 = vld [vmem:[#allocation4 + $0x1ac] ss:$16 sps:$4 sm:$0xff]  }
 0xba1   :  { %v5520_v18 = vsub.f32 %v5493_v3, %v5514_v4  ;;  %v13106_v4 = vld [vmem:[#allocation4 + $0x1a4] ss:$16 sps:$4 sm:$0xff]   ;;  %v13107_v3 = vld [vmem:[#allocation4 + $0x1a8] ss:$16 sps:$4 sm:$0xff]  }
 0xba2   :  { %v5527_v30 = vmax.f32 %v5521_v59, 0.0  ;;  %v13104_v59 = vld [vmem:[#allocation4 + $0x1a0] ss:$16 sps:$4 sm:$0xff]  }
 0xba3   :  { %v5526_v62 = vmax.f32 %v5520_v18, 0.0  ;;  %v13112_v18 = vld [vmem:[#allocation4 + $0x1c4] ss:$16 sps:$4 sm:$0xff]  }
 0xba4   :  { %v5539_v15 = vadd.f32 1e-12, %v5527_v30  ;;  %v13115_v30 = vld [vmem:[#allocation4 + $0x1cc] ss:$16 sps:$4 sm:$0xff]  }
 0xba5   :  { %v5538_v50 = vadd.f32 1e-12, %v5526_v62  ;;  %v13110_v62 = vld [vmem:[#allocation4 + $0x1c0] ss:$16 sps:$4 sm:$0xff]  }
 0xba6   :  { %13362 = vrsqrt.f32 %v5539_v15  ;;  %v13113_v15 = vld [vmem:[#allocation4 + $0x1c8] ss:$16 sps:$4 sm:$0xff]  }
 0xba7   :  { %13364 = vrsqrt.f32 %v5538_v50  ;;  %v13118_v50 = vld [vmem:[#allocation4 + $0x1e4] ss:$16 sps:$4 sm:$0xff]  }
 0xba8   :  { %v13359_v9 = vpop.eup %13358 }
 0xba9   :  { %v13361_v19 = vpop.eup %13360  ;;  %v5549_v60 = vmul.f32 %v13359_v9, %v5531_v28  ;;  %v13121_v28 = vld [vmem:[#allocation4 + $0x1ec] ss:$16 sps:$4 sm:$0xff]   ;;  %v13116_v9 = vld [vmem:[#allocation4 + $0x1e0] ss:$16 sps:$4 sm:$0xff]  }
 0xbaa   :  { %v5548_v27 = vmul.f32 %v13361_v19, %v5530_v55  ;;  %v13119_v55 = vld [vmem:[#allocation4 + $0x1e8] ss:$16 sps:$4 sm:$0xff]   ;;  %v13124_v19 = vld [vmem:[#allocation6 + $0x104] ss:$16 sps:$4 sm:$0xff]  }
 0xbab   :  { %v5561_v57 = vmul.f32 %v15298_v8, %v5549_v60  ;;  %v13127_v60 = vld [vmem:[#allocation6 + $0x10c] ss:$16 sps:$4 sm:$0xff]  }
 0xbac   :  { %v5560_v53 = vmul.f32 %v15298_v8, %v5548_v27 }
 0xbad   :  { %v15308_v48 = vadd.f32 %v15303_v11, %v5561_v57 }
 0xbae   :  { %v15311_v22 = vadd.f32 %v15303_v11, %v5560_v53 }
 0xbaf   :  { %16535 = vst [vmem:[#allocation27_spill] sm:$0xff] %v15308_v48 }
 0xbb0   :  { %16536 = vst [vmem:[#allocation28_spill] sm:$0xff] %v15311_v22  ;;  %v13363_v43 = vpop.eup %13362  ;;  %v15317_v29 = vpack.c.bf16 %v15308_v48, %v15311_v22 }
 0xbb1   :  { %v13365_v36 = vpop.eup %13364  ;;  %v5551_v12 = vmul.f32 %v13363_v43, %v5533_v46 }
 0xbb2   :  { %v5550_v26 = vmul.f32 %v13365_v36, %v5532_v16  ;;  %5830 = vmatmul.mubr.bf16.vlgmr.msra.gmra.mrb[168].mxu0 %v15317_v29  ;;  %5893 = vmatmul.mubr.bf16.vlgmr.msra.gmra.mrb[188].mxu1 %v15317_v29 }
 0xbb3   :  { %v5563_v1 = vmul.f32 %v15298_v8, %v5551_v12  ;;  %5839 = vmatprep.mubr.bf16.mxu0 %v16534_v6  ;;  %5902 = vmatprep.mubr.bf16.mxu1 %v16534_v6 }
 0xbb4   :  { %v5562_v5 = vmul.f32 %v15298_v8, %v5550_v26  ;;  %6140 = vmatpush1.bf16.msra.mxu0 %v13074_v40  ;;  %6203 = vmatpush1.bf16.msra.mxu1 %v13077_v33 }
 0xbb5   :  { %v15326_v45 = vadd.f32 %v15303_v11, %v5563_v1  ;;  %6141 = vmatprep.subr.bf16.mxu0 %v13082_v31  ;;  %6204 = vmatprep.subr.bf16.mxu1 %v13085_v24 }
 0xbb6   :  { %v15329_v54 = vadd.f32 %v15303_v11, %v5562_v5 }
 0xbb7   :  { %16537 = vst [vmem:[#allocation29_spill] sm:$0xff] %v15326_v45 }
 0xbb8   :  { %16538 = vst [vmem:[#allocation30_spill] sm:$0xff] %v15329_v54  ;;  %v15333_v14 = vpack.c.bf16 %v15326_v45, %v15329_v54  ;;  %6142 = vmatpush1.bf16.msra.mxu0 %v13080_v51  ;;  %6205 = vmatpush1.bf16.msra.mxu1 %v13083_v56 }
 0xbb9   :  { %6143 = vmatprep.subr.bf16.mxu0 %v13088_v58  ;;  %6206 = vmatprep.subr.bf16.mxu1 %v13091_v25 }
 0xbba   :  { %5840 = vmatmul.mubr.bf16.gmra.mrb[172].mxu0 %v15333_v14  ;;  %5903 = vmatmul.mubr.bf16.gmra.mrb[192].mxu1 %v15333_v14 }
 0xbbb   :  { %5849 = vmatprep.mubr.bf16.mxu0 %v16534_v6  ;;  %5912 = vmatprep.mubr.bf16.mxu1 %v16534_v6 }
 0xbbc   :  { %6144 = vmatpush1.bf16.msra.mxu0 %v13086_v0  ;;  %6207 = vmatpush1.bf16.msra.mxu1 %v13089_v37 }
 0xbbd   :  { %6145 = vmatprep.subr.bf16.mxu0 %v13094_v34  ;;  %6208 = vmatprep.subr.bf16.mxu1 %v13097_v38 }
 0xbc0   :  { %6146 = vmatpush1.bf16.msra.mxu0 %v13092_v49  ;;  %6209 = vmatpush1.bf16.msra.mxu1 %v13095_v7  ;;  %v13133_v49 = vld [vmem:[#allocation6 + $0x12c] ss:$16 sps:$4 sm:$0xff]   ;;  %v13131_v7 = vld [vmem:[#allocation6 + $0x128] ss:$16 sps:$4 sm:$0xff]  }
 0xbc1   :  { %6147 = vmatprep.subr.bf16.mxu0 %v13100_v23  ;;  %6210 = vmatprep.subr.bf16.mxu1 %v13103_v10  ;;  %v13136_v23 = vld [vmem:[#allocation6 + $0x144] ss:$16 sps:$4 sm:$0xff]   ;;  %v13139_v10 = vld [vmem:[#allocation6 + $0x14c] ss:$16 sps:$4 sm:$0xff]  }
 0xbc4   :  { %6148 = vmatpush1.bf16.msra.mxu0 %v13098_v61  ;;  %6211 = vmatpush1.bf16.msra.mxu1 %v13101_v41  ;;  %v13134_v61 = vld [vmem:[#allocation6 + $0x140] ss:$16 sps:$4 sm:$0xff]   ;;  %v13137_v41 = vld [vmem:[#allocation6 + $0x148] ss:$16 sps:$4 sm:$0xff]  }
 0xbc5   :  { %6149 = vmatprep.subr.bf16.mxu0 %v13106_v4  ;;  %6212 = vmatprep.subr.bf16.mxu1 %v13109_v35  ;;  %v13142_v4 = vld [vmem:[#allocation6 + $0x164] ss:$16 sps:$4 sm:$0xff]   ;;  %v13145_v35 = vld [vmem:[#allocation6 + $0x16c] ss:$16 sps:$4 sm:$0xff]  }
 0xbc8   :  { %6150 = vmatpush1.bf16.msra.mxu0 %v13104_v59  ;;  %6213 = vmatpush1.bf16.msra.mxu1 %v13107_v3  ;;  %v13140_v59 = vld [vmem:[#allocation6 + $0x160] ss:$16 sps:$4 sm:$0xff]   ;;  %v13143_v3 = vld [vmem:[#allocation6 + $0x168] ss:$16 sps:$4 sm:$0xff]  }
 0xbc9   :  { %6151 = vmatprep.subr.bf16.mxu0 %v13112_v18  ;;  %6214 = vmatprep.subr.bf16.mxu1 %v13115_v30  ;;  %v13148_v18 = vld [vmem:[#allocation6 + $0x184] ss:$16 sps:$4 sm:$0xff]   ;;  %v13151_v30 = vld [vmem:[#allocation6 + $0x18c] ss:$16 sps:$4 sm:$0xff]  }
 0xbcc   :  { %6152 = vmatpush1.bf16.msra.mxu0 %v13110_v62  ;;  %6215 = vmatpush1.bf16.msra.mxu1 %v13113_v15  ;;  %v13146_v62 = vld [vmem:[#allocation6 + $0x180] ss:$16 sps:$4 sm:$0xff]   ;;  %v13149_v15 = vld [vmem:[#allocation6 + $0x188] ss:$16 sps:$4 sm:$0xff]  }
 0xbcd   :  { %6153 = vmatprep.subr.bf16.mxu0 %v13118_v50  ;;  %6216 = vmatprep.subr.bf16.mxu1 %v13121_v28  ;;  %v13154_v50 = vld [vmem:[#allocation6 + $0x1a4] ss:$16 sps:$4 sm:$0xff]   ;;  %v13157_v28 = vld [vmem:[#allocation6 + $0x1ac] ss:$16 sps:$4 sm:$0xff]  }
 0xbd0   :  { %6154 = vmatpush1.bf16.msra.mxu0 %v13116_v9  ;;  %6217 = vmatpush1.bf16.msra.mxu1 %v13119_v55  ;;  %v13152_v9 = vld [vmem:[#allocation6 + $0x1a0] ss:$16 sps:$4 sm:$0xff]   ;;  %v13155_v55 = vld [vmem:[#allocation6 + $0x1a8] ss:$16 sps:$4 sm:$0xff]  }
 0xbd1   :  { %6481 = vmatprep.subr.bf16.mxu0 %v13124_v19  ;;  %6544 = vmatprep.subr.bf16.mxu1 %v13127_v60  ;;  %v13160_v19 = vld [vmem:[#allocation6 + $0x1c4] ss:$16 sps:$4 sm:$0xff]   ;;  %v13163_v60 = vld [vmem:[#allocation6 + $0x1cc] ss:$16 sps:$4 sm:$0xff]  }
 0xbe7   :  { %v12037_v27 = vpop.f32.mrb[166].mxu0 }
 0xbe8   :  { %v5517_v57 = vmul.f32 %v12037_v27, %v12037_v27  ;;  %v5402_v53 = vpop.f32.mrb[167].mxu0  ;;  %v5535_v26 = vsub.f32 %v15283_v44, %v12037_v27  ;;  %v13125_v44 = vld [vmem:[#allocation6 + $0x108] ss:$16 sps:$4 sm:$0xff]   ;;  %v13158_v27 = vld [vmem:[#allocation6 + $0x1c0] ss:$16 sps:$4 sm:$0xff]  }
 0xbe9   :  { %v5516_v46 = vmul.f32 %v5402_v53, %v5402_v53  ;;  %v12078_v43 = vpop.f32.mrb[184].mxu1  ;;  %v5534_v5 = vsub.f32 %v15280_v47, %v5402_v53  ;;  %v13122_v47 = vld [vmem:[#allocation6 + $0x100] ss:$16 sps:$4 sm:$0xff]   ;;  %v13166_v53 = vld [vmem:[#allocation6 + $0x1e4] ss:$16 sps:$4 sm:$0xff]  }
 0xbea   :  { %v5523_v16 = vsub.f32 %v12078_v43, %v5517_v57  ;;  %v5503_v40 = vpop.f32.mrb[185].mxu1  ;;  %v13161_v57 = vld [vmem:[#allocation6 + $0x1c8] ss:$16 sps:$4 sm:$0xff]   ;;  %v13164_v43 = vld [vmem:[#allocation6 + $0x1e0] ss:$16 sps:$4 sm:$0xff]  }
 0xbeb   :  { %v5522_v33 = vsub.f32 %v5503_v40, %v5516_v46  ;;  %v13169_v46 = vld [vmem:[#allocation6 + $0x1ec] ss:$16 sps:$4 sm:$0xff]  }
 0xbec   :  { %v5529_v36 = vmax.f32 %v5523_v16, 0.0  ;;  %v13167_v16 = vld [vmem:[#allocation6 + $0x1e8] ss:$16 sps:$4 sm:$0xff]  }
 0xbed   :  { %v5528_v12 = vmax.f32 %v5522_v33, 0.0 }
 0xbee   :  { %v5541_v31 = vadd.f32 1e-12, %v5529_v36 }
 0xbef   :  { %v5540_v24 = vadd.f32 1e-12, %v5528_v12 }
 0xbf0   :  { %13366 = vrsqrt.f32 %v5541_v31 }
 0xbf1   :  { %13368 = vrsqrt.f32 %v5540_v24 }
 0xbfa   :  { %v13367_v1 = vpop.eup %13366 }
 0xbfb   :  { %v13369_v51 = vpop.eup %13368  ;;  %v5553_v56 = vmul.f32 %v13367_v1, %v5535_v26 }
 0xbfc   :  { %v5552_v58 = vmul.f32 %v13369_v51, %v5534_v5 }
 0xbfd   :  { %v5565_v25 = vmul.f32 %v15298_v8, %v5553_v56 }
 0xbfe   :  { %v5564_v0 = vmul.f32 %v15298_v8, %v5552_v58  ;;  %v13130_v8 = vld [vmem:[#allocation6 + $0x124] ss:$16 sps:$4 sm:$0xff]  }
 0xbff   :  { %v15344_v37 = vadd.f32 %v15303_v11, %v5565_v25 }
 0xc00   :  { %v15347_v34 = vadd.f32 %v15303_v11, %v5564_v0  ;;  %v13128_v11 = vld [vmem:[#allocation6 + $0x120] ss:$16 sps:$4 sm:$0xff]  }
 0xc01   :  { %16539 = vst [vmem:[#allocation18_spill] sm:$0xff] %v15344_v37 }
 0xc02   :  { %16540 = vst [vmem:[#allocation17_spill] sm:$0xff] %v15347_v34  ;;  %v15351_v38 = vpack.c.bf16 %v15344_v37, %v15347_v34 }
 0xc04   :  { %5850 = vmatmul.mubr.bf16.gmra.mrb[176].mxu0 %v15351_v38  ;;  %5913 = vmatmul.mubr.bf16.gmra.mrb[196].mxu1 %v15351_v38 }
 0xc05   :  { %6171 = vmatprep.mubr.bf16.mxu0 %v16534_v6  ;;  %6234 = vmatprep.mubr.bf16.mxu1 %v16534_v6 }
 0xc0c   :  { %6172 = vmatmul.mubr.bf16.vlgmr.msra.gmra.mrb[180].mxu0 %v15317_v29  ;;  %6235 = vmatmul.mubr.bf16.vlgmr.msra.gmra.mrb[200].mxu1 %v15317_v29 }
 0xc0d   :  { %6482 = vmatpush1.bf16.msra.mxu0 %v13122_v47  ;;  %6545 = vmatpush1.bf16.msra.mxu1 %v13125_v44 }
 0xc0e   :  { %6483 = vmatprep.subr.bf16.mxu0 %v13130_v8  ;;  %6546 = vmatprep.subr.bf16.mxu1 %v13133_v49 }
 0xc0f   :  { %6181 = vmatprep.mubr.bf16.mxu0 %v16534_v6  ;;  %6244 = vmatprep.mubr.bf16.mxu1 %v16534_v6 }
 0xc11   :  { %6484 = vmatpush1.bf16.msra.mxu0 %v13128_v11  ;;  %6547 = vmatpush1.bf16.msra.mxu1 %v13131_v7  ;;  %v15424_v11 = vld [vmem:[%s16394_s9 + $0x4] sm:$0xf] }
 0xc12   :  { %6485 = vmatprep.subr.bf16.mxu0 %v13136_v23  ;;  %6548 = vmatprep.subr.bf16.mxu1 %v13139_v10  ;;  %v5962_v10 = vrot.slane %v15424_v11, %v14223_v20 }
 0xc14   :  { %6182 = vmatmul.mubr.bf16.gmra.mrb[184].mxu0 %v15333_v14  ;;  %6245 = vmatmul.mubr.bf16.gmra.mrb[204].mxu1 %v15333_v14 }
 0xc15   :  { %6486 = vmatpush1.bf16.msra.mxu0 %v13134_v61  ;;  %6549 = vmatpush1.bf16.msra.mxu1 %v13137_v41  ;;  %v15434_v61 = vrot.slane %v15424_v11, %v14226_v21  ;;  %v15439_v41 = vld [vmem:[%s16491_s4 + $0x4] sm:$0xf] }
 0xc16   :  { %6487 = vmatprep.subr.bf16.mxu0 %v13142_v4  ;;  %6550 = vmatprep.subr.bf16.mxu1 %v13145_v35 }
 0xc17   :  { %6191 = vmatprep.mubr.bf16.mxu0 %v16534_v6  ;;  %6254 = vmatprep.mubr.bf16.mxu1 %v16534_v6 }
 0xc19   :  { %6488 = vmatpush1.bf16.msra.mxu0 %v13140_v59  ;;  %6551 = vmatpush1.bf16.msra.mxu1 %v13143_v3 }
 0xc1a   :  { %6489 = vmatprep.subr.bf16.mxu0 %v13148_v18  ;;  %6552 = vmatprep.subr.bf16.mxu1 %v13151_v30  ;;  %v15447_v30 = vrot.slane %v15439_v41, %v14223_v20 }
 0xc1c   :  { %6192 = vmatmul.mubr.bf16.gmra.mrb[188].mxu0 %v15351_v38  ;;  %6255 = vmatmul.mubr.bf16.gmra.mrb[208].mxu1 %v15351_v38 }
 0xc1d   :  { %6490 = vmatpush1.bf16.msra.mxu0 %v13146_v62  ;;  %6553 = vmatpush1.bf16.msra.mxu1 %v13149_v15 }
 0xc1e   :  { %6491 = vmatprep.subr.bf16.mxu0 %v13154_v50  ;;  %6554 = vmatprep.subr.bf16.mxu1 %v13157_v28 }
 0xc1f   :  { %6513 = vmatprep.mubr.bf16.mxu0 %v16534_v6  ;;  %6576 = vmatprep.mubr.bf16.mxu1 %v16534_v6 }
 0xc21   :  { %6492 = vmatpush1.bf16.msra.mxu0 %v13152_v9  ;;  %6555 = vmatpush1.bf16.msra.mxu1 %v13155_v55 }
 0xc22   :  { %6493 = vmatprep.subr.bf16.mxu0 %v13160_v19  ;;  %6556 = vmatprep.subr.bf16.mxu1 %v13163_v60 }
 0xc25   :  { %6494 = vmatpush1.bf16.msra.mxu0 %v13158_v27  ;;  %6557 = vmatpush1.bf16.msra.mxu1 %v13161_v57 }
 0xc26   :  { %6495 = vmatprep.subr.bf16.mxu0 %v13166_v53  ;;  %6558 = vmatprep.subr.bf16.mxu1 %v13169_v46 }
 0xc29   :  { %6496 = vmatpush1.bf16.msra.mxu0 %v13164_v43  ;;  %6559 = vmatpush1.bf16.msra.mxu1 %v13167_v16 }
 0xc2a   :  { %12079 = vmatprep.subr.bf16.mxu0 %v16494_v42  ;;  %12085 = vmatprep.subr.bf16.mxu1 %v16494_v42 }
 0xc2c   :  { %6514 = vmatmul.mubr.bf16.vlgmr.msra.gmra.mrb[192].mxu0 %v15317_v29  ;;  %6577 = vmatmul.mubr.bf16.vlgmr.msra.gmra.mrb[212].mxu1 %v15317_v29 }
 0xc2d   :  { %6523 = vmatprep.mubr.bf16.mxu0 %v16534_v6  ;;  %6586 = vmatprep.mubr.bf16.mxu1 %v16534_v6 }
 0xc34   :  { %6524 = vmatmul.mubr.bf16.gmra.mrb[196].mxu0 %v15333_v14  ;;  %6587 = vmatmul.mubr.bf16.gmra.mrb[216].mxu1 %v15333_v14 }
 0xc35   :  { %6533 = vmatprep.mubr.bf16.mxu0 %v16534_v6  ;;  %6596 = vmatprep.mubr.bf16.mxu1 %v16534_v6 }
 0xc3c   :  { %6534 = vmatmul.mubr.bf16.gmra.mrb[200].mxu0 %v15351_v38  ;;  %6597 = vmatmul.mubr.bf16.gmra.mrb[220].mxu1 %v15351_v38 }
 0xc3d   :  { %12081 = vmatprep.mubr.msk.bf16.mxu0 %vm13681_vm6, %v16494_v42  ;;  %12087 = vmatprep.mubr.msk.bf16.mxu1 %vm13681_vm6, %v16494_v42 }
 0xc85   :  { %v5831_v29 = vpop.f32.mrb[168].mxu0  ;;  %v15385_v40 = vpop.f32.mrb[188].mxu1 }
 0xc86   :  { %v15387_v33 = vpop.f32.mrb[169].mxu0  ;;  %v15389_v14 = vpop.f32.mrb[189].mxu1  ;;  %v5832_v57 = vadd.f32 %v5831_v29, %v15447_v30 }
 0xc87   :  { %v5835_v36 = vpop.f32.mrb[170].mxu0  ;;  %v15391_v12 = vpop.f32.mrb[190].mxu1 }
 0xc88   :  { %v15393_v6 = vpop.f32.mrb[171].mxu0  ;;  %v15395_v31 = vpop.f32.mrb[191].mxu1  ;;  %v5836_v53 = vadd.f32 %v5835_v36, %v15447_v30 }
 0xc8a   :  { %v6608_v37 = vpack.c.bf16 %v5836_v53, %v5836_v53 }
 0xc8d   :  { %v5841_v24 = vpop.f32.mrb[172].mxu0  ;;  %v15397_v26 = vpop.f32.mrb[192].mxu1 }
 0xc8e   :  { %v15399_v1 = vpop.f32.mrb[173].mxu0  ;;  %v15401_v5 = vpop.f32.mrb[193].mxu1 }
 0xc8f   :  { %v5845_v51 = vpop.f32.mrb[174].mxu0  ;;  %v15403_v56 = vpop.f32.mrb[194].mxu1 }
 0xc90   :  { %v15405_v58 = vpop.f32.mrb[175].mxu0  ;;  %v15407_v25 = vpop.f32.mrb[195].mxu1  ;;  %v5846_v53 = vadd.f32 %v5845_v51, %v15447_v30 }
 0xcd7   :  { %v15409_v0 = vpop.f32.mrb[176].mxu0  ;;  %v15411_v38 = vpop.f32.mrb[196].mxu1 }
 0xcd8   :  { %v15413_v47 = vpop.f32.mrb[177].mxu0  ;;  %v15415_v44 = vpop.f32.mrb[197].mxu1 }
 0xcd9   :  { %v15417_v8 = vpop.f32.mrb[178].mxu0  ;;  %v15419_v49 = vpop.f32.mrb[198].mxu1 }
 0xcda   :  { %v15426_v7 = vpop.f32.mrb[179].mxu0  ;;  %v15428_v23 = vpop.f32.mrb[199].mxu1 }
 0xcdf   :  { %v6173_v4 = vpop.f32.mrb[180].mxu0  ;;  %v15441_v35 = vpop.f32.mrb[200].mxu1 }
 0xce0   :  { %v6174_v59 = vadd.f32 %v6173_v4, %v5962_v10  ;;  %v15443_v3 = vpop.f32.mrb[181].mxu0  ;;  %v6238_v18 = vpop.f32.mrb[201].mxu1 }
 0xce1   :  { %v15450_v62 = vadd.f32 %v6238_v18, %v15434_v61  ;;  %v6177_v15 = vpop.f32.mrb[182].mxu0  ;;  %v15452_v50 = vpop.f32.mrb[202].mxu1  ;;  %v6607_v18 = vpack.c.bf16 %v5832_v57, %v5832_v57  ;;  %v5842_v57 = vadd.f32 %v5841_v24, %v15447_v30 }
 0xce2   :  { %v6631_v28 = vpack.c.bf16 %v6174_v59, %v6174_v59  ;;  %v6178_v9 = vadd.f32 %v6177_v15, %v5962_v10  ;;  %v15454_v55 = vpop.f32.mrb[183].mxu0  ;;  %v6242_v19 = vpop.f32.mrb[203].mxu1 }
 0xce3   :  { %v15457_v60 = vadd.f32 %v6242_v19, %v15434_v61 }
 0xce4   :  { %v6632_v27 = vpack.c.bf16 %v6178_v9, %v6178_v9  ;;  %12080 = vmatpush3.bf16.xpose.msra.mxu0 %v6631_v28 }
 0xce5   :  { %12091 = vmatprep.subr.bf16.mxu0 %v16494_v42 }
 0xce6   :  { %12086 = vmatpush3.bf16.xpose.msra.mxu1 %v6632_v27 }
 0xce7   :  { %v6183_v46 = vpop.f32.mrb[184].mxu0  ;;  %v15462_v43 = vpop.f32.mrb[204].mxu1  ;;  %12097 = vmatprep.subr.bf16.mxu1 %v16494_v42 }
 0xce8   :  { %v6184_v16 = vadd.f32 %v6183_v46, %v5962_v10  ;;  %v15465_v4 = vpop.f32.mrb[185].mxu0  ;;  %v6248_v59 = vpop.f32.mrb[205].mxu1 }
 0xce9   :  { %v15468_v15 = vadd.f32 %v6248_v59, %v15434_v61  ;;  %v6187_v28 = vpop.f32.mrb[186].mxu0  ;;  %v15470_v29 = vpop.f32.mrb[206].mxu1 }
 0xcea   :  { %v6633_v9 = vpack.c.bf16 %v6184_v16, %v6184_v16  ;;  %v6188_v19 = vadd.f32 %v6187_v28, %v5962_v10  ;;  %v15472_v27 = vpop.f32.mrb[187].mxu0  ;;  %v6252_v36 = vpop.f32.mrb[207].mxu1 }
 0xceb   :  { %v15475_v34 = vadd.f32 %v6252_v36, %v15434_v61  ;;  %12082 = vmatmul.mubr.bf16.vlgmr.msra.gmra.mrb[204].mxu0 %v6607_v18 }
 0xcec   :  { %v6634_v46 = vpack.c.bf16 %v6188_v19, %v6188_v19  ;;  %12092 = vmatpush3.bf16.xpose.msra.mxu0 %v6633_v9  ;;  %12093 = vmatprep.mubr.msk.bf16.mxu0 %vm13681_vm6, %v16494_v42  ;;  %v6609_v19 = vpack.c.bf16 %v5842_v57, %v5842_v57 }
 0xced   :  { %12088 = vmatmul.mubr.bf16.vlgmr.msra.gmra.mrb[224].mxu1 %v6608_v37  ;;  %12103 = vmatprep.subr.bf16.mxu0 %v16494_v42 }
 0xcee   :  { %12098 = vmatpush3.bf16.xpose.msra.mxu1 %v6634_v46  ;;  %12099 = vmatprep.mubr.msk.bf16.mxu1 %vm13681_vm6, %v16494_v42  ;;  %v16541_v46 = vld [vmem:[#allocation25_spill] sm:$0xff] }
 0xcef   :  { %v6193_v16 = vpop.f32.mrb[188].mxu0  ;;  %v15484_v59 = vpop.f32.mrb[208].mxu1  ;;  %12109 = vmatprep.subr.bf16.mxu1 %v16494_v42  ;;  %v15496_v45 = vrot.slane %v15424_v11, %v16541_v46 }
 0xcf0   :  { %v6194_v18 = vadd.f32 %v6193_v16, %v5962_v10  ;;  %v15487_v28 = vpop.f32.mrb[189].mxu0  ;;  %v6258_v9 = vpop.f32.mrb[209].mxu1  ;;  %v6610_v16 = vpack.c.bf16 %v5846_v53, %v5846_v53 }
 0xcf1   :  { %v15490_v37 = vadd.f32 %v6258_v9, %v15434_v61  ;;  %v6197_v24 = vpop.f32.mrb[190].mxu0  ;;  %v15492_v36 = vpop.f32.mrb[210].mxu1  ;;  %v5852_v9 = vadd.f32 %v15409_v0, %v15447_v30  ;;  %v15519_v0 = vrot.slane %v15439_v41, %v16541_v46 }
 0xcf2   :  { %v6635_v51 = vpack.c.bf16 %v6194_v18, %v6194_v18  ;;  %v6198_v54 = vadd.f32 %v6197_v24, %v5962_v10  ;;  %v15498_v48 = vpop.f32.mrb[191].mxu0  ;;  %v6262_v22 = vpop.f32.mrb[211].mxu1  ;;  %v6176_v10 = vadd.f32 %v15443_v3, %v15496_v45  ;;  %v10697_v3 = vld [vmem:[%s16396_s11 + $0x4] sm:$0xf] }
 0xcf3   :  { %v15501_v17 = vadd.f32 %v6262_v22, %v15434_v61  ;;  %12094 = vmatmul.mubr.bf16.vlgmr.msra.gmra.mrb[208].mxu0 %v6609_v19  ;;  %v5856_v22 = vadd.f32 %v15417_v8, %v15447_v30  ;;  %v6611_v61 = vpack.c.bf16 %v5852_v9, %v5852_v9  ;;  %v15525_v8 = vrot.slane %v10697_v3, %v14308_v2 }
 0xcf4   :  { %v6636_v57 = vpack.c.bf16 %v6198_v54, %v6198_v54  ;;  %12104 = vmatpush3.bf16.xpose.msra.mxu0 %v6635_v51  ;;  %12105 = vmatprep.mubr.msk.bf16.mxu0 %vm13681_vm6, %v16494_v42  ;;  %v6180_v54 = vadd.f32 %v15454_v55, %v15496_v45  ;;  %v6637_v53 = vpack.c.bf16 %v6176_v10, %v6176_v10 }
 0xcf5   :  { %12100 = vmatmul.mubr.bf16.vlgmr.msra.gmra.mrb[228].mxu1 %v6610_v16  ;;  %12115 = vmatprep.subr.bf16.mxu0 %v16494_v42  ;;  %v6612_v18 = vpack.c.bf16 %v5856_v22, %v5856_v22  ;;  %v5834_v30 = vadd.f32 %v15387_v33, %v15519_v0  ;;  %v15532_v55 = vrot.slane %v10697_v3, %v16541_v46 }
 0xcf6   :  { %12110 = vmatpush3.bf16.xpose.msra.mxu1 %v6636_v57  ;;  %12111 = vmatprep.mubr.msk.bf16.mxu1 %vm13681_vm6, %v16494_v42  ;;  %v6638_v19 = vpack.c.bf16 %v6180_v54, %v6180_v54  ;;  %v15535_v24 = vrot.slane %v10697_v3, %v14226_v21  ;;  %v6186_v51 = vadd.f32 %v15465_v4, %v15496_v45 }
 0xcf7   :  { %12121 = vmatprep.subr.bf16.mxu1 %v16494_v42  ;;  %v5838_v16 = vadd.f32 %v15393_v6, %v15519_v0  ;;  %v6190_v46 = vadd.f32 %v15472_v27, %v15496_v45  ;;  %v6613_v22 = vpack.c.bf16 %v5834_v30, %v5834_v30 }
 0xcfb   :  { %12106 = vmatmul.mubr.bf16.vlgmr.msra.gmra.mrb[212].mxu0 %v6611_v61 }
 0xcfc   :  { %12116 = vmatpush3.bf16.xpose.msra.mxu0 %v6637_v53  ;;  %12117 = vmatprep.mubr.msk.bf16.mxu0 %vm13681_vm6, %v16494_v42 }
 0xcfd   :  { %12112 = vmatmul.mubr.bf16.vlgmr.msra.gmra.mrb[232].mxu1 %v6612_v18  ;;  %12127 = vmatprep.subr.bf16.mxu0 %v16494_v42  ;;  %v6639_v18 = vpack.c.bf16 %v6186_v51, %v6186_v51  ;;  %v5844_v51 = vadd.f32 %v15399_v1, %v15519_v0  ;;  %v6200_v1 = vadd.f32 %v15498_v48, %v15496_v45 }
 0xcfe   :  { %12122 = vmatpush3.bf16.xpose.msra.mxu1 %v6638_v19  ;;  %12123 = vmatprep.mubr.msk.bf16.mxu1 %vm13681_vm6, %v16494_v42  ;;  %v15600_v48 = vrot.slane %v15424_v11, %v14308_v2  ;;  %v5854_v11 = vadd.f32 %v15413_v47, %v15519_v0 }
 0xcff   :  { %v15544_v33 = vpop.f32.mrb[192].mxu0  ;;  %v6578_v57 = vpop.f32.mrb[212].mxu1  ;;  %12133 = vmatprep.subr.bf16.mxu1 %v16494_v42 }
 0xd00   :  { %v15550_v9 = vadd.f32 %v6578_v57, %v15525_v8  ;;  %v6517_v10 = vpop.f32.mrb[193].mxu0  ;;  %v6580_v4 = vpop.f32.mrb[213].mxu1  ;;  %v6614_v57 = vpack.c.bf16 %v5838_v16, %v5838_v16  ;;  %v6196_v16 = vadd.f32 %v15487_v28, %v15496_v45  ;;  %v6241_v47 = vadd.f32 %v15452_v50, %v15600_v48 }
 0xd01   :  { %v15553_v54 = vadd.f32 %v6517_v10, %v15532_v55  ;;  %v15556_v61 = vadd.f32 %v6580_v4, %v15535_v24  ;;  %v15558_v6 = vpop.f32.mrb[194].mxu0  ;;  %v6582_v53 = vpop.f32.mrb[214].mxu1  ;;  %v6640_v10 = vpack.c.bf16 %v6190_v46, %v6190_v46  ;;  %v15577_v4 = vrot.slane %v10697_v3, %v14223_v20 }
 0xd02   :  { %16542 = vst [vmem:[#allocation19_spill] sm:$0xff] %v15550_v9  ;;  %v15561_v19 = vadd.f32 %v6582_v53, %v15525_v8  ;;  %v6521_v27 = vpop.f32.mrb[195].mxu0  ;;  %v6584_v63 = vpop.f32.mrb[215].mxu1  ;;  %v6641_v45 = vpack.c.bf16 %v6196_v16, %v6196_v16  ;;  %v6237_v16 = vadd.f32 %v15441_v35, %v15600_v48 }
 0xd03   :  { %16543 = vst [vmem:[#allocation20_spill] sm:$0xff] %v15556_v61  ;;  %v15564_v9 = vadd.f32 %v6521_v27, %v15532_v55  ;;  %v15567_v30 = vadd.f32 %v6584_v63, %v15535_v24  ;;  %12118 = vmatmul.mubr.bf16.vlgmr.msra.gmra.mrb[216].mxu0 %v6613_v22  ;;  %v5848_v63 = vadd.f32 %v15405_v58, %v15519_v0 }
 0xd04   :  { %12128 = vmatpush3.bf16.xpose.msra.mxu0 %v6639_v18  ;;  %12129 = vmatprep.mubr.msk.bf16.mxu0 %vm13681_vm6, %v16494_v42  ;;  %v6615_v18 = vpack.c.bf16 %v5844_v51, %v5844_v51 }
 0xd05   :  { %16544 = vst [vmem:[#allocation21_spill] sm:$0xff] %v15567_v30  ;;  %12124 = vmatmul.mubr.bf16.vlgmr.msra.gmra.mrb[236].mxu1 %v6614_v57  ;;  %12139 = vmatprep.subr.bf16.mxu0 %v16494_v42 }
 0xd06   :  { %12134 = vmatpush3.bf16.xpose.msra.mxu1 %v6640_v10  ;;  %12135 = vmatprep.mubr.msk.bf16.mxu1 %vm13681_vm6, %v16494_v42 }
 0xd07   :  { %v6525_v46 = vpop.f32.mrb[196].mxu0  ;;  %v6588_v22 = vpop.f32.mrb[216].mxu1  ;;  %12145 = vmatprep.subr.bf16.mxu1 %v16494_v42 }
 0xd08   :  { %v15587_v53 = vadd.f32 %v6525_v46, %v15577_v4  ;;  %v15590_v20 = vadd.f32 %v6588_v22, %v15525_v8  ;;  %v6527_v28 = vpop.f32.mrb[197].mxu0  ;;  %v6590_v3 = vpop.f32.mrb[217].mxu1 }
 0xd09   :  { %v15593_v27 = vadd.f32 %v6527_v28, %v15532_v55  ;;  %v15596_v58 = vadd.f32 %v6590_v3, %v15535_v24  ;;  %v6529_v57 = vpop.f32.mrb[198].mxu0  ;;  %v6592_v10 = vpop.f32.mrb[218].mxu1  ;;  %v6616_v28 = vpack.c.bf16 %v5848_v63, %v5848_v63 }
 0xd0a   :  { %v15603_v46 = vadd.f32 %v6529_v57, %v15577_v4  ;;  %v15606_v22 = vadd.f32 %v6592_v10, %v15525_v8  ;;  %v6531_v51 = vpop.f32.mrb[199].mxu0  ;;  %v6594_v30 = vpop.f32.mrb[219].mxu1  ;;  %v5628_v10 = vrot.slane %v15439_v41, %v14308_v2 }
 0xd0b   :  { %16545 = vst [vmem:[#allocation22_spill] sm:$0xff] %v15596_v58  ;;  %v15609_v61 = vadd.f32 %v6531_v51, %v15532_v55  ;;  %v15612_v3 = vadd.f32 %v6594_v30, %v15535_v24  ;;  %12130 = vmatmul.mubr.bf16.vlgmr.msra.gmra.mrb[220].mxu0 %v6615_v18  ;;  %v6642_v58 = vpack.c.bf16 %v6200_v1, %v6200_v1 }
 0xd0c   :  { %16546 = vst [vmem:[#allocation25_spill] sm:$0xff] %v15606_v22  ;;  %12140 = vmatpush3.bf16.xpose.msra.mxu0 %v6641_v45  ;;  %12141 = vmatprep.mubr.msk.bf16.mxu0 %vm13681_vm6, %v16494_v42  ;;  %v5858_v30 = vadd.f32 %v15426_v7, %v15519_v0  ;;  %v6617_v45 = vpack.c.bf16 %v5854_v11, %v5854_v11 }
 0xd0d   :  { %16547 = vst [vmem:[#allocation48_spill] sm:$0xff] %v15612_v3  ;;  %12136 = vmatmul.mubr.bf16.vlgmr.msra.gmra.mrb[240].mxu1 %v6616_v28  ;;  %12151 = vmatprep.subr.bf16.mxu0 %v16494_v42  ;;  %v6643_v28 = vpack.c.bf16 %v6237_v16, %v6237_v16  ;;  %v5895_v16 = vadd.f32 %v15385_v40, %v5628_v10 }
 0xd0e   :  { %12146 = vmatpush3.bf16.xpose.msra.mxu1 %v6642_v58  ;;  %12147 = vmatprep.mubr.msk.bf16.mxu1 %vm13681_vm6, %v16494_v42  ;;  %v6618_v22 = vpack.c.bf16 %v5858_v30, %v5858_v30 }
 0xd0f   :  { %v6535_v63 = vpop.f32.mrb[200].mxu0  ;;  %v6598_v1 = vpop.f32.mrb[220].mxu1  ;;  %12157 = vmatprep.subr.bf16.mxu1 %v16494_v42 }
 0xd10   :  { %v15629_v18 = vadd.f32 %v6535_v63, %v15577_v4  ;;  %v15632_v57 = vadd.f32 %v6598_v1, %v15525_v8  ;;  %v6537_v35 = vpop.f32.mrb[201].mxu0  ;;  %v6600_v58 = vpop.f32.mrb[221].mxu1 }
 0xd11   :  { %v15637_v7 = vadd.f32 %v6537_v35, %v15532_v55  ;;  %v15640_v0 = vadd.f32 %v6600_v58, %v15535_v24  ;;  %v6539_v51 = vpop.f32.mrb[202].mxu0  ;;  %v6602_v50 = vpop.f32.mrb[222].mxu1  ;;  %v6644_v35 = vpack.c.bf16 %v6241_v47, %v6241_v47  ;;  %v6261_v47 = vadd.f32 %v15492_v36, %v15600_v48 }
 0xd12   :  { %16548 = vst [vmem:[#allocation49_spill] sm:$0xff] %v15632_v57  ;;  %v15643_v63 = vadd.f32 %v6539_v51, %v15577_v4  ;;  %v15646_v1 = vadd.f32 %v6602_v50, %v15525_v8  ;;  %v6541_v3 = vpop.f32.mrb[203].mxu0  ;;  %v6604_v57 = vpop.f32.mrb[223].mxu1  ;;  %v6247_v8 = vadd.f32 %v15462_v43, %v15600_v48  ;;  %v5905_v43 = vadd.f32 %v15397_v26, %v5628_v10 }
 0xd13   :  { %v15649_v2 = vadd.f32 %v6541_v3, %v15532_v55  ;;  %v15652_v11 = vadd.f32 %v6604_v57, %v15535_v24  ;;  %12142 = vmatmul.mubr.bf16.vlgmr.msra.gmra.mrb[224].mxu0 %v6617_v45  ;;  %v5899_v55 = vadd.f32 %v15391_v12, %v5628_v10  ;;  %v6251_v24 = vadd.f32 %v15470_v29, %v15600_v48 }
 0xd14   :  { %12152 = vmatpush3.bf16.xpose.msra.mxu0 %v6643_v28  ;;  %12153 = vmatprep.mubr.msk.bf16.mxu0 %vm13681_vm6, %v16494_v42  ;;  %v6619_v3 = vpack.c.bf16 %v5895_v16, %v5895_v16  ;;  %v6645_v30 = vpack.c.bf16 %v6247_v8, %v6247_v8  ;;  %v6257_v12 = vadd.f32 %v15484_v59, %v15600_v48 }
 0xd15   :  { %12148 = vmatmul.mubr.bf16.vlgmr.msra.gmra.mrb[244].mxu1 %v6618_v22  ;;  %12163 = vmatprep.subr.bf16.mxu0 %v16494_v42  ;;  %v6620_v40 = vpack.c.bf16 %v5899_v55, %v5899_v55  ;;  %v6646_v22 = vpack.c.bf16 %v6251_v24, %v6251_v24  ;;  %v5909_v29 = vadd.f32 %v15403_v56, %v5628_v10 }
 0xd16   :  { %12158 = vmatpush3.bf16.xpose.msra.mxu1 %v6644_v35  ;;  %12159 = vmatprep.mubr.msk.bf16.mxu1 %vm13681_vm6, %v16494_v42  ;;  %v6621_v57 = vpack.c.bf16 %v5905_v43, %v5905_v43  ;;  %v6647_v58 = vpack.c.bf16 %v6257_v12, %v6257_v12  ;;  %v6648_v45 = vpack.c.bf16 %v6261_v47, %v6261_v47 }
 0xd17   :  { %12169 = vmatprep.subr.bf16.mxu1 %v16494_v42  ;;  %v6622_v26 = vpack.c.bf16 %v5909_v29, %v5909_v29  ;;  %v5915_v59 = vadd.f32 %v15411_v38, %v5628_v10  ;;  %v5919_v56 = vadd.f32 %v15419_v49, %v5628_v10  ;;  %v5632_v36 = vrot.slane %v15439_v41, %v14226_v21 }
 0xd18   :  { %v6649_v51 = vpack.c.bf16 %v15450_v62, %v15450_v62  ;;  %v6650_v38 = vpack.c.bf16 %v15457_v60, %v15457_v60  ;;  %v6651_v62 = vpack.c.bf16 %v15468_v15, %v15468_v15  ;;  %v6516_v35 = vadd.f32 %v15544_v33, %v15577_v4 }
 0xd19   :  { %v6623_v48 = vpack.c.bf16 %v5915_v59, %v5915_v59  ;;  %v6624_v50 = vpack.c.bf16 %v5919_v56, %v5919_v56  ;;  %v5897_v49 = vadd.f32 %v15389_v14, %v5632_v36  ;;  %v5901_v21 = vadd.f32 %v15395_v31, %v5632_v36  ;;  %v16549_v59 = vld [vmem:[#allocation23_spill] sm:$0xff] }
 0xd1a   :  { %v6652_v14 = vpack.c.bf16 %v15475_v34, %v15475_v34  ;;  %v5907_v10 = vadd.f32 %v15401_v5, %v5632_v36  ;;  %v5911_v31 = vadd.f32 %v15407_v25, %v5632_v36  ;;  %v6653_v34 = vpack.c.bf16 %v15490_v37, %v15490_v37 }
 0xd1b   :  { %12154 = vmatmul.mubr.bf16.vlgmr.msra.gmra.mrb[228].mxu0 %v6619_v3  ;;  %v6625_v41 = vpack.c.bf16 %v5897_v49, %v5897_v49  ;;  %v6626_v60 = vpack.c.bf16 %v5901_v21, %v5901_v21  ;;  %v6654_v5 = vpack.c.bf16 %v15501_v17, %v15501_v17  ;;  %v5917_v25 = vadd.f32 %v15415_v44, %v5632_v36  ;;  %v16550_v21 = vld [vmem:[#allocation26_spill] sm:$0xff] }
 0xd1c   :  { %12164 = vmatpush3.bf16.xpose.msra.mxu0 %v6645_v30  ;;  %12165 = vmatprep.mubr.msk.bf16.mxu0 %vm13681_vm6, %v16494_v42  ;;  %v6627_v15 = vpack.c.bf16 %v5907_v10, %v5907_v10  ;;  %v6628_v28 = vpack.c.bf16 %v5911_v31, %v5911_v31  ;;  %v6520_v16 = vadd.f32 %v15558_v6, %v15577_v4  ;;  %v16551_v10 = vld [vmem:[#allocation31_spill] sm:$0xff] }
 0xd1d   :  { %12160 = vmatmul.mubr.bf16.vlgmr.msra.gmra.mrb[248].mxu1 %v6620_v40  ;;  %12175 = vmatprep.subr.bf16.mxu0 %v16494_v42  ;;  %v5921_v37 = vadd.f32 %v15428_v23, %v5632_v36  ;;  %v7903_v33 = vpack.c.bf16 %v6516_v35, %v6516_v35  ;;  %v6629_v17 = vpack.c.bf16 %v5917_v25, %v5917_v25 }
 0xd1e   :  { %12170 = vmatpush3.bf16.xpose.msra.mxu1 %v6646_v22  ;;  %12171 = vmatprep.mubr.msk.bf16.mxu1 %vm13681_vm6, %v16494_v42  ;;  %v7904_v8 = vpack.c.bf16 %v6520_v16, %v6520_v16 }
 0xd1f   :  { %12181 = vmatprep.subr.bf16.mxu1 %v16494_v42  ;;  %v6630_v55 = vpack.c.bf16 %v5921_v37, %v5921_v37  ;;  %v7931_v44 = vsel %vm611_vm7, %v7903_v33, 0  ;;  %v16552_v37 = vld [vmem:[#allocation24_spill] sm:$0xff] }
 0xd20   :  { %v7977_v6 = vsel %vm611_vm7, %v7904_v8, 0 }
 0xd23   :  { %12166 = vmatmul.mubr.bf16.vlgmr.msra.gmra.mrb[232].mxu0 %v6621_v57 }
 0xd24   :  { %12176 = vmatpush3.bf16.xpose.msra.mxu0 %v6647_v58  ;;  %12177 = vmatprep.mubr.msk.bf16.mxu0 %vm13681_vm6, %v16494_v42 }
 0xd25   :  { %12172 = vmatmul.mubr.bf16.vlgmr.msra.gmra.mrb[252].mxu1 %v6622_v26  ;;  %12187 = vmatprep.subr.bf16.mxu0 %v16494_v42 }
 0xd26   :  { %12182 = vmatpush3.bf16.xpose.msra.mxu1 %v6648_v45  ;;  %12183 = vmatprep.mubr.msk.bf16.mxu1 %vm13681_vm6, %v16494_v42 }
 0xd27   :  { %12193 = vmatprep.subr.bf16.mxu1 %v16494_v42 }
 0xd2b   :  { %12178 = vmatmul.mubr.bf16.vlgmr.msra.gmra.mrb[236].mxu0 %v6623_v48 }
 0xd2c   :  { %12188 = vmatpush3.bf16.xpose.msra.mxu0 %v6649_v51  ;;  %12189 = vmatprep.mubr.msk.bf16.mxu0 %vm13681_vm6, %v16494_v42 }
 0xd2d   :  { %12184 = vmatmul.mubr.bf16.vlgmr.msra.gmra.mrb[0].mxu1 %v6624_v50  ;;  %12199 = vmatprep.subr.bf16.mxu0 %v16494_v42 }
 0xd2e   :  { %12194 = vmatpush3.bf16.xpose.msra.mxu1 %v6650_v38  ;;  %12195 = vmatprep.mubr.msk.bf16.mxu1 %vm13681_vm6, %v16494_v42 }
 0xd2f   :  { %12205 = vmatprep.subr.bf16.mxu1 %v16494_v42 }
 0xd33   :  { %12190 = vmatmul.mubr.bf16.vlgmr.msra.gmra.mrb[240].mxu0 %v6625_v41 }
 0xd34   :  { %12200 = vmatpush3.bf16.xpose.msra.mxu0 %v6651_v62  ;;  %12201 = vmatprep.mubr.msk.bf16.mxu0 %vm13681_vm6, %v16494_v42 }
 0xd35   :  { %12196 = vmatmul.mubr.bf16.vlgmr.msra.gmra.mrb[8].mxu1 %v6626_v60  ;;  %12211 = vmatprep.subr.bf16.mxu0 %v16494_v42 }
 0xd36   :  { %12206 = vmatpush3.bf16.xpose.msra.mxu1 %v6652_v14  ;;  %12207 = vmatprep.mubr.msk.bf16.mxu1 %vm13681_vm6, %v16494_v42 }
 0xd37   :  { %12217 = vmatprep.subr.bf16.mxu1 %v16494_v42 }
 0xd3b   :  { %12202 = vmatmul.mubr.bf16.vlgmr.msra.gmra.mrb[244].mxu0 %v6627_v15 }
 0xd3c   :  { %12212 = vmatpush3.bf16.xpose.msra.mxu0 %v6653_v34  ;;  %12213 = vmatprep.mubr.msk.bf16.mxu0 %vm13681_vm6, %v16494_v42 }
 0xd3d   :  { %12208 = vmatmul.mubr.bf16.vlgmr.msra.gmra.mrb[12].mxu1 %v6628_v28  ;;  %12223 = vmatprep.subr.bf16.mxu0 %v16494_v42 }
 0xd3e   :  { %12218 = vmatpush3.bf16.xpose.msra.mxu1 %v6654_v5  ;;  %12219 = vmatprep.mubr.msk.bf16.mxu1 %vm13681_vm6, %v16494_v42 }
 0xd3f   :  { %12229 = vmatprep.subr.bf16.mxu1 %v16494_v42 }
 0xd43   :  { %12214 = vmatmul.mubr.bf16.vlgmr.msra.gmra.mrb[248].mxu0 %v6629_v17 }
 0xd44   :  { %12224 = vmatpush3.bf16.msra.mxu0 %v7931_v44  ;;  %12225 = vmatprep.mubr.msk.bf16.mxu0 %vm13681_vm6, %v16494_v42  ;;  %v16553_v44 = vld [vmem:[#allocation33_spill] sm:$0xff] }
 0xd45   :  { %12220 = vmatmul.mubr.bf16.vlgmr.msra.gmra.mrb[16].mxu1 %v6630_v55  ;;  %12235 = vmatprep.subr.bf16.mxu0 %v16494_v42 }
 0xd46   :  { %12230 = vmatpush3.bf16.msra.mxu1 %v7977_v6  ;;  %12231 = vmatprep.mubr.msk.bf16.mxu1 %vm13681_vm6, %v16494_v42 }
 0xd47   :  { %12241 = vmatprep.subr.bf16.mxu1 %v16494_v42 }
 0xdbe   :  { %v6689_v23 = vpop.f32.mrb[204].mxu0 }
 0xdbf   :  { %v15737_v4 = vadd.f32 %v6689_v23, %v14568_v39  ;;  %v12083_v24 = vpop.f32.mrb[205].mxu0 }
 0xdc0   :  { %v6692_v3 = vpop.f32.mrb[206].mxu0  ;;  %v6729_v30 = vpop.f32.mrb[224].mxu1 }
 0xdc1   :  { %v15740_v40 = vadd.f32 %v6729_v30, %v14577_v52  ;;  %v12084_v22 = vpop.f32.mrb[207].mxu0  ;;  %v12089_v43 = vpop.f32.mrb[225].mxu1  ;;  %v7615_v12 = vsel %vm2916_vm9, %v15737_v4, -inf }
 0xdc2   :  { %v6732_v29 = vpop.f32.mrb[226].mxu1  ;;  %7616 = vmax.xlane.f32.xlu1 %v7615_v12 }
 0xdc3   :  { %v12090_v47 = vpop.f32.mrb[227].mxu1  ;;  %v7618_v57 = vsel %vm2916_vm9, %v15740_v40, -inf  ;;  %v16554_v29 = vld [vmem:[#allocation32_spill] sm:$0xff] }
 0xdc4   :  { %7619 = vmax.xlane.f32.xlu0 %v7618_v57 }
 0xdc6   :  { %v6769_v39 = vpop.f32.mrb[208].mxu0 }
 0xdc7   :  { %v15747_v58 = vadd.f32 %v6769_v39, %v14587_v13  ;;  %v12095_v26 = vpop.f32.mrb[209].mxu0 }
 0xdc8   :  { %v6772_v45 = vpop.f32.mrb[210].mxu0  ;;  %v6809_v52 = vpop.f32.mrb[228].mxu1 }
 0xdc9   :  { %v15750_v56 = vadd.f32 %v6809_v52, %v16549_v59  ;;  %v12096_v36 = vpop.f32.mrb[211].mxu0  ;;  %v12101_v48 = vpop.f32.mrb[229].mxu1  ;;  %v7621_v51 = vsel %vm2916_vm9, %v15747_v58, -inf  ;;  %v16555_v45 = vld [vmem:[#allocation35_spill] sm:$0xff] }
 0xdca   :  { %v6812_v50 = vpop.f32.mrb[230].mxu1  ;;  %7622 = vmax.xlane.f32.xlu1 %v7621_v51 }
 0xdcb   :  { %v12102_v38 = vpop.f32.mrb[231].mxu1  ;;  %v7624_v49 = vsel %vm2916_vm9, %v15750_v56, -inf }
 0xdcc   :  { %7625 = vmax.xlane.f32.xlu0 %v7624_v49 }
 0xdce   :  { %v6849_v13 = vpop.f32.mrb[212].mxu0 }
 0xdcf   :  { %v15757_v41 = vadd.f32 %v6849_v13, %v16550_v21  ;;  %v12107_v62 = vpop.f32.mrb[213].mxu0  ;;  %v16556_v13 = vld [vmem:[#allocation34_spill] sm:$0xff] }
 0xdd0   :  { %v6852_v60 = vpop.f32.mrb[214].mxu0  ;;  %v6889_v14 = vpop.f32.mrb[232].mxu1 }
 0xdd1   :  { %v15760_v31 = vadd.f32 %v6889_v14, %v16551_v10  ;;  %v12108_v15 = vpop.f32.mrb[215].mxu0  ;;  %v12113_v34 = vpop.f32.mrb[233].mxu1  ;;  %v7627_v28 = vsel %vm2916_vm9, %v15757_v41, -inf  ;;  %v16557_v10 = vld [vmem:[#allocation37_spill] sm:$0xff] }
 0xdd2   :  { %v6892_v35 = vpop.f32.mrb[234].mxu1  ;;  %7628 = vmax.xlane.f32.xlu1 %v7627_v28 }
 0xdd3   :  { %v12114_v5 = vpop.f32.mrb[235].mxu1  ;;  %v7630_v25 = vsel %vm2916_vm9, %v15760_v31, -inf }
 0xdd4   :  { %7631 = vmax.xlane.f32.xlu0 %v7630_v25 }
 0xdd6   :  { %v6929_v16 = vpop.f32.mrb[216].mxu0 }
 0xdd7   :  { %v15767_v33 = vadd.f32 %v6929_v16, %v16552_v37  ;;  %v12119_v17 = vpop.f32.mrb[217].mxu0 }
 0xdd8   :  { %v6932_v8 = vpop.f32.mrb[218].mxu0  ;;  %v6969_v55 = vpop.f32.mrb[236].mxu1  ;;  %v16558_v17 = vld [vmem:[#allocation36_spill] sm:$0xff] }
 0xdd9   :  { %v15770_v6 = vadd.f32 %v6969_v55, %v16553_v44  ;;  %v12120_v23 = vpop.f32.mrb[219].mxu0  ;;  %v12125_v24 = vpop.f32.mrb[237].mxu1  ;;  %v7633_v3 = vsel %vm2916_vm9, %v15767_v33, -inf }
 0xdda   :  { %v6972_v30 = vpop.f32.mrb[238].mxu1  ;;  %7634 = vmax.xlane.f32.xlu1 %v7633_v3  ;;  %v16559_v24 = vld [vmem:[#allocation39_spill] sm:$0xff] }
 0xddb   :  { %v12126_v22 = vpop.f32.mrb[239].mxu1  ;;  %v7636_v43 = vsel %vm2916_vm9, %v15770_v6, -inf }
 0xddc   :  { %7637 = vmax.xlane.f32.xlu0 %v7636_v43 }
 0xdde   :  { %v7009_v12 = vpop.f32.mrb[220].mxu0 }
 0xddf   :  { %v15777_v47 = vadd.f32 %v7009_v12, %v16554_v29  ;;  %v12131_v57 = vpop.f32.mrb[221].mxu0 }
 0xde0   :  { %v7012_v39 = vpop.f32.mrb[222].mxu0  ;;  %v7049_v26 = vpop.f32.mrb[240].mxu1 }
 0xde1   :  { %v15780_v52 = vadd.f32 %v7049_v26, %v16555_v45  ;;  %v12132_v59 = vpop.f32.mrb[223].mxu0  ;;  %v12137_v36 = vpop.f32.mrb[241].mxu1  ;;  %v7639_v48 = vsel %vm2916_vm9, %v15777_v47, -inf  ;;  %v16560_v26 = vld [vmem:[#allocation38_spill] sm:$0xff] }
 0xde2   :  { %v7052_v51 = vpop.f32.mrb[242].mxu1  ;;  %7640 = vmax.xlane.f32.xlu1 %v7639_v48 }
 0xde3   :  { %v12138_v50 = vpop.f32.mrb[243].mxu1  ;;  %v7642_v38 = vsel %vm2916_vm9, %v15780_v52, -inf  ;;  %v16561_v51 = vld [vmem:[#allocation41_spill] sm:$0xff] }
 0xde4   :  { %7643 = vmax.xlane.f32.xlu0 %v7642_v38 }
 0xde6   :  { %v7089_v49 = vpop.f32.mrb[224].mxu0 }
 0xde7   :  { %v15787_v21 = vadd.f32 %v7089_v49, %v16556_v13  ;;  %v12143_v62 = vpop.f32.mrb[225].mxu0 }
 0xde8   :  { %v7092_v60 = vpop.f32.mrb[226].mxu0  ;;  %v7129_v14 = vpop.f32.mrb[244].mxu1 }
 0xde9   :  { %v15790_v15 = vadd.f32 %v7129_v14, %v16557_v10  ;;  %v12144_v34 = vpop.f32.mrb[227].mxu0  ;;  %v12149_v28 = vpop.f32.mrb[245].mxu1  ;;  %v7645_v35 = vsel %vm2916_vm9, %v15787_v21, -inf }
 0xdea   :  { %v7132_v5 = vpop.f32.mrb[246].mxu1  ;;  %7646 = vmax.xlane.f32.xlu1 %v7645_v35  ;;  %v16562_v34 = vld [vmem:[#allocation40_spill] sm:$0xff] }
 0xdeb   :  { %v12150_v25 = vpop.f32.mrb[247].mxu1  ;;  %v7648_v16 = vsel %vm2916_vm9, %v15790_v15, -inf }
 0xdec   :  { %7649 = vmax.xlane.f32.xlu0 %v7648_v16  ;;  %v16563_v16 = vld [vmem:[#allocation43_spill] sm:$0xff] }
 0xdee   :  { %v7169_v37 = vpop.f32.mrb[228].mxu0 }
 0xdef   :  { %v15797_v8 = vadd.f32 %v7169_v37, %v16558_v17  ;;  %v12155_v55 = vpop.f32.mrb[229].mxu0 }
 0xdf0   :  { %v7172_v44 = vpop.f32.mrb[230].mxu0  ;;  %v7209_v23 = vpop.f32.mrb[248].mxu1 }
 0xdf1   :  { %v15800_v3 = vadd.f32 %v7209_v23, %v16559_v24  ;;  %v12156_v30 = vpop.f32.mrb[231].mxu0  ;;  %v12161_v22 = vpop.f32.mrb[249].mxu1  ;;  %v7651_v43 = vsel %vm2916_vm9, %v15797_v8, -inf }
 0xdf2   :  { %v7212_v12 = vpop.f32.mrb[250].mxu1  ;;  %7652 = vmax.xlane.f32.xlu1 %v7651_v43  ;;  %v16564_v43 = vld [vmem:[#allocation42_spill] sm:$0xff] }
 0xdf3   :  { %v12162_v29 = vpop.f32.mrb[251].mxu1  ;;  %v7654_v57 = vsel %vm2916_vm9, %v15800_v3, -inf }
 0xdf4   :  { %7655 = vmax.xlane.f32.xlu0 %v7654_v57 }
 0xdf6   :  { %v7249_v39 = vpop.f32.mrb[232].mxu0 }
 0xdf7   :  { %v15807_v45 = vadd.f32 %v7249_v39, %v16560_v26  ;;  %v12167_v59 = vpop.f32.mrb[233].mxu0  ;;  %v16565_v26 = vld [vmem:[#allocation45_spill] sm:$0xff] }
 0xdf8   :  { %v7252_v36 = vpop.f32.mrb[234].mxu0  ;;  %v7289_v48 = vpop.f32.mrb[252].mxu1 }
 0xdf9   :  { %v15810_v50 = vadd.f32 %v7289_v48, %v16561_v51  ;;  %v12168_v38 = vpop.f32.mrb[235].mxu0  ;;  %v12173_v49 = vpop.f32.mrb[253].mxu1  ;;  %v7657_v13 = vsel %vm2916_vm9, %v15807_v45, -inf }
 0xdfa   :  { %v7292_v62 = vpop.f32.mrb[254].mxu1  ;;  %7658 = vmax.xlane.f32.xlu1 %v7657_v13 }
 0xdfb   :  { %v12174_v60 = vpop.f32.mrb[255].mxu1  ;;  %v7660_v14 = vsel %vm2916_vm9, %v15810_v50, -inf }
 0xdfc   :  { %7661 = vmax.xlane.f32.xlu0 %v7660_v14  ;;  %v16566_v60 = vld [vmem:[#allocation44_spill] sm:$0xff] }
 0xdfe   :  { %v7329_v10 = vpop.f32.mrb[236].mxu0 }
 0xdff   :  { %v15817_v28 = vadd.f32 %v7329_v10, %v16562_v34  ;;  %v12179_v35 = vpop.f32.mrb[237].mxu0 }
 0xe00   :  { %v7332_v5 = vpop.f32.mrb[238].mxu0  ;;  %v7369_v25 = vpop.f32.mrb[0].mxu1 }
 0xe01   :  { %v15820_v37 = vadd.f32 %v7369_v25, %v16563_v16  ;;  %v12180_v17 = vpop.f32.mrb[239].mxu0  ;;  %v12185_v55 = vpop.f32.mrb[1].mxu1  ;;  %v7663_v44 = vsel %vm2916_vm9, %v15817_v28, -inf  ;;  %v16567_v5 = vld [vmem:[#allocation46_spill] sm:$0xff] }
 0xe02   :  { %v7372_v23 = vpop.f32.mrb[2].mxu1  ;;  %7664 = vmax.xlane.f32.xlu1 %v7663_v44 }
 0xe03   :  { %v12186_v24 = vpop.f32.mrb[3].mxu1  ;;  %v7666_v30 = vsel %vm2916_vm9, %v15820_v37, -inf }
 0xe04   :  { %7667 = vmax.xlane.f32.xlu0 %v7666_v30 }
 0xe06   :  { %v7409_v22 = vpop.f32.mrb[240].mxu0 }
 0xe07   :  { %v15827_v12 = vadd.f32 %v7409_v22, %v16564_v43  ;;  %v12191_v29 = vpop.f32.mrb[241].mxu0 }
 0xe08   :  { %v7412_v57 = vpop.f32.mrb[242].mxu0  ;;  %v7449_v39 = vpop.f32.mrb[8].mxu1 }
 0xe09   :  { %v15830_v59 = vadd.f32 %v7449_v39, %v16565_v26  ;;  %v12192_v36 = vpop.f32.mrb[243].mxu0  ;;  %v12197_v48 = vpop.f32.mrb[9].mxu1  ;;  %v7669_v51 = vsel %vm2916_vm9, %v15827_v12, -inf  ;;  %v16568_v39 = vld [vmem:[#allocation47_spill] sm:$0xff] }
 0xe0a   :  { %v7452_v38 = vpop.f32.mrb[10].mxu1  ;;  %7670 = vmax.xlane.f32.xlu1 %v7669_v51 }
 0xe0b   :  { %v12198_v49 = vpop.f32.mrb[11].mxu1  ;;  %v7672_v13 = vsel %vm2916_vm9, %v15830_v59, -inf }
 0xe0c   :  { %7673 = vmax.xlane.f32.xlu0 %v7672_v13 }
 0xe0e   :  { %v7489_v62 = vpop.f32.mrb[244].mxu0 }
 0xe0f   :  { %v15837_v14 = vadd.f32 %v7489_v62, %v16566_v60  ;;  %v12203_v10 = vpop.f32.mrb[245].mxu0 }
 0xe10   :  { %v7492_v34 = vpop.f32.mrb[246].mxu0  ;;  %v7529_v35 = vpop.f32.mrb[12].mxu1 }
 0xe11   :  { %v15840_v25 = vadd.f32 %v7529_v35, %v16567_v5  ;;  %v12204_v16 = vpop.f32.mrb[247].mxu0  ;;  %v12209_v17 = vpop.f32.mrb[13].mxu1  ;;  %v7675_v55 = vsel %vm2916_vm9, %v15837_v14, -inf }
 0xe12   :  { %v7532_v44 = vpop.f32.mrb[14].mxu1  ;;  %7676 = vmax.xlane.f32.xlu1 %v7675_v55 }
 0xe13   :  { %v12210_v23 = vpop.f32.mrb[15].mxu1  ;;  %v7678_v24 = vsel %vm2916_vm9, %v15840_v25, -inf }
 0xe14   :  { %7679 = vmax.xlane.f32.xlu0 %v7678_v24 }
 0xe16   :  { %v7569_v30 = vpop.f32.mrb[248].mxu0 }
 0xe17   :  { %v15847_v22 = vadd.f32 %v7569_v30, %v14769_v32  ;;  %v12215_v43 = vpop.f32.mrb[249].mxu0 }
 0xe18   :  { %v7572_v29 = vpop.f32.mrb[250].mxu0  ;;  %v7609_v57 = vpop.f32.mrb[16].mxu1 }
 0xe19   :  { %v15850_v26 = vadd.f32 %v7609_v57, %v16568_v39  ;;  %v12216_v36 = vpop.f32.mrb[251].mxu0  ;;  %v12221_v48 = vpop.f32.mrb[17].mxu1  ;;  %v7681_v51 = vsel %vm2916_vm9, %v15847_v22, -inf }
 0xe1a   :  { %v7612_v38 = vpop.f32.mrb[18].mxu1  ;;  %7682 = vmax.xlane.f32.xlu1 %v7681_v51 }
 0xe1b   :  { %v12222_v49 = vpop.f32.mrb[19].mxu1  ;;  %v7684_v13 = vsel %vm2916_vm9, %v15850_v26, -inf }
 0xe1c   :  { %7685 = vmax.xlane.f32.xlu0 %v7684_v13 }
 0xe4f   :  { %v7617_v32 = vpop.xlane.xlu1 %7616 }
 0xe50   :  { %v7687_v62 = vsub.f32 %v15737_v4, %v7617_v32 }
 0xe51   :  { %v7620_v60 = vpop.xlane.xlu0 %7619 }
 0xe52   :  { %v7711_v10 = vmul.f32 1.442695, %v7687_v62  ;;  %v7688_v34 = vsub.f32 %v15740_v40, %v7620_v60 }
 0xe54   :  { %13370 = vpow2.f32 %v7711_v10  ;;  %v7713_v35 = vmul.f32 1.442695, %v7688_v34 }
 0xe56   :  { %13372 = vpow2.f32 %v7713_v35 }
 0xe57   :  { %v7623_v5 = vpop.xlane.xlu1 %7622 }
 0xe58   :  { %v7689_v16 = vsub.f32 %v15747_v58, %v7623_v5 }
 0xe59   :  { %v7626_v17 = vpop.xlane.xlu0 %7625 }
 0xe5a   :  { %v7715_v55 = vmul.f32 1.442695, %v7689_v16  ;;  %v7690_v44 = vsub.f32 %v15750_v56, %v7626_v17 }
 0xe5c   :  { %13374 = vpow2.f32 %v7715_v55  ;;  %v7717_v23 = vmul.f32 1.442695, %v7690_v44 }
 0xe5e   :  { %v15860_v24 = vpop.eup %13370  ;;  %13376 = vpow2.f32 %v7717_v23 }
 0xe5f   :  { %v7629_v4 = vpop.xlane.xlu1 %7628  ;;  %v7759_v30 = vsel %vm2916_vm9, %v15860_v24, 0.0 }
 0xe60   :  { %v15864_v40 = vpop.eup %13372  ;;  %v7691_v43 = vsub.f32 %v15757_v41, %v7629_v4  ;;  %7760 = vadd.xlane.f32.xlu1 %v7759_v30 }
 0xe61   :  { %v7632_v29 = vpop.xlane.xlu0 %7631  ;;  %v7762_v58 = vsel %vm2916_vm9, %v15864_v40, 0.0 }
 0xe62   :  { %v7719_v57 = vmul.f32 1.442695, %v7691_v43  ;;  %v7692_v56 = vsub.f32 %v15760_v31, %v7632_v29  ;;  %7763 = vadd.xlane.f32.xlu0 %v7762_v58 }
 0xe64   :  { %13378 = vpow2.f32 %v7719_v57  ;;  %v7721_v39 = vmul.f32 1.442695, %v7692_v56 }
 0xe66   :  { %v15870_v36 = vpop.eup %13374  ;;  %13380 = vpow2.f32 %v7721_v39 }
 0xe67   :  { %v7635_v48 = vpop.xlane.xlu1 %7634  ;;  %v7765_v51 = vsel %vm2916_vm9, %v15870_v36, 0.0 }
 0xe68   :  { %v15874_v38 = vpop.eup %13376  ;;  %v7693_v41 = vsub.f32 %v15767_v33, %v7635_v48  ;;  %7766 = vadd.xlane.f32.xlu1 %v7765_v51 }
 0xe69   :  { %v7638_v49 = vpop.xlane.xlu0 %7637  ;;  %v7768_v13 = vsel %vm2916_vm9, %v15874_v38, 0.0 }
 0xe6a   :  { %v7723_v31 = vmul.f32 1.442695, %v7693_v41  ;;  %v7694_v32 = vsub.f32 %v15770_v6, %v7638_v49  ;;  %7769 = vadd.xlane.f32.xlu0 %v7768_v13 }
 0xe6c   :  { %13382 = vpow2.f32 %v7723_v31  ;;  %v7725_v62 = vmul.f32 1.442695, %v7694_v32 }
 0xe6e   :  { %v15880_v60 = vpop.eup %13378  ;;  %13384 = vpow2.f32 %v7725_v62 }
 0xe6f   :  { %v7641_v10 = vpop.xlane.xlu1 %7640  ;;  %v7771_v34 = vsel %vm2916_vm9, %v15880_v60, 0.0 }
 0xe70   :  { %v15884_v35 = vpop.eup %13380  ;;  %v7695_v33 = vsub.f32 %v15777_v47, %v7641_v10  ;;  %7772 = vadd.xlane.f32.xlu1 %v7771_v34 }
 0xe71   :  { %v7644_v5 = vpop.xlane.xlu0 %7643  ;;  %v7774_v16 = vsel %vm2916_vm9, %v15884_v35, 0.0 }
 0xe72   :  { %v7727_v6 = vmul.f32 1.442695, %v7695_v33  ;;  %v7696_v17 = vsub.f32 %v15780_v52, %v7644_v5  ;;  %7775 = vadd.xlane.f32.xlu0 %v7774_v16 }
 0xe74   :  { %13386 = vpow2.f32 %v7727_v6  ;;  %v7729_v55 = vmul.f32 1.442695, %v7696_v17 }
 0xe76   :  { %v15890_v44 = vpop.eup %13382  ;;  %13388 = vpow2.f32 %v7729_v55 }
 0xe77   :  { %v7647_v23 = vpop.xlane.xlu1 %7646  ;;  %v7777_v4 = vsel %vm2916_vm9, %v15890_v44, 0.0 }
 0xe78   :  { %v15894_v30 = vpop.eup %13384  ;;  %v7697_v47 = vsub.f32 %v15787_v21, %v7647_v23  ;;  %7778 = vadd.xlane.f32.xlu1 %v7777_v4 }
 0xe79   :  { %v7650_v43 = vpop.xlane.xlu0 %7649  ;;  %v7780_v29 = vsel %vm2916_vm9, %v15894_v30, 0.0 }
 0xe7a   :  { %v7731_v52 = vmul.f32 1.442695, %v7697_v47  ;;  %v7698_v58 = vsub.f32 %v15790_v15, %v7650_v43  ;;  %7781 = vadd.xlane.f32.xlu0 %v7780_v29 }
 0xe7c   :  { %13390 = vpow2.f32 %v7731_v52  ;;  %v7733_v57 = vmul.f32 1.442695, %v7698_v58 }
 0xe7e   :  { %v15900_v56 = vpop.eup %13386  ;;  %13392 = vpow2.f32 %v7733_v57 }
 0xe7f   :  { %v7653_v39 = vpop.xlane.xlu1 %7652  ;;  %v7783_v48 = vsel %vm2916_vm9, %v15900_v56, 0.0 }
 0xe80   :  { %v15904_v51 = vpop.eup %13388  ;;  %v7699_v21 = vsub.f32 %v15797_v8, %v7653_v39  ;;  %7784 = vadd.xlane.f32.xlu1 %v7783_v48 }
 0xe81   :  { %v7656_v41 = vpop.xlane.xlu0 %7655  ;;  %v7786_v49 = vsel %vm2916_vm9, %v15904_v51, 0.0 }
 0xe82   :  { %v7735_v15 = vmul.f32 1.442695, %v7699_v21  ;;  %v7700_v13 = vsub.f32 %v15800_v3, %v7656_v41  ;;  %7787 = vadd.xlane.f32.xlu0 %v7786_v49 }
 0xe84   :  { %13394 = vpow2.f32 %v7735_v15  ;;  %v7737_v31 = vmul.f32 1.442695, %v7700_v13 }
 0xe86   :  { %v15910_v32 = vpop.eup %13390  ;;  %13396 = vpow2.f32 %v7737_v31 }
 0xe87   :  { %v7659_v62 = vpop.xlane.xlu1 %7658  ;;  %v7789_v10 = vsel %vm2916_vm9, %v15910_v32, 0.0 }
 0xe88   :  { %v15914_v34 = vpop.eup %13392  ;;  %v7701_v8 = vsub.f32 %v15807_v45, %v7659_v62  ;;  %7790 = vadd.xlane.f32.xlu1 %v7789_v10 }
 0xe89   :  { %v7662_v33 = vpop.xlane.xlu0 %7661  ;;  %v7792_v5 = vsel %vm2916_vm9, %v15914_v34, 0.0 }
 0xe8a   :  { %v7739_v3 = vmul.f32 1.442695, %v7701_v8  ;;  %v7702_v16 = vsub.f32 %v15810_v50, %v7662_v33  ;;  %7793 = vadd.xlane.f32.xlu0 %v7792_v5 }
 0xe8c   :  { %13398 = vpow2.f32 %v7739_v3  ;;  %v7741_v6 = vmul.f32 1.442695, %v7702_v16 }
 0xe8e   :  { %v15920_v17 = vpop.eup %13394  ;;  %13400 = vpow2.f32 %v7741_v6 }
 0xe8f   :  { %v7665_v55 = vpop.xlane.xlu1 %7664  ;;  %v7795_v23 = vsel %vm2916_vm9, %v15920_v17, 0.0 }
 0xe90   :  { %v15924_v4 = vpop.eup %13396  ;;  %v7703_v45 = vsub.f32 %v15817_v28, %v7665_v55  ;;  %7796 = vadd.xlane.f32.xlu1 %v7795_v23 }
 0xe91   :  { %v7668_v47 = vpop.xlane.xlu0 %7667  ;;  %v7798_v43 = vsel %vm2916_vm9, %v15924_v4, 0.0 }
 0xe92   :  { %v7743_v50 = vmul.f32 1.442695, %v7703_v45  ;;  %v7704_v29 = vsub.f32 %v15820_v37, %v7668_v47  ;;  %7799 = vadd.xlane.f32.xlu0 %v7798_v43 }
 0xe94   :  { %13402 = vpow2.f32 %v7743_v50  ;;  %v7745_v52 = vmul.f32 1.442695, %v7704_v29 }
 0xe96   :  { %v15930_v58 = vpop.eup %13398  ;;  %13404 = vpow2.f32 %v7745_v52 }
 0xe97   :  { %v7671_v57 = vpop.xlane.xlu1 %7670  ;;  %v7801_v39 = vsel %vm2916_vm9, %v15930_v58, 0.0 }
 0xe98   :  { %v15934_v48 = vpop.eup %13400  ;;  %v7705_v28 = vsub.f32 %v15827_v12, %v7671_v57  ;;  %7802 = vadd.xlane.f32.xlu1 %v7801_v39 }
 0xe99   :  { %v7674_v21 = vpop.xlane.xlu0 %7673  ;;  %v7804_v41 = vsel %vm2916_vm9, %v15934_v48, 0.0 }
 0xe9a   :  { %v7747_v37 = vmul.f32 1.442695, %v7705_v28  ;;  %v7706_v49 = vsub.f32 %v15830_v59, %v7674_v21  ;;  %7805 = vadd.xlane.f32.xlu0 %v7804_v41 }
 0xe9c   :  { %13406 = vpow2.f32 %v7747_v37  ;;  %v7749_v15 = vmul.f32 1.442695, %v7706_v49 }
 0xe9e   :  { %v15940_v13 = vpop.eup %13402  ;;  %13408 = vpow2.f32 %v7749_v15 }
 0xe9f   :  { %v7677_v31 = vpop.xlane.xlu1 %7676  ;;  %v7807_v62 = vsel %vm2916_vm9, %v15940_v13, 0.0 }
 0xea0   :  { %v15944_v10 = vpop.eup %13404  ;;  %v7707_v12 = vsub.f32 %v15837_v14, %v7677_v31  ;;  %7808 = vadd.xlane.f32.xlu1 %v7807_v62  ;;  %v7905_v62 = vpack.c.bf16 %v15587_v53, %v15587_v53 }
 0xea1   :  { %v7680_v8 = vpop.xlane.xlu0 %7679  ;;  %v7810_v33 = vsel %vm2916_vm9, %v15944_v10, 0.0 }
 0xea2   :  { %v7751_v59 = vmul.f32 1.442695, %v7707_v12  ;;  %v7708_v5 = vsub.f32 %v15840_v25, %v7680_v8  ;;  %7811 = vadd.xlane.f32.xlu0 %v7810_v33  ;;  %v7906_v33 = vpack.c.bf16 %v15603_v46, %v15603_v46 }
 0xea4   :  { %13410 = vpow2.f32 %v7751_v59  ;;  %v7753_v3 = vmul.f32 1.442695, %v7708_v5  ;;  %v8069_v53 = vsel %vm611_vm7, %v7906_v33, 0  ;;  %v7912_v33 = vpack.c.bf16 %v15609_v61, %v15609_v61 }
 0xea6   :  { %v15950_v16 = vpop.eup %13406  ;;  %13412 = vpow2.f32 %v7753_v3  ;;  %v8023_v3 = vsel %vm611_vm7, %v7905_v62, 0 }
 0xea7   :  { %v7683_v6 = vpop.xlane.xlu1 %7682  ;;  %v7813_v55 = vsel %vm2916_vm9, %v15950_v16, 0.0 }
 0xea8   :  { %v15954_v23 = vpop.eup %13408  ;;  %v7709_v14 = vsub.f32 %v15847_v22, %v7683_v6  ;;  %7814 = vadd.xlane.f32.xlu1 %v7813_v55 }
 0xea9   :  { %v7686_v45 = vpop.xlane.xlu0 %7685  ;;  %v7816_v47 = vsel %vm2916_vm9, %v15954_v23, 0.0 }
 0xeaa   :  { %v7755_v25 = vmul.f32 1.442695, %v7709_v14  ;;  %v7710_v43 = vsub.f32 %v15850_v26, %v7686_v45  ;;  %7817 = vadd.xlane.f32.xlu0 %v7816_v47  ;;  %v7908_v47 = vpack.c.bf16 %v15643_v63, %v15643_v63 }
 0xeac   :  { %13414 = vpow2.f32 %v7755_v25  ;;  %v7757_v50 = vmul.f32 1.442695, %v7710_v43 }
 0xeae   :  { %v15960_v29 = vpop.eup %13410  ;;  %13416 = vpow2.f32 %v7757_v50 }
 0xeaf   :  { %v7819_v52 = vsel %vm2916_vm9, %v15960_v29, 0.0 }
 0xeb0   :  { %v15964_v57 = vpop.eup %13412  ;;  %7820 = vadd.xlane.f32.xlu1 %v7819_v52 }
 0xeb1   :  { %v7822_v22 = vsel %vm2916_vm9, %v15964_v57, 0.0 }
 0xeb2   :  { %7823 = vadd.xlane.f32.xlu0 %v7822_v22 }
 0xeb6   :  { %v15968_v39 = vpop.eup %13414 }
 0xeb7   :  { %v7825_v26 = vsel %vm2916_vm9, %v15968_v39, 0.0 }
 0xeb8   :  { %v15972_v28 = vpop.eup %13416  ;;  %7826 = vadd.xlane.f32.xlu1 %v7825_v26 }
 0xeb9   :  { %v7828_v21 = vsel %vm2916_vm9, %v15972_v28, 0.0 }
 0xeba   :  { %7829 = vadd.xlane.f32.xlu0 %v7828_v21 }
 0xeed   :  { %v7761_v41 = vpop.xlane.xlu1 %7760 }
 0xeee   :  { %13418 = vrcp.f32 %v7761_v41  ;;  %v7910_v41 = vpack.c.bf16 %v15564_v9, %v15564_v9 }
 0xeef   :  { %v7764_v37 = vpop.xlane.xlu0 %7763 }
 0xef0   :  { %13420 = vrcp.f32 %v7764_v37 }
 0xef5   :  { %v7767_v49 = vpop.xlane.xlu1 %7766 }
 0xef6   :  { %13422 = vrcp.f32 %v7767_v49 }
 0xef7   :  { %v7770_v15 = vpop.xlane.xlu0 %7769 }
 0xef8   :  { %v13419_v31 = vpop.eup %13418  ;;  %13424 = vrcp.f32 %v7770_v15 }
 0xef9   :  { %v7855_v12 = vmul.f32 %v13419_v31, %v15860_v24 }
 0xefa   :  { %v13421_v8 = vpop.eup %13420 }
 0xefb   :  { %v7856_v59 = vmul.f32 %v13421_v8, %v15864_v40  ;;  %v7879_v5 = vpack.c.bf16 %v7855_v12, %v7855_v12  ;;  %v7907_v40 = vpack.c.bf16 %v15629_v18, %v15629_v18  ;;  %v8161_v18 = vsel %vm611_vm7, %v7908_v47, 0 }
 0xefd   :  { %v7880_v6 = vpack.c.bf16 %v7856_v59, %v7856_v59  ;;  %12226 = vmatmul.mubr.msk.bf16.vlgmr.msra.gmra.mrb[252].mxu0 %vm2916_vm9, %v7879_v5  ;;  %v7773_v55 = vpop.xlane.xlu1 %7772  ;;  %v8115_v50 = vsel %vm611_vm7, %v7907_v40, 0 }
 0xefe   :  { %12236 = vmatpush3.bf16.msra.mxu0 %v8023_v3  ;;  %13426 = vrcp.f32 %v7773_v55  ;;  %12237 = vmatprep.mubr.msk.bf16.mxu0 %vm13681_vm6, %v16494_v42 }
 0xeff   :  { %12232 = vmatmul.mubr.msk.bf16.vlgmr.msra.gmra.mrb[20].mxu1 %vm2916_vm9, %v7880_v6  ;;  %v7776_v24 = vpop.xlane.xlu0 %7775  ;;  %12247 = vmatprep.subr.bf16.mxu0 %v16494_v42 }
 0xf00   :  { %v13423_v46 = vpop.eup %13422  ;;  %12242 = vmatpush3.bf16.msra.mxu1 %v8069_v53  ;;  %13428 = vrcp.f32 %v7776_v24  ;;  %12243 = vmatprep.mubr.msk.bf16.mxu1 %vm13681_vm6, %v16494_v42 }
 0xf01   :  { %v7857_v14 = vmul.f32 %v13423_v46, %v15870_v36  ;;  %12253 = vmatprep.subr.bf16.mxu1 %v16494_v42  ;;  %v7914_v46 = vpack.c.bf16 %v15649_v2, %v15649_v2 }
 0xf02   :  { %v13425_v45 = vpop.eup %13424 }
 0xf03   :  { %v7881_v25 = vpack.c.bf16 %v7857_v14, %v7857_v14  ;;  %v7858_v43 = vmul.f32 %v13425_v45, %v15874_v38  ;;  %v7909_v38 = vpack.c.bf16 %v15553_v54, %v15553_v54  ;;  %v8253_v54 = vsel %vm611_vm7, %v7910_v41, 0 }
 0xf05   :  { %v7882_v52 = vpack.c.bf16 %v7858_v43, %v7858_v43  ;;  %12238 = vmatmul.mubr.msk.bf16.vlgmr.msra.gmra.mrb[0].mxu0 %vm2916_vm9, %v7881_v25  ;;  %v7779_v22 = vpop.xlane.xlu1 %7778  ;;  %v8207_v15 = vsel %vm611_vm7, %v7909_v38, 0 }
 0xf06   :  { %12248 = vmatpush3.bf16.msra.mxu0 %v8115_v50  ;;  %13430 = vrcp.f32 %v7779_v22  ;;  %12249 = vmatprep.mubr.msk.bf16.mxu0 %vm13681_vm6, %v16494_v42  ;;  %v7916_v22 = vpack.c.bf16 %v15561_v19, %v15561_v19 }
 0xf07   :  { %12244 = vmatmul.mubr.msk.bf16.vlgmr.msra.gmra.mrb[24].mxu1 %vm2916_vm9, %v7882_v52  ;;  %v7782_v36 = vpop.xlane.xlu0 %7781  ;;  %12259 = vmatprep.subr.bf16.mxu0 %v16494_v42 }
 0xf08   :  { %v13427_v63 = vpop.eup %13426  ;;  %12254 = vmatpush3.bf16.msra.mxu1 %v8161_v18  ;;  %13432 = vrcp.f32 %v7782_v36  ;;  %12255 = vmatprep.mubr.msk.bf16.mxu1 %vm13681_vm6, %v16494_v42 }
 0xf09   :  { %v7859_v26 = vmul.f32 %v13427_v63, %v15880_v60  ;;  %12265 = vmatprep.subr.bf16.mxu1 %v16494_v42 }
 0xf0a   :  { %v13429_v21 = vpop.eup %13428 }
 0xf0b   :  { %v7883_v37 = vpack.c.bf16 %v7859_v26, %v7859_v26  ;;  %v7860_v49 = vmul.f32 %v13429_v21, %v15884_v35  ;;  %v7911_v35 = vpack.c.bf16 %v15593_v27, %v15593_v27  ;;  %v8345_v27 = vsel %vm611_vm7, %v7912_v33, 0 }
 0xf0d   :  { %v7884_v31 = vpack.c.bf16 %v7860_v49, %v7860_v49  ;;  %12250 = vmatmul.mubr.msk.bf16.vlgmr.msra.gmra.mrb[4].mxu0 %vm2916_vm9, %v7883_v37  ;;  %v7785_v62 = vpop.xlane.xlu1 %7784  ;;  %v8299_v3 = vsel %vm611_vm7, %v7911_v35, 0  ;;  %v16570_v49 = vld [vmem:[#allocation25_spill] sm:$0xff] }
 0xf0e   :  { %12260 = vmatpush3.bf16.msra.mxu0 %v8207_v15  ;;  %13434 = vrcp.f32 %v7785_v62  ;;  %12261 = vmatprep.mubr.msk.bf16.mxu0 %vm13681_vm6, %v16494_v42  ;;  %v7918_v15 = vpack.c.bf16 %v16570_v49, %v16570_v49  ;;  %v13170_v49 = vld [vmem:[#allocation7 + $0x140] sm:$0xff]  }
 0xf0f   :  { %12256 = vmatmul.mubr.msk.bf16.vlgmr.msra.gmra.mrb[28].mxu1 %vm2916_vm9, %v7884_v31  ;;  %v7788_v60 = vpop.xlane.xlu0 %7787  ;;  %12271 = vmatprep.subr.bf16.mxu0 %v16494_v42 }
 0xf10   :  { %v13431_v9 = vpop.eup %13430  ;;  %12266 = vmatpush3.bf16.msra.mxu1 %v8253_v54  ;;  %13436 = vrcp.f32 %v7788_v60  ;;  %12267 = vmatprep.mubr.msk.bf16.mxu1 %vm13681_vm6, %v16494_v42 }
 0xf11   :  { %v7861_v12 = vmul.f32 %v13431_v9, %v15890_v44  ;;  %12277 = vmatprep.subr.bf16.mxu1 %v16494_v42 }
 0xf12   :  { %v13433_v8 = vpop.eup %13432 }
 0xf13   :  { %v7885_v59 = vpack.c.bf16 %v7861_v12, %v7861_v12  ;;  %v7862_v5 = vmul.f32 %v13433_v8, %v15894_v30  ;;  %v7913_v30 = vpack.c.bf16 %v15637_v7, %v15637_v7  ;;  %v8437_v7 = vsel %vm611_vm7, %v7914_v46, 0 }
 0xf15   :  { %v7886_v6 = vpack.c.bf16 %v7862_v5, %v7862_v5  ;;  %12262 = vmatmul.mubr.msk.bf16.vlgmr.msra.gmra.mrb[8].mxu0 %vm2916_vm9, %v7885_v59  ;;  %v7791_v55 = vpop.xlane.xlu1 %7790  ;;  %v8391_v45 = vsel %vm611_vm7, %v7913_v30, 0  ;;  %v7920_v59 = vpack.c.bf16 %v15646_v1, %v15646_v1 }
 0xf16   :  { %12272 = vmatpush3.bf16.msra.mxu0 %v8299_v3  ;;  %13438 = vrcp.f32 %v7791_v55  ;;  %12273 = vmatprep.mubr.msk.bf16.mxu0 %vm13681_vm6, %v16494_v42 }
 0xf17   :  { %12268 = vmatmul.mubr.msk.bf16.vlgmr.msra.gmra.mrb[32].mxu1 %vm2916_vm9, %v7886_v6  ;;  %v7794_v44 = vpop.xlane.xlu0 %7793  ;;  %12283 = vmatprep.subr.bf16.mxu0 %v16494_v42 }
 0xf18   :  { %v13435_v61 = vpop.eup %13434  ;;  %12278 = vmatpush3.bf16.msra.mxu1 %v8345_v27  ;;  %13440 = vrcp.f32 %v7794_v44  ;;  %12279 = vmatprep.mubr.msk.bf16.mxu1 %vm13681_vm6, %v16494_v42 }
 0xf19   :  { %v7863_v53 = vmul.f32 %v13435_v61, %v15900_v56  ;;  %12289 = vmatprep.subr.bf16.mxu1 %v16494_v42 }
 0xf1a   :  { %v13437_v24 = vpop.eup %13436 }
 0xf1b   :  { %v7887_v40 = vpack.c.bf16 %v7863_v53, %v7863_v53  ;;  %v7864_v14 = vmul.f32 %v13437_v24, %v15904_v51  ;;  %v16569_v51 = vld [vmem:[#allocation19_spill] sm:$0xff]  ;;  %v16573_v24 = vld [vmem:[#allocation21_spill] sm:$0xff] }
 0xf1c   :  { %v7915_v43 = vpack.c.bf16 %v16569_v51, %v16569_v51  ;;  %v7922_v46 = vpack.c.bf16 %v16573_v24, %v16573_v24  ;;  %v13193_v24 = vld [vmem:[#allocation7 + $0x198] sm:$0xff]  }
 0xf1d   :  { %v7888_v47 = vpack.c.bf16 %v7864_v14, %v7864_v14  ;;  %12274 = vmatmul.mubr.msk.bf16.vlgmr.msra.gmra.mrb[12].mxu0 %vm2916_vm9, %v7887_v40  ;;  %v7797_v25 = vpop.xlane.xlu1 %7796 }
 0xf1e   :  { %12284 = vmatpush3.bf16.msra.mxu0 %v8391_v45  ;;  %13442 = vrcp.f32 %v7797_v25  ;;  %12285 = vmatprep.mubr.msk.bf16.mxu0 %vm13681_vm6, %v16494_v42  ;;  %v8483_v63 = vsel %vm611_vm7, %v7915_v43, 0 }
 0xf1f   :  { %12280 = vmatmul.mubr.msk.bf16.vlgmr.msra.gmra.mrb[36].mxu1 %vm2916_vm9, %v7888_v47  ;;  %v7800_v56 = vpop.xlane.xlu0 %7799  ;;  %12295 = vmatprep.subr.bf16.mxu0 %v16494_v42 }
 0xf20   :  { %v13439_v2 = vpop.eup %13438  ;;  %12290 = vmatpush3.bf16.msra.mxu1 %v8437_v7  ;;  %13444 = vrcp.f32 %v7800_v56  ;;  %12291 = vmatprep.mubr.msk.bf16.mxu1 %vm13681_vm6, %v16494_v42 }
 0xf21   :  { %v7865_v50 = vmul.f32 %v13439_v2, %v15910_v32  ;;  %12301 = vmatprep.subr.bf16.mxu1 %v16494_v42  ;;  %v8529_v32 = vsel %vm611_vm7, %v7916_v22, 0 }
 0xf22   :  { %v13441_v52 = vpop.eup %13440 }
 0xf23   :  { %v7889_v18 = vpack.c.bf16 %v7865_v50, %v7865_v50  ;;  %v7866_v36 = vmul.f32 %v13441_v52, %v15914_v34  ;;  %v7917_v34 = vpack.c.bf16 %v15590_v20, %v15590_v20  ;;  %v8621_v20 = vsel %vm611_vm7, %v7918_v15, 0  ;;  %v16575_v50 = vld [vmem:[#allocation48_spill] sm:$0xff] }
 0xf24   :  { %v7924_v52 = vpack.c.bf16 %v16575_v50, %v16575_v50 }
 0xf25   :  { %v7890_v38 = vpack.c.bf16 %v7866_v36, %v7866_v36  ;;  %12286 = vmatmul.mubr.msk.bf16.vlgmr.msra.gmra.mrb[16].mxu0 %vm2916_vm9, %v7889_v18  ;;  %v7803_v26 = vpop.xlane.xlu1 %7802  ;;  %v8575_v54 = vsel %vm611_vm7, %v7917_v34, 0  ;;  %v7926_v34 = vpack.c.bf16 %v15652_v11, %v15652_v11 }
 0xf26   :  { %12296 = vmatpush3.bf16.msra.mxu0 %v8483_v63  ;;  %13446 = vrcp.f32 %v7803_v26  ;;  %12297 = vmatprep.mubr.msk.bf16.mxu0 %vm13681_vm6, %v16494_v42 }
 0xf27   :  { %12292 = vmatmul.mubr.msk.bf16.vlgmr.msra.gmra.mrb[40].mxu1 %vm2916_vm9, %v7890_v38  ;;  %v7806_v21 = vpop.xlane.xlu0 %7805  ;;  %12307 = vmatprep.subr.bf16.mxu0 %v16494_v42 }
 0xf28   :  { %v13443_v19 = vpop.eup %13442  ;;  %12302 = vmatpush3.bf16.msra.mxu1 %v8529_v32  ;;  %13448 = vrcp.f32 %v7806_v21  ;;  %12303 = vmatprep.mubr.msk.bf16.mxu1 %vm13681_vm6, %v16494_v42 }
 0xf29   :  { %v7867_v41 = vmul.f32 %v13443_v19, %v15920_v17  ;;  %12313 = vmatprep.subr.bf16.mxu1 %v16494_v42 }
 0xf2a   :  { %v13445_v37 = vpop.eup %13444 }
 0xf2b   :  { %v7891_v31 = vpack.c.bf16 %v7867_v41, %v7867_v41  ;;  %v7868_v62 = vmul.f32 %v13445_v37, %v15924_v4  ;;  %v16571_v4 = vld [vmem:[#allocation49_spill] sm:$0xff] }
 0xf2c   :  { %v7919_v12 = vpack.c.bf16 %v16571_v4, %v16571_v4  ;;  %v13175_v4 = vld [vmem:[#allocation7 + $0x110] sm:$0xff]  }
 0xf2d   :  { %v7892_v60 = vpack.c.bf16 %v7868_v62, %v7868_v62  ;;  %12298 = vmatmul.mubr.msk.bf16.vlgmr.msra.gmra.mrb[20].mxu0 %vm2916_vm9, %v7891_v31  ;;  %v7809_v9 = vpop.xlane.xlu1 %7808  ;;  %v13171_v62 = vld [vmem:[#allocation7 + $0x100] sm:$0xff]  }
 0xf2e   :  { %12308 = vmatpush3.bf16.msra.mxu0 %v8575_v54  ;;  %13450 = vrcp.f32 %v7809_v9  ;;  %12309 = vmatprep.mubr.msk.bf16.mxu0 %vm13681_vm6, %v16494_v42  ;;  %v8667_v6 = vsel %vm611_vm7, %v7919_v12, 0  ;;  %v13172_v9 = vld [vmem:[#allocation7 + $0x148] sm:$0xff]   ;;  %v13176_v12 = vld [vmem:[#allocation7 + $0x158] sm:$0xff]  }
 0xf2f   :  { %12304 = vmatmul.mubr.msk.bf16.vlgmr.msra.gmra.mrb[44].mxu1 %vm2916_vm9, %v7892_v60  ;;  %v7812_v17 = vpop.xlane.xlu0 %7811  ;;  %12319 = vmatprep.subr.bf16.mxu0 %v16494_v42 }
 0xf30   :  { %v13447_v35 = vpop.eup %13446  ;;  %12314 = vmatpush3.bf16.msra.mxu1 %v8621_v20  ;;  %13452 = vrcp.f32 %v7812_v17  ;;  %12315 = vmatprep.mubr.msk.bf16.mxu1 %vm13681_vm6, %v16494_v42  ;;  %v13173_v17 = vld [vmem:[#allocation7 + $0x108] sm:$0xff]  }
 0xf31   :  { %v7869_v8 = vmul.f32 %v13447_v35, %v15930_v58  ;;  %12325 = vmatprep.subr.bf16.mxu1 %v16494_v42  ;;  %v8713_v58 = vsel %vm611_vm7, %v7920_v59, 0  ;;  %v13174_v35 = vld [vmem:[#allocation7 + $0x150] sm:$0xff]   ;;  %v13181_v59 = vld [vmem:[#allocation7 + $0x128] sm:$0xff]  }
 0xf32   :  { %v13449_v33 = vpop.eup %13448 }
 0xf33   :  { %v7893_v5 = vpack.c.bf16 %v7869_v8, %v7869_v8  ;;  %v7870_v3 = vmul.f32 %v13449_v33, %v15934_v48  ;;  %v16572_v48 = vld [vmem:[#allocation20_spill] sm:$0xff]  ;;  %v13178_v8 = vld [vmem:[#allocation7 + $0x160] sm:$0xff]   ;;  %v13180_v33 = vld [vmem:[#allocation7 + $0x168] sm:$0xff]  }
 0xf34   :  { %v7921_v61 = vpack.c.bf16 %v16572_v48, %v16572_v48  ;;  %v13189_v48 = vld [vmem:[#allocation7 + $0x188] sm:$0xff]  }
 0xf35   :  { %v7894_v55 = vpack.c.bf16 %v7870_v3, %v7870_v3  ;;  %12310 = vmatmul.mubr.msk.bf16.vlgmr.msra.gmra.mrb[24].mxu0 %vm2916_vm9, %v7893_v5  ;;  %v7815_v27 = vpop.xlane.xlu1 %7814  ;;  %v13182_v5 = vld [vmem:[#allocation7 + $0x170] sm:$0xff]  }
 0xf36   :  { %12320 = vmatpush3.bf16.msra.mxu0 %v8667_v6  ;;  %13454 = vrcp.f32 %v7815_v27  ;;  %12321 = vmatprep.mubr.msk.bf16.mxu0 %vm13681_vm6, %v16494_v42  ;;  %v8759_v45 = vsel %vm611_vm7, %v7921_v61, 0  ;;  %v13183_v3 = vld [vmem:[#allocation7 + $0x130] sm:$0xff]   ;;  %v13184_v6 = vld [vmem:[#allocation7 + $0x178] sm:$0xff]   ;;  %v16576_v27 = vmov 0.03125|0.03125  }
 0xf37   :  { %12316 = vmatmul.mubr.msk.bf16.vlgmr.msra.gmra.mrb[48].mxu1 %vm2916_vm9, %v7894_v55  ;;  %v7818_v44 = vpop.xlane.xlu0 %7817  ;;  %12331 = vmatprep.subr.bf16.mxu0 %v16494_v42  ;;  %v13185_v55 = vld [vmem:[#allocation7 + $0x138] sm:$0xff]   ;;  %v13190_v61 = vld [vmem:[#allocation7 + $0x1d0] sm:$0xff]  }
 0xf38   :  { %v13451_v1 = vpop.eup %13450  ;;  %12326 = vmatpush3.bf16.msra.mxu1 %v8713_v58  ;;  %13456 = vrcp.f32 %v7818_v44  ;;  %12327 = vmatprep.mubr.msk.bf16.mxu1 %vm13681_vm6, %v16494_v42  ;;  %v13186_v58 = vld [vmem:[#allocation7 + $0x1c0] sm:$0xff]  }
 0xf39   :  { %v7871_v30 = vmul.f32 %v13451_v1, %v15940_v13  ;;  %12337 = vmatprep.subr.bf16.mxu1 %v16494_v42  ;;  %v8805_v13 = vsel %vm611_vm7, %v7922_v46, 0  ;;  %v13187_v44 = vld [vmem:[#allocation7 + $0x180] sm:$0xff]   ;;  %v13188_v1 = vld [vmem:[#allocation7 + $0x1c8] sm:$0xff]  }
 0xf3a   :  { %v13453_v53 = vpop.eup %13452  ;;  %v13194_v46 = vld [vmem:[#allocation7 + $0x1e0] sm:$0xff]  }
 0xf3b   :  { %v7895_v40 = vpack.c.bf16 %v7871_v30, %v7871_v30  ;;  %v7872_v14 = vmul.f32 %v13453_v53, %v15944_v10  ;;  %v16574_v10 = vld [vmem:[#allocation22_spill] sm:$0xff]  ;;  %v13191_v30 = vld [vmem:[#allocation7 + $0x190] sm:$0xff]   ;;  %v13192_v53 = vld [vmem:[#allocation7 + $0x1d8] sm:$0xff]  }
 0xf3c   :  { %v7923_v2 = vpack.c.bf16 %v16574_v10, %v16574_v10 }
 0xf3d   :  { %v7896_v47 = vpack.c.bf16 %v7872_v14, %v7872_v14  ;;  %12322 = vmatmul.mubr.msk.bf16.vlgmr.msra.gmra.mrb[28].mxu0 %vm2916_vm9, %v7895_v40  ;;  %v7821_v25 = vpop.xlane.xlu1 %7820  ;;  %v13195_v40 = vld [vmem:[#allocation7 + $0x1a0] sm:$0xff]   ;;  %v13196_v14 = vld [vmem:[#allocation7 + $0x1e8] sm:$0xff]  }
 0xf3e   :  { %12332 = vmatpush3.bf16.msra.mxu0 %v8759_v45  ;;  %13458 = vrcp.f32 %v7821_v25  ;;  %12333 = vmatprep.mubr.msk.bf16.mxu0 %vm13681_vm6, %v16494_v42  ;;  %v8851_v36 = vsel %vm611_vm7, %v7923_v2, 0  ;;  %v13197_v45 = vld [vmem:[#allocation7 + $0x1a8] sm:$0xff]   ;;  %v13199_v25 = vld [vmem:[#allocation7 + $0x1b0] sm:$0xff]  }
 0xf3f   :  { %12328 = vmatmul.mubr.msk.bf16.vlgmr.msra.gmra.mrb[52].mxu1 %vm2916_vm9, %v7896_v47  ;;  %v7824_v7 = vpop.xlane.xlu0 %7823  ;;  %12343 = vmatprep.subr.bf16.mxu0 %v16494_v42  ;;  %v13198_v47 = vld [vmem:[#allocation7 + $0x1f0] sm:$0xff]  }
 0xf40   :  { %v13455_v56 = vpop.eup %13454  ;;  %12338 = vmatpush3.bf16.msra.mxu1 %v8805_v13  ;;  %13460 = vrcp.f32 %v7824_v7  ;;  %12339 = vmatprep.mubr.msk.bf16.mxu1 %vm13681_vm6, %v16494_v42  ;;  %v13200_v13 = vld [vmem:[#allocation7 + $0x1f8] sm:$0xff]  }
 0xf41   :  { %v7873_v51 = vmul.f32 %v13455_v56, %v15950_v16  ;;  %12349 = vmatprep.subr.bf16.mxu1 %v16494_v42  ;;  %v8897_v16 = vsel %vm611_vm7, %v7924_v52, 0  ;;  %v13201_v7 = vld [vmem:[#allocation7 + $0x1b8] sm:$0xff]  }
 0xf42   :  { %v13457_v43 = vpop.eup %13456 }
 0xf43   :  { %v7897_v22 = vpack.c.bf16 %v7873_v51, %v7873_v51  ;;  %v7874_v18 = vmul.f32 %v13457_v43, %v15954_v23  ;;  %v7925_v23 = vpack.c.bf16 %v15640_v0, %v15640_v0  ;;  %v8989_v0 = vsel %vm611_vm7, %v7926_v34, 0 }
 0xf45   :  { %v7898_v63 = vpack.c.bf16 %v7874_v18, %v7874_v18  ;;  %12334 = vmatmul.mubr.msk.bf16.vlgmr.msra.gmra.mrb[32].mxu0 %vm2916_vm9, %v7897_v22  ;;  %v7827_v38 = vpop.xlane.xlu1 %7826  ;;  %v8943_v15 = vsel %vm611_vm7, %v7925_v23, 0 }
 0xf46   :  { %12344 = vmatpush3.bf16.msra.mxu0 %v8851_v36  ;;  %13462 = vrcp.f32 %v7827_v38  ;;  %12345 = vmatprep.mubr.msk.bf16.mxu0 %vm13681_vm6, %v16494_v42 }
 0xf47   :  { %12340 = vmatmul.mubr.msk.bf16.vlgmr.msra.gmra.mrb[56].mxu1 %vm2916_vm9, %v7898_v63  ;;  %v7830_v26 = vpop.xlane.xlu0 %7829  ;;  %12355 = vmatprep.subr.bf16.mxu0 %v16494_v42 }
 0xf48   :  { %v13459_v32 = vpop.eup %13458  ;;  %12350 = vmatpush3.bf16.msra.mxu1 %v8897_v16  ;;  %13464 = vrcp.f32 %v7830_v26  ;;  %12351 = vmatprep.mubr.msk.bf16.mxu1 %vm13681_vm6, %v16494_v42 }
 0xf49   :  { %v7875_v21 = vmul.f32 %v13459_v32, %v15960_v29  ;;  %12361 = vmatprep.subr.bf16.mxu1 %v16494_v42 }
 0xf4a   :  { %v13461_v19 = vpop.eup %13460 }
 0xf4b   :  { %v7899_v41 = vpack.c.bf16 %v7875_v21, %v7875_v21  ;;  %v7876_v37 = vmul.f32 %v13461_v19, %v15964_v57 }
 0xf4d   :  { %v7900_v31 = vpack.c.bf16 %v7876_v37, %v7876_v37  ;;  %12346 = vmatmul.mubr.msk.bf16.vlgmr.msra.gmra.mrb[36].mxu0 %vm2916_vm9, %v7899_v41 }
 0xf4e   :  { %12356 = vmatpush3.bf16.msra.mxu0 %v8943_v15  ;;  %12357 = vmatprep.mubr.msk.bf16.mxu0 %vm13681_vm6, %v16494_v42 }
 0xf4f   :  { %12352 = vmatmul.mubr.msk.bf16.vlgmr.msra.gmra.mrb[60].mxu1 %vm2916_vm9, %v7900_v31  ;;  %11261 = vmatprep.subr.bf16.mxu0 %v13170_v49 }
 0xf50   :  { %v13463_v29 = vpop.eup %13462  ;;  %12362 = vmatpush3.bf16.msra.mxu1 %v8989_v0  ;;  %12363 = vmatprep.mubr.msk.bf16.mxu1 %vm13681_vm6, %v16494_v42 }
 0xf51   :  { %v7877_v11 = vmul.f32 %v13463_v29, %v15968_v39  ;;  %v13177_v39 = vld [vmem:[#allocation7 + $0x118] sm:$0xff]   ;;  %11295 = vmatprep.subr.bf16.mxu1 %v13186_v58 }
 0xf52   :  { %v13465_v57 = vpop.eup %13464 }
 0xf53   :  { %v7901_v54 = vpack.c.bf16 %v7877_v11, %v7877_v11  ;;  %v7878_v60 = vmul.f32 %v13465_v57, %v15972_v28  ;;  %v13179_v28 = vld [vmem:[#allocation7 + $0x120] sm:$0xff]  }
 0xf55   :  { %v7902_v20 = vpack.c.bf16 %v7878_v60, %v7878_v60  ;;  %12358 = vmatmul.mubr.msk.bf16.vlgmr.msra.gmra.mrb[40].mxu0 %vm2916_vm9, %v7901_v54 }
 0xf56   :  { %11262 = vmatpush3.bf16.msra.mxu0 %v13171_v62 }
 0xf57   :  { %12364 = vmatmul.mubr.msk.bf16.vlgmr.msra.gmra.mrb[64].mxu1 %vm2916_vm9, %v7902_v20  ;;  %11263 = vmatprep.subr.bf16.mxu0 %v13172_v9 }
 0xf58   :  { %11296 = vmatpush3.bf16.msra.mxu1 %v13187_v44 }
 0xf59   :  { %11297 = vmatprep.subr.bf16.mxu1 %v13188_v1 }
 0xf5a   :  { %11264 = vmatpush3.bf16.msra.mxu0 %v13173_v17 }
 0xf5b   :  { %11265 = vmatprep.subr.bf16.mxu0 %v13174_v35 }
 0xf5c   :  { %11298 = vmatpush3.bf16.msra.mxu1 %v13189_v48 }
 0xf5d   :  { %11299 = vmatprep.subr.bf16.mxu1 %v13190_v61 }
 0xf5e   :  { %11266 = vmatpush3.bf16.msra.mxu0 %v13175_v4 }
 0xf5f   :  { %11267 = vmatprep.subr.bf16.mxu0 %v13176_v12 }
 0xf60   :  { %11300 = vmatpush3.bf16.msra.mxu1 %v13191_v30 }
 0xf61   :  { %11301 = vmatprep.subr.bf16.mxu1 %v13192_v53 }
 0xf62   :  { %11268 = vmatpush3.bf16.msra.mxu0 %v13177_v39 }
 0xf63   :  { %11269 = vmatprep.subr.bf16.mxu0 %v13178_v8 }
 0xf64   :  { %11302 = vmatpush3.bf16.msra.mxu1 %v13193_v24 }
 0xf65   :  { %11303 = vmatprep.subr.bf16.mxu1 %v13194_v46 }
 0xf66   :  { %11270 = vmatpush3.bf16.msra.mxu0 %v13179_v28 }
 0xf67   :  { %11271 = vmatprep.subr.bf16.mxu0 %v13180_v33 }
 0xf68   :  { %11304 = vmatpush3.bf16.msra.mxu1 %v13195_v40 }
 0xf69   :  { %11305 = vmatprep.subr.bf16.mxu1 %v13196_v14 }
 0xf6a   :  { %11272 = vmatpush3.bf16.msra.mxu0 %v13181_v59 }
 0xf6b   :  { %11273 = vmatprep.subr.bf16.mxu0 %v13182_v5 }
 0xf6c   :  { %11306 = vmatpush3.bf16.msra.mxu1 %v13197_v45 }
 0xf6d   :  { %11307 = vmatprep.subr.bf16.mxu1 %v13198_v47 }
 0xf6e   :  { %11274 = vmatpush3.bf16.msra.mxu0 %v13183_v3 }
 0xf6f   :  { %11275 = vmatprep.subr.bf16.mxu0 %v13184_v6 }
 0xf70   :  { %11308 = vmatpush3.bf16.msra.mxu1 %v13199_v25 }
 0xf71   :  { %11309 = vmatprep.subr.bf16.mxu1 %v13200_v13 }
 0xf72   :  { %11276 = vmatpush3.bf16.msra.mxu0 %v13185_v55 }
 0xf73   :  { %12735 = vmatprep.subr.bf16.mxu0 %v16576_v27 }
 0xf74   :  { %11310 = vmatpush3.bf16.msra.mxu1 %v13201_v7 }
 0xf75   :  { %12751 = vmatprep.subr.bf16.mxu1 %v16576_v27 }
 0xfd0   :  { %v7967_v56 = vpop.f32.mrb[252].mxu0 }
 0xfd1   :  { %v12227_v10 = vpop.f32.mrb[253].mxu0 }
 0xfd2   :  { %v7970_v2 = vpop.f32.mrb[254].mxu0  ;;  %v8013_v51 = vpop.f32.mrb[20].mxu1 }
 0xfd3   :  { %v9031_v43 = vpack.c.bf16 %v8013_v51, %v7967_v56  ;;  %v12228_v50 = vpop.f32.mrb[255].mxu0  ;;  %v12233_v52 = vpop.f32.mrb[21].mxu1 }
 0xfd4   :  { %v8016_v22 = vpop.f32.mrb[22].mxu1 }
 0xfd5   :  { %v12234_v18 = vpop.f32.mrb[23].mxu1 }
 0xfd8   :  { %v8059_v36 = vpop.f32.mrb[0].mxu0 }
 0xfd9   :  { %v12239_v63 = vpop.f32.mrb[1].mxu0 }
 0xfda   :  { %v8062_v38 = vpop.f32.mrb[2].mxu0  ;;  %v8105_v16 = vpop.f32.mrb[24].mxu1 }
 0xfdb   :  { %v9035_v26 = vpack.c.bf16 %v8105_v16, %v8059_v36  ;;  %v12240_v32 = vpop.f32.mrb[3].mxu0  ;;  %v12245_v23 = vpop.f32.mrb[25].mxu1 }
 0xfdc   :  { %v8108_v21 = vpop.f32.mrb[26].mxu1 }
 0xfdd   :  { %v12246_v19 = vpop.f32.mrb[27].mxu1 }
 0xfe0   :  { %v8151_v34 = vpop.f32.mrb[4].mxu0 }
 0xfe1   :  { %v12251_v41 = vpop.f32.mrb[5].mxu0 }
 0xfe2   :  { %v8154_v37 = vpop.f32.mrb[6].mxu0  ;;  %v8197_v49 = vpop.f32.mrb[28].mxu1 }
 0xfe3   :  { %v9039_v15 = vpack.c.bf16 %v8197_v49, %v8151_v34  ;;  %v12252_v31 = vpop.f32.mrb[7].mxu0  ;;  %v12257_v0 = vpop.f32.mrb[29].mxu1 }
 0xfe4   :  { %v8200_v29 = vpop.f32.mrb[30].mxu1 }
 0xfe5   :  { %v12258_v11 = vpop.f32.mrb[31].mxu1 }
 0xfe8   :  { %v8243_v57 = vpop.f32.mrb[8].mxu0 }
 0xfe9   :  { %v12263_v62 = vpop.f32.mrb[9].mxu0 }
 0xfea   :  { %v8246_v54 = vpop.f32.mrb[10].mxu0  ;;  %v8289_v60 = vpop.f32.mrb[32].mxu1 }
 0xfeb   :  { %v9032_v9 = vpack.c.bf16 %v8289_v60, %v8243_v57  ;;  %v12264_v20 = vpop.f32.mrb[11].mxu0  ;;  %v12269_v17 = vpop.f32.mrb[33].mxu1 }
 0xfec   :  { %v8292_v35 = vpop.f32.mrb[34].mxu1 }
 0xfed   :  { %v12270_v4 = vpop.f32.mrb[35].mxu1  ;;  %9340 = vmatprep.mubr.bf16.mxu0 %v9032_v9 }
 0xfee   :  { %9341 = vmatmul.mubr.bf16.vlgmr.msra.gmra.mrb[44].mxu0 %v9031_v43 }
 0xfef   :  { %12736 = vmatpush3.bf16.msra.mxu0 %v16576_v27 }
 0xff0   :  { %v8335_v12 = vpop.f32.mrb[12].mxu0  ;;  %12737 = vmatprep.subr.bf16.mxu0 %v16576_v27 }
 0xff1   :  { %v12275_v39 = vpop.f32.mrb[13].mxu0 }
 0xff2   :  { %v8338_v8 = vpop.f32.mrb[14].mxu0  ;;  %v8381_v28 = vpop.f32.mrb[36].mxu1 }
 0xff3   :  { %v9036_v33 = vpack.c.bf16 %v8381_v28, %v8335_v12  ;;  %v12276_v59 = vpop.f32.mrb[15].mxu0  ;;  %v12281_v5 = vpop.f32.mrb[37].mxu1  ;;  %12738 = vmatpush3.bf16.msra.mxu0 %v16576_v27 }
 0xff4   :  { %v8384_v3 = vpop.f32.mrb[38].mxu1  ;;  %12739 = vmatprep.subr.bf16.mxu0 %v16576_v27 }
 0xff5   :  { %v12282_v6 = vpop.f32.mrb[39].mxu1  ;;  %9348 = vmatprep.mubr.bf16.mxu0 %v9036_v33 }
 0xff6   :  { %9349 = vmatmul.mubr.bf16.gmra.mrb[48].mxu0 %v9035_v26 }
 0xff7   :  { %12740 = vmatpush3.bf16.msra.mxu0 %v16576_v27 }
 0xff8   :  { %v8427_v55 = vpop.f32.mrb[16].mxu0  ;;  %12741 = vmatprep.subr.bf16.mxu0 %v16576_v27 }
 0xff9   :  { %v12287_v58 = vpop.f32.mrb[17].mxu0 }
 0xffa   :  { %v8430_v44 = vpop.f32.mrb[18].mxu0  ;;  %v8473_v1 = vpop.f32.mrb[40].mxu1 }
 0xffb   :  { %v9040_v48 = vpack.c.bf16 %v8473_v1, %v8427_v55  ;;  %v12288_v61 = vpop.f32.mrb[19].mxu0  ;;  %v12293_v30 = vpop.f32.mrb[41].mxu1  ;;  %12742 = vmatpush3.bf16.msra.mxu0 %v16576_v27 }
 0xffc   :  { %v8476_v53 = vpop.f32.mrb[42].mxu1  ;;  %12743 = vmatprep.subr.bf16.mxu0 %v16576_v27 }
 0xffd   :  { %v12294_v24 = vpop.f32.mrb[43].mxu1  ;;  %9356 = vmatprep.mubr.bf16.mxu0 %v9040_v48 }
 0xffe   :  { %9357 = vmatmul.mubr.bf16.gmra.mrb[52].mxu0 %v9039_v15 }
 0xfff   :  { %12744 = vmatpush3.bf16.msra.mxu0 %v16576_v27 }
0x1000   :  { %v8519_v46 = vpop.f32.mrb[20].mxu0  ;;  %12745 = vmatprep.subr.bf16.mxu0 %v16576_v27 }
0x1001   :  { %v12299_v40 = vpop.f32.mrb[21].mxu0 }
0x1002   :  { %v8522_v14 = vpop.f32.mrb[22].mxu0  ;;  %v8565_v45 = vpop.f32.mrb[44].mxu1 }
0x1003   :  { %v9033_v47 = vpack.c.bf16 %v8565_v45, %v8519_v46  ;;  %v12300_v25 = vpop.f32.mrb[23].mxu0  ;;  %v12305_v13 = vpop.f32.mrb[45].mxu1  ;;  %12746 = vmatpush3.bf16.msra.mxu0 %v16576_v27 }
0x1004   :  { %v8568_v7 = vpop.f32.mrb[46].mxu1  ;;  %12747 = vmatprep.subr.bf16.mxu0 %v16576_v27 }
0x1005   :  { %v12306_v56 = vpop.f32.mrb[47].mxu1 }
0x1007   :  { %12748 = vmatpush3.bf16.msra.mxu0 %v16576_v27 }
0x1008   :  { %v8611_v10 = vpop.f32.mrb[24].mxu0  ;;  %12749 = vmatprep.subr.bf16.mxu0 %v16576_v27 }
0x1009   :  { %v12311_v2 = vpop.f32.mrb[25].mxu0 }
0x100a   :  { %v8614_v51 = vpop.f32.mrb[26].mxu0  ;;  %v8657_v43 = vpop.f32.mrb[48].mxu1  ;;  %v10755_v2 = vld [vmem:[%s16398_s13 + $0x1] ss:$0 sm:$0xff] }
0x100b   :  { %v9037_v50 = vpack.c.bf16 %v8657_v43, %v8611_v10  ;;  %v12312_v52 = vpop.f32.mrb[27].mxu0  ;;  %v12317_v22 = vpop.f32.mrb[49].mxu1  ;;  %12750 = vmatpush3.bf16.msra.mxu0 %v16576_v27 }
0x100c   :  { %v8660_v18 = vpop.f32.mrb[50].mxu1  ;;  %12449 = vmatprep.subr.bf16.mxu0 %v16494_v42 }
0x100d   :  { %v12318_v36 = vpop.f32.mrb[51].mxu1 }
0x1010   :  { %v8703_v63 = vpop.f32.mrb[28].mxu0 }
0x1011   :  { %v12323_v38 = vpop.f32.mrb[29].mxu0 }
0x1012   :  { %v8706_v16 = vpop.f32.mrb[30].mxu0  ;;  %v8749_v26 = vpop.f32.mrb[52].mxu1 }
0x1013   :  { %v9041_v32 = vpack.c.bf16 %v8749_v26, %v8703_v63  ;;  %v12324_v23 = vpop.f32.mrb[31].mxu0  ;;  %v12329_v21 = vpop.f32.mrb[53].mxu1  ;;  %v16577_v26 = vld [vmem:[#allocation28_spill] sm:$0xff] }
0x1014   :  { %v8752_v19 = vpop.f32.mrb[54].mxu1  ;;  %v13202_v23 = vld [vmem:[#allocation9 + $0x40] sm:$0xff]   ;;  %v16578_v21 = vld [vmem:[#allocation27_spill] sm:$0xff] }
0x1015   :  { %v12330_v34 = vpop.f32.mrb[55].mxu1 }
0x1018   :  { %v8795_v41 = vpop.f32.mrb[32].mxu0 }
0x1019   :  { %v12335_v37 = vpop.f32.mrb[33].mxu0 }
0x101a   :  { %v8798_v49 = vpop.f32.mrb[34].mxu0  ;;  %v8841_v15 = vpop.f32.mrb[56].mxu1 }
0x101b   :  { %v9034_v31 = vpack.c.bf16 %v8841_v15, %v8795_v41  ;;  %v12336_v0 = vpop.f32.mrb[35].mxu0  ;;  %v12341_v29 = vpop.f32.mrb[57].mxu1 }
0x101c   :  { %v8844_v11 = vpop.f32.mrb[58].mxu1 }
0x101d   :  { %v12342_v57 = vpop.f32.mrb[59].mxu1  ;;  %9397 = vmatprep.mubr.bf16.mxu1 %v9034_v31 }
0x101e   :  { %9398 = vmatmul.mubr.bf16.vlgmr.msra.gmra.mrb[68].mxu1 %v9033_v47 }
0x101f   :  { %12752 = vmatpush3.bf16.msra.mxu1 %v16576_v27 }
0x1020   :  { %v8887_v62 = vpop.f32.mrb[36].mxu0  ;;  %12753 = vmatprep.subr.bf16.mxu1 %v16576_v27 }
0x1021   :  { %v12347_v54 = vpop.f32.mrb[37].mxu0 }
0x1022   :  { %v8890_v60 = vpop.f32.mrb[38].mxu0  ;;  %v8933_v9 = vpop.f32.mrb[60].mxu1 }
0x1023   :  { %v9038_v20 = vpack.c.bf16 %v8933_v9, %v8887_v62  ;;  %v12348_v17 = vpop.f32.mrb[39].mxu0  ;;  %v12353_v35 = vpop.f32.mrb[61].mxu1  ;;  %12754 = vmatpush3.bf16.msra.mxu1 %v16576_v27  ;;  %v16579_v60 = vld [vmem:[#allocation30_spill] sm:$0xff] }
0x1024   :  { %v8936_v4 = vpop.f32.mrb[62].mxu1  ;;  %12755 = vmatprep.subr.bf16.mxu1 %v16576_v27 }
0x1025   :  { %v12354_v12 = vpop.f32.mrb[63].mxu1  ;;  %9405 = vmatprep.mubr.bf16.mxu1 %v9038_v20  ;;  %v16580_v20 = vld [vmem:[#allocation29_spill] sm:$0xff] }
0x1026   :  { %9406 = vmatmul.mubr.bf16.gmra.mrb[72].mxu1 %v9037_v50 }
0x1027   :  { %12756 = vmatpush3.bf16.msra.mxu1 %v16576_v27 }
0x1028   :  { %v8979_v39 = vpop.f32.mrb[40].mxu0  ;;  %12757 = vmatprep.subr.bf16.mxu1 %v16576_v27 }
0x1029   :  { %v12359_v8 = vpop.f32.mrb[41].mxu0 }
0x102a   :  { %v8982_v28 = vpop.f32.mrb[42].mxu0  ;;  %v9025_v33 = vpop.f32.mrb[64].mxu1 }
0x102b   :  { %v9042_v59 = vpack.c.bf16 %v9025_v33, %v8979_v39  ;;  %v12360_v5 = vpop.f32.mrb[43].mxu0  ;;  %v12365_v3 = vpop.f32.mrb[65].mxu1  ;;  %12758 = vmatpush3.bf16.msra.mxu1 %v16576_v27 }
0x102c   :  { %v9028_v6 = vpop.f32.mrb[66].mxu1  ;;  %12759 = vmatprep.subr.bf16.mxu1 %v16576_v27 }
0x102d   :  { %v12366_v55 = vpop.f32.mrb[67].mxu1  ;;  %9413 = vmatprep.mubr.bf16.mxu1 %v9042_v59 }
0x102e   :  { %9414 = vmatmul.mubr.bf16.gmra.mrb[76].mxu1 %v9041_v32 }
0x102f   :  { %12760 = vmatpush3.bf16.msra.mxu1 %v16576_v27 }
0x1030   :  { %12761 = vmatprep.subr.bf16.mxu1 %v16576_v27 }
0x1033   :  { %12762 = vmatpush3.bf16.msra.mxu1 %v16576_v27 }
0x1034   :  { %12763 = vmatprep.subr.bf16.mxu1 %v16576_v27 }
0x1037   :  { %12764 = vmatpush3.bf16.msra.mxu1 %v16576_v27 }
0x1038   :  { %12765 = vmatprep.subr.bf16.mxu1 %v16576_v27 }
0x103b   :  { %12766 = vmatpush3.bf16.msra.mxu1 %v16576_v27 }
0x103c   :  { %12477 = vmatprep.subr.bf16.mxu1 %v16494_v42 }
0x10c1   :  { %v11277_v58 = vpop.f32.mrb[44].mxu0 }
0x10c2   :  { %v11278_v44 = vpop.f32.mrb[45].mxu0 }
0x10c3   :  { %v11279_v1 = vadd.f32 %v11278_v44, %v11277_v58  ;;  %v11280_v48 = vpop.f32.mrb[46].mxu0  ;;  %v16581_v58 = vld [vmem:[#allocation17_spill] sm:$0xff] }
0x10c4   :  { %v11281_v61 = vpop.f32.mrb[47].mxu0 }
0x10c5   :  { %v11282_v30 = vadd.f32 %v11281_v61, %v11280_v48  ;;  %v9343_v50 = vadd.f32 %v11279_v1, %v10755_v2  ;;  %v16582_v1 = vld [vmem:[#allocation18_spill] sm:$0xff] }
0x10c7   :  { %v9346_v36 = vadd.f32 %v11282_v30, %v10755_v2 }
0x10c9   :  { %v11283_v53 = vpop.f32.mrb[48].mxu0 }
0x10ca   :  { %v11284_v24 = vpop.f32.mrb[49].mxu0 }
0x10cb   :  { %v11285_v46 = vadd.f32 %v11284_v24, %v11283_v53  ;;  %v11286_v40 = vpop.f32.mrb[50].mxu0  ;;  %v13203_v53 = vld [vmem:[#allocation9 + $0x48] sm:$0xff]   ;;  %v13204_v24 = vld [vmem:[#allocation9 + $0x50] sm:$0xff]  }
0x10cc   :  { %v11287_v14 = vpop.f32.mrb[51].mxu0 }
0x10cd   :  { %v11288_v45 = vadd.f32 %v11287_v14, %v11286_v40  ;;  %v9351_v49 = vadd.f32 %v11285_v46, %v10755_v2  ;;  %v13205_v46 = vld [vmem:[#allocation9 + $0x58] sm:$0xff]   ;;  %v13206_v40 = vld [vmem:[#allocation9 + $0x60] sm:$0xff]   ;;  %v13207_v14 = vld [vmem:[#allocation9 + $0x68] sm:$0xff]  }
0x10cf   :  { %v9354_v11 = vadd.f32 %v11288_v45, %v10755_v2  ;;  %v13208_v45 = vld [vmem:[#allocation9 + $0x70] sm:$0xff]  }
0x10d1   :  { %v11289_v47 = vpop.f32.mrb[52].mxu0 }
0x10d2   :  { %v11290_v25 = vpop.f32.mrb[53].mxu0 }
0x10d3   :  { %v11291_v13 = vadd.f32 %v11290_v25, %v11289_v47  ;;  %v11292_v7 = vpop.f32.mrb[54].mxu0  ;;  %v13209_v47 = vld [vmem:[#allocation9 + $0x78] sm:$0xff]  }
0x10d4   :  { %v11293_v56 = vpop.f32.mrb[55].mxu0 }
0x10d5   :  { %v11294_v10 = vadd.f32 %v11293_v56, %v11292_v7  ;;  %v9359_v39 = vadd.f32 %v11291_v13, %v10755_v2 }
0x10d7   :  { %v9362_v5 = vadd.f32 %v11294_v10, %v10755_v2 }
0x10f1   :  { %v11311_v51 = vpop.f32.mrb[68].mxu1 }
0x10f2   :  { %v11312_v43 = vpop.f32.mrb[69].mxu1 }
0x10f3   :  { %v11313_v52 = vadd.f32 %v11312_v43, %v11311_v51  ;;  %v11314_v22 = vpop.f32.mrb[70].mxu1 }
0x10f4   :  { %v11315_v18 = vpop.f32.mrb[71].mxu1 }
0x10f5   :  { %v9400_v63 = vadd.f32 %v11313_v52, %v9343_v50  ;;  %v11316_v38 = vadd.f32 %v11315_v18, %v11314_v22 }
0x10f7   :  { %v9403_v16 = vadd.f32 %v11316_v38, %v9346_v36  ;;  %v16192_v32 = vadd.f32 %v9400_v63, %v16577_v26 }
0x10f9   :  { %v16195_v19 = vadd.f32 %v9403_v16, %v16578_v21  ;;  %v11317_v34 = vpop.f32.mrb[72].mxu1  ;;  %12399 = vmatprep.mubr.f32.mxu0 %v16192_v32  ;;  %v9527_v41 = vmul.f32 %v16192_v32, %v16192_v32 }
0x10fa   :  { %v11318_v37 = vpop.f32.mrb[73].mxu1 }
0x10fb   :  { %v9528_v15 = vmul.f32 %v16195_v19, %v16195_v19  ;;  %v11319_v31 = vadd.f32 %v11318_v37, %v11317_v34  ;;  %v11320_v0 = vpop.f32.mrb[74].mxu1  ;;  %12400 = vmatmul.mubr.f32.vlgmr.msra.gmra.mrb[56].mxu0 %v16195_v19  ;;  %12440 = vmatprep.mubr.f32.mxu1 %v9527_v41 }
0x10fc   :  { %v11321_v29 = vpop.f32.mrb[75].mxu1  ;;  %12450 = vmatpush3.bf16.msra.mxu0 %v13202_v23 }
0x10fd   :  { %v9408_v57 = vadd.f32 %v11319_v31, %v9351_v49  ;;  %v11322_v62 = vadd.f32 %v11321_v29, %v11320_v0  ;;  %12441 = vmatmul.mubr.f32.vlgmr.msra.gmra.mrb[186].mxu1 %v9528_v15  ;;  %12451 = vmatprep.subr.bf16.mxu0 %v16494_v42 }
0x10ff   :  { %v9411_v54 = vadd.f32 %v11322_v62, %v9354_v11  ;;  %v16205_v9 = vadd.f32 %v9408_v57, %v16579_v60 }
0x1100   :  { %12452 = vmatpush3.bf16.msra.mxu0 %v13203_v53 }
0x1101   :  { %v16208_v17 = vadd.f32 %v9411_v54, %v16580_v20  ;;  %v11323_v35 = vpop.f32.mrb[76].mxu1  ;;  %12402 = vmatprep.mubr.f32.mxu0 %v16205_v9  ;;  %v9529_v4 = vmul.f32 %v16205_v9, %v16205_v9  ;;  %12453 = vmatprep.subr.bf16.mxu0 %v16494_v42  ;;  %v10790_v20 = vld [vmem:[%s16399_s14 + $0x1] ss:$0 sm:$0xff] }
0x1102   :  { %v11324_v12 = vpop.f32.mrb[77].mxu1 }
0x1103   :  { %v9530_v8 = vmul.f32 %v16208_v17, %v16208_v17  ;;  %v11325_v28 = vadd.f32 %v11324_v12, %v11323_v35  ;;  %v11326_v33 = vpop.f32.mrb[78].mxu1  ;;  %12403 = vmatmul.mubr.f32.gmra.mrb[58].mxu0 %v16208_v17  ;;  %12443 = vmatprep.mubr.f32.mxu1 %v9529_v4 }
0x1104   :  { %v11327_v59 = vpop.f32.mrb[79].mxu1  ;;  %12454 = vmatpush3.bf16.msra.mxu0 %v13204_v24 }
0x1105   :  { %v9416_v3 = vadd.f32 %v11325_v28, %v9359_v39  ;;  %v11328_v6 = vadd.f32 %v11327_v59, %v11326_v33  ;;  %12444 = vmatmul.mubr.f32.gmra.mrb[4].mxu1 %v9530_v8  ;;  %12455 = vmatprep.subr.bf16.mxu0 %v16494_v42  ;;  %v10791_v28 = vld [vmem:[%s16400_s15 + $0x1] ss:$0 sm:$0xff] }
0x1107   :  { %v9419_v55 = vadd.f32 %v11328_v6, %v9362_v5  ;;  %v16217_v44 = vadd.f32 %v9416_v3, %v16581_v58 }
0x1108   :  { %12456 = vmatpush3.bf16.msra.mxu0 %v13205_v46 }
0x1109   :  { %v16220_v48 = vadd.f32 %v9419_v55, %v16582_v1  ;;  %12405 = vmatprep.mubr.f32.mxu0 %v16217_v44  ;;  %v9531_v61 = vmul.f32 %v16217_v44, %v16217_v44  ;;  %12457 = vmatprep.subr.bf16.mxu0 %v16494_v42 }
0x110b   :  { %v9532_v30 = vmul.f32 %v16220_v48, %v16220_v48  ;;  %12406 = vmatmul.mubr.f32.gmra.mrb[60].mxu0 %v16220_v48  ;;  %12446 = vmatprep.mubr.f32.mxu1 %v9531_v61 }
0x110c   :  { %12465 = vmatprep.mubr.msk.bf16.mxu0 %vm13681_vm6, %v16494_v42  ;;  %12458 = vmatpush3.bf16.msra.mxu0 %v13206_v40 }
0x110d   :  { %12447 = vmatmul.mubr.f32.gmra.mrb[80].mxu1 %v9532_v30  ;;  %12459 = vmatprep.subr.bf16.mxu0 %v16494_v42 }
0x110e   :  { %12493 = vmatprep.mubr.msk.bf16.mxu1 %vm13681_vm6, %v16494_v42 }
0x1110   :  { %12460 = vmatpush3.bf16.msra.mxu0 %v13207_v14 }
0x1111   :  { %12461 = vmatprep.subr.bf16.mxu0 %v16494_v42 }
0x1114   :  { %12462 = vmatpush3.bf16.msra.mxu0 %v13208_v45 }
0x1115   :  { %12463 = vmatprep.subr.bf16.mxu0 %v16494_v42 }
0x1118   :  { %12464 = vmatpush3.bf16.msra.mxu0 %v13209_v47 }
0x1119   :  { %12767 = vmatprep.subr.bf16.mxu0 %v16576_v27 }
0x11ce   :  { %v12401_v25 = vpop.f32.mrb[56].mxu0 }
0x11cf   :  { %v9629_v13 = vmul.f32 %v12401_v25, %v12401_v25  ;;  %v9498_v7 = vpop.f32.mrb[57].mxu0  ;;  %v9647_v11 = vsub.f32 %v16195_v19, %v12401_v25 }
0x11d0   :  { %v9628_v56 = vmul.f32 %v9498_v7, %v9498_v7  ;;  %v12442_v10 = vpop.f32.mrb[186].mxu1  ;;  %v9646_v60 = vsub.f32 %v16192_v32, %v9498_v7 }
0x11d1   :  { %v9635_v2 = vsub.f32 %v12442_v10, %v9629_v13  ;;  %v9599_v51 = vpop.f32.mrb[187].mxu1 }
0x11d2   :  { %v9634_v43 = vsub.f32 %v9599_v51, %v9628_v56 }
0x11d3   :  { %v9641_v50 = vmax.f32 %v9635_v2, 0.0 }
0x11d4   :  { %v9640_v52 = vmax.f32 %v9634_v43, 0.0 }
0x11d5   :  { %v9653_v22 = vadd.f32 1e-12, %v9641_v50 }
0x11d6   :  { %v9652_v18 = vadd.f32 1e-12, %v9640_v52  ;;  %v12404_v36 = vpop.f32.mrb[58].mxu0  ;;  %v13210_v52 = vld [vmem:[#allocation10 + $0x40] sm:$0xff]  }
0x11d7   :  { %13466 = vrsqrt.f32 %v9653_v22  ;;  %v9631_v63 = vmul.f32 %v12404_v36, %v12404_v36  ;;  %v9508_v38 = vpop.f32.mrb[59].mxu0  ;;  %v9649_v1 = vsub.f32 %v16208_v17, %v12404_v36  ;;  %12478 = vmatpush3.bf16.msra.mxu1 %v13210_v52  ;;  %v13211_v22 = vld [vmem:[#allocation10 + $0x48] sm:$0xff]   ;;  %v13213_v36 = vld [vmem:[#allocation10 + $0x58] sm:$0xff]  }
0x11d8   :  { %13468 = vrsqrt.f32 %v9652_v18  ;;  %v9630_v16 = vmul.f32 %v9508_v38, %v9508_v38  ;;  %v12445_v26 = vpop.f32.mrb[4].mxu1  ;;  %v9648_v53 = vsub.f32 %v16205_v9, %v9508_v38  ;;  %12479 = vmatprep.subr.bf16.mxu1 %v16494_v42  ;;  %v13212_v18 = vld [vmem:[#allocation10 + $0x50] sm:$0xff]   ;;  %v13215_v38 = vld [vmem:[#allocation10 + $0x68] sm:$0xff]  }
0x11d9   :  { %v9637_v23 = vsub.f32 %v12445_v26, %v9631_v63  ;;  %v9609_v21 = vpop.f32.mrb[5].mxu1  ;;  %v13214_v63 = vld [vmem:[#allocation10 + $0x60] sm:$0xff]   ;;  %v13217_v26 = vld [vmem:[#allocation10 + $0x78] sm:$0xff]  }
0x11da   :  { %v9636_v34 = vsub.f32 %v9609_v21, %v9630_v16  ;;  %v13216_v16 = vld [vmem:[#allocation10 + $0x70] sm:$0xff]  }
0x11db   :  { %v9643_v41 = vmax.f32 %v9637_v23, 0.0  ;;  %12480 = vmatpush3.bf16.msra.mxu1 %v13211_v22  ;;  %v10793_v23 = vld [vmem:[%s16402_s17 + $0x1] ss:$0 sm:$0xff] }
0x11dc   :  { %v9642_v37 = vmax.f32 %v9636_v34, 0.0  ;;  %12481 = vmatprep.subr.bf16.mxu1 %v16494_v42 }
0x11dd   :  { %v9655_v49 = vadd.f32 1e-12, %v9643_v41 }
0x11de   :  { %v9654_v15 = vadd.f32 1e-12, %v9642_v37  ;;  %v12407_v31 = vpop.f32.mrb[60].mxu0 }
0x11df   :  { %13470 = vrsqrt.f32 %v9655_v49  ;;  %v9633_v0 = vmul.f32 %v12407_v31, %v12407_v31  ;;  %v9518_v29 = vpop.f32.mrb[61].mxu0  ;;  %v9651_v25 = vsub.f32 %v16220_v48, %v12407_v31  ;;  %12482 = vmatpush3.bf16.msra.mxu1 %v13212_v18 }
0x11e0   :  { %13472 = vrsqrt.f32 %v9654_v15  ;;  %v9632_v57 = vmul.f32 %v9518_v29, %v9518_v29  ;;  %v12448_v62 = vpop.f32.mrb[80].mxu1  ;;  %v9650_v7 = vsub.f32 %v16217_v44, %v9518_v29  ;;  %12483 = vmatprep.subr.bf16.mxu1 %v16494_v42 }
0x11e1   :  { %v13467_v54 = vpop.eup %13466  ;;  %v9639_v35 = vsub.f32 %v12448_v62, %v9633_v0  ;;  %v9619_v4 = vpop.f32.mrb[81].mxu1 }
0x11e2   :  { %v13469_v12 = vpop.eup %13468  ;;  %v9665_v39 = vmul.f32 %v13467_v54, %v9647_v11  ;;  %v9638_v8 = vsub.f32 %v9619_v4, %v9632_v57 }
0x11e3   :  { %v9664_v19 = vmul.f32 %v13469_v12, %v9646_v60  ;;  %v9645_v33 = vmax.f32 %v9639_v35, 0.0  ;;  %12484 = vmatpush3.bf16.msra.mxu1 %v13213_v36 }
0x11e4   :  { %v9677_v59 = vmul.f32 %v10790_v20, %v9665_v39  ;;  %v9644_v5 = vmax.f32 %v9638_v8, 0.0  ;;  %12485 = vmatprep.subr.bf16.mxu1 %v16494_v42 }
0x11e5   :  { %v9676_v3 = vmul.f32 %v10790_v20, %v9664_v19  ;;  %v9657_v6 = vadd.f32 1e-12, %v9645_v33 }
0x11e6   :  { %v16247_v32 = vadd.f32 %v10791_v28, %v9677_v59  ;;  %v9656_v55 = vadd.f32 1e-12, %v9644_v5 }
0x11e7   :  { %v16249_v58 = vadd.f32 %v10791_v28, %v9676_v3  ;;  %13474 = vrsqrt.f32 %v9657_v6  ;;  %12486 = vmatpush3.bf16.msra.mxu1 %v13214_v63 }
0x11e8   :  { %13476 = vrsqrt.f32 %v9656_v55  ;;  %12487 = vmatprep.subr.bf16.mxu1 %v16494_v42 }
0x11e9   :  { %v13471_v61 = vpop.eup %13470  ;;  %v9694_v30 = vpack.c.bf16 %v16247_v32, %v16249_v58 }
0x11ea   :  { %v13473_v24 = vpop.eup %13472  ;;  %v9667_v46 = vmul.f32 %v13471_v61, %v9649_v1 }
0x11eb   :  { %v9666_v40 = vmul.f32 %v13473_v24, %v9648_v53  ;;  %12466 = vmatmul.mubr.bf16.vlgmr.msra.gmra.mrb[64].mxu0 %v9694_v30  ;;  %12488 = vmatpush3.bf16.msra.mxu1 %v13215_v38 }
0x11ec   :  { %v9679_v14 = vmul.f32 %v10790_v20, %v9667_v46  ;;  %12469 = vmatprep.mubr.msk.bf16.mxu0 %vm13681_vm6, %v16494_v42  ;;  %12768 = vmatpush3.bf16.msra.mxu0 %v16576_v27 }
0x11ed   :  { %v9678_v45 = vmul.f32 %v10790_v20, %v9666_v40  ;;  %12769 = vmatprep.subr.bf16.mxu0 %v16576_v27  ;;  %12489 = vmatprep.subr.bf16.mxu1 %v16494_v42 }
0x11ee   :  { %v16259_v17 = vadd.f32 %v10791_v28, %v9679_v14 }
0x11ef   :  { %v16261_v47 = vadd.f32 %v10791_v28, %v9678_v45  ;;  %12490 = vmatpush3.bf16.msra.mxu1 %v13216_v16 }
0x11f0   :  { %12770 = vmatpush3.bf16.msra.mxu0 %v16576_v27  ;;  %12491 = vmatprep.subr.bf16.mxu1 %v16494_v42 }
0x11f1   :  { %v13475_v9 = vpop.eup %13474  ;;  %v9695_v13 = vpack.c.bf16 %v16259_v17, %v16261_v47  ;;  %12771 = vmatprep.subr.bf16.mxu0 %v16576_v27 }
0x11f2   :  { %v13477_v56 = vpop.eup %13476  ;;  %v9669_v10 = vmul.f32 %v13475_v9, %v9651_v25 }
0x11f3   :  { %v9668_v2 = vmul.f32 %v13477_v56, %v9650_v7  ;;  %12470 = vmatmul.mubr.bf16.gmra.mrb[68].mxu0 %v9695_v13  ;;  %12492 = vmatpush3.bf16.msra.mxu1 %v13217_v26 }
0x11f4   :  { %v9681_v51 = vmul.f32 %v10790_v20, %v9669_v10  ;;  %12473 = vmatprep.mubr.msk.bf16.mxu0 %vm13681_vm6, %v16494_v42  ;;  %12772 = vmatpush3.bf16.msra.mxu0 %v16576_v27 }
0x11f5   :  { %v9680_v48 = vmul.f32 %v10790_v20, %v9668_v2  ;;  %12773 = vmatprep.subr.bf16.mxu0 %v16576_v27  ;;  %12783 = vmatprep.subr.bf16.mxu1 %v16576_v27 }
0x11f6   :  { %v16273_v43 = vadd.f32 %v10791_v28, %v9681_v51 }
0x11f7   :  { %v16275_v50 = vadd.f32 %v10791_v28, %v9680_v48 }
0x11f8   :  { %12774 = vmatpush3.bf16.msra.mxu0 %v16576_v27 }
0x11f9   :  { %v9696_v44 = vpack.c.bf16 %v16273_v43, %v16275_v50  ;;  %12775 = vmatprep.subr.bf16.mxu0 %v16576_v27 }
0x11fb   :  { %12474 = vmatmul.mubr.bf16.gmra.mrb[72].mxu0 %v9696_v44 }
0x11fc   :  { %12776 = vmatpush3.bf16.msra.mxu0 %v16576_v27 }
0x11fd   :  { %12777 = vmatprep.subr.bf16.mxu0 %v16576_v27 }
0x1200   :  { %12778 = vmatpush3.bf16.msra.mxu0 %v16576_v27 }
0x1201   :  { %12779 = vmatprep.subr.bf16.mxu0 %v16576_v27 }
0x1204   :  { %12780 = vmatpush3.bf16.msra.mxu0 %v16576_v27 }
0x1205   :  { %12781 = vmatprep.subr.bf16.mxu0 %v16576_v27 }
0x1208   :  { %12782 = vmatpush3.bf16.msra.mxu0 %v16576_v27 }
0x1209   :  { %12587 = vmatprep.subr.bf16.mxu0 %v16494_v42 }
0x12be   :  { %v9804_v21 = vpop.f32.mrb[64].mxu0 }
0x12bf   :  { %v9805_v34 = vadd.f32 %v10793_v23, %v9804_v21  ;;  %v12467_v41 = vpop.f32.mrb[65].mxu0 }
0x12c0   :  { %v9807_v37 = vpop.f32.mrb[66].mxu0 }
0x12c1   :  { %v9833_v49 = vmul.f32 0.044715, %v9805_v34  ;;  %v9808_v15 = vadd.f32 %v10793_v23, %v9807_v37  ;;  %v12468_v31 = vpop.f32.mrb[67].mxu0  ;;  %v9827_v22 = vmul.f32 0.5, %v9805_v34 }
0x12c3   :  { %v9839_v0 = vmul.f32 %v9833_v49, %v9805_v34  ;;  %v9834_v29 = vmul.f32 0.044715, %v9808_v15  ;;  %v9828_v18 = vmul.f32 0.5, %v9808_v15 }
0x12c5   :  { %v9845_v11 = vmul.f32 %v9839_v0, %v9805_v34  ;;  %v9840_v57 = vmul.f32 %v9834_v29, %v9808_v15 }
0x12c6   :  { %v9812_v62 = vpop.f32.mrb[68].mxu0 }
0x12c7   :  { %v9851_v54 = vadd.f32 %v9845_v11, %v9805_v34  ;;  %v9846_v60 = vmul.f32 %v9840_v57, %v9808_v15  ;;  %v9813_v20 = vadd.f32 %v10793_v23, %v9812_v62  ;;  %v12471_v35 = vpop.f32.mrb[69].mxu0 }
0x12c8   :  { %v9815_v4 = vpop.f32.mrb[70].mxu0 }
0x12c9   :  { %v9857_v12 = vmul.f32 0.7978846, %v9851_v54  ;;  %v9852_v39 = vadd.f32 %v9846_v60, %v9808_v15  ;;  %v9835_v8 = vmul.f32 0.044715, %v9813_v20  ;;  %v12472_v28 = vpop.f32.mrb[71].mxu0  ;;  %v9816_v19 = vadd.f32 %v10793_v23, %v9815_v4 }
0x12ca   :  { %v9829_v34 = vmul.f32 0.5, %v9813_v20 }
0x12cb   :  { %13478 = vtanh.f32 %v9857_v12  ;;  %v9858_v33 = vmul.f32 0.7978846, %v9852_v39  ;;  %v9841_v59 = vmul.f32 %v9835_v8, %v9813_v20  ;;  %v9836_v5 = vmul.f32 0.044715, %v9816_v19  ;;  %v10803_v8 = vld [vmem:[%s16404_s19 + $0x1] ss:$0 sm:$0xff] }
0x12cc   :  { %v9830_v15 = vmul.f32 0.5, %v9816_v19 }
0x12cd   :  { %13480 = vtanh.f32 %v9858_v33  ;;  %v9847_v3 = vmul.f32 %v9841_v59, %v9813_v20  ;;  %v9842_v6 = vmul.f32 %v9836_v5, %v9816_v19 }
0x12ce   :  { %v9820_v55 = vpop.f32.mrb[72].mxu0 }
0x12cf   :  { %v9853_v1 = vadd.f32 %v9847_v3, %v9813_v20  ;;  %v9821_v61 = vadd.f32 %v10793_v23, %v9820_v55  ;;  %v12475_v30 = vpop.f32.mrb[73].mxu0  ;;  %v9848_v53 = vmul.f32 %v9842_v6, %v9816_v19 }
0x12d0   :  { %v9823_v24 = vpop.f32.mrb[74].mxu0 }
0x12d1   :  { %v9859_v46 = vmul.f32 0.7978846, %v9853_v1  ;;  %v9837_v40 = vmul.f32 0.044715, %v9821_v61  ;;  %v9824_v14 = vadd.f32 %v10793_v23, %v9823_v24  ;;  %v12476_v45 = vpop.f32.mrb[75].mxu0  ;;  %v9854_v25 = vadd.f32 %v9848_v53, %v9816_v19 }
0x12d2   :  { %v9831_v60 = vmul.f32 0.5, %v9821_v61 }
0x12d3   :  { %13482 = vtanh.f32 %v9859_v46  ;;  %v9843_v9 = vmul.f32 %v9837_v40, %v9821_v61  ;;  %v9838_v13 = vmul.f32 0.044715, %v9824_v14  ;;  %v9860_v7 = vmul.f32 0.7978846, %v9854_v25 }
0x12d4   :  { %v9832_v35 = vmul.f32 0.5, %v9824_v14 }
0x12d5   :  { %v13479_v56 = vpop.eup %13478  ;;  %v9849_v10 = vmul.f32 %v9843_v9, %v9821_v61  ;;  %v9844_v2 = vmul.f32 %v9838_v13, %v9824_v14  ;;  %13484 = vtanh.f32 %v9860_v7 }
0x12d6   :  { %v9869_v51 = vadd.f32 1.0, %v13479_v56 }
0x12d7   :  { %v13481_v48 = vpop.eup %13480  ;;  %v9855_v44 = vadd.f32 %v9849_v10, %v9821_v61  ;;  %v9850_v52 = vmul.f32 %v9844_v2, %v9824_v14 }
0x12d8   :  { %v9870_v36 = vadd.f32 1.0, %v13481_v48  ;;  %v9875_v16 = vmul.f32 %v9869_v51, %v9827_v22  ;;  %v13220_v48 = vld [vmem:[#allocation12 + $0x10] sm:$0xff]   ;;  %v13223_v22 = vld [vmem:[#allocation12 + $0x28] sm:$0xff]  }
0x12d9   :  { %v9861_v63 = vmul.f32 0.7978846, %v9855_v44  ;;  %v9856_v38 = vadd.f32 %v9850_v52, %v9824_v14  ;;  %v13221_v44 = vld [vmem:[#allocation12 + $0x18] sm:$0xff]   ;;  %v13222_v52 = vld [vmem:[#allocation12 + $0x20] sm:$0xff]  }
0x12da   :  { %v9876_v26 = vmul.f32 %v9870_v36, %v9828_v18  ;;  %v13224_v18 = vld [vmem:[#allocation12 + $0x30] sm:$0xff]   ;;  %v13225_v36 = vld [vmem:[#allocation12 + $0x38] sm:$0xff]  }
0x12db   :  { %13486 = vtanh.f32 %v9861_v63  ;;  %v9862_v23 = vmul.f32 0.7978846, %v9856_v38 }
0x12dc   :  { %v9881_v21 = vpack.c.bf16 %v9876_v26, %v9875_v16 }
0x12dd   :  { %v13483_v41 = vpop.eup %13482  ;;  %13488 = vtanh.f32 %v9862_v23 }
0x12de   :  { %12494 = vmatmul.mubr.bf16.vlgmr.msra.gmra.mrb[84].mxu1 %v9881_v21  ;;  %v9871_v37 = vadd.f32 1.0, %v13483_v41 }
0x12df   :  { %12497 = vmatprep.mubr.msk.bf16.mxu1 %vm13681_vm6, %v16494_v42  ;;  %12784 = vmatpush3.bf16.msra.mxu1 %v16576_v27  ;;  %v13485_v49 = vpop.eup %13484 }
0x12e0   :  { %12785 = vmatprep.subr.bf16.mxu1 %v16576_v27  ;;  %v9872_v31 = vadd.f32 1.0, %v13485_v49  ;;  %v9877_v0 = vmul.f32 %v9871_v37, %v9829_v34 }
0x12e2   :  { %v9878_v29 = vmul.f32 %v9872_v31, %v9830_v15 }
0x12e3   :  { %12786 = vmatpush3.bf16.msra.mxu1 %v16576_v27 }
0x12e4   :  { %12787 = vmatprep.subr.bf16.mxu1 %v16576_v27  ;;  %v9882_v57 = vpack.c.bf16 %v9878_v29, %v9877_v0 }
0x12e5   :  { %v13487_v11 = vpop.eup %13486 }
0x12e6   :  { %v9873_v62 = vadd.f32 1.0, %v13487_v11  ;;  %12498 = vmatmul.mubr.bf16.gmra.mrb[88].mxu1 %v9882_v57 }
0x12e7   :  { %v13489_v54 = vpop.eup %13488  ;;  %12501 = vmatprep.mubr.msk.bf16.mxu1 %vm13681_vm6, %v16494_v42  ;;  %12788 = vmatpush3.bf16.msra.mxu1 %v16576_v27 }
0x12e8   :  { %v9874_v4 = vadd.f32 1.0, %v13489_v54  ;;  %12789 = vmatprep.subr.bf16.mxu1 %v16576_v27  ;;  %v9879_v20 = vmul.f32 %v9873_v62, %v9831_v60 }
0x12ea   :  { %v9880_v12 = vmul.f32 %v9874_v4, %v9832_v35 }
0x12eb   :  { %12790 = vmatpush3.bf16.msra.mxu1 %v16576_v27 }
0x12ec   :  { %v9883_v39 = vpack.c.bf16 %v9880_v12, %v9879_v20  ;;  %12791 = vmatprep.subr.bf16.mxu1 %v16576_v27 }
0x12ee   :  { %12502 = vmatmul.mubr.bf16.gmra.mrb[92].mxu1 %v9883_v39 }
0x12ef   :  { %12792 = vmatpush3.bf16.msra.mxu1 %v16576_v27 }
0x12f0   :  { %12793 = vmatprep.subr.bf16.mxu1 %v16576_v27 }
0x12f3   :  { %12794 = vmatpush3.bf16.msra.mxu1 %v16576_v27 }
0x12f4   :  { %12795 = vmatprep.subr.bf16.mxu1 %v16576_v27 }
0x12f7   :  { %12796 = vmatpush3.bf16.msra.mxu1 %v16576_v27 }
0x12f8   :  { %12797 = vmatprep.subr.bf16.mxu1 %v16576_v27 }
0x12fb   :  { %12798 = vmatpush3.bf16.msra.mxu1 %v16576_v27 }
0x13b1   :  { %v9991_v28 = vpop.f32.mrb[84].mxu1 }
0x13b2   :  { %v9992_v19 = vadd.f32 %v10803_v8, %v9991_v28  ;;  %v12495_v33 = vpop.f32.mrb[85].mxu1 }
0x13b3   :  { %v9994_v59 = vpop.f32.mrb[86].mxu1 }
0x13b4   :  { %v16323_v5 = vadd.f32 %v9992_v19, %v16249_v58  ;;  %v9995_v3 = vadd.f32 %v10803_v8, %v9994_v59  ;;  %v12496_v6 = vpop.f32.mrb[87].mxu1 }
0x13b6   :  { %v16326_v55 = vadd.f32 %v9995_v3, %v16247_v32  ;;  %12537 = vmatprep.mubr.f32.mxu0 %v16323_v5  ;;  %v10119_v27 = vmul.f32 %v16323_v5, %v16323_v5  ;;  %v10814_v3 = vld [vmem:[%s16405_s20 + $0x1] ss:$0 sm:$0xff] }
0x13b8   :  { %v10120_v1 = vmul.f32 %v16326_v55, %v16326_v55  ;;  %12538 = vmatmul.mubr.f32.vlgmr.msra.gmra.mrb[62].mxu0 %v16326_v55  ;;  %12578 = vmatprep.mubr.f32.mxu1 %v10119_v27 }
0x13b9   :  { %v9999_v61 = vpop.f32.mrb[88].mxu1 }
0x13ba   :  { %12579 = vmatmul.mubr.f32.vlgmr.msra.gmra.mrb[82].mxu1 %v10120_v1  ;;  %v10000_v58 = vadd.f32 %v10803_v8, %v9999_v61  ;;  %v12499_v30 = vpop.f32.mrb[89].mxu1 }
0x13bb   :  { %v10002_v53 = vpop.f32.mrb[90].mxu1 }
0x13bc   :  { %v16335_v24 = vadd.f32 %v10000_v58, %v16261_v47  ;;  %v10003_v32 = vadd.f32 %v10803_v8, %v10002_v53  ;;  %v12500_v46 = vpop.f32.mrb[91].mxu1 }
0x13be   :  { %v16338_v40 = vadd.f32 %v10003_v32, %v16259_v17  ;;  %12540 = vmatprep.mubr.f32.mxu0 %v16335_v24  ;;  %v10121_v14 = vmul.f32 %v16335_v24, %v16335_v24 }
0x13c0   :  { %v10122_v45 = vmul.f32 %v16338_v40, %v16338_v40  ;;  %12541 = vmatmul.mubr.f32.gmra.mrb[76].mxu0 %v16338_v40  ;;  %12581 = vmatprep.mubr.f32.mxu1 %v10121_v14 }
0x13c1   :  { %v10007_v25 = vpop.f32.mrb[92].mxu1 }
0x13c2   :  { %v10008_v9 = vadd.f32 %v10803_v8, %v10007_v25  ;;  %v12503_v47 = vpop.f32.mrb[93].mxu1  ;;  %12582 = vmatmul.mubr.f32.gmra.mrb[96].mxu1 %v10122_v45 }
0x13c3   :  { %v10010_v13 = vpop.f32.mrb[94].mxu1 }
0x13c4   :  { %v16347_v7 = vadd.f32 %v10008_v9, %v16275_v50  ;;  %v10011_v17 = vadd.f32 %v10803_v8, %v10010_v13  ;;  %v12504_v56 = vpop.f32.mrb[95].mxu1  ;;  %v13218_v50 = vld [vmem:[#allocation12] sm:$0xff]  }
0x13c5   :  { %12588 = vmatpush3.bf16.msra.mxu0 %v13218_v50 }
0x13c6   :  { %v16350_v10 = vadd.f32 %v10011_v17, %v16273_v43  ;;  %12543 = vmatprep.mubr.f32.mxu0 %v16347_v7  ;;  %v10123_v2 = vmul.f32 %v16347_v7, %v16347_v7  ;;  %12589 = vmatprep.subr.bf16.mxu0 %v16494_v42  ;;  %v13219_v43 = vld [vmem:[#allocation12 + $0x8] sm:$0xff]  }
0x13c8   :  { %v10124_v51 = vmul.f32 %v16350_v10, %v16350_v10  ;;  %12544 = vmatmul.mubr.f32.gmra.mrb[78].mxu0 %v16350_v10  ;;  %12584 = vmatprep.mubr.f32.mxu1 %v10123_v2 }
0x13c9   :  { %12603 = vmatprep.mubr.msk.bf16.mxu0 %vm13681_vm6, %v16494_v42  ;;  %12590 = vmatpush3.bf16.msra.mxu0 %v13219_v43 }
0x13ca   :  { %12585 = vmatmul.mubr.f32.gmra.mrb[98].mxu1 %v10124_v51  ;;  %12591 = vmatprep.subr.bf16.mxu0 %v16494_v42 }
0x13cd   :  { %12592 = vmatpush3.bf16.msra.mxu0 %v13220_v48 }
0x13ce   :  { %12593 = vmatprep.subr.bf16.mxu0 %v16494_v42 }
0x13d1   :  { %12594 = vmatpush3.bf16.msra.mxu0 %v13221_v44 }
0x13d2   :  { %12595 = vmatprep.subr.bf16.mxu0 %v16494_v42 }
0x13d5   :  { %12596 = vmatpush3.bf16.msra.mxu0 %v13222_v52 }
0x13d6   :  { %12597 = vmatprep.subr.bf16.mxu0 %v16494_v42 }
0x13d9   :  { %12598 = vmatpush3.bf16.msra.mxu0 %v13223_v22 }
0x13da   :  { %12599 = vmatprep.subr.bf16.mxu0 %v16494_v42 }
0x13dd   :  { %12600 = vmatpush3.bf16.msra.mxu0 %v13224_v18 }
0x13de   :  { %12601 = vmatprep.subr.bf16.mxu0 %v16494_v42 }
0x13e1   :  { %12602 = vmatpush3.bf16.msra.mxu0 %v13225_v36 }
0x148b   :  { %v12539_v63 = vpop.f32.mrb[62].mxu0 }
0x148c   :  { %v10221_v38 = vmul.f32 %v12539_v63, %v12539_v63  ;;  %v10090_v16 = vpop.f32.mrb[63].mxu0  ;;  %v10239_v8 = vsub.f32 %v16326_v55, %v12539_v63  ;;  %v10815_v55 = vld [vmem:[%s16406_s21 + $0x1] ss:$0 sm:$0xff] }
0x148d   :  { %v10220_v26 = vmul.f32 %v10090_v16, %v10090_v16  ;;  %v12580_v23 = vpop.f32.mrb[82].mxu1  ;;  %v10238_v59 = vsub.f32 %v16323_v5, %v10090_v16 }
0x148e   :  { %v10227_v21 = vsub.f32 %v12580_v23, %v10221_v38  ;;  %v10191_v41 = vpop.f32.mrb[83].mxu1 }
0x148f   :  { %v10226_v37 = vsub.f32 %v10191_v41, %v10220_v26 }
0x1490   :  { %v10233_v49 = vmax.f32 %v10227_v21, 0.0 }
0x1491   :  { %v10232_v34 = vmax.f32 %v10226_v37, 0.0 }
0x1492   :  { %v10245_v15 = vadd.f32 1e-12, %v10233_v49 }
0x1493   :  { %v10244_v31 = vadd.f32 1e-12, %v10232_v34  ;;  %v12542_v0 = vpop.f32.mrb[76].mxu0 }
0x1494   :  { %13490 = vrsqrt.f32 %v10245_v15  ;;  %v10223_v29 = vmul.f32 %v12542_v0, %v12542_v0  ;;  %v10100_v11 = vpop.f32.mrb[77].mxu0  ;;  %v10241_v2 = vsub.f32 %v16338_v40, %v12542_v0 }
0x1495   :  { %13492 = vrsqrt.f32 %v10244_v31  ;;  %v10222_v42 = vmul.f32 %v10100_v11, %v10100_v11  ;;  %v12583_v57 = vpop.f32.mrb[96].mxu1  ;;  %v10240_v43 = vsub.f32 %v16335_v24, %v10100_v11 }
0x1496   :  { %v10229_v62 = vsub.f32 %v12583_v57, %v10223_v29  ;;  %v10201_v54 = vpop.f32.mrb[97].mxu1 }
0x1497   :  { %v10228_v60 = vsub.f32 %v10201_v54, %v10222_v42 }
0x1498   :  { %v10235_v35 = vmax.f32 %v10229_v62, 0.0 }
0x1499   :  { %v10234_v4 = vmax.f32 %v10228_v60, 0.0 }
0x149a   :  { %v10247_v20 = vadd.f32 1e-12, %v10235_v35 }
0x149b   :  { %v10246_v12 = vadd.f32 1e-12, %v10234_v4  ;;  %v12545_v39 = vpop.f32.mrb[78].mxu0 }
0x149c   :  { %13494 = vrsqrt.f32 %v10247_v20  ;;  %v10225_v28 = vmul.f32 %v12545_v39, %v12545_v39  ;;  %v10110_v19 = vpop.f32.mrb[79].mxu0  ;;  %v10243_v21 = vsub.f32 %v16350_v10, %v12545_v39 }
0x149d   :  { %13496 = vrsqrt.f32 %v10246_v12  ;;  %v10224_v6 = vmul.f32 %v10110_v19, %v10110_v19  ;;  %v12586_v27 = vpop.f32.mrb[98].mxu1  ;;  %v10242_v37 = vsub.f32 %v16347_v7, %v10110_v19  ;;  %v10816_v19 = vld [vmem:[%s16408_s23] ss:$0 sm:$0xff] }
0x149e   :  { %v13491_v33 = vpop.eup %13490  ;;  %v10231_v58 = vsub.f32 %v12586_v27, %v10225_v28  ;;  %v10211_v30 = vpop.f32.mrb[99].mxu1 }
0x149f   :  { %v13493_v1 = vpop.eup %13492  ;;  %v10257_v61 = vmul.f32 %v13491_v33, %v10239_v8  ;;  %v10230_v32 = vsub.f32 %v10211_v30, %v10224_v6 }
0x14a0   :  { %v10256_v53 = vmul.f32 %v13493_v1, %v10238_v59  ;;  %v10237_v14 = vmax.f32 %v10231_v58, 0.0 }
0x14a1   :  { %v10269_v46 = vmul.f32 %v10814_v3, %v10257_v61  ;;  %v10236_v45 = vmax.f32 %v10230_v32, 0.0 }
0x14a2   :  { %v10268_v5 = vmul.f32 %v10814_v3, %v10256_v53  ;;  %v10249_v9 = vadd.f32 1e-12, %v10237_v14 }
0x14a3   :  { %v10281_v25 = vadd.f32 %v10815_v55, %v10269_v46  ;;  %v10248_v13 = vadd.f32 1e-12, %v10236_v45 }
0x14a4   :  { %v10280_v47 = vadd.f32 %v10815_v55, %v10268_v5  ;;  %13498 = vrsqrt.f32 %v10249_v9 }
0x14a5   :  { %v10287_v17 = vpack.c.bf16 %v10281_v25, %v10281_v25  ;;  %13500 = vrsqrt.f32 %v10248_v13 }
0x14a6   :  { %v10286_v56 = vpack.c.bf16 %v10280_v47, %v10280_v47  ;;  %v13495_v51 = vpop.eup %13494 }
0x14a7   :  { %v10322_v50 = vunpack.c.l.b16 %v10287_v17  ;;  %v13497_v48 = vpop.eup %13496  ;;  %v10259_v52 = vmul.f32 %v13495_v51, %v10241_v2 }
0x14a8   :  { %v10321_v44 = vunpack.c.l.b16 %v10286_v56  ;;  %v10258_v18 = vmul.f32 %v13497_v48, %v10240_v43 }
0x14a9   :  { %v10327_v22 = vrot.slane %v10322_v50, 7  ;;  %v10271_v36 = vmul.f32 %v10814_v3, %v10259_v52 }
0x14aa   :  { %v10270_v38 = vmul.f32 %v10814_v3, %v10258_v18 }
0x14ab   :  { %v10329_v63 = vsel %vm10328_vm11, %v10327_v22, %v10321_v44  ;;  %v10283_v16 = vadd.f32 %v10815_v55, %v10271_v36 }
0x14ac   :  { %v10282_v26 = vadd.f32 %v10815_v55, %v10270_v38 }
0x14ad   :  { %v10289_v23 = vpack.c.bf16 %v10283_v16, %v10283_v16 }
0x14ae   :  { %v13499_v40 = vpop.eup %13498  ;;  %v10288_v41 = vpack.c.bf16 %v10282_v26, %v10282_v26 }
0x14af   :  { %v13501_v49 = vpop.eup %13500  ;;  %v10324_v24 = vunpack.c.l.b16 %v10289_v23  ;;  %v10261_v34 = vmul.f32 %v13499_v40, %v10243_v21 }
0x14b0   :  { %v10323_v15 = vunpack.c.l.b16 %v10288_v41  ;;  %v10260_v31 = vmul.f32 %v13501_v49, %v10242_v37 }
0x14b1   :  { %v10273_v0 = vmul.f32 %v10814_v3, %v10261_v34  ;;  %v10333_v42 = vrot.slane %v10324_v24, 5 }
0x14b2   :  { %v10330_v29 = vrot.slane %v10323_v15, 6  ;;  %v10272_v11 = vmul.f32 %v10814_v3, %v10260_v31 }
0x14b3   :  { %v10285_v57 = vadd.f32 %v10815_v55, %v10273_v0 }
0x14b4   :  { %v10332_v62 = vsel %vm10331_vm12, %v10330_v29, %v10329_v63  ;;  %v10284_v54 = vadd.f32 %v10815_v55, %v10272_v11 }
0x14b5   :  { %v10291_v60 = vpack.c.bf16 %v10285_v57, %v10285_v57  ;;  %v10335_v10 = vsel %vm10334_vm13, %v10333_v42, %v10332_v62 }
0x14b6   :  { %v10290_v35 = vpack.c.bf16 %v10284_v54, %v10284_v54 }
0x14b7   :  { %v10326_v4 = vunpack.c.l.b16 %v10291_v60 }
0x14b8   :  { %v10325_v20 = vunpack.c.l.b16 %v10290_v35 }
0x14b9   :  { %v10339_v12 = vrot.slane %v10326_v4, 3 }
0x14ba   :  { %v10336_v7 = vrot.slane %v10325_v20, 4 }
0x14bc   :  { %v10338_v39 = vsel %vm10337_vm14, %v10336_v7, %v10335_v10 }
0x14bd   :  { %v10341_v8 = vsel %vm10340_vm15, %v10339_v12, %v10338_v39 }
0x14be   :  { %v10342_v28 = vpack.c.b16 %v10341_v8, %v10341_v8 }
0x14c0   :  { %12604 = vmatmul.mubr.bf16.vlgmr.msra.gmra.mrb[80].mxu0 %v10342_v28 }
0x1593   :  { %v10426_v33 = vpop.f32.mrb[80].mxu0 }
0x1594   :  { %v10427_v59 = vadd.f32 %v10816_v19, %v10426_v33  ;;  %v12605_v3 = vpop.f32.mrb[81].mxu0 }
0x1595   :  { %v10429_v6 = vpop.f32.mrb[82].mxu0 }
0x1596   :  { %13502 = vtanh.f32 %v10427_v59  ;;  %v12606_v27 = vpop.f32.mrb[83].mxu0 }
0x15a0   :  { %v13503_v1 = vpop.eup %13502 }
0x15a1   :  { %10433 = vst [vmem:[%s16583_s7] sm:$0x3f] %v13503_v1 }
0x15a2   :  { %10438 = vsyncpa [#allocation3], 1 }
0x15a3   :  { %10439 = vsyncpa [#allocation5], 1 }
0x15a4   :  { %10440 = vsyncpa [#allocation8], 1 }
0x15a5   :  { %10441 = vsyncpa [#allocation11], 1 }

</bundles_post_ra>
